<compile_context>
chip_gen: v6e
topology: v6e:2x2x1
jax: 0.10.0
libtpu: 0.0.40
codegen_flags: <defaults>
</compile_context>

<pallas_src>
import functools
import math

import jax
import jax.numpy as jnp
from jax.experimental import pallas as pl
from jax.experimental.pallas import tpu as pltpu


# ----------------------------------------------------------------------------
# helpers
# ----------------------------------------------------------------------------
_VMEM_LIMIT = 64 * 1024 * 1024   # generous scoped-VMEM headroom; actual tiles
                                 # (bf16, K-tiled) stay well under this.


def _round_up(v, m):
    return ((v + m - 1) // m) * m


def _choose_tk(K, max_tk=2048):
    """Contraction tile: full K when small, else a 128-multiple divisor of K."""
    if K <= max_tk:
        return K
    if K % 128 == 0:
        tk = (max_tk // 128) * 128
        while tk >= 128:
            if K % tk == 0:
                return tk
            tk -= 128
    return K


# ----------------------------------------------------------------------------
# Pallas kernels
# ----------------------------------------------------------------------------
def _mm_bias_act_kernel(x_ref, w_ref, b_ref, *rest, act, has_res):
    """o = act((X @ W) + bias) (+ residual); grid = (M tiles, K tiles)."""
    if has_res:
        r_ref, o_ref, acc_ref = rest
    else:
        o_ref, acc_ref = rest

    k = pl.program_id(1)

    @pl.when(k == 0)
    def _init():
        acc_ref[...] = jnp.zeros_like(acc_ref)

    # bf16 x bf16 -> f32 accumulate on the MXU.
    acc_ref[...] += jnp.dot(x_ref[...], w_ref[...],
                            preferred_element_type=jnp.float32)

    @pl.when(k == pl.num_programs(1) - 1)
    def _finalize():
        y = acc_ref[...] + b_ref[...]            # BN scale folded into W
        if act == "silu":
            # sigmoid via EUP exp + approx reciprocal (keeps VALU slots free)
            y = y * pl.reciprocal(1.0 + jnp.exp(-y), approx=True)
        if has_res:
            y = y + r_ref[...].astype(jnp.float32)
        o_ref[...] = y.astype(o_ref.dtype)


def _concat_mm_bias_act_kernel(*refs, n_br):
    """ELAN output projection without materializing the channel concat:
       o = silu(sum_i x_i @ w_i + bias)."""
    xs = refs[:n_br]
    ws = refs[n_br:2 * n_br]
    b_ref = refs[2 * n_br]
    o_ref = refs[2 * n_br + 1]

    acc = jnp.dot(xs[0][...], ws[0][...], preferred_element_type=jnp.float32)
    for xr, wr in zip(xs[1:], ws[1:]):
        acc = acc + jnp.dot(xr[...], wr[...],
                            preferred_element_type=jnp.float32)
    y = acc + b_ref[...]
    y = y * pl.reciprocal(1.0 + jnp.exp(-y), approx=True)
    o_ref[...] = y.astype(o_ref.dtype)


def _pool_fc_kernel(x_ref, w_ref, b_ref, o_ref, *, inv_hw):
    """Global average pool over the spatial axis fused with the FC head."""
    x = x_ref[...].astype(jnp.float32)           # (N, HW, C)
    pooled = jnp.sum(x, axis=1) * inv_hw         # (N, C)
    o_ref[...] = (jnp.dot(pooled, w_ref[...],
                          preferred_element_type=jnp.float32) + b_ref[...])


# ----------------------------------------------------------------------------
# Kernel wrappers
# ----------------------------------------------------------------------------
def fused_matmul_bias_act(x, w, bias, act="silu", residual=None,
                          out_dtype=jnp.bfloat16):
    """x:(M,K) bf16, w:(K,N) bf16, bias:(1,N) f32 -> (M,N) out_dtype."""
    M, K = x.shape
    _, N = w.shape

    TM = 256
    if M <= TM:
        TM = _round_up(M, 8)
        Mp = TM
    else:
        Mp = _round_up(M, TM)
    if Mp != M:
        x = jnp.pad(x, ((0, Mp - M), (0, 0)))
        if residual is not None:
            residual = jnp.pad(residual, ((0, Mp - M), (0, 0)))

    TK = _choose_tk(K)
    grid = (Mp // TM, K // TK)

    in_specs = [
        pl.BlockSpec((TM, TK), lambda i, kk: (i, kk)),
        pl.BlockSpec((TK, N), lambda i, kk: (kk, 0)),
        pl.BlockSpec((1, N), lambda i, kk: (0, 0)),
    ]
    args = [x, w, bias]
    if residual is not None:
        in_specs.append(pl.BlockSpec((TM, N), lambda i, kk: (i, 0)))
        args.append(residual)

    out = pl.pallas_call(
        functools.partial(_mm_bias_act_kernel, act=act,
                          has_res=residual is not None),
        out_shape=jax.ShapeDtypeStruct((Mp, N), out_dtype),
        grid=grid,
        in_specs=in_specs,
        out_specs=pl.BlockSpec((TM, N), lambda i, kk: (i, 0)),
        scratch_shapes=[pltpu.VMEM((TM, N), jnp.float32)],
        compiler_params=pltpu.CompilerParams(
            dimension_semantics=("parallel", "arbitrary"),
            vmem_limit_bytes=_VMEM_LIMIT),
    )(*args)
    return out[:M] if Mp != M else out


def fused_concat_matmul_bias_act(xs, ws, bias, out_dtype=jnp.bfloat16):
    """silu(sum_i xs[i] @ ws[i] + bias); avoids the HBM concat round trip."""
    M = xs[0].shape[0]
    N = ws[0].shape[1]

    TM = 256
    if M <= TM:
        TM = _round_up(M, 8)
        Mp = TM
    else:
        Mp = _round_up(M, TM)
    if Mp != M:
        xs = [jnp.pad(xx, ((0, Mp - M), (0, 0))) for xx in xs]

    n_br = len(xs)
    in_specs = (
        [pl.BlockSpec((TM, xx.shape[1]), lambda i: (i, 0)) for xx in xs]
        + [pl.BlockSpec((ww.shape[0], N), lambda i: (0, 0)) for ww in ws]
        + [pl.BlockSpec((1, N), lambda i: (0, 0))]
    )
    out = pl.pallas_call(
        functools.partial(_concat_mm_bias_act_kernel, n_br=n_br),
        out_shape=jax.ShapeDtypeStruct((Mp, N), out_dtype),
        grid=(Mp // TM,),
        in_specs=in_specs,
        out_specs=pl.BlockSpec((TM, N), lambda i: (i, 0)),
        compiler_params=pltpu.CompilerParams(
            dimension_semantics=("parallel",),
            vmem_limit_bytes=_VMEM_LIMIT),
    )(*xs, *ws, bias)
    return out[:M] if Mp != M else out


def pool_fc(x_nhwc, fc_w, fc_b):
    """x_nhwc:(N,H,W,C) -> logits (N, num_classes) f32."""
    N, H, W, C = x_nhwc.shape
    num_classes = fc_w.shape[1]
    x3 = x_nhwc.reshape(N, H * W, C)
    return pl.pallas_call(
        functools.partial(_pool_fc_kernel, inv_hw=1.0 / float(H * W)),
        out_shape=jax.ShapeDtypeStruct((N, num_classes), jnp.float32),
        grid=(1,),
        in_specs=[
            pl.BlockSpec((N, H * W, C), lambda i: (0, 0, 0)),
            pl.BlockSpec((C, num_classes), lambda i: (0, 0)),
            pl.BlockSpec((1, num_classes), lambda i: (0, 0)),
        ],
        out_specs=pl.BlockSpec((N, num_classes), lambda i: (0, 0)),
    )(x3, fc_w, fc_b)


# ----------------------------------------------------------------------------
# Conv (im2col glue in JAX, fused GEMM/bias/SiLU/residual in Pallas)
# ----------------------------------------------------------------------------
def basic_conv_fwd(p, x, stride=1, residual=None):
    """x:(N,H,W,Cin) bf16; p['w']:(k,k,Cin,Cout) bf16 with BN scale folded in."""
    w4 = p["w"]
    k, _, cin, cout = w4.shape
    padding = k // 2
    N, H, W, _ = x.shape

    if k == 1 and stride == 1:
        Ho, Wo = H, W
        pat = x.reshape(N * H * W, cin)
    else:
        # TODO(synk): gather the k*k taps inside the kernel (halo block + pl.ds
        # strided reads) instead of materializing the im2col matrix in HBM.
        xp = jnp.pad(x, ((0, 0), (padding, padding), (padding, padding), (0, 0)))
        Ho = (H + 2 * padding - k) // stride + 1
        Wo = (W + 2 * padding - k) // stride + 1
        taps = []
        for i in range(k):
            for j in range(k):
                taps.append(xp[:, i:i + (Ho - 1) * stride + 1:stride,
                               j:j + (Wo - 1) * stride + 1:stride, :])
        pat = jnp.concatenate(taps, axis=-1).reshape(N * Ho * Wo, k * k * cin)

    w2 = w4.reshape(k * k * cin, cout)
    res2 = residual.reshape(N * Ho * Wo, cout) if residual is not None else None
    y = fused_matmul_bias_act(pat, w2, p["bias"], act="silu", residual=res2)
    return y.reshape(N, Ho, Wo, cout)


# ----------------------------------------------------------------------------
# Parameter construction (deterministic, synthetic; BN folded at build time)
# ----------------------------------------------------------------------------
class ParamGen:
    def __init__(self, key):
        self.key = key
        self.i = 0

    def next(self, shape, scale=1.0):
        k = jax.random.fold_in(self.key, self.i)
        self.i += 1
        return jax.random.normal(k, shape, jnp.float32) * scale


def make_basic_conv(pg, cin, cout, k):
    fan_in = cin * k * k
    w = pg.next((k, k, cin, cout), 1.0 / math.sqrt(fan_in))
    gamma = 1.0 + 0.1 * pg.next((cout,))
    beta = 0.1 * pg.next((cout,))
    mean = 0.05 * pg.next((cout,))
    var = jnp.abs(1.0 + 0.1 * pg.next((cout,)))
    eps = 1e-5
    scale = gamma / jnp.sqrt(var + eps)            # eval-mode BatchNorm fold
    bias = beta - mean * scale
    # Fold BN scale into the conv weights -> kernel epilogue is only "+ bias".
    w_folded = (w * scale[None, None, None, :]).astype(jnp.bfloat16)
    return dict(w=w_folded, bias=bias.reshape(1, cout).astype(jnp.float32))


def make_elan(pg, in_dim, out_dim, num_blocks):
    inter = round(out_dim * 0.5)
    return dict(
        input_proj=make_basic_conv(pg, in_dim, 2 * inter, 1),
        blocks=[dict(cv1=make_basic_conv(pg, inter, inter, 3),
                     cv2=make_basic_conv(pg, inter, inter, 3))
                for _ in range(num_blocks)],
        output_proj=make_basic_conv(pg, (2 + num_blocks) * inter, out_dim, 1),
    )


def make_elandarknet_params(key, img_dim=3, width=1.0, depth=1.0, ratio=1.0,
                            num_classes=1000):
    pg = ParamGen(key)
    fd = [round(64 * width), round(128 * width), round(256 * width),
          round(512 * width), round(512 * width * ratio)]
    return dict(
        layer1=make_basic_conv(pg, img_dim, fd[0], 3),
        layer2_conv=make_basic_conv(pg, fd[0], fd[1], 3),
        layer2_elan=make_elan(pg, fd[1], fd[1], round(3 * depth)),
        layer3_conv=make_basic_conv(pg, fd[1], fd[2], 3),
        layer3_elan=make_elan(pg, fd[2], fd[2], round(6 * depth)),
        layer4_conv=make_basic_conv(pg, fd[2], fd[3], 3),
        layer4_elan=make_elan(pg, fd[3], fd[3], round(6 * depth)),
        layer5_conv=make_basic_conv(pg, fd[3], fd[4], 3),
        layer5_elan=make_elan(pg, fd[4], fd[4], round(3 * depth)),
        fc_w=pg.next((fd[4], num_classes), 1.0 / math.sqrt(fd[4])),
        fc_b=pg.next((num_classes,), 0.01).reshape(1, num_classes),
    )


# ----------------------------------------------------------------------------
# Forward
# ----------------------------------------------------------------------------
def elan_fwd(p, x):
    # C2f-style ELAN: 1x1 proj -> split -> chained residual 3x3 bottlenecks
    # -> (virtual) concat -> 1x1 proj.  Concat is never materialized: the
    # output projection sums per-branch GEMMs inside one Pallas call.
    y = basic_conv_fwd(p["input_proj"], x)         # (N,H,W,2*inter)
    inter = y.shape[-1] // 2                       # static: from weight shape
    x2 = y[..., inter:]
    outs = [x2]
    for bp in p["blocks"]:
        h = basic_conv_fwd(bp["cv1"], outs[-1])
        h = basic_conv_fwd(bp["cv2"], h, residual=outs[-1])   # fused shortcut
        outs.append(h)

    N, H, W, _ = y.shape
    M = N * H * W
    # PyTorch concat order is [x1, x2, b1, ..., bn]; y == [x1 | x2] so the
    # whole y covers the first two chunks of the weight.
    branches = [y.reshape(M, 2 * inter)] + [o.reshape(M, inter) for o in outs[1:]]
    w4 = p["output_proj"]["w"]                     # (1,1,(2+n)*inter,out_dim)
    w2 = w4.reshape(w4.shape[2], w4.shape[3])
    w_chunks = [w2[:2 * inter]]
    for t in range(len(outs) - 1):
        s = 2 * inter + t * inter
        w_chunks.append(w2[s:s + inter])
    out = fused_concat_matmul_bias_act(branches, w_chunks,
                                       p["output_proj"]["bias"])
    return out.reshape(N, H, W, w2.shape[1])


def elandarknet_fwd(params, x_nchw):
    x = jnp.transpose(x_nchw, (0, 2, 3, 1)).astype(jnp.bfloat16)  # NCHW->NHWC
    c1 = basic_conv_fwd(params["layer1"], x, stride=2)
    c2 = elan_fwd(params["layer2_elan"],
                  basic_conv_fwd(params["layer2_conv"], c1, stride=2))
    c3 = elan_fwd(params["layer3_elan"],
                  basic_conv_fwd(params["layer3_conv"], c2, stride=2))
    c4 = elan_fwd(params["layer4_elan"],
                  basic_conv_fwd(params["layer4_conv"], c3, stride=2))
    c5 = elan_fwd(params["layer5_elan"],
                  basic_conv_fwd(params["layer5_conv"], c4, stride=2))
    return pool_fc(c5, params["fc_w"], params["fc_b"])   # avgpool+flatten+fc


# ----------------------------------------------------------------------------
if __name__ == "__main__":
    # Small configuration: width=0.25, depth=0.34 -> feat_dims=[16,32,64,128,128],
    # ELAN num_blocks=[1,2,2,1]; input 2x3x32x32 -> 1x1 spatial at stage 5.
    key = jax.random.PRNGKey(0)
    pkey, xkey = jax.random.split(key)
    params = make_elandarknet_params(pkey, img_dim=3, width=0.25, depth=0.34,
                                     ratio=1.0, num_classes=10)
    x = jax.random.normal(xkey, (2, 3, 32, 32), jnp.float32)  # NCHW like PyTorch

    fwd = jax.jit(elandarknet_fwd)
    logits = fwd(params, x)
    jax.block_until_ready(logits)

    assert logits.shape == (2, 10)
    assert bool(jnp.all(jnp.isfinite(logits)))
    print("KERNEL_OK")
</pallas_src>

<mosaic_0001>
module attributes {stable_mosaic.version = 11 : i64} {
  func.func @_mm_bias_act_kernel(%arg0: i32, %arg1: i32, %arg2: memref<256x27xbf16, #tpu.memory_space<vmem>>, %arg3: memref<27x16xbf16, #tpu.memory_space<vmem>>, %arg4: memref<1x16xf32, #tpu.memory_space<vmem>>, %arg5: memref<256x16xbf16, #tpu.memory_space<vmem>>, %arg6: memref<256x16xf32, #tpu.memory_space<vmem>>) attributes {dimension_semantics = [#tpu.dimension_semantics<parallel>, #tpu.dimension_semantics<arbitrary>], iteration_bounds = array<i64: 2, 1>, scalar_prefetch = 0 : i64, scratch_operands = 1 : i64, tpu.core_type = #tpu.core_type<tc>, window_params = [{transform_indices = @transform_0, window_bounds = array<i64: 256, 27>}, {transform_indices = @transform_1, window_bounds = array<i64: 27, 16>}, {pipeline_mode = #tpu.pipeline_mode<synchronous>, transform_indices = @transform_2, window_bounds = array<i64: 1, 16>}, {transform_indices = @transform_3, window_bounds = array<i64: 256, 16>}]} {
    %c0_i32 = arith.constant 0 : i32
    %0 = arith.cmpi eq, %arg1, %c0_i32 : i32
    %1 = arith.extui %0 : i1 to i32
    %c0_i32_0 = arith.constant 0 : i32
    %2 = arith.cmpi ne, %1, %c0_i32_0 : i32
    scf.if %2 {
      %cst_10 = arith.constant 0.000000e+00 : f32
      %12 = vector.broadcast %cst_10 : f32 to vector<256x16xf32>
      %c0_11 = arith.constant 0 : index
      %c0_12 = arith.constant 0 : index
      %13 = vector.load %arg6[%c0_11, %c0_12] : memref<256x16xf32, #tpu.memory_space<vmem>>, vector<256x16xf32>
      tpu.vector_store %arg6[%c0_11, %c0_12], %12 {strides = array<i32>} : memref<256x16xf32, #tpu.memory_space<vmem>>, vector<256x16xf32>,
    } else {
    }
    %c0 = arith.constant 0 : index
    %c0_1 = arith.constant 0 : index
    %3 = vector.load %arg6[%c0, %c0_1] : memref<256x16xf32, #tpu.memory_space<vmem>>, vector<256x16xf32>
    %c0_2 = arith.constant 0 : index
    %c0_3 = arith.constant 0 : index
    %4 = vector.load %arg2[%c0_2, %c0_3] : memref<256x27xbf16, #tpu.memory_space<vmem>>, vector<256x27xbf16>
    %c0_4 = arith.constant 0 : index
    %c0_5 = arith.constant 0 : index
    %5 = vector.load %arg3[%c0_4, %c0_5] : memref<27x16xbf16, #tpu.memory_space<vmem>>, vector<27x16xbf16>
    %cst = arith.constant dense<0.000000e+00> : vector<256x16xf32>
    %6 = tpu.matmul %4, %5, %cst {dimension_numbers = #tpu.dot_dimension_numbers<[1], [0], [0], [1], [0, 0, 1, 1], [], []>} : vector<256x27xbf16>, vector<27x16xbf16>, vector<256x16xf32> -> vector<256x16xf32>
    %7 = arith.addf %3, %6 : vector<256x16xf32>
    %c0_6 = arith.constant 0 : index
    %c0_7 = arith.constant 0 : index
    %8 = vector.load %arg6[%c0_6, %c0_7] : memref<256x16xf32, #tpu.memory_space<vmem>>, vector<256x16xf32>
    tpu.vector_store %arg6[%c0_6, %c0_7], %7 {strides = array<i32>} : memref<256x16xf32, #tpu.memory_space<vmem>>, vector<256x16xf32>,
    %c0_i32_8 = arith.constant 0 : i32
    %9 = arith.cmpi eq, %arg1, %c0_i32_8 : i32
    %10 = arith.extui %9 : i1 to i32
    %c0_i32_9 = arith.constant 0 : i32
    %11 = arith.cmpi ne, %10, %c0_i32_9 : i32
    scf.if %11 {
      %c0_10 = arith.constant 0 : index
      %c0_11 = arith.constant 0 : index
      %12 = vector.load %arg6[%c0_10, %c0_11] : memref<256x16xf32, #tpu.memory_space<vmem>>, vector<256x16xf32>
      %c0_12 = arith.constant 0 : index
      %c0_13 = arith.constant 0 : index
      %13 = vector.load %arg4[%c0_12, %c0_13] : memref<1x16xf32, #tpu.memory_space<vmem>>, vector<1x16xf32>
      %14 = vector.broadcast %13 : vector<1x16xf32> to vector<256x16xf32>
      %15 = arith.addf %12, %14 : vector<256x16xf32>
      %cst_14 = arith.constant 0.000000e+00 : f32
      %16 = vector.broadcast %cst_14 : f32 to vector<256x16xf32>
      %17 = arith.subf %16, %15 : vector<256x16xf32>
      %18 = math.exp %17 : vector<256x16xf32>
      %cst_15 = arith.constant 1.000000e+00 : f32
      %19 = vector.broadcast %cst_15 : f32 to vector<256x16xf32>
      %20 = arith.addf %19, %18 : vector<256x16xf32>
      %21 = tpu.reciprocal %20 {approx = true} : vector<256x16xf32> -> vector<256x16xf32>
      %22 = arith.mulf %15, %21 : vector<256x16xf32>
      %23 = arith.truncf %22 : vector<256x16xf32> to vector<256x16xbf16>
      %c0_16 = arith.constant 0 : index
      %c0_17 = arith.constant 0 : index
      %24 = vector.load %arg5[%c0_16, %c0_17] : memref<256x16xbf16, #tpu.memory_space<vmem>>, vector<256x16xbf16>
      tpu.vector_store %arg5[%c0_16, %c0_17], %23 {strides = array<i32>} : memref<256x16xbf16, #tpu.memory_space<vmem>>, vector<256x16xbf16>,
    } else {
    }
    return
  }
  func.func @transform_0(%arg0: i32, %arg1: i32) -> (i32, i32) {
    %c0_i32 = arith.constant 0 : i32
    return %arg0, %arg1 : i32, i32
  }
  func.func @transform_1(%arg0: i32, %arg1: i32) -> (i32, i32) {
    %c0_i32 = arith.constant 0 : i32
    %c0_i32_0 = arith.constant 0 : i32
    return %arg1, %c0_i32 : i32, i32
  }
  func.func @transform_2(%arg0: i32, %arg1: i32) -> (i32, i32) {
    %c0_i32 = arith.constant 0 : i32
    %c0_i32_0 = arith.constant 0 : i32
    %c0_i32_1 = arith.constant 0 : i32
    return %c0_i32, %c0_i32_0 : i32, i32
  }
  func.func @transform_3(%arg0: i32, %arg1: i32) -> (i32, i32) {
    %c0_i32 = arith.constant 0 : i32
    %c0_i32_0 = arith.constant 0 : i32
    return %arg0, %c0_i32 : i32, i32
  }
}

module attributes {stable_mosaic.version = 11 : i64} {
  func.func @_mm_bias_act_kernel(%arg0: i32, %arg1: i32, %arg2: memref<128x144xbf16, #tpu.memory_space<vmem>>, %arg3: memref<144x32xbf16, #tpu.memory_space<vmem>>, %arg4: memref<1x32xf32, #tpu.memory_space<vmem>>, %arg5: memref<128x32xbf16, #tpu.memory_space<vmem>>, %arg6: memref<128x32xf32, #tpu.memory_space<vmem>>) attributes {dimension_semantics = [#tpu.dimension_semantics<parallel>, #tpu.dimension_semantics<arbitrary>], iteration_bounds = array<i64: 1, 1>, scalar_prefetch = 0 : i64, scratch_operands = 1 : i64, tpu.core_type = #tpu.core_type<tc>, window_params = [{transform_indices = @transform_0, window_bounds = array<i64: 128, 144>}, {transform_indices = @transform_1, window_bounds = array<i64: 144, 32>}, {pipeline_mode = #tpu.pipeline_mode<synchronous>, transform_indices = @transform_2, window_bounds = array<i64: 1, 32>}, {transform_indices = @transform_3, window_bounds = array<i64: 128, 32>}]} {
    %c0_i32 = arith.constant 0 : i32
    %0 = arith.cmpi eq, %arg1, %c0_i32 : i32
    %1 = arith.extui %0 : i1 to i32
    %c0_i32_0 = arith.constant 0 : i32
    %2 = arith.cmpi ne, %1, %c0_i32_0 : i32
    scf.if %2 {
      %cst_10 = arith.constant 0.000000e+00 : f32
      %12 = vector.broadcast %cst_10 : f32 to vector<128x32xf32>
      %c0_11 = arith.constant 0 : index
      %c0_12 = arith.constant 0 : index
      %13 = vector.load %arg6[%c0_11, %c0_12] : memref<128x32xf32, #tpu.memory_space<vmem>>, vector<128x32xf32>
      tpu.vector_store %arg6[%c0_11, %c0_12], %12 {strides = array<i32>} : memref<128x32xf32, #tpu.memory_space<vmem>>, vector<128x32xf32>,
    } else {
    }
    %c0 = arith.constant 0 : index
    %c0_1 = arith.constant 0 : index
    %3 = vector.load %arg6[%c0, %c0_1] : memref<128x32xf32, #tpu.memory_space<vmem>>, vector<128x32xf32>
    %c0_2 = arith.constant 0 : index
    %c0_3 = arith.constant 0 : index
    %4 = vector.load %arg2[%c0_2, %c0_3] : memref<128x144xbf16, #tpu.memory_space<vmem>>, vector<128x144xbf16>
    %c0_4 = arith.constant 0 : index
    %c0_5 = arith.constant 0 : index
    %5 = vector.load %arg3[%c0_4, %c0_5] : memref<144x32xbf16, #tpu.memory_space<vmem>>, vector<144x32xbf16>
    %cst = arith.constant dense<0.000000e+00> : vector<128x32xf32>
    %6 = tpu.matmul %4, %5, %cst {dimension_numbers = #tpu.dot_dimension_numbers<[1], [0], [0], [1], [0, 0, 1, 1], [], []>} : vector<128x144xbf16>, vector<144x32xbf16>, vector<128x32xf32> -> vector<128x32xf32>
    %7 = arith.addf %3, %6 : vector<128x32xf32>
    %c0_6 = arith.constant 0 : index
    %c0_7 = arith.constant 0 : index
    %8 = vector.load %arg6[%c0_6, %c0_7] : memref<128x32xf32, #tpu.memory_space<vmem>>, vector<128x32xf32>
    tpu.vector_store %arg6[%c0_6, %c0_7], %7 {strides = array<i32>} : memref<128x32xf32, #tpu.memory_space<vmem>>, vector<128x32xf32>,
    %c0_i32_8 = arith.constant 0 : i32
    %9 = arith.cmpi eq, %arg1, %c0_i32_8 : i32
    %10 = arith.extui %9 : i1 to i32
    %c0_i32_9 = arith.constant 0 : i32
    %11 = arith.cmpi ne, %10, %c0_i32_9 : i32
    scf.if %11 {
      %c0_10 = arith.constant 0 : index
      %c0_11 = arith.constant 0 : index
      %12 = vector.load %arg6[%c0_10, %c0_11] : memref<128x32xf32, #tpu.memory_space<vmem>>, vector<128x32xf32>
      %c0_12 = arith.constant 0 : index
      %c0_13 = arith.constant 0 : index
      %13 = vector.load %arg4[%c0_12, %c0_13] : memref<1x32xf32, #tpu.memory_space<vmem>>, vector<1x32xf32>
      %14 = vector.broadcast %13 : vector<1x32xf32> to vector<128x32xf32>
      %15 = arith.addf %12, %14 : vector<128x32xf32>
      %cst_14 = arith.constant 0.000000e+00 : f32
      %16 = vector.broadcast %cst_14 : f32 to vector<128x32xf32>
      %17 = arith.subf %16, %15 : vector<128x32xf32>
      %18 = math.exp %17 : vector<128x32xf32>
      %cst_15 = arith.constant 1.000000e+00 : f32
      %19 = vector.broadcast %cst_15 : f32 to vector<128x32xf32>
      %20 = arith.addf %19, %18 : vector<128x32xf32>
      %21 = tpu.reciprocal %20 {approx = true} : vector<128x32xf32> -> vector<128x32xf32>
      %22 = arith.mulf %15, %21 : vector<128x32xf32>
      %23 = arith.truncf %22 : vector<128x32xf32> to vector<128x32xbf16>
      %c0_16 = arith.constant 0 : index
      %c0_17 = arith.constant 0 : index
      %24 = vector.load %arg5[%c0_16, %c0_17] : memref<128x32xbf16, #tpu.memory_space<vmem>>, vector<128x32xbf16>
      tpu.vector_store %arg5[%c0_16, %c0_17], %23 {strides = array<i32>} : memref<128x32xbf16, #tpu.memory_space<vmem>>, vector<128x32xbf16>,
    } else {
    }
    return
  }
  func.func @transform_0(%arg0: i32, %arg1: i32) -> (i32, i32) {
    %c0_i32 = arith.constant 0 : i32
    return %arg0, %arg1 : i32, i32
  }
  func.func @transform_1(%arg0: i32, %arg1: i32) -> (i32, i32) {
    %c0_i32 = arith.constant 0 : i32
    %c0_i32_0 = arith.constant 0 : i32
    return %arg1, %c0_i32 : i32, i32
  }
  func.func @transform_2(%arg0: i32, %arg1: i32) -> (i32, i32) {
    %c0_i32 = arith.constant 0 : i32
    %c0_i32_0 = arith.constant 0 : i32
    %c0_i32_1 = arith.constant 0 : i32
    return %c0_i32, %c0_i32_0 : i32, i32
  }
  func.func @transform_3(%arg0: i32, %arg1: i32) -> (i32, i32) {
    %c0_i32 = arith.constant 0 : i32
    %c0_i32_0 = arith.constant 0 : i32
    return %arg0, %c0_i32 : i32, i32
  }
}

module attributes {stable_mosaic.version = 11 : i64} {
  func.func @_mm_bias_act_kernel(%arg0: i32, %arg1: i32, %arg2: memref<128x32xbf16, #tpu.memory_space<vmem>>, %arg3: memref<32x32xbf16, #tpu.memory_space<vmem>>, %arg4: memref<1x32xf32, #tpu.memory_space<vmem>>, %arg5: memref<128x32xbf16, #tpu.memory_space<vmem>>, %arg6: memref<128x32xf32, #tpu.memory_space<vmem>>) attributes {dimension_semantics = [#tpu.dimension_semantics<parallel>, #tpu.dimension_semantics<arbitrary>], iteration_bounds = array<i64: 1, 1>, scalar_prefetch = 0 : i64, scratch_operands = 1 : i64, tpu.core_type = #tpu.core_type<tc>, window_params = [{transform_indices = @transform_0, window_bounds = array<i64: 128, 32>}, {transform_indices = @transform_1, window_bounds = array<i64: 32, 32>}, {pipeline_mode = #tpu.pipeline_mode<synchronous>, transform_indices = @transform_2, window_bounds = array<i64: 1, 32>}, {transform_indices = @transform_3, window_bounds = array<i64: 128, 32>}]} {
    %c0_i32 = arith.constant 0 : i32
    %0 = arith.cmpi eq, %arg1, %c0_i32 : i32
    %1 = arith.extui %0 : i1 to i32
    %c0_i32_0 = arith.constant 0 : i32
    %2 = arith.cmpi ne, %1, %c0_i32_0 : i32
    scf.if %2 {
      %cst_10 = arith.constant 0.000000e+00 : f32
      %12 = vector.broadcast %cst_10 : f32 to vector<128x32xf32>
      %c0_11 = arith.constant 0 : index
      %c0_12 = arith.constant 0 : index
      %13 = vector.load %arg6[%c0_11, %c0_12] : memref<128x32xf32, #tpu.memory_space<vmem>>, vector<128x32xf32>
      tpu.vector_store %arg6[%c0_11, %c0_12], %12 {strides = array<i32>} : memref<128x32xf32, #tpu.memory_space<vmem>>, vector<128x32xf32>,
    } else {
    }
    %c0 = arith.constant 0 : index
    %c0_1 = arith.constant 0 : index
    %3 = vector.load %arg6[%c0, %c0_1] : memref<128x32xf32, #tpu.memory_space<vmem>>, vector<128x32xf32>
    %c0_2 = arith.constant 0 : index
    %c0_3 = arith.constant 0 : index
    %4 = vector.load %arg2[%c0_2, %c0_3] : memref<128x32xbf16, #tpu.memory_space<vmem>>, vector<128x32xbf16>
    %c0_4 = arith.constant 0 : index
    %c0_5 = arith.constant 0 : index
    %5 = vector.load %arg3[%c0_4, %c0_5] : memref<32x32xbf16, #tpu.memory_space<vmem>>, vector<32x32xbf16>
    %cst = arith.constant dense<0.000000e+00> : vector<128x32xf32>
    %6 = tpu.matmul %4, %5, %cst {dimension_numbers = #tpu.dot_dimension_numbers<[1], [0], [0], [1], [0, 0, 1, 1], [], []>} : vector<128x32xbf16>, vector<32x32xbf16>, vector<128x32xf32> -> vector<128x32xf32>
    %7 = arith.addf %3, %6 : vector<128x32xf32>
    %c0_6 = arith.constant 0 : index
    %c0_7 = arith.constant 0 : index
    %8 = vector.load %arg6[%c0_6, %c0_7] : memref<128x32xf32, #tpu.memory_space<vmem>>, vector<128x32xf32>
    tpu.vector_store %arg6[%c0_6, %c0_7], %7 {strides = array<i32>} : memref<128x32xf32, #tpu.memory_space<vmem>>, vector<128x32xf32>,
    %c0_i32_8 = arith.constant 0 : i32
    %9 = arith.cmpi eq, %arg1, %c0_i32_8 : i32
    %10 = arith.extui %9 : i1 to i32
    %c0_i32_9 = arith.constant 0 : i32
    %11 = arith.cmpi ne, %10, %c0_i32_9 : i32
    scf.if %11 {
      %c0_10 = arith.constant 0 : index
      %c0_11 = arith.constant 0 : index
      %12 = vector.load %arg6[%c0_10, %c0_11] : memref<128x32xf32, #tpu.memory_space<vmem>>, vector<128x32xf32>
      %c0_12 = arith.constant 0 : index
      %c0_13 = arith.constant 0 : index
      %13 = vector.load %arg4[%c0_12, %c0_13] : memref<1x32xf32, #tpu.memory_space<vmem>>, vector<1x32xf32>
      %14 = vector.broadcast %13 : vector<1x32xf32> to vector<128x32xf32>
      %15 = arith.addf %12, %14 : vector<128x32xf32>
      %cst_14 = arith.constant 0.000000e+00 : f32
      %16 = vector.broadcast %cst_14 : f32 to vector<128x32xf32>
      %17 = arith.subf %16, %15 : vector<128x32xf32>
      %18 = math.exp %17 : vector<128x32xf32>
      %cst_15 = arith.constant 1.000000e+00 : f32
      %19 = vector.broadcast %cst_15 : f32 to vector<128x32xf32>
      %20 = arith.addf %19, %18 : vector<128x32xf32>
      %21 = tpu.reciprocal %20 {approx = true} : vector<128x32xf32> -> vector<128x32xf32>
      %22 = arith.mulf %15, %21 : vector<128x32xf32>
      %23 = arith.truncf %22 : vector<128x32xf32> to vector<128x32xbf16>
      %c0_16 = arith.constant 0 : index
      %c0_17 = arith.constant 0 : index
      %24 = vector.load %arg5[%c0_16, %c0_17] : memref<128x32xbf16, #tpu.memory_space<vmem>>, vector<128x32xbf16>
      tpu.vector_store %arg5[%c0_16, %c0_17], %23 {strides = array<i32>} : memref<128x32xbf16, #tpu.memory_space<vmem>>, vector<128x32xbf16>,
    } else {
    }
    return
  }
  func.func @transform_0(%arg0: i32, %arg1: i32) -> (i32, i32) {
    %c0_i32 = arith.constant 0 : i32
    return %arg0, %arg1 : i32, i32
  }
  func.func @transform_1(%arg0: i32, %arg1: i32) -> (i32, i32) {
    %c0_i32 = arith.constant 0 : i32
    %c0_i32_0 = arith.constant 0 : i32
    return %arg1, %c0_i32 : i32, i32
  }
  func.func @transform_2(%arg0: i32, %arg1: i32) -> (i32, i32) {
    %c0_i32 = arith.constant 0 : i32
    %c0_i32_0 = arith.constant 0 : i32
    %c0_i32_1 = arith.constant 0 : i32
    return %c0_i32, %c0_i32_0 : i32, i32
  }
  func.func @transform_3(%arg0: i32, %arg1: i32) -> (i32, i32) {
    %c0_i32 = arith.constant 0 : i32
    %c0_i32_0 = arith.constant 0 : i32
    return %arg0, %c0_i32 : i32, i32
  }
}

module attributes {stable_mosaic.version = 11 : i64} {
  func.func @_mm_bias_act_kernel(%arg0: i32, %arg1: i32, %arg2: memref<128x144xbf16, #tpu.memory_space<vmem>>, %arg3: memref<144x16xbf16, #tpu.memory_space<vmem>>, %arg4: memref<1x16xf32, #tpu.memory_space<vmem>>, %arg5: memref<128x16xbf16, #tpu.memory_space<vmem>>, %arg6: memref<128x16xf32, #tpu.memory_space<vmem>>) attributes {dimension_semantics = [#tpu.dimension_semantics<parallel>, #tpu.dimension_semantics<arbitrary>], iteration_bounds = array<i64: 1, 1>, scalar_prefetch = 0 : i64, scratch_operands = 1 : i64, tpu.core_type = #tpu.core_type<tc>, window_params = [{transform_indices = @transform_0, window_bounds = array<i64: 128, 144>}, {transform_indices = @transform_1, window_bounds = array<i64: 144, 16>}, {pipeline_mode = #tpu.pipeline_mode<synchronous>, transform_indices = @transform_2, window_bounds = array<i64: 1, 16>}, {transform_indices = @transform_3, window_bounds = array<i64: 128, 16>}]} {
    %c0_i32 = arith.constant 0 : i32
    %0 = arith.cmpi eq, %arg1, %c0_i32 : i32
    %1 = arith.extui %0 : i1 to i32
    %c0_i32_0 = arith.constant 0 : i32
    %2 = arith.cmpi ne, %1, %c0_i32_0 : i32
    scf.if %2 {
      %cst_10 = arith.constant 0.000000e+00 : f32
      %12 = vector.broadcast %cst_10 : f32 to vector<128x16xf32>
      %c0_11 = arith.constant 0 : index
      %c0_12 = arith.constant 0 : index
      %13 = vector.load %arg6[%c0_11, %c0_12] : memref<128x16xf32, #tpu.memory_space<vmem>>, vector<128x16xf32>
      tpu.vector_store %arg6[%c0_11, %c0_12], %12 {strides = array<i32>} : memref<128x16xf32, #tpu.memory_space<vmem>>, vector<128x16xf32>,
    } else {
    }
    %c0 = arith.constant 0 : index
    %c0_1 = arith.constant 0 : index
    %3 = vector.load %arg6[%c0, %c0_1] : memref<128x16xf32, #tpu.memory_space<vmem>>, vector<128x16xf32>
    %c0_2 = arith.constant 0 : index
    %c0_3 = arith.constant 0 : index
    %4 = vector.load %arg2[%c0_2, %c0_3] : memref<128x144xbf16, #tpu.memory_space<vmem>>, vector<128x144xbf16>
    %c0_4 = arith.constant 0 : index
    %c0_5 = arith.constant 0 : index
    %5 = vector.load %arg3[%c0_4, %c0_5] : memref<144x16xbf16, #tpu.memory_space<vmem>>, vector<144x16xbf16>
    %cst = arith.constant dense<0.000000e+00> : vector<128x16xf32>
    %6 = tpu.matmul %4, %5, %cst {dimension_numbers = #tpu.dot_dimension_numbers<[1], [0], [0], [1], [0, 0, 1, 1], [], []>} : vector<128x144xbf16>, vector<144x16xbf16>, vector<128x16xf32> -> vector<128x16xf32>
    %7 = arith.addf %3, %6 : vector<128x16xf32>
    %c0_6 = arith.constant 0 : index
    %c0_7 = arith.constant 0 : index
    %8 = vector.load %arg6[%c0_6, %c0_7] : memref<128x16xf32, #tpu.memory_space<vmem>>, vector<128x16xf32>
    tpu.vector_store %arg6[%c0_6, %c0_7], %7 {strides = array<i32>} : memref<128x16xf32, #tpu.memory_space<vmem>>, vector<128x16xf32>,
    %c0_i32_8 = arith.constant 0 : i32
    %9 = arith.cmpi eq, %arg1, %c0_i32_8 : i32
    %10 = arith.extui %9 : i1 to i32
    %c0_i32_9 = arith.constant 0 : i32
    %11 = arith.cmpi ne, %10, %c0_i32_9 : i32
    scf.if %11 {
      %c0_10 = arith.constant 0 : index
      %c0_11 = arith.constant 0 : index
      %12 = vector.load %arg6[%c0_10, %c0_11] : memref<128x16xf32, #tpu.memory_space<vmem>>, vector<128x16xf32>
      %c0_12 = arith.constant 0 : index
      %c0_13 = arith.constant 0 : index
      %13 = vector.load %arg4[%c0_12, %c0_13] : memref<1x16xf32, #tpu.memory_space<vmem>>, vector<1x16xf32>
      %14 = vector.broadcast %13 : vector<1x16xf32> to vector<128x16xf32>
      %15 = arith.addf %12, %14 : vector<128x16xf32>
      %cst_14 = arith.constant 0.000000e+00 : f32
      %16 = vector.broadcast %cst_14 : f32 to vector<128x16xf32>
      %17 = arith.subf %16, %15 : vector<128x16xf32>
      %18 = math.exp %17 : vector<128x16xf32>
      %cst_15 = arith.constant 1.000000e+00 : f32
      %19 = vector.broadcast %cst_15 : f32 to vector<128x16xf32>
      %20 = arith.addf %19, %18 : vector<128x16xf32>
      %21 = tpu.reciprocal %20 {approx = true} : vector<128x16xf32> -> vector<128x16xf32>
      %22 = arith.mulf %15, %21 : vector<128x16xf32>
      %23 = arith.truncf %22 : vector<128x16xf32> to vector<128x16xbf16>
      %c0_16 = arith.constant 0 : index
      %c0_17 = arith.constant 0 : index
      %24 = vector.load %arg5[%c0_16, %c0_17] : memref<128x16xbf16, #tpu.memory_space<vmem>>, vector<128x16xbf16>
      tpu.vector_store %arg5[%c0_16, %c0_17], %23 {strides = array<i32>} : memref<128x16xbf16, #tpu.memory_space<vmem>>, vector<128x16xbf16>,
    } else {
    }
    return
  }
  func.func @transform_0(%arg0: i32, %arg1: i32) -> (i32, i32) {
    %c0_i32 = arith.constant 0 : i32
    return %arg0, %arg1 : i32, i32
  }
  func.func @transform_1(%arg0: i32, %arg1: i32) -> (i32, i32) {
    %c0_i32 = arith.constant 0 : i32
    %c0_i32_0 = arith.constant 0 : i32
    return %arg1, %c0_i32 : i32, i32
  }
  func.func @transform_2(%arg0: i32, %arg1: i32) -> (i32, i32) {
    %c0_i32 = arith.constant 0 : i32
    %c0_i32_0 = arith.constant 0 : i32
    %c0_i32_1 = arith.constant 0 : i32
    return %c0_i32, %c0_i32_0 : i32, i32
  }
  func.func @transform_3(%arg0: i32, %arg1: i32) -> (i32, i32) {
    %c0_i32 = arith.constant 0 : i32
    %c0_i32_0 = arith.constant 0 : i32
    return %arg0, %c0_i32 : i32, i32
  }
}

module attributes {stable_mosaic.version = 11 : i64} {
  func.func @_mm_bias_act_kernel(%arg0: i32, %arg1: i32, %arg2: memref<128x144xbf16, #tpu.memory_space<vmem>>, %arg3: memref<144x16xbf16, #tpu.memory_space<vmem>>, %arg4: memref<1x16xf32, #tpu.memory_space<vmem>>, %arg5: memref<128x16xbf16, #tpu.memory_space<vmem>>, %arg6: memref<128x16xbf16, #tpu.memory_space<vmem>>, %arg7: memref<128x16xf32, #tpu.memory_space<vmem>>) attributes {dimension_semantics = [#tpu.dimension_semantics<parallel>, #tpu.dimension_semantics<arbitrary>], iteration_bounds = array<i64: 1, 1>, scalar_prefetch = 0 : i64, scratch_operands = 1 : i64, tpu.core_type = #tpu.core_type<tc>, window_params = [{transform_indices = @transform_0, window_bounds = array<i64: 128, 144>}, {transform_indices = @transform_1, window_bounds = array<i64: 144, 16>}, {pipeline_mode = #tpu.pipeline_mode<synchronous>, transform_indices = @transform_2, window_bounds = array<i64: 1, 16>}, {transform_indices = @transform_3, window_bounds = array<i64: 128, 16>}, {transform_indices = @transform_4, window_bounds = array<i64: 128, 16>}]} {
    %c0_i32 = arith.constant 0 : i32
    %0 = arith.cmpi eq, %arg1, %c0_i32 : i32
    %1 = arith.extui %0 : i1 to i32
    %c0_i32_0 = arith.constant 0 : i32
    %2 = arith.cmpi ne, %1, %c0_i32_0 : i32
    scf.if %2 {
      %cst_10 = arith.constant 0.000000e+00 : f32
      %12 = vector.broadcast %cst_10 : f32 to vector<128x16xf32>
      %c0_11 = arith.constant 0 : index
      %c0_12 = arith.constant 0 : index
      %13 = vector.load %arg7[%c0_11, %c0_12] : memref<128x16xf32, #tpu.memory_space<vmem>>, vector<128x16xf32>
      tpu.vector_store %arg7[%c0_11, %c0_12], %12 {strides = array<i32>} : memref<128x16xf32, #tpu.memory_space<vmem>>, vector<128x16xf32>,
    } else {
    }
    %c0 = arith.constant 0 : index
    %c0_1 = arith.constant 0 : index
    %3 = vector.load %arg7[%c0, %c0_1] : memref<128x16xf32, #tpu.memory_space<vmem>>, vector<128x16xf32>
    %c0_2 = arith.constant 0 : index
    %c0_3 = arith.constant 0 : index
    %4 = vector.load %arg2[%c0_2, %c0_3] : memref<128x144xbf16, #tpu.memory_space<vmem>>, vector<128x144xbf16>
    %c0_4 = arith.constant 0 : index
    %c0_5 = arith.constant 0 : index
    %5 = vector.load %arg3[%c0_4, %c0_5] : memref<144x16xbf16, #tpu.memory_space<vmem>>, vector<144x16xbf16>
    %cst = arith.constant dense<0.000000e+00> : vector<128x16xf32>
    %6 = tpu.matmul %4, %5, %cst {dimension_numbers = #tpu.dot_dimension_numbers<[1], [0], [0], [1], [0, 0, 1, 1], [], []>} : vector<128x144xbf16>, vector<144x16xbf16>, vector<128x16xf32> -> vector<128x16xf32>
    %7 = arith.addf %3, %6 : vector<128x16xf32>
    %c0_6 = arith.constant 0 : index
    %c0_7 = arith.constant 0 : index
    %8 = vector.load %arg7[%c0_6, %c0_7] : memref<128x16xf32, #tpu.memory_space<vmem>>, vector<128x16xf32>
    tpu.vector_store %arg7[%c0_6, %c0_7], %7 {strides = array<i32>} : memref<128x16xf32, #tpu.memory_space<vmem>>, vector<128x16xf32>,
    %c0_i32_8 = arith.constant 0 : i32
    %9 = arith.cmpi eq, %arg1, %c0_i32_8 : i32
    %10 = arith.extui %9 : i1 to i32
    %c0_i32_9 = arith.constant 0 : i32
    %11 = arith.cmpi ne, %10, %c0_i32_9 : i32
    scf.if %11 {
      %c0_10 = arith.constant 0 : index
      %c0_11 = arith.constant 0 : index
      %12 = vector.load %arg7[%c0_10, %c0_11] : memref<128x16xf32, #tpu.memory_space<vmem>>, vector<128x16xf32>
      %c0_12 = arith.constant 0 : index
      %c0_13 = arith.constant 0 : index
      %13 = vector.load %arg4[%c0_12, %c0_13] : memref<1x16xf32, #tpu.memory_space<vmem>>, vector<1x16xf32>
      %14 = vector.broadcast %13 : vector<1x16xf32> to vector<128x16xf32>
      %15 = arith.addf %12, %14 : vector<128x16xf32>
      %cst_14 = arith.constant 0.000000e+00 : f32
      %16 = vector.broadcast %cst_14 : f32 to vector<128x16xf32>
      %17 = arith.subf %16, %15 : vector<128x16xf32>
      %18 = math.exp %17 : vector<128x16xf32>
      %cst_15 = arith.constant 1.000000e+00 : f32
      %19 = vector.broadcast %cst_15 : f32 to vector<128x16xf32>
      %20 = arith.addf %19, %18 : vector<128x16xf32>
      %21 = tpu.reciprocal %20 {approx = true} : vector<128x16xf32> -> vector<128x16xf32>
      %22 = arith.mulf %15, %21 : vector<128x16xf32>
      %c0_16 = arith.constant 0 : index
      %c0_17 = arith.constant 0 : index
      %23 = vector.load %arg5[%c0_16, %c0_17] : memref<128x16xbf16, #tpu.memory_space<vmem>>, vector<128x16xbf16>
      %24 = arith.extf %23 : vector<128x16xbf16> to vector<128x16xf32>
      %25 = arith.addf %22, %24 : vector<128x16xf32>
      %26 = arith.truncf %25 : vector<128x16xf32> to vector<128x16xbf16>
      %c0_18 = arith.constant 0 : index
      %c0_19 = arith.constant 0 : index
      %27 = vector.load %arg6[%c0_18, %c0_19] : memref<128x16xbf16, #tpu.memory_space<vmem>>, vector<128x16xbf16>
      tpu.vector_store %arg6[%c0_18, %c0_19], %26 {strides = array<i32>} : memref<128x16xbf16, #tpu.memory_space<vmem>>, vector<128x16xbf16>,
    } else {
    }
    return
  }
  func.func @transform_0(%arg0: i32, %arg1: i32) -> (i32, i32) {
    %c0_i32 = arith.constant 0 : i32
    return %arg0, %arg1 : i32, i32
  }
  func.func @transform_1(%arg0: i32, %arg1: i32) -> (i32, i32) {
    %c0_i32 = arith.constant 0 : i32
    %c0_i32_0 = arith.constant 0 : i32
    return %arg1, %c0_i32 : i32, i32
  }
  func.func @transform_2(%arg0: i32, %arg1: i32) -> (i32, i32) {
    %c0_i32 = arith.constant 0 : i32
    %c0_i32_0 = arith.constant 0 : i32
    %c0_i32_1 = arith.constant 0 : i32
    return %c0_i32, %c0_i32_0 : i32, i32
  }
  func.func @transform_3(%arg0: i32, %arg1: i32) -> (i32, i32) {
    %c0_i32 = arith.constant 0 : i32
    %c0_i32_0 = arith.constant 0 : i32
    return %arg0, %c0_i32 : i32, i32
  }
  func.func @transform_4(%arg0: i32, %arg1: i32) -> (i32, i32) {
    %c0_i32 = arith.constant 0 : i32
    %c0_i32_0 = arith.constant 0 : i32
    return %arg0, %c0_i32 : i32, i32
  }
}

module attributes {stable_mosaic.version = 11 : i64} {
  func.func @_concat_mm_bias_act_kernel(%arg0: i32, %arg1: memref<128x32xbf16, #tpu.memory_space<vmem>>, %arg2: memref<128x16xbf16, #tpu.memory_space<vmem>>, %arg3: memref<32x32xbf16, #tpu.memory_space<vmem>>, %arg4: memref<16x32xbf16, #tpu.memory_space<vmem>>, %arg5: memref<1x32xf32, #tpu.memory_space<vmem>>, %arg6: memref<128x32xbf16, #tpu.memory_space<vmem>>) attributes {dimension_semantics = [#tpu.dimension_semantics<parallel>], iteration_bounds = array<i64: 1>, scalar_prefetch = 0 : i64, scratch_operands = 0 : i64, tpu.core_type = #tpu.core_type<tc>, window_params = [{transform_indices = @transform_0, window_bounds = array<i64: 128, 32>}, {transform_indices = @transform_1, window_bounds = array<i64: 128, 16>}, {pipeline_mode = #tpu.pipeline_mode<synchronous>, transform_indices = @transform_2, window_bounds = array<i64: 32, 32>}, {pipeline_mode = #tpu.pipeline_mode<synchronous>, transform_indices = @transform_3, window_bounds = array<i64: 16, 32>}, {pipeline_mode = #tpu.pipeline_mode<synchronous>, transform_indices = @transform_4, window_bounds = array<i64: 1, 32>}, {transform_indices = @transform_5, window_bounds = array<i64: 128, 32>}]} {
    %c0 = arith.constant 0 : index
    %c0_0 = arith.constant 0 : index
    %0 = vector.load %arg1[%c0, %c0_0] : memref<128x32xbf16, #tpu.memory_space<vmem>>, vector<128x32xbf16>
    %c0_1 = arith.constant 0 : index
    %c0_2 = arith.constant 0 : index
    %1 = vector.load %arg3[%c0_1, %c0_2] : memref<32x32xbf16, #tpu.memory_space<vmem>>, vector<32x32xbf16>
    %cst = arith.constant dense<0.000000e+00> : vector<128x32xf32>
    %2 = tpu.matmul %0, %1, %cst {dimension_numbers = #tpu.dot_dimension_numbers<[1], [0], [0], [1], [0, 0, 1, 1], [], []>} : vector<128x32xbf16>, vector<32x32xbf16>, vector<128x32xf32> -> vector<128x32xf32>
    %c0_3 = arith.constant 0 : index
    %c0_4 = arith.constant 0 : index
    %3 = vector.load %arg2[%c0_3, %c0_4] : memref<128x16xbf16, #tpu.memory_space<vmem>>, vector<128x16xbf16>
    %c0_5 = arith.constant 0 : index
    %c0_6 = arith.constant 0 : index
    %4 = vector.load %arg4[%c0_5, %c0_6] : memref<16x32xbf16, #tpu.memory_space<vmem>>, vector<16x32xbf16>
    %cst_7 = arith.constant dense<0.000000e+00> : vector<128x32xf32>
    %5 = tpu.matmul %3, %4, %cst_7 {dimension_numbers = #tpu.dot_dimension_numbers<[1], [0], [0], [1], [0, 0, 1, 1], [], []>} : vector<128x16xbf16>, vector<16x32xbf16>, vector<128x32xf32> -> vector<128x32xf32>
    %6 = arith.addf %2, %5 : vector<128x32xf32>
    %c0_8 = arith.constant 0 : index
    %c0_9 = arith.constant 0 : index
    %7 = vector.load %arg5[%c0_8, %c0_9] : memref<1x32xf32, #tpu.memory_space<vmem>>, vector<1x32xf32>
    %8 = vector.broadcast %7 : vector<1x32xf32> to vector<128x32xf32>
    %9 = arith.addf %6, %8 : vector<128x32xf32>
    %cst_10 = arith.constant 0.000000e+00 : f32
    %10 = vector.broadcast %cst_10 : f32 to vector<128x32xf32>
    %11 = arith.subf %10, %9 : vector<128x32xf32>
    %12 = math.exp %11 : vector<128x32xf32>
    %cst_11 = arith.constant 1.000000e+00 : f32
    %13 = vector.broadcast %cst_11 : f32 to vector<128x32xf32>
    %14 = arith.addf %13, %12 : vector<128x32xf32>
    %15 = tpu.reciprocal %14 {approx = true} : vector<128x32xf32> -> vector<128x32xf32>
    %16 = arith.mulf %9, %15 : vector<128x32xf32>
    %17 = arith.truncf %16 : vector<128x32xf32> to vector<128x32xbf16>
    %c0_12 = arith.constant 0 : index
    %c0_13 = arith.constant 0 : index
    %18 = vector.load %arg6[%c0_12, %c0_13] : memref<128x32xbf16, #tpu.memory_space<vmem>>, vector<128x32xbf16>
    tpu.vector_store %arg6[%c0_12, %c0_13], %17 {strides = array<i32>} : memref<128x32xbf16, #tpu.memory_space<vmem>>, vector<128x32xbf16>,
    return
  }
  func.func @transform_0(%arg0: i32) -> (i32, i32) {
    %c0_i32 = arith.constant 0 : i32
    %c0_i32_0 = arith.constant 0 : i32
    return %arg0, %c0_i32 : i32, i32
  }
  func.func @transform_1(%arg0: i32) -> (i32, i32) {
    %c0_i32 = arith.constant 0 : i32
    %c0_i32_0 = arith.constant 0 : i32
    return %arg0, %c0_i32 : i32, i32
  }
  func.func @transform_2(%arg0: i32) -> (i32, i32) {
    %c0_i32 = arith.constant 0 : i32
    %c0_i32_0 = arith.constant 0 : i32
    %c0_i32_1 = arith.constant 0 : i32
    return %c0_i32, %c0_i32_0 : i32, i32
  }
  func.func @transform_3(%arg0: i32) -> (i32, i32) {
    %c0_i32 = arith.constant 0 : i32
    %c0_i32_0 = arith.constant 0 : i32
    %c0_i32_1 = arith.constant 0 : i32
    return %c0_i32, %c0_i32_0 : i32, i32
  }
  func.func @transform_4(%arg0: i32) -> (i32, i32) {
    %c0_i32 = arith.constant 0 : i32
    %c0_i32_0 = arith.constant 0 : i32
    %c0_i32_1 = arith.constant 0 : i32
    return %c0_i32, %c0_i32_0 : i32, i32
  }
  func.func @transform_5(%arg0: i32) -> (i32, i32) {
    %c0_i32 = arith.constant 0 : i32
    %c0_i32_0 = arith.constant 0 : i32
    return %arg0, %c0_i32 : i32, i32
  }
}

module attributes {stable_mosaic.version = 11 : i64} {
  func.func @_mm_bias_act_kernel(%arg0: i32, %arg1: i32, %arg2: memref<32x64xbf16, #tpu.memory_space<vmem>>, %arg3: memref<64x64xbf16, #tpu.memory_space<vmem>>, %arg4: memref<1x64xf32, #tpu.memory_space<vmem>>, %arg5: memref<32x64xbf16, #tpu.memory_space<vmem>>, %arg6: memref<32x64xf32, #tpu.memory_space<vmem>>) attributes {dimension_semantics = [#tpu.dimension_semantics<parallel>, #tpu.dimension_semantics<arbitrary>], iteration_bounds = array<i64: 1, 1>, scalar_prefetch = 0 : i64, scratch_operands = 1 : i64, tpu.core_type = #tpu.core_type<tc>, window_params = [{transform_indices = @transform_0, window_bounds = array<i64: 32, 64>}, {transform_indices = @transform_1, window_bounds = array<i64: 64, 64>}, {pipeline_mode = #tpu.pipeline_mode<synchronous>, transform_indices = @transform_2, window_bounds = array<i64: 1, 64>}, {transform_indices = @transform_3, window_bounds = array<i64: 32, 64>}]} {
    %c0_i32 = arith.constant 0 : i32
    %0 = arith.cmpi eq, %arg1, %c0_i32 : i32
    %1 = arith.extui %0 : i1 to i32
    %c0_i32_0 = arith.constant 0 : i32
    %2 = arith.cmpi ne, %1, %c0_i32_0 : i32
    scf.if %2 {
      %cst_10 = arith.constant 0.000000e+00 : f32
      %12 = vector.broadcast %cst_10 : f32 to vector<32x64xf32>
      %c0_11 = arith.constant 0 : index
      %c0_12 = arith.constant 0 : index
      %13 = vector.load %arg6[%c0_11, %c0_12] : memref<32x64xf32, #tpu.memory_space<vmem>>, vector<32x64xf32>
      tpu.vector_store %arg6[%c0_11, %c0_12], %12 {strides = array<i32>} : memref<32x64xf32, #tpu.memory_space<vmem>>, vector<32x64xf32>,
    } else {
    }
    %c0 = arith.constant 0 : index
    %c0_1 = arith.constant 0 : index
    %3 = vector.load %arg6[%c0, %c0_1] : memref<32x64xf32, #tpu.memory_space<vmem>>, vector<32x64xf32>
    %c0_2 = arith.constant 0 : index
    %c0_3 = arith.constant 0 : index
    %4 = vector.load %arg2[%c0_2, %c0_3] : memref<32x64xbf16, #tpu.memory_space<vmem>>, vector<32x64xbf16>
    %c0_4 = arith.constant 0 : index
    %c0_5 = arith.constant 0 : index
    %5 = vector.load %arg3[%c0_4, %c0_5] : memref<64x64xbf16, #tpu.memory_space<vmem>>, vector<64x64xbf16>
    %cst = arith.constant dense<0.000000e+00> : vector<32x64xf32>
    %6 = tpu.matmul %4, %5, %cst {dimension_numbers = #tpu.dot_dimension_numbers<[1], [0], [0], [1], [0, 0, 1, 1], [], []>} : vector<32x64xbf16>, vector<64x64xbf16>, vector<32x64xf32> -> vector<32x64xf32>
    %7 = arith.addf %3, %6 : vector<32x64xf32>
    %c0_6 = arith.constant 0 : index
    %c0_7 = arith.constant 0 : index
    %8 = vector.load %arg6[%c0_6, %c0_7] : memref<32x64xf32, #tpu.memory_space<vmem>>, vector<32x64xf32>
    tpu.vector_store %arg6[%c0_6, %c0_7], %7 {strides = array<i32>} : memref<32x64xf32, #tpu.memory_space<vmem>>, vector<32x64xf32>,
    %c0_i32_8 = arith.constant 0 : i32
    %9 = arith.cmpi eq, %arg1, %c0_i32_8 : i32
    %10 = arith.extui %9 : i1 to i32
    %c0_i32_9 = arith.constant 0 : i32
    %11 = arith.cmpi ne, %10, %c0_i32_9 : i32
    scf.if %11 {
      %c0_10 = arith.constant 0 : index
      %c0_11 = arith.constant 0 : index
      %12 = vector.load %arg6[%c0_10, %c0_11] : memref<32x64xf32, #tpu.memory_space<vmem>>, vector<32x64xf32>
      %c0_12 = arith.constant 0 : index
      %c0_13 = arith.constant 0 : index
      %13 = vector.load %arg4[%c0_12, %c0_13] : memref<1x64xf32, #tpu.memory_space<vmem>>, vector<1x64xf32>
      %14 = vector.broadcast %13 : vector<1x64xf32> to vector<32x64xf32>
      %15 = arith.addf %12, %14 : vector<32x64xf32>
      %cst_14 = arith.constant 0.000000e+00 : f32
      %16 = vector.broadcast %cst_14 : f32 to vector<32x64xf32>
      %17 = arith.subf %16, %15 : vector<32x64xf32>
      %18 = math.exp %17 : vector<32x64xf32>
      %cst_15 = arith.constant 1.000000e+00 : f32
      %19 = vector.broadcast %cst_15 : f32 to vector<32x64xf32>
      %20 = arith.addf %19, %18 : vector<32x64xf32>
      %21 = tpu.reciprocal %20 {approx = true} : vector<32x64xf32> -> vector<32x64xf32>
      %22 = arith.mulf %15, %21 : vector<32x64xf32>
      %23 = arith.truncf %22 : vector<32x64xf32> to vector<32x64xbf16>
      %c0_16 = arith.constant 0 : index
      %c0_17 = arith.constant 0 : index
      %24 = vector.load %arg5[%c0_16, %c0_17] : memref<32x64xbf16, #tpu.memory_space<vmem>>, vector<32x64xbf16>
      tpu.vector_store %arg5[%c0_16, %c0_17], %23 {strides = array<i32>} : memref<32x64xbf16, #tpu.memory_space<vmem>>, vector<32x64xbf16>,
    } else {
    }
    return
  }
  func.func @transform_0(%arg0: i32, %arg1: i32) -> (i32, i32) {
    %c0_i32 = arith.constant 0 : i32
    return %arg0, %arg1 : i32, i32
  }
  func.func @transform_1(%arg0: i32, %arg1: i32) -> (i32, i32) {
    %c0_i32 = arith.constant 0 : i32
    %c0_i32_0 = arith.constant 0 : i32
    return %arg1, %c0_i32 : i32, i32
  }
  func.func @transform_2(%arg0: i32, %arg1: i32) -> (i32, i32) {
    %c0_i32 = arith.constant 0 : i32
    %c0_i32_0 = arith.constant 0 : i32
    %c0_i32_1 = arith.constant 0 : i32
    return %c0_i32, %c0_i32_0 : i32, i32
  }
  func.func @transform_3(%arg0: i32, %arg1: i32) -> (i32, i32) {
    %c0_i32 = arith.constant 0 : i32
    %c0_i32_0 = arith.constant 0 : i32
    return %arg0, %c0_i32 : i32, i32
  }
}

module attributes {stable_mosaic.version = 11 : i64} {
  func.func @_mm_bias_act_kernel(%arg0: i32, %arg1: i32, %arg2: memref<32x288xbf16, #tpu.memory_space<vmem>>, %arg3: memref<288x64xbf16, #tpu.memory_space<vmem>>, %arg4: memref<1x64xf32, #tpu.memory_space<vmem>>, %arg5: memref<32x64xbf16, #tpu.memory_space<vmem>>, %arg6: memref<32x64xf32, #tpu.memory_space<vmem>>) attributes {dimension_semantics = [#tpu.dimension_semantics<parallel>, #tpu.dimension_semantics<arbitrary>], iteration_bounds = array<i64: 1, 1>, scalar_prefetch = 0 : i64, scratch_operands = 1 : i64, tpu.core_type = #tpu.core_type<tc>, window_params = [{transform_indices = @transform_0, window_bounds = array<i64: 32, 288>}, {transform_indices = @transform_1, window_bounds = array<i64: 288, 64>}, {pipeline_mode = #tpu.pipeline_mode<synchronous>, transform_indices = @transform_2, window_bounds = array<i64: 1, 64>}, {transform_indices = @transform_3, window_bounds = array<i64: 32, 64>}]} {
    %c0_i32 = arith.constant 0 : i32
    %0 = arith.cmpi eq, %arg1, %c0_i32 : i32
    %1 = arith.extui %0 : i1 to i32
    %c0_i32_0 = arith.constant 0 : i32
    %2 = arith.cmpi ne, %1, %c0_i32_0 : i32
    scf.if %2 {
      %cst_10 = arith.constant 0.000000e+00 : f32
      %12 = vector.broadcast %cst_10 : f32 to vector<32x64xf32>
      %c0_11 = arith.constant 0 : index
      %c0_12 = arith.constant 0 : index
      %13 = vector.load %arg6[%c0_11, %c0_12] : memref<32x64xf32, #tpu.memory_space<vmem>>, vector<32x64xf32>
      tpu.vector_store %arg6[%c0_11, %c0_12], %12 {strides = array<i32>} : memref<32x64xf32, #tpu.memory_space<vmem>>, vector<32x64xf32>,
    } else {
    }
    %c0 = arith.constant 0 : index
    %c0_1 = arith.constant 0 : index
    %3 = vector.load %arg6[%c0, %c0_1] : memref<32x64xf32, #tpu.memory_space<vmem>>, vector<32x64xf32>
    %c0_2 = arith.constant 0 : index
    %c0_3 = arith.constant 0 : index
    %4 = vector.load %arg2[%c0_2, %c0_3] : memref<32x288xbf16, #tpu.memory_space<vmem>>, vector<32x288xbf16>
    %c0_4 = arith.constant 0 : index
    %c0_5 = arith.constant 0 : index
    %5 = vector.load %arg3[%c0_4, %c0_5] : memref<288x64xbf16, #tpu.memory_space<vmem>>, vector<288x64xbf16>
    %cst = arith.constant dense<0.000000e+00> : vector<32x64xf32>
    %6 = tpu.matmul %4, %5, %cst {dimension_numbers = #tpu.dot_dimension_numbers<[1], [0], [0], [1], [0, 0, 1, 1], [], []>} : vector<32x288xbf16>, vector<288x64xbf16>, vector<32x64xf32> -> vector<32x64xf32>
    %7 = arith.addf %3, %6 : vector<32x64xf32>
    %c0_6 = arith.constant 0 : index
    %c0_7 = arith.constant 0 : index
    %8 = vector.load %arg6[%c0_6, %c0_7] : memref<32x64xf32, #tpu.memory_space<vmem>>, vector<32x64xf32>
    tpu.vector_store %arg6[%c0_6, %c0_7], %7 {strides = array<i32>} : memref<32x64xf32, #tpu.memory_space<vmem>>, vector<32x64xf32>,
    %c0_i32_8 = arith.constant 0 : i32
    %9 = arith.cmpi eq, %arg1, %c0_i32_8 : i32
    %10 = arith.extui %9 : i1 to i32
    %c0_i32_9 = arith.constant 0 : i32
    %11 = arith.cmpi ne, %10, %c0_i32_9 : i32
    scf.if %11 {
      %c0_10 = arith.constant 0 : index
      %c0_11 = arith.constant 0 : index
      %12 = vector.load %arg6[%c0_10, %c0_11] : memref<32x64xf32, #tpu.memory_space<vmem>>, vector<32x64xf32>
      %c0_12 = arith.constant 0 : index
      %c0_13 = arith.constant 0 : index
      %13 = vector.load %arg4[%c0_12, %c0_13] : memref<1x64xf32, #tpu.memory_space<vmem>>, vector<1x64xf32>
      %14 = vector.broadcast %13 : vector<1x64xf32> to vector<32x64xf32>
      %15 = arith.addf %12, %14 : vector<32x64xf32>
      %cst_14 = arith.constant 0.000000e+00 : f32
      %16 = vector.broadcast %cst_14 : f32 to vector<32x64xf32>
      %17 = arith.subf %16, %15 : vector<32x64xf32>
      %18 = math.exp %17 : vector<32x64xf32>
      %cst_15 = arith.constant 1.000000e+00 : f32
      %19 = vector.broadcast %cst_15 : f32 to vector<32x64xf32>
      %20 = arith.addf %19, %18 : vector<32x64xf32>
      %21 = tpu.reciprocal %20 {approx = true} : vector<32x64xf32> -> vector<32x64xf32>
      %22 = arith.mulf %15, %21 : vector<32x64xf32>
      %23 = arith.truncf %22 : vector<32x64xf32> to vector<32x64xbf16>
      %c0_16 = arith.constant 0 : index
      %c0_17 = arith.constant 0 : index
      %24 = vector.load %arg5[%c0_16, %c0_17] : memref<32x64xbf16, #tpu.memory_space<vmem>>, vector<32x64xbf16>
      tpu.vector_store %arg5[%c0_16, %c0_17], %23 {strides = array<i32>} : memref<32x64xbf16, #tpu.memory_space<vmem>>, vector<32x64xbf16>,
    } else {
    }
    return
  }
  func.func @transform_0(%arg0: i32, %arg1: i32) -> (i32, i32) {
    %c0_i32 = arith.constant 0 : i32
    return %arg0, %arg1 : i32, i32
  }
  func.func @transform_1(%arg0: i32, %arg1: i32) -> (i32, i32) {
    %c0_i32 = arith.constant 0 : i32
    %c0_i32_0 = arith.constant 0 : i32
    return %arg1, %c0_i32 : i32, i32
  }
  func.func @transform_2(%arg0: i32, %arg1: i32) -> (i32, i32) {
    %c0_i32 = arith.constant 0 : i32
    %c0_i32_0 = arith.constant 0 : i32
    %c0_i32_1 = arith.constant 0 : i32
    return %c0_i32, %c0_i32_0 : i32, i32
  }
  func.func @transform_3(%arg0: i32, %arg1: i32) -> (i32, i32) {
    %c0_i32 = arith.constant 0 : i32
    %c0_i32_0 = arith.constant 0 : i32
    return %arg0, %c0_i32 : i32, i32
  }
}

module attributes {stable_mosaic.version = 11 : i64} {
  func.func @_mm_bias_act_kernel(%arg0: i32, %arg1: i32, %arg2: memref<32x288xbf16, #tpu.memory_space<vmem>>, %arg3: memref<288x32xbf16, #tpu.memory_space<vmem>>, %arg4: memref<1x32xf32, #tpu.memory_space<vmem>>, %arg5: memref<32x32xbf16, #tpu.memory_space<vmem>>, %arg6: memref<32x32xf32, #tpu.memory_space<vmem>>) attributes {dimension_semantics = [#tpu.dimension_semantics<parallel>, #tpu.dimension_semantics<arbitrary>], iteration_bounds = array<i64: 1, 1>, scalar_prefetch = 0 : i64, scratch_operands = 1 : i64, tpu.core_type = #tpu.core_type<tc>, window_params = [{transform_indices = @transform_0, window_bounds = array<i64: 32, 288>}, {transform_indices = @transform_1, window_bounds = array<i64: 288, 32>}, {pipeline_mode = #tpu.pipeline_mode<synchronous>, transform_indices = @transform_2, window_bounds = array<i64: 1, 32>}, {transform_indices = @transform_3, window_bounds = array<i64: 32, 32>}]} {
    %c0_i32 = arith.constant 0 : i32
    %0 = arith.cmpi eq, %arg1, %c0_i32 : i32
    %1 = arith.extui %0 : i1 to i32
    %c0_i32_0 = arith.constant 0 : i32
    %2 = arith.cmpi ne, %1, %c0_i32_0 : i32
    scf.if %2 {
      %cst_10 = arith.constant 0.000000e+00 : f32
      %12 = vector.broadcast %cst_10 : f32 to vector<32x32xf32>
      %c0_11 = arith.constant 0 : index
      %c0_12 = arith.constant 0 : index
      %13 = vector.load %arg6[%c0_11, %c0_12] : memref<32x32xf32, #tpu.memory_space<vmem>>, vector<32x32xf32>
      tpu.vector_store %arg6[%c0_11, %c0_12], %12 {strides = array<i32>} : memref<32x32xf32, #tpu.memory_space<vmem>>, vector<32x32xf32>,
    } else {
    }
    %c0 = arith.constant 0 : index
    %c0_1 = arith.constant 0 : index
    %3 = vector.load %arg6[%c0, %c0_1] : memref<32x32xf32, #tpu.memory_space<vmem>>, vector<32x32xf32>
    %c0_2 = arith.constant 0 : index
    %c0_3 = arith.constant 0 : index
    %4 = vector.load %arg2[%c0_2, %c0_3] : memref<32x288xbf16, #tpu.memory_space<vmem>>, vector<32x288xbf16>
    %c0_4 = arith.constant 0 : index
    %c0_5 = arith.constant 0 : index
    %5 = vector.load %arg3[%c0_4, %c0_5] : memref<288x32xbf16, #tpu.memory_space<vmem>>, vector<288x32xbf16>
    %cst = arith.constant dense<0.000000e+00> : vector<32x32xf32>
    %6 = tpu.matmul %4, %5, %cst {dimension_numbers = #tpu.dot_dimension_numbers<[1], [0], [0], [1], [0, 0, 1, 1], [], []>} : vector<32x288xbf16>, vector<288x32xbf16>, vector<32x32xf32> -> vector<32x32xf32>
    %7 = arith.addf %3, %6 : vector<32x32xf32>
    %c0_6 = arith.constant 0 : index
    %c0_7 = arith.constant 0 : index
    %8 = vector.load %arg6[%c0_6, %c0_7] : memref<32x32xf32, #tpu.memory_space<vmem>>, vector<32x32xf32>
    tpu.vector_store %arg6[%c0_6, %c0_7], %7 {strides = array<i32>} : memref<32x32xf32, #tpu.memory_space<vmem>>, vector<32x32xf32>,
    %c0_i32_8 = arith.constant 0 : i32
    %9 = arith.cmpi eq, %arg1, %c0_i32_8 : i32
    %10 = arith.extui %9 : i1 to i32
    %c0_i32_9 = arith.constant 0 : i32
    %11 = arith.cmpi ne, %10, %c0_i32_9 : i32
    scf.if %11 {
      %c0_10 = arith.constant 0 : index
      %c0_11 = arith.constant 0 : index
      %12 = vector.load %arg6[%c0_10, %c0_11] : memref<32x32xf32, #tpu.memory_space<vmem>>, vector<32x32xf32>
      %c0_12 = arith.constant 0 : index
      %c0_13 = arith.constant 0 : index
      %13 = vector.load %arg4[%c0_12, %c0_13] : memref<1x32xf32, #tpu.memory_space<vmem>>, vector<1x32xf32>
      %14 = vector.broadcast %13 : vector<1x32xf32> to vector<32x32xf32>
      %15 = arith.addf %12, %14 : vector<32x32xf32>
      %cst_14 = arith.constant 0.000000e+00 : f32
      %16 = vector.broadcast %cst_14 : f32 to vector<32x32xf32>
      %17 = arith.subf %16, %15 : vector<32x32xf32>
      %18 = math.exp %17 : vector<32x32xf32>
      %cst_15 = arith.constant 1.000000e+00 : f32
      %19 = vector.broadcast %cst_15 : f32 to vector<32x32xf32>
      %20 = arith.addf %19, %18 : vector<32x32xf32>
      %21 = tpu.reciprocal %20 {approx = true} : vector<32x32xf32> -> vector<32x32xf32>
      %22 = arith.mulf %15, %21 : vector<32x32xf32>
      %23 = arith.truncf %22 : vector<32x32xf32> to vector<32x32xbf16>
      %c0_16 = arith.constant 0 : index
      %c0_17 = arith.constant 0 : index
      %24 = vector.load %arg5[%c0_16, %c0_17] : memref<32x32xbf16, #tpu.memory_space<vmem>>, vector<32x32xbf16>
      tpu.vector_store %arg5[%c0_16, %c0_17], %23 {strides = array<i32>} : memref<32x32xbf16, #tpu.memory_space<vmem>>, vector<32x32xbf16>,
    } else {
    }
    return
  }
  func.func @transform_0(%arg0: i32, %arg1: i32) -> (i32, i32) {
    %c0_i32 = arith.constant 0 : i32
    return %arg0, %arg1 : i32, i32
  }
  func.func @transform_1(%arg0: i32, %arg1: i32) -> (i32, i32) {
    %c0_i32 = arith.constant 0 : i32
    %c0_i32_0 = arith.constant 0 : i32
    return %arg1, %c0_i32 : i32, i32
  }
  func.func @transform_2(%arg0: i32, %arg1: i32) -> (i32, i32) {
    %c0_i32 = arith.constant 0 : i32
    %c0_i32_0 = arith.constant 0 : i32
    %c0_i32_1 = arith.constant 0 : i32
    return %c0_i32, %c0_i32_0 : i32, i32
  }
  func.func @transform_3(%arg0: i32, %arg1: i32) -> (i32, i32) {
    %c0_i32 = arith.constant 0 : i32
    %c0_i32_0 = arith.constant 0 : i32
    return %arg0, %c0_i32 : i32, i32
  }
}

module attributes {stable_mosaic.version = 11 : i64} {
  func.func @_mm_bias_act_kernel(%arg0: i32, %arg1: i32, %arg2: memref<32x288xbf16, #tpu.memory_space<vmem>>, %arg3: memref<288x32xbf16, #tpu.memory_space<vmem>>, %arg4: memref<1x32xf32, #tpu.memory_space<vmem>>, %arg5: memref<32x32xbf16, #tpu.memory_space<vmem>>, %arg6: memref<32x32xbf16, #tpu.memory_space<vmem>>, %arg7: memref<32x32xf32, #tpu.memory_space<vmem>>) attributes {dimension_semantics = [#tpu.dimension_semantics<parallel>, #tpu.dimension_semantics<arbitrary>], iteration_bounds = array<i64: 1, 1>, scalar_prefetch = 0 : i64, scratch_operands = 1 : i64, tpu.core_type = #tpu.core_type<tc>, window_params = [{transform_indices = @transform_0, window_bounds = array<i64: 32, 288>}, {transform_indices = @transform_1, window_bounds = array<i64: 288, 32>}, {pipeline_mode = #tpu.pipeline_mode<synchronous>, transform_indices = @transform_2, window_bounds = array<i64: 1, 32>}, {transform_indices = @transform_3, window_bounds = array<i64: 32, 32>}, {transform_indices = @transform_4, window_bounds = array<i64: 32, 32>}]} {
    %c0_i32 = arith.constant 0 : i32
    %0 = arith.cmpi eq, %arg1, %c0_i32 : i32
    %1 = arith.extui %0 : i1 to i32
    %c0_i32_0 = arith.constant 0 : i32
    %2 = arith.cmpi ne, %1, %c0_i32_0 : i32
    scf.if %2 {
      %cst_10 = arith.constant 0.000000e+00 : f32
      %12 = vector.broadcast %cst_10 : f32 to vector<32x32xf32>
      %c0_11 = arith.constant 0 : index
      %c0_12 = arith.constant 0 : index
      %13 = vector.load %arg7[%c0_11, %c0_12] : memref<32x32xf32, #tpu.memory_space<vmem>>, vector<32x32xf32>
      tpu.vector_store %arg7[%c0_11, %c0_12], %12 {strides = array<i32>} : memref<32x32xf32, #tpu.memory_space<vmem>>, vector<32x32xf32>,
    } else {
    }
    %c0 = arith.constant 0 : index
    %c0_1 = arith.constant 0 : index
    %3 = vector.load %arg7[%c0, %c0_1] : memref<32x32xf32, #tpu.memory_space<vmem>>, vector<32x32xf32>
    %c0_2 = arith.constant 0 : index
    %c0_3 = arith.constant 0 : index
    %4 = vector.load %arg2[%c0_2, %c0_3] : memref<32x288xbf16, #tpu.memory_space<vmem>>, vector<32x288xbf16>
    %c0_4 = arith.constant 0 : index
    %c0_5 = arith.constant 0 : index
    %5 = vector.load %arg3[%c0_4, %c0_5] : memref<288x32xbf16, #tpu.memory_space<vmem>>, vector<288x32xbf16>
    %cst = arith.constant dense<0.000000e+00> : vector<32x32xf32>
    %6 = tpu.matmul %4, %5, %cst {dimension_numbers = #tpu.dot_dimension_numbers<[1], [0], [0], [1], [0, 0, 1, 1], [], []>} : vector<32x288xbf16>, vector<288x32xbf16>, vector<32x32xf32> -> vector<32x32xf32>
    %7 = arith.addf %3, %6 : vector<32x32xf32>
    %c0_6 = arith.constant 0 : index
    %c0_7 = arith.constant 0 : index
    %8 = vector.load %arg7[%c0_6, %c0_7] : memref<32x32xf32, #tpu.memory_space<vmem>>, vector<32x32xf32>
    tpu.vector_store %arg7[%c0_6, %c0_7], %7 {strides = array<i32>} : memref<32x32xf32, #tpu.memory_space<vmem>>, vector<32x32xf32>,
    %c0_i32_8 = arith.constant 0 : i32
    %9 = arith.cmpi eq, %arg1, %c0_i32_8 : i32
    %10 = arith.extui %9 : i1 to i32
    %c0_i32_9 = arith.constant 0 : i32
    %11 = arith.cmpi ne, %10, %c0_i32_9 : i32
    scf.if %11 {
      %c0_10 = arith.constant 0 : index
      %c0_11 = arith.constant 0 : index
      %12 = vector.load %arg7[%c0_10, %c0_11] : memref<32x32xf32, #tpu.memory_space<vmem>>, vector<32x32xf32>
      %c0_12 = arith.constant 0 : index
      %c0_13 = arith.constant 0 : index
      %13 = vector.load %arg4[%c0_12, %c0_13] : memref<1x32xf32, #tpu.memory_space<vmem>>, vector<1x32xf32>
      %14 = vector.broadcast %13 : vector<1x32xf32> to vector<32x32xf32>
      %15 = arith.addf %12, %14 : vector<32x32xf32>
      %cst_14 = arith.constant 0.000000e+00 : f32
      %16 = vector.broadcast %cst_14 : f32 to vector<32x32xf32>
      %17 = arith.subf %16, %15 : vector<32x32xf32>
      %18 = math.exp %17 : vector<32x32xf32>
      %cst_15 = arith.constant 1.000000e+00 : f32
      %19 = vector.broadcast %cst_15 : f32 to vector<32x32xf32>
      %20 = arith.addf %19, %18 : vector<32x32xf32>
      %21 = tpu.reciprocal %20 {approx = true} : vector<32x32xf32> -> vector<32x32xf32>
      %22 = arith.mulf %15, %21 : vector<32x32xf32>
      %c0_16 = arith.constant 0 : index
      %c0_17 = arith.constant 0 : index
      %23 = vector.load %arg5[%c0_16, %c0_17] : memref<32x32xbf16, #tpu.memory_space<vmem>>, vector<32x32xbf16>
      %24 = arith.extf %23 : vector<32x32xbf16> to vector<32x32xf32>
      %25 = arith.addf %22, %24 : vector<32x32xf32>
      %26 = arith.truncf %25 : vector<32x32xf32> to vector<32x32xbf16>
      %c0_18 = arith.constant 0 : index
      %c0_19 = arith.constant 0 : index
      %27 = vector.load %arg6[%c0_18, %c0_19] : memref<32x32xbf16, #tpu.memory_space<vmem>>, vector<32x32xbf16>
      tpu.vector_store %arg6[%c0_18, %c0_19], %26 {strides = array<i32>} : memref<32x32xbf16, #tpu.memory_space<vmem>>, vector<32x32xbf16>,
    } else {
    }
    return
  }
  func.func @transform_0(%arg0: i32, %arg1: i32) -> (i32, i32) {
    %c0_i32 = arith.constant 0 : i32
    return %arg0, %arg1 : i32, i32
  }
  func.func @transform_1(%arg0: i32, %arg1: i32) -> (i32, i32) {
    %c0_i32 = arith.constant 0 : i32
    %c0_i32_0 = arith.constant 0 : i32
    return %arg1, %c0_i32 : i32, i32
  }
  func.func @transform_2(%arg0: i32, %arg1: i32) -> (i32, i32) {
    %c0_i32 = arith.constant 0 : i32
    %c0_i32_0 = arith.constant 0 : i32
    %c0_i32_1 = arith.constant 0 : i32
    return %c0_i32, %c0_i32_0 : i32, i32
  }
  func.func @transform_3(%arg0: i32, %arg1: i32) -> (i32, i32) {
    %c0_i32 = arith.constant 0 : i32
    %c0_i32_0 = arith.constant 0 : i32
    return %arg0, %c0_i32 : i32, i32
  }
  func.func @transform_4(%arg0: i32, %arg1: i32) -> (i32, i32) {
    %c0_i32 = arith.constant 0 : i32
    %c0_i32_0 = arith.constant 0 : i32
    return %arg0, %c0_i32 : i32, i32
  }
}

module attributes {stable_mosaic.version = 11 : i64} {
  func.func @_concat_mm_bias_act_kernel(%arg0: i32, %arg1: memref<32x64xbf16, #tpu.memory_space<vmem>>, %arg2: memref<32x32xbf16, #tpu.memory_space<vmem>>, %arg3: memref<32x32xbf16, #tpu.memory_space<vmem>>, %arg4: memref<64x64xbf16, #tpu.memory_space<vmem>>, %arg5: memref<32x64xbf16, #tpu.memory_space<vmem>>, %arg6: memref<32x64xbf16, #tpu.memory_space<vmem>>, %arg7: memref<1x64xf32, #tpu.memory_space<vmem>>, %arg8: memref<32x64xbf16, #tpu.memory_space<vmem>>) attributes {dimension_semantics = [#tpu.dimension_semantics<parallel>], iteration_bounds = array<i64: 1>, scalar_prefetch = 0 : i64, scratch_operands = 0 : i64, tpu.core_type = #tpu.core_type<tc>, window_params = [{transform_indices = @transform_0, window_bounds = array<i64: 32, 64>}, {transform_indices = @transform_1, window_bounds = array<i64: 32, 32>}, {transform_indices = @transform_2, window_bounds = array<i64: 32, 32>}, {pipeline_mode = #tpu.pipeline_mode<synchronous>, transform_indices = @transform_3, window_bounds = array<i64: 64, 64>}, {pipeline_mode = #tpu.pipeline_mode<synchronous>, transform_indices = @transform_4, window_bounds = array<i64: 32, 64>}, {pipeline_mode = #tpu.pipeline_mode<synchronous>, transform_indices = @transform_5, window_bounds = array<i64: 32, 64>}, {pipeline_mode = #tpu.pipeline_mode<synchronous>, transform_indices = @transform_6, window_bounds = array<i64: 1, 64>}, {transform_indices = @transform_7, window_bounds = array<i64: 32, 64>}]} {
    %c0 = arith.constant 0 : index
    %c0_0 = arith.constant 0 : index
    %0 = vector.load %arg1[%c0, %c0_0] : memref<32x64xbf16, #tpu.memory_space<vmem>>, vector<32x64xbf16>
    %c0_1 = arith.constant 0 : index
    %c0_2 = arith.constant 0 : index
    %1 = vector.load %arg4[%c0_1, %c0_2] : memref<64x64xbf16, #tpu.memory_space<vmem>>, vector<64x64xbf16>
    %cst = arith.constant dense<0.000000e+00> : vector<32x64xf32>
    %2 = tpu.matmul %0, %1, %cst {dimension_numbers = #tpu.dot_dimension_numbers<[1], [0], [0], [1], [0, 0, 1, 1], [], []>} : vector<32x64xbf16>, vector<64x64xbf16>, vector<32x64xf32> -> vector<32x64xf32>
    %c0_3 = arith.constant 0 : index
    %c0_4 = arith.constant 0 : index
    %3 = vector.load %arg2[%c0_3, %c0_4] : memref<32x32xbf16, #tpu.memory_space<vmem>>, vector<32x32xbf16>
    %c0_5 = arith.constant 0 : index
    %c0_6 = arith.constant 0 : index
    %4 = vector.load %arg5[%c0_5, %c0_6] : memref<32x64xbf16, #tpu.memory_space<vmem>>, vector<32x64xbf16>
    %cst_7 = arith.constant dense<0.000000e+00> : vector<32x64xf32>
    %5 = tpu.matmul %3, %4, %cst_7 {dimension_numbers = #tpu.dot_dimension_numbers<[1], [0], [0], [1], [0, 0, 1, 1], [], []>} : vector<32x32xbf16>, vector<32x64xbf16>, vector<32x64xf32> -> vector<32x64xf32>
    %6 = arith.addf %2, %5 : vector<32x64xf32>
    %c0_8 = arith.constant 0 : index
    %c0_9 = arith.constant 0 : index
    %7 = vector.load %arg3[%c0_8, %c0_9] : memref<32x32xbf16, #tpu.memory_space<vmem>>, vector<32x32xbf16>
    %c0_10 = arith.constant 0 : index
    %c0_11 = arith.constant 0 : index
    %8 = vector.load %arg6[%c0_10, %c0_11] : memref<32x64xbf16, #tpu.memory_space<vmem>>, vector<32x64xbf16>
    %cst_12 = arith.constant dense<0.000000e+00> : vector<32x64xf32>
    %9 = tpu.matmul %7, %8, %cst_12 {dimension_numbers = #tpu.dot_dimension_numbers<[1], [0], [0], [1], [0, 0, 1, 1], [], []>} : vector<32x32xbf16>, vector<32x64xbf16>, vector<32x64xf32> -> vector<32x64xf32>
    %10 = arith.addf %6, %9 : vector<32x64xf32>
    %c0_13 = arith.constant 0 : index
    %c0_14 = arith.constant 0 : index
    %11 = vector.load %arg7[%c0_13, %c0_14] : memref<1x64xf32, #tpu.memory_space<vmem>>, vector<1x64xf32>
    %12 = vector.broadcast %11 : vector<1x64xf32> to vector<32x64xf32>
    %13 = arith.addf %10, %12 : vector<32x64xf32>
    %cst_15 = arith.constant 0.000000e+00 : f32
    %14 = vector.broadcast %cst_15 : f32 to vector<32x64xf32>
    %15 = arith.subf %14, %13 : vector<32x64xf32>
    %16 = math.exp %15 : vector<32x64xf32>
    %cst_16 = arith.constant 1.000000e+00 : f32
    %17 = vector.broadcast %cst_16 : f32 to vector<32x64xf32>
    %18 = arith.addf %17, %16 : vector<32x64xf32>
    %19 = tpu.reciprocal %18 {approx = true} : vector<32x64xf32> -> vector<32x64xf32>
    %20 = arith.mulf %13, %19 : vector<32x64xf32>
    %21 = arith.truncf %20 : vector<32x64xf32> to vector<32x64xbf16>
    %c0_17 = arith.constant 0 : index
    %c0_18 = arith.constant 0 : index
    %22 = vector.load %arg8[%c0_17, %c0_18] : memref<32x64xbf16, #tpu.memory_space<vmem>>, vector<32x64xbf16>
    tpu.vector_store %arg8[%c0_17, %c0_18], %21 {strides = array<i32>} : memref<32x64xbf16, #tpu.memory_space<vmem>>, vector<32x64xbf16>,
    return
  }
  func.func @transform_0(%arg0: i32) -> (i32, i32) {
    %c0_i32 = arith.constant 0 : i32
    %c0_i32_0 = arith.constant 0 : i32
    return %arg0, %c0_i32 : i32, i32
  }
  func.func @transform_1(%arg0: i32) -> (i32, i32) {
    %c0_i32 = arith.constant 0 : i32
    %c0_i32_0 = arith.constant 0 : i32
    return %arg0, %c0_i32 : i32, i32
  }
  func.func @transform_2(%arg0: i32) -> (i32, i32) {
    %c0_i32 = arith.constant 0 : i32
    %c0_i32_0 = arith.constant 0 : i32
    return %arg0, %c0_i32 : i32, i32
  }
  func.func @transform_3(%arg0: i32) -> (i32, i32) {
    %c0_i32 = arith.constant 0 : i32
    %c0_i32_0 = arith.constant 0 : i32
    %c0_i32_1 = arith.constant 0 : i32
    return %c0_i32, %c0_i32_0 : i32, i32
  }
  func.func @transform_4(%arg0: i32) -> (i32, i32) {
    %c0_i32 = arith.constant 0 : i32
    %c0_i32_0 = arith.constant 0 : i32
    %c0_i32_1 = arith.constant 0 : i32
    return %c0_i32, %c0_i32_0 : i32, i32
  }
  func.func @transform_5(%arg0: i32) -> (i32, i32) {
    %c0_i32 = arith.constant 0 : i32
    %c0_i32_0 = arith.constant 0 : i32
    %c0_i32_1 = arith.constant 0 : i32
    return %c0_i32, %c0_i32_0 : i32, i32
  }
  func.func @transform_6(%arg0: i32) -> (i32, i32) {
    %c0_i32 = arith.constant 0 : i32
    %c0_i32_0 = arith.constant 0 : i32
    %c0_i32_1 = arith.constant 0 : i32
    return %c0_i32, %c0_i32_0 : i32, i32
  }
  func.func @transform_7(%arg0: i32) -> (i32, i32) {
    %c0_i32 = arith.constant 0 : i32
    %c0_i32_0 = arith.constant 0 : i32
    return %arg0, %c0_i32 : i32, i32
  }
}

module attributes {stable_mosaic.version = 11 : i64} {
  func.func @_mm_bias_act_kernel(%arg0: i32, %arg1: i32, %arg2: memref<8x576xbf16, #tpu.memory_space<vmem>>, %arg3: memref<576x128xbf16, #tpu.memory_space<vmem>>, %arg4: memref<1x128xf32, #tpu.memory_space<vmem>>, %arg5: memref<8x128xbf16, #tpu.memory_space<vmem>>, %arg6: memref<8x128xf32, #tpu.memory_space<vmem>>) attributes {dimension_semantics = [#tpu.dimension_semantics<parallel>, #tpu.dimension_semantics<arbitrary>], iteration_bounds = array<i64: 1, 1>, scalar_prefetch = 0 : i64, scratch_operands = 1 : i64, tpu.core_type = #tpu.core_type<tc>, window_params = [{transform_indices = @transform_0, window_bounds = array<i64: 8, 576>}, {transform_indices = @transform_1, window_bounds = array<i64: 576, 128>}, {pipeline_mode = #tpu.pipeline_mode<synchronous>, transform_indices = @transform_2, window_bounds = array<i64: 1, 128>}, {transform_indices = @transform_3, window_bounds = array<i64: 8, 128>}]} {
    %c0_i32 = arith.constant 0 : i32
    %0 = arith.cmpi eq, %arg1, %c0_i32 : i32
    %1 = arith.extui %0 : i1 to i32
    %c0_i32_0 = arith.constant 0 : i32
    %2 = arith.cmpi ne, %1, %c0_i32_0 : i32
    scf.if %2 {
      %cst_10 = arith.constant 0.000000e+00 : f32
      %12 = vector.broadcast %cst_10 : f32 to vector<8x128xf32>
      %c0_11 = arith.constant 0 : index
      %c0_12 = arith.constant 0 : index
      %13 = vector.load %arg6[%c0_11, %c0_12] : memref<8x128xf32, #tpu.memory_space<vmem>>, vector<8x128xf32>
      tpu.vector_store %arg6[%c0_11, %c0_12], %12 {strides = array<i32>} : memref<8x128xf32, #tpu.memory_space<vmem>>, vector<8x128xf32>,
    } else {
    }
    %c0 = arith.constant 0 : index
    %c0_1 = arith.constant 0 : index
    %3 = vector.load %arg6[%c0, %c0_1] : memref<8x128xf32, #tpu.memory_space<vmem>>, vector<8x128xf32>
    %c0_2 = arith.constant 0 : index
    %c0_3 = arith.constant 0 : index
    %4 = vector.load %arg2[%c0_2, %c0_3] : memref<8x576xbf16, #tpu.memory_space<vmem>>, vector<8x576xbf16>
    %c0_4 = arith.constant 0 : index
    %c0_5 = arith.constant 0 : index
    %5 = vector.load %arg3[%c0_4, %c0_5] : memref<576x128xbf16, #tpu.memory_space<vmem>>, vector<576x128xbf16>
    %cst = arith.constant dense<0.000000e+00> : vector<8x128xf32>
    %6 = tpu.matmul %4, %5, %cst {dimension_numbers = #tpu.dot_dimension_numbers<[1], [0], [0], [1], [0, 0, 1, 1], [], []>} : vector<8x576xbf16>, vector<576x128xbf16>, vector<8x128xf32> -> vector<8x128xf32>
    %7 = arith.addf %3, %6 : vector<8x128xf32>
    %c0_6 = arith.constant 0 : index
    %c0_7 = arith.constant 0 : index
    %8 = vector.load %arg6[%c0_6, %c0_7] : memref<8x128xf32, #tpu.memory_space<vmem>>, vector<8x128xf32>
    tpu.vector_store %arg6[%c0_6, %c0_7], %7 {strides = array<i32>} : memref<8x128xf32, #tpu.memory_space<vmem>>, vector<8x128xf32>,
    %c0_i32_8 = arith.constant 0 : i32
    %9 = arith.cmpi eq, %arg1, %c0_i32_8 : i32
    %10 = arith.extui %9 : i1 to i32
    %c0_i32_9 = arith.constant 0 : i32
    %11 = arith.cmpi ne, %10, %c0_i32_9 : i32
    scf.if %11 {
      %c0_10 = arith.constant 0 : index
      %c0_11 = arith.constant 0 : index
      %12 = vector.load %arg6[%c0_10, %c0_11] : memref<8x128xf32, #tpu.memory_space<vmem>>, vector<8x128xf32>
      %c0_12 = arith.constant 0 : index
      %c0_13 = arith.constant 0 : index
      %13 = vector.load %arg4[%c0_12, %c0_13] : memref<1x128xf32, #tpu.memory_space<vmem>>, vector<1x128xf32>
      %14 = vector.broadcast %13 : vector<1x128xf32> to vector<8x128xf32>
      %15 = arith.addf %12, %14 : vector<8x128xf32>
      %cst_14 = arith.constant 0.000000e+00 : f32
      %16 = vector.broadcast %cst_14 : f32 to vector<8x128xf32>
      %17 = arith.subf %16, %15 : vector<8x128xf32>
      %18 = math.exp %17 : vector<8x128xf32>
      %cst_15 = arith.constant 1.000000e+00 : f32
      %19 = vector.broadcast %cst_15 : f32 to vector<8x128xf32>
      %20 = arith.addf %19, %18 : vector<8x128xf32>
      %21 = tpu.reciprocal %20 {approx = true} : vector<8x128xf32> -> vector<8x128xf32>
      %22 = arith.mulf %15, %21 : vector<8x128xf32>
      %23 = arith.truncf %22 : vector<8x128xf32> to vector<8x128xbf16>
      %c0_16 = arith.constant 0 : index
      %c0_17 = arith.constant 0 : index
      %24 = vector.load %arg5[%c0_16, %c0_17] : memref<8x128xbf16, #tpu.memory_space<vmem>>, vector<8x128xbf16>
      tpu.vector_store %arg5[%c0_16, %c0_17], %23 {strides = array<i32>} : memref<8x128xbf16, #tpu.memory_space<vmem>>, vector<8x128xbf16>,
    } else {
    }
    return
  }
  func.func @transform_0(%arg0: i32, %arg1: i32) -> (i32, i32) {
    %c0_i32 = arith.constant 0 : i32
    return %arg0, %arg1 : i32, i32
  }
  func.func @transform_1(%arg0: i32, %arg1: i32) -> (i32, i32) {
    %c0_i32 = arith.constant 0 : i32
    %c0_i32_0 = arith.constant 0 : i32
    return %arg1, %c0_i32 : i32, i32
  }
  func.func @transform_2(%arg0: i32, %arg1: i32) -> (i32, i32) {
    %c0_i32 = arith.constant 0 : i32
    %c0_i32_0 = arith.constant 0 : i32
    %c0_i32_1 = arith.constant 0 : i32
    return %c0_i32, %c0_i32_0 : i32, i32
  }
  func.func @transform_3(%arg0: i32, %arg1: i32) -> (i32, i32) {
    %c0_i32 = arith.constant 0 : i32
    %c0_i32_0 = arith.constant 0 : i32
    return %arg0, %c0_i32 : i32, i32
  }
}

module attributes {stable_mosaic.version = 11 : i64} {
  func.func @_mm_bias_act_kernel(%arg0: i32, %arg1: i32, %arg2: memref<8x128xbf16, #tpu.memory_space<vmem>>, %arg3: memref<128x128xbf16, #tpu.memory_space<vmem>>, %arg4: memref<1x128xf32, #tpu.memory_space<vmem>>, %arg5: memref<8x128xbf16, #tpu.memory_space<vmem>>, %arg6: memref<8x128xf32, #tpu.memory_space<vmem>>) attributes {dimension_semantics = [#tpu.dimension_semantics<parallel>, #tpu.dimension_semantics<arbitrary>], iteration_bounds = array<i64: 1, 1>, scalar_prefetch = 0 : i64, scratch_operands = 1 : i64, tpu.core_type = #tpu.core_type<tc>, window_params = [{transform_indices = @transform_0, window_bounds = array<i64: 8, 128>}, {transform_indices = @transform_1, window_bounds = array<i64: 128, 128>}, {pipeline_mode = #tpu.pipeline_mode<synchronous>, transform_indices = @transform_2, window_bounds = array<i64: 1, 128>}, {transform_indices = @transform_3, window_bounds = array<i64: 8, 128>}]} {
    %c0_i32 = arith.constant 0 : i32
    %0 = arith.cmpi eq, %arg1, %c0_i32 : i32
    %1 = arith.extui %0 : i1 to i32
    %c0_i32_0 = arith.constant 0 : i32
    %2 = arith.cmpi ne, %1, %c0_i32_0 : i32
    scf.if %2 {
      %cst_10 = arith.constant 0.000000e+00 : f32
      %12 = vector.broadcast %cst_10 : f32 to vector<8x128xf32>
      %c0_11 = arith.constant 0 : index
      %c0_12 = arith.constant 0 : index
      %13 = vector.load %arg6[%c0_11, %c0_12] : memref<8x128xf32, #tpu.memory_space<vmem>>, vector<8x128xf32>
      tpu.vector_store %arg6[%c0_11, %c0_12], %12 {strides = array<i32>} : memref<8x128xf32, #tpu.memory_space<vmem>>, vector<8x128xf32>,
    } else {
    }
    %c0 = arith.constant 0 : index
    %c0_1 = arith.constant 0 : index
    %3 = vector.load %arg6[%c0, %c0_1] : memref<8x128xf32, #tpu.memory_space<vmem>>, vector<8x128xf32>
    %c0_2 = arith.constant 0 : index
    %c0_3 = arith.constant 0 : index
    %4 = vector.load %arg2[%c0_2, %c0_3] : memref<8x128xbf16, #tpu.memory_space<vmem>>, vector<8x128xbf16>
    %c0_4 = arith.constant 0 : index
    %c0_5 = arith.constant 0 : index
    %5 = vector.load %arg3[%c0_4, %c0_5] : memref<128x128xbf16, #tpu.memory_space<vmem>>, vector<128x128xbf16>
    %cst = arith.constant dense<0.000000e+00> : vector<8x128xf32>
    %6 = tpu.matmul %4, %5, %cst {dimension_numbers = #tpu.dot_dimension_numbers<[1], [0], [0], [1], [0, 0, 1, 1], [], []>} : vector<8x128xbf16>, vector<128x128xbf16>, vector<8x128xf32> -> vector<8x128xf32>
    %7 = arith.addf %3, %6 : vector<8x128xf32>
    %c0_6 = arith.constant 0 : index
    %c0_7 = arith.constant 0 : index
    %8 = vector.load %arg6[%c0_6, %c0_7] : memref<8x128xf32, #tpu.memory_space<vmem>>, vector<8x128xf32>
    tpu.vector_store %arg6[%c0_6, %c0_7], %7 {strides = array<i32>} : memref<8x128xf32, #tpu.memory_space<vmem>>, vector<8x128xf32>,
    %c0_i32_8 = arith.constant 0 : i32
    %9 = arith.cmpi eq, %arg1, %c0_i32_8 : i32
    %10 = arith.extui %9 : i1 to i32
    %c0_i32_9 = arith.constant 0 : i32
    %11 = arith.cmpi ne, %10, %c0_i32_9 : i32
    scf.if %11 {
      %c0_10 = arith.constant 0 : index
      %c0_11 = arith.constant 0 : index
      %12 = vector.load %arg6[%c0_10, %c0_11] : memref<8x128xf32, #tpu.memory_space<vmem>>, vector<8x128xf32>
      %c0_12 = arith.constant 0 : index
      %c0_13 = arith.constant 0 : index
      %13 = vector.load %arg4[%c0_12, %c0_13] : memref<1x128xf32, #tpu.memory_space<vmem>>, vector<1x128xf32>
      %14 = vector.broadcast %13 : vector<1x128xf32> to vector<8x128xf32>
      %15 = arith.addf %12, %14 : vector<8x128xf32>
      %cst_14 = arith.constant 0.000000e+00 : f32
      %16 = vector.broadcast %cst_14 : f32 to vector<8x128xf32>
      %17 = arith.subf %16, %15 : vector<8x128xf32>
      %18 = math.exp %17 : vector<8x128xf32>
      %cst_15 = arith.constant 1.000000e+00 : f32
      %19 = vector.broadcast %cst_15 : f32 to vector<8x128xf32>
      %20 = arith.addf %19, %18 : vector<8x128xf32>
      %21 = tpu.reciprocal %20 {approx = true} : vector<8x128xf32> -> vector<8x128xf32>
      %22 = arith.mulf %15, %21 : vector<8x128xf32>
      %23 = arith.truncf %22 : vector<8x128xf32> to vector<8x128xbf16>
      %c0_16 = arith.constant 0 : index
      %c0_17 = arith.constant 0 : index
      %24 = vector.load %arg5[%c0_16, %c0_17] : memref<8x128xbf16, #tpu.memory_space<vmem>>, vector<8x128xbf16>
      tpu.vector_store %arg5[%c0_16, %c0_17], %23 {strides = array<i32>} : memref<8x128xbf16, #tpu.memory_space<vmem>>, vector<8x128xbf16>,
    } else {
    }
    return
  }
  func.func @transform_0(%arg0: i32, %arg1: i32) -> (i32, i32) {
    %c0_i32 = arith.constant 0 : i32
    return %arg0, %arg1 : i32, i32
  }
  func.func @transform_1(%arg0: i32, %arg1: i32) -> (i32, i32) {
    %c0_i32 = arith.constant 0 : i32
    %c0_i32_0 = arith.constant 0 : i32
    return %arg1, %c0_i32 : i32, i32
  }
  func.func @transform_2(%arg0: i32, %arg1: i32) -> (i32, i32) {
    %c0_i32 = arith.constant 0 : i32
    %c0_i32_0 = arith.constant 0 : i32
    %c0_i32_1 = arith.constant 0 : i32
    return %c0_i32, %c0_i32_0 : i32, i32
  }
  func.func @transform_3(%arg0: i32, %arg1: i32) -> (i32, i32) {
    %c0_i32 = arith.constant 0 : i32
    %c0_i32_0 = arith.constant 0 : i32
    return %arg0, %c0_i32 : i32, i32
  }
}

module attributes {stable_mosaic.version = 11 : i64} {
  func.func @_mm_bias_act_kernel(%arg0: i32, %arg1: i32, %arg2: memref<8x576xbf16, #tpu.memory_space<vmem>>, %arg3: memref<576x64xbf16, #tpu.memory_space<vmem>>, %arg4: memref<1x64xf32, #tpu.memory_space<vmem>>, %arg5: memref<8x64xbf16, #tpu.memory_space<vmem>>, %arg6: memref<8x64xf32, #tpu.memory_space<vmem>>) attributes {dimension_semantics = [#tpu.dimension_semantics<parallel>, #tpu.dimension_semantics<arbitrary>], iteration_bounds = array<i64: 1, 1>, scalar_prefetch = 0 : i64, scratch_operands = 1 : i64, tpu.core_type = #tpu.core_type<tc>, window_params = [{transform_indices = @transform_0, window_bounds = array<i64: 8, 576>}, {transform_indices = @transform_1, window_bounds = array<i64: 576, 64>}, {pipeline_mode = #tpu.pipeline_mode<synchronous>, transform_indices = @transform_2, window_bounds = array<i64: 1, 64>}, {transform_indices = @transform_3, window_bounds = array<i64: 8, 64>}]} {
    %c0_i32 = arith.constant 0 : i32
    %0 = arith.cmpi eq, %arg1, %c0_i32 : i32
    %1 = arith.extui %0 : i1 to i32
    %c0_i32_0 = arith.constant 0 : i32
    %2 = arith.cmpi ne, %1, %c0_i32_0 : i32
    scf.if %2 {
      %cst_10 = arith.constant 0.000000e+00 : f32
      %12 = vector.broadcast %cst_10 : f32 to vector<8x64xf32>
      %c0_11 = arith.constant 0 : index
      %c0_12 = arith.constant 0 : index
      %13 = vector.load %arg6[%c0_11, %c0_12] : memref<8x64xf32, #tpu.memory_space<vmem>>, vector<8x64xf32>
      tpu.vector_store %arg6[%c0_11, %c0_12], %12 {strides = array<i32>} : memref<8x64xf32, #tpu.memory_space<vmem>>, vector<8x64xf32>,
    } else {
    }
    %c0 = arith.constant 0 : index
    %c0_1 = arith.constant 0 : index
    %3 = vector.load %arg6[%c0, %c0_1] : memref<8x64xf32, #tpu.memory_space<vmem>>, vector<8x64xf32>
    %c0_2 = arith.constant 0 : index
    %c0_3 = arith.constant 0 : index
    %4 = vector.load %arg2[%c0_2, %c0_3] : memref<8x576xbf16, #tpu.memory_space<vmem>>, vector<8x576xbf16>
    %c0_4 = arith.constant 0 : index
    %c0_5 = arith.constant 0 : index
    %5 = vector.load %arg3[%c0_4, %c0_5] : memref<576x64xbf16, #tpu.memory_space<vmem>>, vector<576x64xbf16>
    %cst = arith.constant dense<0.000000e+00> : vector<8x64xf32>
    %6 = tpu.matmul %4, %5, %cst {dimension_numbers = #tpu.dot_dimension_numbers<[1], [0], [0], [1], [0, 0, 1, 1], [], []>} : vector<8x576xbf16>, vector<576x64xbf16>, vector<8x64xf32> -> vector<8x64xf32>
    %7 = arith.addf %3, %6 : vector<8x64xf32>
    %c0_6 = arith.constant 0 : index
    %c0_7 = arith.constant 0 : index
    %8 = vector.load %arg6[%c0_6, %c0_7] : memref<8x64xf32, #tpu.memory_space<vmem>>, vector<8x64xf32>
    tpu.vector_store %arg6[%c0_6, %c0_7], %7 {strides = array<i32>} : memref<8x64xf32, #tpu.memory_space<vmem>>, vector<8x64xf32>,
    %c0_i32_8 = arith.constant 0 : i32
    %9 = arith.cmpi eq, %arg1, %c0_i32_8 : i32
    %10 = arith.extui %9 : i1 to i32
    %c0_i32_9 = arith.constant 0 : i32
    %11 = arith.cmpi ne, %10, %c0_i32_9 : i32
    scf.if %11 {
      %c0_10 = arith.constant 0 : index
      %c0_11 = arith.constant 0 : index
      %12 = vector.load %arg6[%c0_10, %c0_11] : memref<8x64xf32, #tpu.memory_space<vmem>>, vector<8x64xf32>
      %c0_12 = arith.constant 0 : index
      %c0_13 = arith.constant 0 : index
      %13 = vector.load %arg4[%c0_12, %c0_13] : memref<1x64xf32, #tpu.memory_space<vmem>>, vector<1x64xf32>
      %14 = vector.broadcast %13 : vector<1x64xf32> to vector<8x64xf32>
      %15 = arith.addf %12, %14 : vector<8x64xf32>
      %cst_14 = arith.constant 0.000000e+00 : f32
      %16 = vector.broadcast %cst_14 : f32 to vector<8x64xf32>
      %17 = arith.subf %16, %15 : vector<8x64xf32>
      %18 = math.exp %17 : vector<8x64xf32>
      %cst_15 = arith.constant 1.000000e+00 : f32
      %19 = vector.broadcast %cst_15 : f32 to vector<8x64xf32>
      %20 = arith.addf %19, %18 : vector<8x64xf32>
      %21 = tpu.reciprocal %20 {approx = true} : vector<8x64xf32> -> vector<8x64xf32>
      %22 = arith.mulf %15, %21 : vector<8x64xf32>
      %23 = arith.truncf %22 : vector<8x64xf32> to vector<8x64xbf16>
      %c0_16 = arith.constant 0 : index
      %c0_17 = arith.constant 0 : index
      %24 = vector.load %arg5[%c0_16, %c0_17] : memref<8x64xbf16, #tpu.memory_space<vmem>>, vector<8x64xbf16>
      tpu.vector_store %arg5[%c0_16, %c0_17], %23 {strides = array<i32>} : memref<8x64xbf16, #tpu.memory_space<vmem>>, vector<8x64xbf16>,
    } else {
    }
    return
  }
  func.func @transform_0(%arg0: i32, %arg1: i32) -> (i32, i32) {
    %c0_i32 = arith.constant 0 : i32
    return %arg0, %arg1 : i32, i32
  }
  func.func @transform_1(%arg0: i32, %arg1: i32) -> (i32, i32) {
    %c0_i32 = arith.constant 0 : i32
    %c0_i32_0 = arith.constant 0 : i32
    return %arg1, %c0_i32 : i32, i32
  }
  func.func @transform_2(%arg0: i32, %arg1: i32) -> (i32, i32) {
    %c0_i32 = arith.constant 0 : i32
    %c0_i32_0 = arith.constant 0 : i32
    %c0_i32_1 = arith.constant 0 : i32
    return %c0_i32, %c0_i32_0 : i32, i32
  }
  func.func @transform_3(%arg0: i32, %arg1: i32) -> (i32, i32) {
    %c0_i32 = arith.constant 0 : i32
    %c0_i32_0 = arith.constant 0 : i32
    return %arg0, %c0_i32 : i32, i32
  }
}

module attributes {stable_mosaic.version = 11 : i64} {
  func.func @_mm_bias_act_kernel(%arg0: i32, %arg1: i32, %arg2: memref<8x576xbf16, #tpu.memory_space<vmem>>, %arg3: memref<576x64xbf16, #tpu.memory_space<vmem>>, %arg4: memref<1x64xf32, #tpu.memory_space<vmem>>, %arg5: memref<8x64xbf16, #tpu.memory_space<vmem>>, %arg6: memref<8x64xbf16, #tpu.memory_space<vmem>>, %arg7: memref<8x64xf32, #tpu.memory_space<vmem>>) attributes {dimension_semantics = [#tpu.dimension_semantics<parallel>, #tpu.dimension_semantics<arbitrary>], iteration_bounds = array<i64: 1, 1>, scalar_prefetch = 0 : i64, scratch_operands = 1 : i64, tpu.core_type = #tpu.core_type<tc>, window_params = [{transform_indices = @transform_0, window_bounds = array<i64: 8, 576>}, {transform_indices = @transform_1, window_bounds = array<i64: 576, 64>}, {pipeline_mode = #tpu.pipeline_mode<synchronous>, transform_indices = @transform_2, window_bounds = array<i64: 1, 64>}, {transform_indices = @transform_3, window_bounds = array<i64: 8, 64>}, {transform_indices = @transform_4, window_bounds = array<i64: 8, 64>}]} {
    %c0_i32 = arith.constant 0 : i32
    %0 = arith.cmpi eq, %arg1, %c0_i32 : i32
    %1 = arith.extui %0 : i1 to i32
    %c0_i32_0 = arith.constant 0 : i32
    %2 = arith.cmpi ne, %1, %c0_i32_0 : i32
    scf.if %2 {
      %cst_10 = arith.constant 0.000000e+00 : f32
      %12 = vector.broadcast %cst_10 : f32 to vector<8x64xf32>
      %c0_11 = arith.constant 0 : index
      %c0_12 = arith.constant 0 : index
      %13 = vector.load %arg7[%c0_11, %c0_12] : memref<8x64xf32, #tpu.memory_space<vmem>>, vector<8x64xf32>
      tpu.vector_store %arg7[%c0_11, %c0_12], %12 {strides = array<i32>} : memref<8x64xf32, #tpu.memory_space<vmem>>, vector<8x64xf32>,
    } else {
    }
    %c0 = arith.constant 0 : index
    %c0_1 = arith.constant 0 : index
    %3 = vector.load %arg7[%c0, %c0_1] : memref<8x64xf32, #tpu.memory_space<vmem>>, vector<8x64xf32>
    %c0_2 = arith.constant 0 : index
    %c0_3 = arith.constant 0 : index
    %4 = vector.load %arg2[%c0_2, %c0_3] : memref<8x576xbf16, #tpu.memory_space<vmem>>, vector<8x576xbf16>
    %c0_4 = arith.constant 0 : index
    %c0_5 = arith.constant 0 : index
    %5 = vector.load %arg3[%c0_4, %c0_5] : memref<576x64xbf16, #tpu.memory_space<vmem>>, vector<576x64xbf16>
    %cst = arith.constant dense<0.000000e+00> : vector<8x64xf32>
    %6 = tpu.matmul %4, %5, %cst {dimension_numbers = #tpu.dot_dimension_numbers<[1], [0], [0], [1], [0, 0, 1, 1], [], []>} : vector<8x576xbf16>, vector<576x64xbf16>, vector<8x64xf32> -> vector<8x64xf32>
    %7 = arith.addf %3, %6 : vector<8x64xf32>
    %c0_6 = arith.constant 0 : index
    %c0_7 = arith.constant 0 : index
    %8 = vector.load %arg7[%c0_6, %c0_7] : memref<8x64xf32, #tpu.memory_space<vmem>>, vector<8x64xf32>
    tpu.vector_store %arg7[%c0_6, %c0_7], %7 {strides = array<i32>} : memref<8x64xf32, #tpu.memory_space<vmem>>, vector<8x64xf32>,
    %c0_i32_8 = arith.constant 0 : i32
    %9 = arith.cmpi eq, %arg1, %c0_i32_8 : i32
    %10 = arith.extui %9 : i1 to i32
    %c0_i32_9 = arith.constant 0 : i32
    %11 = arith.cmpi ne, %10, %c0_i32_9 : i32
    scf.if %11 {
      %c0_10 = arith.constant 0 : index
      %c0_11 = arith.constant 0 : index
      %12 = vector.load %arg7[%c0_10, %c0_11] : memref<8x64xf32, #tpu.memory_space<vmem>>, vector<8x64xf32>
      %c0_12 = arith.constant 0 : index
      %c0_13 = arith.constant 0 : index
      %13 = vector.load %arg4[%c0_12, %c0_13] : memref<1x64xf32, #tpu.memory_space<vmem>>, vector<1x64xf32>
      %14 = vector.broadcast %13 : vector<1x64xf32> to vector<8x64xf32>
      %15 = arith.addf %12, %14 : vector<8x64xf32>
      %cst_14 = arith.constant 0.000000e+00 : f32
      %16 = vector.broadcast %cst_14 : f32 to vector<8x64xf32>
      %17 = arith.subf %16, %15 : vector<8x64xf32>
      %18 = math.exp %17 : vector<8x64xf32>
      %cst_15 = arith.constant 1.000000e+00 : f32
      %19 = vector.broadcast %cst_15 : f32 to vector<8x64xf32>
      %20 = arith.addf %19, %18 : vector<8x64xf32>
      %21 = tpu.reciprocal %20 {approx = true} : vector<8x64xf32> -> vector<8x64xf32>
      %22 = arith.mulf %15, %21 : vector<8x64xf32>
      %c0_16 = arith.constant 0 : index
      %c0_17 = arith.constant 0 : index
      %23 = vector.load %arg5[%c0_16, %c0_17] : memref<8x64xbf16, #tpu.memory_space<vmem>>, vector<8x64xbf16>
      %24 = arith.extf %23 : vector<8x64xbf16> to vector<8x64xf32>
      %25 = arith.addf %22, %24 : vector<8x64xf32>
      %26 = arith.truncf %25 : vector<8x64xf32> to vector<8x64xbf16>
      %c0_18 = arith.constant 0 : index
      %c0_19 = arith.constant 0 : index
      %27 = vector.load %arg6[%c0_18, %c0_19] : memref<8x64xbf16, #tpu.memory_space<vmem>>, vector<8x64xbf16>
      tpu.vector_store %arg6[%c0_18, %c0_19], %26 {strides = array<i32>} : memref<8x64xbf16, #tpu.memory_space<vmem>>, vector<8x64xbf16>,
    } else {
    }
    return
  }
  func.func @transform_0(%arg0: i32, %arg1: i32) -> (i32, i32) {
    %c0_i32 = arith.constant 0 : i32
    return %arg0, %arg1 : i32, i32
  }
  func.func @transform_1(%arg0: i32, %arg1: i32) -> (i32, i32) {
    %c0_i32 = arith.constant 0 : i32
    %c0_i32_0 = arith.constant 0 : i32
    return %arg1, %c0_i32 : i32, i32
  }
  func.func @transform_2(%arg0: i32, %arg1: i32) -> (i32, i32) {
    %c0_i32 = arith.constant 0 : i32
    %c0_i32_0 = arith.constant 0 : i32
    %c0_i32_1 = arith.constant 0 : i32
    return %c0_i32, %c0_i32_0 : i32, i32
  }
  func.func @transform_3(%arg0: i32, %arg1: i32) -> (i32, i32) {
    %c0_i32 = arith.constant 0 : i32
    %c0_i32_0 = arith.constant 0 : i32
    return %arg0, %c0_i32 : i32, i32
  }
  func.func @transform_4(%arg0: i32, %arg1: i32) -> (i32, i32) {
    %c0_i32 = arith.constant 0 : i32
    %c0_i32_0 = arith.constant 0 : i32
    return %arg0, %c0_i32 : i32, i32
  }
}

module attributes {stable_mosaic.version = 11 : i64} {
  func.func @_concat_mm_bias_act_kernel(%arg0: i32, %arg1: memref<8x128xbf16, #tpu.memory_space<vmem>>, %arg2: memref<8x64xbf16, #tpu.memory_space<vmem>>, %arg3: memref<8x64xbf16, #tpu.memory_space<vmem>>, %arg4: memref<128x128xbf16, #tpu.memory_space<vmem>>, %arg5: memref<64x128xbf16, #tpu.memory_space<vmem>>, %arg6: memref<64x128xbf16, #tpu.memory_space<vmem>>, %arg7: memref<1x128xf32, #tpu.memory_space<vmem>>, %arg8: memref<8x128xbf16, #tpu.memory_space<vmem>>) attributes {dimension_semantics = [#tpu.dimension_semantics<parallel>], iteration_bounds = array<i64: 1>, scalar_prefetch = 0 : i64, scratch_operands = 0 : i64, tpu.core_type = #tpu.core_type<tc>, window_params = [{transform_indices = @transform_0, window_bounds = array<i64: 8, 128>}, {transform_indices = @transform_1, window_bounds = array<i64: 8, 64>}, {transform_indices = @transform_2, window_bounds = array<i64: 8, 64>}, {pipeline_mode = #tpu.pipeline_mode<synchronous>, transform_indices = @transform_3, window_bounds = array<i64: 128, 128>}, {pipeline_mode = #tpu.pipeline_mode<synchronous>, transform_indices = @transform_4, window_bounds = array<i64: 64, 128>}, {pipeline_mode = #tpu.pipeline_mode<synchronous>, transform_indices = @transform_5, window_bounds = array<i64: 64, 128>}, {pipeline_mode = #tpu.pipeline_mode<synchronous>, transform_indices = @transform_6, window_bounds = array<i64: 1, 128>}, {transform_indices = @transform_7, window_bounds = array<i64: 8, 128>}]} {
    %c0 = arith.constant 0 : index
    %c0_0 = arith.constant 0 : index
    %0 = vector.load %arg1[%c0, %c0_0] : memref<8x128xbf16, #tpu.memory_space<vmem>>, vector<8x128xbf16>
    %c0_1 = arith.constant 0 : index
    %c0_2 = arith.constant 0 : index
    %1 = vector.load %arg4[%c0_1, %c0_2] : memref<128x128xbf16, #tpu.memory_space<vmem>>, vector<128x128xbf16>
    %cst = arith.constant dense<0.000000e+00> : vector<8x128xf32>
    %2 = tpu.matmul %0, %1, %cst {dimension_numbers = #tpu.dot_dimension_numbers<[1], [0], [0], [1], [0, 0, 1, 1], [], []>} : vector<8x128xbf16>, vector<128x128xbf16>, vector<8x128xf32> -> vector<8x128xf32>
    %c0_3 = arith.constant 0 : index
    %c0_4 = arith.constant 0 : index
    %3 = vector.load %arg2[%c0_3, %c0_4] : memref<8x64xbf16, #tpu.memory_space<vmem>>, vector<8x64xbf16>
    %c0_5 = arith.constant 0 : index
    %c0_6 = arith.constant 0 : index
    %4 = vector.load %arg5[%c0_5, %c0_6] : memref<64x128xbf16, #tpu.memory_space<vmem>>, vector<64x128xbf16>
    %cst_7 = arith.constant dense<0.000000e+00> : vector<8x128xf32>
    %5 = tpu.matmul %3, %4, %cst_7 {dimension_numbers = #tpu.dot_dimension_numbers<[1], [0], [0], [1], [0, 0, 1, 1], [], []>} : vector<8x64xbf16>, vector<64x128xbf16>, vector<8x128xf32> -> vector<8x128xf32>
    %6 = arith.addf %2, %5 : vector<8x128xf32>
    %c0_8 = arith.constant 0 : index
    %c0_9 = arith.constant 0 : index
    %7 = vector.load %arg3[%c0_8, %c0_9] : memref<8x64xbf16, #tpu.memory_space<vmem>>, vector<8x64xbf16>
    %c0_10 = arith.constant 0 : index
    %c0_11 = arith.constant 0 : index
    %8 = vector.load %arg6[%c0_10, %c0_11] : memref<64x128xbf16, #tpu.memory_space<vmem>>, vector<64x128xbf16>
    %cst_12 = arith.constant dense<0.000000e+00> : vector<8x128xf32>
    %9 = tpu.matmul %7, %8, %cst_12 {dimension_numbers = #tpu.dot_dimension_numbers<[1], [0], [0], [1], [0, 0, 1, 1], [], []>} : vector<8x64xbf16>, vector<64x128xbf16>, vector<8x128xf32> -> vector<8x128xf32>
    %10 = arith.addf %6, %9 : vector<8x128xf32>
    %c0_13 = arith.constant 0 : index
    %c0_14 = arith.constant 0 : index
    %11 = vector.load %arg7[%c0_13, %c0_14] : memref<1x128xf32, #tpu.memory_space<vmem>>, vector<1x128xf32>
    %12 = vector.broadcast %11 : vector<1x128xf32> to vector<8x128xf32>
    %13 = arith.addf %10, %12 : vector<8x128xf32>
    %cst_15 = arith.constant 0.000000e+00 : f32
    %14 = vector.broadcast %cst_15 : f32 to vector<8x128xf32>
    %15 = arith.subf %14, %13 : vector<8x128xf32>
    %16 = math.exp %15 : vector<8x128xf32>
    %cst_16 = arith.constant 1.000000e+00 : f32
    %17 = vector.broadcast %cst_16 : f32 to vector<8x128xf32>
    %18 = arith.addf %17, %16 : vector<8x128xf32>
    %19 = tpu.reciprocal %18 {approx = true} : vector<8x128xf32> -> vector<8x128xf32>
    %20 = arith.mulf %13, %19 : vector<8x128xf32>
    %21 = arith.truncf %20 : vector<8x128xf32> to vector<8x128xbf16>
    %c0_17 = arith.constant 0 : index
    %c0_18 = arith.constant 0 : index
    %22 = vector.load %arg8[%c0_17, %c0_18] : memref<8x128xbf16, #tpu.memory_space<vmem>>, vector<8x128xbf16>
    tpu.vector_store %arg8[%c0_17, %c0_18], %21 {strides = array<i32>} : memref<8x128xbf16, #tpu.memory_space<vmem>>, vector<8x128xbf16>,
    return
  }
  func.func @transform_0(%arg0: i32) -> (i32, i32) {
    %c0_i32 = arith.constant 0 : i32
    %c0_i32_0 = arith.constant 0 : i32
    return %arg0, %c0_i32 : i32, i32
  }
  func.func @transform_1(%arg0: i32) -> (i32, i32) {
    %c0_i32 = arith.constant 0 : i32
    %c0_i32_0 = arith.constant 0 : i32
    return %arg0, %c0_i32 : i32, i32
  }
  func.func @transform_2(%arg0: i32) -> (i32, i32) {
    %c0_i32 = arith.constant 0 : i32
    %c0_i32_0 = arith.constant 0 : i32
    return %arg0, %c0_i32 : i32, i32
  }
  func.func @transform_3(%arg0: i32) -> (i32, i32) {
    %c0_i32 = arith.constant 0 : i32
    %c0_i32_0 = arith.constant 0 : i32
    %c0_i32_1 = arith.constant 0 : i32
    return %c0_i32, %c0_i32_0 : i32, i32
  }
  func.func @transform_4(%arg0: i32) -> (i32, i32) {
    %c0_i32 = arith.constant 0 : i32
    %c0_i32_0 = arith.constant 0 : i32
    %c0_i32_1 = arith.constant 0 : i32
    return %c0_i32, %c0_i32_0 : i32, i32
  }
  func.func @transform_5(%arg0: i32) -> (i32, i32) {
    %c0_i32 = arith.constant 0 : i32
    %c0_i32_0 = arith.constant 0 : i32
    %c0_i32_1 = arith.constant 0 : i32
    return %c0_i32, %c0_i32_0 : i32, i32
  }
  func.func @transform_6(%arg0: i32) -> (i32, i32) {
    %c0_i32 = arith.constant 0 : i32
    %c0_i32_0 = arith.constant 0 : i32
    %c0_i32_1 = arith.constant 0 : i32
    return %c0_i32, %c0_i32_0 : i32, i32
  }
  func.func @transform_7(%arg0: i32) -> (i32, i32) {
    %c0_i32 = arith.constant 0 : i32
    %c0_i32_0 = arith.constant 0 : i32
    return %arg0, %c0_i32 : i32, i32
  }
}

module attributes {stable_mosaic.version = 11 : i64} {
  func.func @_mm_bias_act_kernel(%arg0: i32, %arg1: i32, %arg2: memref<8x1152xbf16, #tpu.memory_space<vmem>>, %arg3: memref<1152x128xbf16, #tpu.memory_space<vmem>>, %arg4: memref<1x128xf32, #tpu.memory_space<vmem>>, %arg5: memref<8x128xbf16, #tpu.memory_space<vmem>>, %arg6: memref<8x128xf32, #tpu.memory_space<vmem>>) attributes {dimension_semantics = [#tpu.dimension_semantics<parallel>, #tpu.dimension_semantics<arbitrary>], iteration_bounds = array<i64: 1, 1>, scalar_prefetch = 0 : i64, scratch_operands = 1 : i64, tpu.core_type = #tpu.core_type<tc>, window_params = [{transform_indices = @transform_0, window_bounds = array<i64: 8, 1152>}, {transform_indices = @transform_1, window_bounds = array<i64: 1152, 128>}, {pipeline_mode = #tpu.pipeline_mode<synchronous>, transform_indices = @transform_2, window_bounds = array<i64: 1, 128>}, {transform_indices = @transform_3, window_bounds = array<i64: 8, 128>}]} {
    %c0_i32 = arith.constant 0 : i32
    %0 = arith.cmpi eq, %arg1, %c0_i32 : i32
    %1 = arith.extui %0 : i1 to i32
    %c0_i32_0 = arith.constant 0 : i32
    %2 = arith.cmpi ne, %1, %c0_i32_0 : i32
    scf.if %2 {
      %cst_10 = arith.constant 0.000000e+00 : f32
      %12 = vector.broadcast %cst_10 : f32 to vector<8x128xf32>
      %c0_11 = arith.constant 0 : index
      %c0_12 = arith.constant 0 : index
      %13 = vector.load %arg6[%c0_11, %c0_12] : memref<8x128xf32, #tpu.memory_space<vmem>>, vector<8x128xf32>
      tpu.vector_store %arg6[%c0_11, %c0_12], %12 {strides = array<i32>} : memref<8x128xf32, #tpu.memory_space<vmem>>, vector<8x128xf32>,
    } else {
    }
    %c0 = arith.constant 0 : index
    %c0_1 = arith.constant 0 : index
    %3 = vector.load %arg6[%c0, %c0_1] : memref<8x128xf32, #tpu.memory_space<vmem>>, vector<8x128xf32>
    %c0_2 = arith.constant 0 : index
    %c0_3 = arith.constant 0 : index
    %4 = vector.load %arg2[%c0_2, %c0_3] : memref<8x1152xbf16, #tpu.memory_space<vmem>>, vector<8x1152xbf16>
    %c0_4 = arith.constant 0 : index
    %c0_5 = arith.constant 0 : index
    %5 = vector.load %arg3[%c0_4, %c0_5] : memref<1152x128xbf16, #tpu.memory_space<vmem>>, vector<1152x128xbf16>
    %cst = arith.constant dense<0.000000e+00> : vector<8x128xf32>
    %6 = tpu.matmul %4, %5, %cst {dimension_numbers = #tpu.dot_dimension_numbers<[1], [0], [0], [1], [0, 0, 1, 1], [], []>} : vector<8x1152xbf16>, vector<1152x128xbf16>, vector<8x128xf32> -> vector<8x128xf32>
    %7 = arith.addf %3, %6 : vector<8x128xf32>
    %c0_6 = arith.constant 0 : index
    %c0_7 = arith.constant 0 : index
    %8 = vector.load %arg6[%c0_6, %c0_7] : memref<8x128xf32, #tpu.memory_space<vmem>>, vector<8x128xf32>
    tpu.vector_store %arg6[%c0_6, %c0_7], %7 {strides = array<i32>} : memref<8x128xf32, #tpu.memory_space<vmem>>, vector<8x128xf32>,
    %c0_i32_8 = arith.constant 0 : i32
    %9 = arith.cmpi eq, %arg1, %c0_i32_8 : i32
    %10 = arith.extui %9 : i1 to i32
    %c0_i32_9 = arith.constant 0 : i32
    %11 = arith.cmpi ne, %10, %c0_i32_9 : i32
    scf.if %11 {
      %c0_10 = arith.constant 0 : index
      %c0_11 = arith.constant 0 : index
      %12 = vector.load %arg6[%c0_10, %c0_11] : memref<8x128xf32, #tpu.memory_space<vmem>>, vector<8x128xf32>
      %c0_12 = arith.constant 0 : index
      %c0_13 = arith.constant 0 : index
      %13 = vector.load %arg4[%c0_12, %c0_13] : memref<1x128xf32, #tpu.memory_space<vmem>>, vector<1x128xf32>
      %14 = vector.broadcast %13 : vector<1x128xf32> to vector<8x128xf32>
      %15 = arith.addf %12, %14 : vector<8x128xf32>
      %cst_14 = arith.constant 0.000000e+00 : f32
      %16 = vector.broadcast %cst_14 : f32 to vector<8x128xf32>
      %17 = arith.subf %16, %15 : vector<8x128xf32>
      %18 = math.exp %17 : vector<8x128xf32>
      %cst_15 = arith.constant 1.000000e+00 : f32
      %19 = vector.broadcast %cst_15 : f32 to vector<8x128xf32>
      %20 = arith.addf %19, %18 : vector<8x128xf32>
      %21 = tpu.reciprocal %20 {approx = true} : vector<8x128xf32> -> vector<8x128xf32>
      %22 = arith.mulf %15, %21 : vector<8x128xf32>
      %23 = arith.truncf %22 : vector<8x128xf32> to vector<8x128xbf16>
      %c0_16 = arith.constant 0 : index
      %c0_17 = arith.constant 0 : index
      %24 = vector.load %arg5[%c0_16, %c0_17] : memref<8x128xbf16, #tpu.memory_space<vmem>>, vector<8x128xbf16>
      tpu.vector_store %arg5[%c0_16, %c0_17], %23 {strides = array<i32>} : memref<8x128xbf16, #tpu.memory_space<vmem>>, vector<8x128xbf16>,
    } else {
    }
    return
  }
  func.func @transform_0(%arg0: i32, %arg1: i32) -> (i32, i32) {
    %c0_i32 = arith.constant 0 : i32
    return %arg0, %arg1 : i32, i32
  }
  func.func @transform_1(%arg0: i32, %arg1: i32) -> (i32, i32) {
    %c0_i32 = arith.constant 0 : i32
    %c0_i32_0 = arith.constant 0 : i32
    return %arg1, %c0_i32 : i32, i32
  }
  func.func @transform_2(%arg0: i32, %arg1: i32) -> (i32, i32) {
    %c0_i32 = arith.constant 0 : i32
    %c0_i32_0 = arith.constant 0 : i32
    %c0_i32_1 = arith.constant 0 : i32
    return %c0_i32, %c0_i32_0 : i32, i32
  }
  func.func @transform_3(%arg0: i32, %arg1: i32) -> (i32, i32) {
    %c0_i32 = arith.constant 0 : i32
    %c0_i32_0 = arith.constant 0 : i32
    return %arg0, %c0_i32 : i32, i32
  }
}

module attributes {stable_mosaic.version = 11 : i64} {
  func.func @_concat_mm_bias_act_kernel(%arg0: i32, %arg1: memref<8x128xbf16, #tpu.memory_space<vmem>>, %arg2: memref<8x64xbf16, #tpu.memory_space<vmem>>, %arg3: memref<128x128xbf16, #tpu.memory_space<vmem>>, %arg4: memref<64x128xbf16, #tpu.memory_space<vmem>>, %arg5: memref<1x128xf32, #tpu.memory_space<vmem>>, %arg6: memref<8x128xbf16, #tpu.memory_space<vmem>>) attributes {dimension_semantics = [#tpu.dimension_semantics<parallel>], iteration_bounds = array<i64: 1>, scalar_prefetch = 0 : i64, scratch_operands = 0 : i64, tpu.core_type = #tpu.core_type<tc>, window_params = [{transform_indices = @transform_0, window_bounds = array<i64: 8, 128>}, {transform_indices = @transform_1, window_bounds = array<i64: 8, 64>}, {pipeline_mode = #tpu.pipeline_mode<synchronous>, transform_indices = @transform_2, window_bounds = array<i64: 128, 128>}, {pipeline_mode = #tpu.pipeline_mode<synchronous>, transform_indices = @transform_3, window_bounds = array<i64: 64, 128>}, {pipeline_mode = #tpu.pipeline_mode<synchronous>, transform_indices = @transform_4, window_bounds = array<i64: 1, 128>}, {transform_indices = @transform_5, window_bounds = array<i64: 8, 128>}]} {
    %c0 = arith.constant 0 : index
    %c0_0 = arith.constant 0 : index
    %0 = vector.load %arg1[%c0, %c0_0] : memref<8x128xbf16, #tpu.memory_space<vmem>>, vector<8x128xbf16>
    %c0_1 = arith.constant 0 : index
    %c0_2 = arith.constant 0 : index
    %1 = vector.load %arg3[%c0_1, %c0_2] : memref<128x128xbf16, #tpu.memory_space<vmem>>, vector<128x128xbf16>
    %cst = arith.constant dense<0.000000e+00> : vector<8x128xf32>
    %2 = tpu.matmul %0, %1, %cst {dimension_numbers = #tpu.dot_dimension_numbers<[1], [0], [0], [1], [0, 0, 1, 1], [], []>} : vector<8x128xbf16>, vector<128x128xbf16>, vector<8x128xf32> -> vector<8x128xf32>
    %c0_3 = arith.constant 0 : index
    %c0_4 = arith.constant 0 : index
    %3 = vector.load %arg2[%c0_3, %c0_4] : memref<8x64xbf16, #tpu.memory_space<vmem>>, vector<8x64xbf16>
    %c0_5 = arith.constant 0 : index
    %c0_6 = arith.constant 0 : index
    %4 = vector.load %arg4[%c0_5, %c0_6] : memref<64x128xbf16, #tpu.memory_space<vmem>>, vector<64x128xbf16>
    %cst_7 = arith.constant dense<0.000000e+00> : vector<8x128xf32>
    %5 = tpu.matmul %3, %4, %cst_7 {dimension_numbers = #tpu.dot_dimension_numbers<[1], [0], [0], [1], [0, 0, 1, 1], [], []>} : vector<8x64xbf16>, vector<64x128xbf16>, vector<8x128xf32> -> vector<8x128xf32>
    %6 = arith.addf %2, %5 : vector<8x128xf32>
    %c0_8 = arith.constant 0 : index
    %c0_9 = arith.constant 0 : index
    %7 = vector.load %arg5[%c0_8, %c0_9] : memref<1x128xf32, #tpu.memory_space<vmem>>, vector<1x128xf32>
    %8 = vector.broadcast %7 : vector<1x128xf32> to vector<8x128xf32>
    %9 = arith.addf %6, %8 : vector<8x128xf32>
    %cst_10 = arith.constant 0.000000e+00 : f32
    %10 = vector.broadcast %cst_10 : f32 to vector<8x128xf32>
    %11 = arith.subf %10, %9 : vector<8x128xf32>
    %12 = math.exp %11 : vector<8x128xf32>
    %cst_11 = arith.constant 1.000000e+00 : f32
    %13 = vector.broadcast %cst_11 : f32 to vector<8x128xf32>
    %14 = arith.addf %13, %12 : vector<8x128xf32>
    %15 = tpu.reciprocal %14 {approx = true} : vector<8x128xf32> -> vector<8x128xf32>
    %16 = arith.mulf %9, %15 : vector<8x128xf32>
    %17 = arith.truncf %16 : vector<8x128xf32> to vector<8x128xbf16>
    %c0_12 = arith.constant 0 : index
    %c0_13 = arith.constant 0 : index
    %18 = vector.load %arg6[%c0_12, %c0_13] : memref<8x128xbf16, #tpu.memory_space<vmem>>, vector<8x128xbf16>
    tpu.vector_store %arg6[%c0_12, %c0_13], %17 {strides = array<i32>} : memref<8x128xbf16, #tpu.memory_space<vmem>>, vector<8x128xbf16>,
    return
  }
  func.func @transform_0(%arg0: i32) -> (i32, i32) {
    %c0_i32 = arith.constant 0 : i32
    %c0_i32_0 = arith.constant 0 : i32
    return %arg0, %c0_i32 : i32, i32
  }
  func.func @transform_1(%arg0: i32) -> (i32, i32) {
    %c0_i32 = arith.constant 0 : i32
    %c0_i32_0 = arith.constant 0 : i32
    return %arg0, %c0_i32 : i32, i32
  }
  func.func @transform_2(%arg0: i32) -> (i32, i32) {
    %c0_i32 = arith.constant 0 : i32
    %c0_i32_0 = arith.constant 0 : i32
    %c0_i32_1 = arith.constant 0 : i32
    return %c0_i32, %c0_i32_0 : i32, i32
  }
  func.func @transform_3(%arg0: i32) -> (i32, i32) {
    %c0_i32 = arith.constant 0 : i32
    %c0_i32_0 = arith.constant 0 : i32
    %c0_i32_1 = arith.constant 0 : i32
    return %c0_i32, %c0_i32_0 : i32, i32
  }
  func.func @transform_4(%arg0: i32) -> (i32, i32) {
    %c0_i32 = arith.constant 0 : i32
    %c0_i32_0 = arith.constant 0 : i32
    %c0_i32_1 = arith.constant 0 : i32
    return %c0_i32, %c0_i32_0 : i32, i32
  }
  func.func @transform_5(%arg0: i32) -> (i32, i32) {
    %c0_i32 = arith.constant 0 : i32
    %c0_i32_0 = arith.constant 0 : i32
    return %arg0, %c0_i32 : i32, i32
  }
}

module attributes {stable_mosaic.version = 11 : i64} {
  func.func @_pool_fc_kernel(%arg0: i32, %arg1: memref<2x1x128xbf16, #tpu.memory_space<vmem>>, %arg2: memref<128x10xf32, #tpu.memory_space<vmem>>, %arg3: memref<1x10xf32, #tpu.memory_space<vmem>>, %arg4: memref<2x10xf32, #tpu.memory_space<vmem>>) attributes {dimension_semantics = [#tpu.dimension_semantics<arbitrary>], iteration_bounds = array<i64: 1>, scalar_prefetch = 0 : i64, scratch_operands = 0 : i64, tpu.core_type = #tpu.core_type<tc>, window_params = [{pipeline_mode = #tpu.pipeline_mode<synchronous>, transform_indices = @transform_0, window_bounds = array<i64: 2, 1, 128>}, {pipeline_mode = #tpu.pipeline_mode<synchronous>, transform_indices = @transform_1, window_bounds = array<i64: 128, 10>}, {pipeline_mode = #tpu.pipeline_mode<synchronous>, transform_indices = @transform_2, window_bounds = array<i64: 1, 10>}, {pipeline_mode = #tpu.pipeline_mode<synchronous>, transform_indices = @transform_3, window_bounds = array<i64: 2, 10>}]} {
    %c0 = arith.constant 0 : index
    %c0_0 = arith.constant 0 : index
    %c0_1 = arith.constant 0 : index
    %0 = vector.load %arg1[%c0, %c0_0, %c0_1] : memref<2x1x128xbf16, #tpu.memory_space<vmem>>, vector<2x1x128xbf16>
    %1 = arith.extf %0 : vector<2x1x128xbf16> to vector<2x1x128xf32>
    %cst = arith.constant dense<0.000000e+00> : vector<2x128xf32>
    %2 = vector.multi_reduction <add>, %1, %cst [1] : vector<2x1x128xf32> to vector<2x128xf32>
    %cst_2 = arith.constant 1.000000e+00 : f32
    %3 = vector.broadcast %cst_2 : f32 to vector<2x128xf32>
    %4 = arith.mulf %2, %3 : vector<2x128xf32>
    %c0_3 = arith.constant 0 : index
    %c0_4 = arith.constant 0 : index
    %5 = vector.load %arg2[%c0_3, %c0_4] : memref<128x10xf32, #tpu.memory_space<vmem>>, vector<128x10xf32>
    %cst_5 = arith.constant dense<0.000000e+00> : vector<2x10xf32>
    %6 = tpu.matmul %4, %5, %cst_5 {dimension_numbers = #tpu.dot_dimension_numbers<[1], [0], [0], [1], [0, 0, 1, 1], [], []>} : vector<2x128xf32>, vector<128x10xf32>, vector<2x10xf32> -> vector<2x10xf32>
    %c0_6 = arith.constant 0 : index
    %c0_7 = arith.constant 0 : index
    %7 = vector.load %arg3[%c0_6, %c0_7] : memref<1x10xf32, #tpu.memory_space<vmem>>, vector<1x10xf32>
    %8 = vector.broadcast %7 : vector<1x10xf32> to vector<2x10xf32>
    %9 = arith.addf %6, %8 : vector<2x10xf32>
    %c0_8 = arith.constant 0 : index
    %c0_9 = arith.constant 0 : index
    %10 = vector.load %arg4[%c0_8, %c0_9] : memref<2x10xf32, #tpu.memory_space<vmem>>, vector<2x10xf32>
    tpu.vector_store %arg4[%c0_8, %c0_9], %9 {strides = array<i32>} : memref<2x10xf32, #tpu.memory_space<vmem>>, vector<2x10xf32>,
    return
  }
  func.func @transform_0(%arg0: i32) -> (i32, i32, i32) {
    %c0_i32 = arith.constant 0 : i32
    %c0_i32_0 = arith.constant 0 : i32
    %c0_i32_1 = arith.constant 0 : i32
    %c0_i32_2 = arith.constant 0 : i32
    return %c0_i32, %c0_i32_0, %c0_i32_1 : i32, i32, i32
  }
  func.func @transform_1(%arg0: i32) -> (i32, i32) {
    %c0_i32 = arith.constant 0 : i32
    %c0_i32_0 = arith.constant 0 : i32
    %c0_i32_1 = arith.constant 0 : i32
    return %c0_i32, %c0_i32_0 : i32, i32
  }
  func.func @transform_2(%arg0: i32) -> (i32, i32) {
    %c0_i32 = arith.constant 0 : i32
    %c0_i32_0 = arith.constant 0 : i32
    %c0_i32_1 = arith.constant 0 : i32
    return %c0_i32, %c0_i32_0 : i32, i32
  }
  func.func @transform_3(%arg0: i32) -> (i32, i32) {
    %c0_i32 = arith.constant 0 : i32
    %c0_i32_0 = arith.constant 0 : i32
    %c0_i32_1 = arith.constant 0 : i32
    return %c0_i32, %c0_i32_0 : i32, i32
  }
}

</mosaic_0001>

<bundles_post_ra>
// kernel: elandarknet_fwd.26
= control target key start
LH: loop header
LB: loop body
LE: loop exit
PB: predicated region body
PF: predicated region fallthrough
CT: control target
= control target key end

     0   :  { %s1595_s12 = smov 0   ;;  %s1597_s13 = smov 0   ;;  %s2004_s0 = inlined_call_operand.vmem [shape: bf16[512,27], index: 0, kind: input, shape index: {}]   ;;  %s2005_s1 = inlined_call_operand.vmem [shape: bf16[27,16], index: 1, kind: input, shape index: {}]   ;;  %s2006_s2 = inlined_call_operand.vmem [shape: f32[1,16], index: 2, kind: input, shape index: {}]   ;;  %s2007_s3 = inlined_call_operand.vmem [shape: bf16[512,16], index: 3, kind: output, shape index: {}]  }
   0x1   :  { %s1599_s14 = smov 0  }
   0x2 LB: > { %s25_s15 = sadd.s32 1, %s1567_s13  ;;  %p1213_p0 = scmp.ge.s32.totalorder %s1571_s14, 1  ;;  %s1571_s14 = sphi %s1599_s14, %s13_s14   ;;  %s1567_s13 = sphi %s1597_s13, %s2010_s13   ;;  %s1563_s12 = sphi %s1595_s12, %s2009_s12  }
   0x3   : > { %p27_p1 = scmp.ge.s32.totalorder %s25_s15, 2  ;;  %p166_p2 = scmp.lt.s32.totalorder %s1571_s14, 3 }
   0x5   : > { %s2012_s15 = smov (%p27_p1, %s25_s15), 0  ;;  %p167_p3 = pnand %p1213_p0, %p166_p2 }
   0x6   : > { %s1214_s18 = sshll.u32 (!%p167_p3), %s1563_s12, 5 }
   0x7   : > { %170 = sbr.rel (%p167_p3) target bundleno = 333 (0x14d), region = 32  ;;  %p1621_p4 = scmp.lt.s32.totalorder (!%p167_p3), %s1214_s18, 63 }
   0xc   : > { %v1403_v0 = vld [vmem:[%s2005_s1 + $0x8] sm:$0x3f]   ;;  %vm465_vm0 = vcmask 1044480   ;;  %vm466_vm1 = vcmask 1045504   ;;  %v1573_v1 = vmov 65535   ;;  %vm224_vm2 = vcmask 130048  }
   0xd   : > { %v467_v2 = vsel %vm465_vm0, 4294967295, %v1573_v1  ;;  %v1404_v5 = vld [vmem:[%s2005_s1] sm:$0xff]   ;;  %v1574_v6 = vmov 0.0   ;;  %s2014_s18 = smov (!%p1621_p4, %s1214_s18), 63  ;;  %vm416_vm3 = vcmask 220160   ;;  %vm1092_vm4 = vcmask 125952  }
   0xe   : > { %v468_v3 = vsel %vm466_vm1, %v467_v2, 0  ;;  %227 = vst.msk [vmem:[#allocation2 + $0x10] sm:$0xff] %vm224_vm2, %v1574_v6  ;;  %225 = vst.msk [vmem:[#allocation2] sm:$0xff] %vm224_vm2, %v1574_v6  ;;  %s1215_s22 = sshll.u32 %s2014_s18, 2  ;;  %v1715_v49 = vld [vmem:[%s2006_s2] ss:$0 sm:$0xff] }
   0xf   : > { %v470_v4 = vand.u32 %v1403_v0, %v468_v3  ;;  %226 = vst.msk [vmem:[#allocation2 + $0x8] sm:$0xff] %vm224_vm2, %v1574_v6  ;;  %228 = vst.msk [vmem:[#allocation2 + $0x18] sm:$0xff] %vm224_vm2, %v1574_v6  ;;  %s1672_s25 = scalar_lea.vmem %s2004_s0, %s1215_s22  ;;  %s1867_s30 = scalar_lea.vmem %s2007_s3, %s1215_s22 }
  0x10   : > { %229 = vst.msk [vmem:[#allocation2 + $0x20] sm:$0xff] %vm224_vm2, %v1574_v6  ;;  %230 = vst.msk [vmem:[#allocation2 + $0x28] sm:$0xff] %vm224_vm2, %v1574_v6  ;;  %v1405_v7 = vld [vmem:[%s1672_s25] sm:$0xff]   ;;  %v1407_v9 = vld [vmem:[%s1672_s25 + $0x8] sm:$0xff]  }
  0x11   : > { %231 = vst.msk [vmem:[#allocation2 + $0x30] sm:$0xff] %vm224_vm2, %v1574_v6  ;;  %232 = vst.msk [vmem:[#allocation2 + $0x38] sm:$0xff] %vm224_vm2, %v1574_v6  ;;  %1337 = vmatprep.subr.bf16.mxu0 %v470_v4  ;;  %1373 = vmatprep.subr.bf16.mxu1 %v470_v4  ;;  %v1406_v8 = vld [vmem:[%s1672_s25 + $0x40] sm:$0xff]   ;;  %v1408_v10 = vld [vmem:[%s1672_s25 + $0x48] sm:$0xff]  }
  0x12   : > { %233 = vst.msk [vmem:[#allocation2 + $0x40] sm:$0xff] %vm224_vm2, %v1574_v6  ;;  %234 = vst.msk [vmem:[#allocation2 + $0x48] sm:$0xff] %vm224_vm2, %v1574_v6  ;;  %1338 = vmatpush3.bf16.msra.mxu0 %v470_v4  ;;  %1375 = vmatpush3.bf16.msra.mxu1 %v470_v4  ;;  %v1409_v11 = vld [vmem:[%s1672_s25 + $0x10] sm:$0xff]   ;;  %v1411_v13 = vld [vmem:[%s1672_s25 + $0x18] sm:$0xff]  }
  0x13   : > { %235 = vst.msk [vmem:[#allocation2 + $0x50] sm:$0xff] %vm224_vm2, %v1574_v6  ;;  %236 = vst.msk [vmem:[#allocation2 + $0x58] sm:$0xff] %vm224_vm2, %v1574_v6  ;;  %1339 = vmatprep.subr.bf16.mxu0 %v1404_v5  ;;  %1374 = vmatprep.subr.bf16.mxu1 %v1404_v5  ;;  %v1410_v12 = vld [vmem:[%s1672_s25 + $0x50] sm:$0xff]   ;;  %v1412_v14 = vld [vmem:[%s1672_s25 + $0x58] sm:$0xff]  }
  0x14   : > { %237 = vst.msk [vmem:[#allocation2 + $0x60] sm:$0xff] %vm224_vm2, %v1574_v6  ;;  %238 = vst.msk [vmem:[#allocation2 + $0x68] sm:$0xff] %vm224_vm2, %v1574_v6  ;;  %1341 = vmatprep.mubr.msk.bf16.mxu0 %vm416_vm3, %v1405_v7  ;;  %1357 = vmatprep.mubr.msk.bf16.mxu1 %vm416_vm3, %v1406_v8  ;;  %v1413_v15 = vld [vmem:[%s1672_s25 + $0x20] sm:$0xff]   ;;  %v1415_v17 = vld [vmem:[%s1672_s25 + $0x28] sm:$0xff]  }
  0x15   : > { %239 = vst.msk [vmem:[#allocation2 + $0x70] sm:$0xff] %vm224_vm2, %v1574_v6  ;;  %240 = vst.msk [vmem:[#allocation2 + $0x78] sm:$0xff] %vm224_vm2, %v1574_v6  ;;  %v1414_v16 = vld [vmem:[%s1672_s25 + $0x60] sm:$0xff]   ;;  %v1416_v18 = vld [vmem:[%s1672_s25 + $0x68] sm:$0xff]  }
  0x16   : > { %241 = vst.msk [vmem:[#allocation2 + $0x80] sm:$0xff] %vm224_vm2, %v1574_v6  ;;  %242 = vst.msk [vmem:[#allocation2 + $0x88] sm:$0xff] %vm224_vm2, %v1574_v6  ;;  %1340 = vmatpush3.bf16.msra.mxu0 %v1404_v5  ;;  %1376 = vmatpush3.bf16.msra.mxu1 %v1404_v5  ;;  %v1417_v19 = vld [vmem:[%s1672_s25 + $0x30] sm:$0xff]   ;;  %v1419_v21 = vld [vmem:[%s1672_s25 + $0x38] sm:$0xff]  }
  0x17   : > { %243 = vst.msk [vmem:[#allocation2 + $0x90] sm:$0xff] %vm224_vm2, %v1574_v6  ;;  %244 = vst.msk [vmem:[#allocation2 + $0x98] sm:$0xff] %vm224_vm2, %v1574_v6  ;;  %v1418_v20 = vld [vmem:[%s1672_s25 + $0x70] sm:$0xff]   ;;  %v1420_v22 = vld [vmem:[%s1672_s25 + $0x78] sm:$0xff]  }
  0x18   : > { %245 = vst.msk [vmem:[#allocation2 + $0xa0] sm:$0xff] %vm224_vm2, %v1574_v6  ;;  %246 = vst.msk [vmem:[#allocation2 + $0xa8] sm:$0xff] %vm224_vm2, %v1574_v6  ;;  %v259_v23 = vld [vmem:[#allocation2 + $0x10] sm:$0xff]  ;;  %v257_v27 = vld [vmem:[#allocation2] sm:$0xff] }
  0x19   : > { %247 = vst.msk [vmem:[#allocation2 + $0xb0] sm:$0xff] %vm224_vm2, %v1574_v6  ;;  %248 = vst.msk [vmem:[#allocation2 + $0xb8] sm:$0xff] %vm224_vm2, %v1574_v6  ;;  %1342 = vmatmul.mubr.msk.bf16.vlgmr.msra.gmra.mxu0 %vm416_vm3, %v1407_v9  ;;  %1358 = vmatmul.mubr.msk.bf16.vlgmr.msra.gmra.mxu1 %vm416_vm3, %v1408_v10  ;;  %v260_v33 = vld [vmem:[#allocation2 + $0x18] sm:$0xff]  ;;  %v258_v39 = vld [vmem:[#allocation2 + $0x8] sm:$0xff] }
  0x1a   : > { %249 = vst.msk [vmem:[#allocation2 + $0xc0] sm:$0xff] %vm224_vm2, %v1574_v6  ;;  %250 = vst.msk [vmem:[#allocation2 + $0xc8] sm:$0xff] %vm224_vm2, %v1574_v6  ;;  %1345 = vmatprep.mubr.msk.bf16.mxu0 %vm416_vm3, %v1409_v11  ;;  %1361 = vmatprep.mubr.msk.bf16.mxu1 %vm416_vm3, %v1410_v12  ;;  %v263_v45 = vld [vmem:[#allocation2 + $0x30] sm:$0xff]  ;;  %v261_v52 = vld [vmem:[#allocation2 + $0x20] sm:$0xff] }
  0x1b   : > { %251 = vst.msk [vmem:[#allocation2 + $0xd0] sm:$0xff] %vm224_vm2, %v1574_v6  ;;  %252 = vst.msk [vmem:[#allocation2 + $0xd8] sm:$0xff] %vm224_vm2, %v1574_v6  ;;  %v264_v0 = vld [vmem:[#allocation2 + $0x38] sm:$0xff]  ;;  %v262_v10 = vld [vmem:[#allocation2 + $0x28] sm:$0xff] }
  0x1c   : > { %253 = vst.msk [vmem:[#allocation2 + $0xe0] sm:$0xff] %vm224_vm2, %v1574_v6  ;;  %254 = vst.msk [vmem:[#allocation2 + $0xe8] sm:$0xff] %vm224_vm2, %v1574_v6 }
  0x1d   : > { %255 = vst.msk [vmem:[#allocation2 + $0xf0] sm:$0xff] %vm224_vm2, %v1574_v6  ;;  %256 = vst.msk [vmem:[#allocation2 + $0xf8] sm:$0xff] %vm224_vm2, %v1574_v6  ;;  %v273_v28 = vld [vmem:[#allocation2 + $0x80] sm:$0xff]  ;;  %v274_v40 = vld [vmem:[#allocation2 + $0x88] sm:$0xff] }
  0x1e   : > { %v275_v24 = vld [vmem:[#allocation2 + $0x90] sm:$0xff]  ;;  %v276_v34 = vld [vmem:[#allocation2 + $0x98] sm:$0xff] }
  0x1f   : > { %v277_v53 = vld [vmem:[#allocation2 + $0xa0] sm:$0xff]  ;;  %v278_v11 = vld [vmem:[#allocation2 + $0xa8] sm:$0xff] }
  0x20   : > { %v279_v46 = vld [vmem:[#allocation2 + $0xb0] sm:$0xff]  ;;  %v280_v1 = vld [vmem:[#allocation2 + $0xb8] sm:$0xff] }
  0x21   : > { %1346 = vmatmul.mubr.msk.bf16.gmra.mxu0 %vm416_vm3, %v1411_v13  ;;  %1362 = vmatmul.mubr.msk.bf16.gmra.mxu1 %vm416_vm3, %v1412_v14 }
  0x22   : > { %1349 = vmatprep.mubr.msk.bf16.mxu0 %vm416_vm3, %v1413_v15  ;;  %1365 = vmatprep.mubr.msk.bf16.mxu1 %vm416_vm3, %v1414_v16 }
  0x29   : > { %1350 = vmatmul.mubr.msk.bf16.gmra.mxu0 %vm416_vm3, %v1415_v17  ;;  %1366 = vmatmul.mubr.msk.bf16.gmra.mxu1 %vm416_vm3, %v1416_v18 }
  0x2a   : > { %1353 = vmatprep.mubr.msk.bf16.mxu0 %vm416_vm3, %v1417_v19  ;;  %1369 = vmatprep.mubr.msk.bf16.mxu1 %vm416_vm3, %v1418_v20 }
  0x31   : > { %1354 = vmatmul.mubr.msk.bf16.gmra.mxu0 %vm416_vm3, %v1419_v21  ;;  %1370 = vmatmul.mubr.msk.bf16.gmra.mxu1 %vm416_vm3, %v1420_v22 }
  0xd9   : > { %v1343_v25 = vpop.f32.mrf.mxu0  ;;  %v1359_v26 = vpop.f32.mrf.mxu1 }
  0xda   : > { %v635_v29 = vadd.f32 %v1343_v25, %v259_v23  ;;  %v651_v30 = vadd.f32 %v1359_v26, %v275_v24 }
  0xdb   : > { %v506_v31 = vpop.f32.mrf.mxu0  ;;  %v570_v32 = vpop.f32.mrf.mxu1 }
  0xdc   : > { %668 = vst.msk [vmem:[#allocation2 + $0x10] sm:$0xff] %vm224_vm2, %v635_v29  ;;  %684 = vst.msk [vmem:[#allocation2 + $0x90] sm:$0xff] %vm224_vm2, %v651_v30  ;;  %v633_v35 = vadd.f32 %v506_v31, %v257_v27  ;;  %v649_v36 = vadd.f32 %v570_v32, %v273_v28 }
  0xdd   : > { %v1344_v37 = vpop.f32.mrf.mxu0  ;;  %v1360_v38 = vpop.f32.mrf.mxu1 }
  0xde   : > { %666 = vst.msk [vmem:[#allocation2] sm:$0xff] %vm224_vm2, %v633_v35  ;;  %682 = vst.msk [vmem:[#allocation2 + $0x80] sm:$0xff] %vm224_vm2, %v649_v36  ;;  %v636_v41 = vadd.f32 %v1344_v37, %v260_v33  ;;  %v652_v42 = vadd.f32 %v1360_v38, %v276_v34 }
  0xdf   : > { %v509_v43 = vpop.f32.mrf.mxu0  ;;  %v573_v44 = vpop.f32.mrf.mxu1 }
  0xe0   : > { %669 = vst.msk [vmem:[#allocation2 + $0x18] sm:$0xff] %vm224_vm2, %v636_v41  ;;  %685 = vst.msk [vmem:[#allocation2 + $0x98] sm:$0xff] %vm224_vm2, %v652_v42  ;;  %v634_v47 = vadd.f32 %v509_v43, %v258_v39  ;;  %v650_v48 = vadd.f32 %v573_v44, %v274_v40  ;;  %v267_v43 = vld [vmem:[#allocation2 + $0x50] sm:$0xff] }
  0xe1   : > { %v1347_v50 = vpop.f32.mrf.mxu0  ;;  %v1363_v51 = vpop.f32.mrf.mxu1 }
  0xe2   : > { %667 = vst.msk [vmem:[#allocation2 + $0x8] sm:$0xff] %vm224_vm2, %v634_v47  ;;  %683 = vst.msk [vmem:[#allocation2 + $0x88] sm:$0xff] %vm224_vm2, %v650_v48  ;;  %v639_v54 = vadd.f32 %v1347_v50, %v263_v45  ;;  %v655_v55 = vadd.f32 %v1363_v51, %v279_v46 }
  0xe3   : > { %v703_v56 = vld [vmem:[#allocation2 + $0x10] sm:$0xff]  ;;  %v522_v58 = vpop.f32.mrf.mxu0  ;;  %v586_v59 = vpop.f32.mrf.mxu1 }
  0xe4   : > { %v719_v57 = vld [vmem:[#allocation2 + $0x90] sm:$0xff]  ;;  %v1720_v60 = vadd.f32 %v1715_v49, %v703_v56  ;;  %672 = vst.msk [vmem:[#allocation2 + $0x30] sm:$0xff] %vm224_vm2, %v639_v54  ;;  %688 = vst.msk [vmem:[#allocation2 + $0xb0] sm:$0xff] %vm224_vm2, %v655_v55  ;;  %v637_v62 = vadd.f32 %v522_v58, %v261_v52  ;;  %v653_v63 = vadd.f32 %v586_v59, %v277_v53 }
  0xe5   : > { %v1723_v61 = vadd.f32 %v1715_v49, %v719_v57  ;;  %v701_v2 = vld [vmem:[#allocation2] sm:$0xff]  ;;  %v1348_v4 = vpop.f32.mrf.mxu0  ;;  %v1364_v5 = vpop.f32.mrf.mxu1  ;;  %v283_v56 = vld [vmem:[#allocation2 + $0xd0] sm:$0xff] }
  0xe6   : > { %v717_v3 = vld [vmem:[#allocation2 + $0x80] sm:$0xff]  ;;  %v774_v6 = vsub.f32 0.0, %v1720_v60  ;;  %v1730_v8 = vadd.f32 %v1715_v49, %v701_v2  ;;  %670 = vst.msk [vmem:[#allocation2 + $0x20] sm:$0xff] %vm224_vm2, %v637_v62  ;;  %686 = vst.msk [vmem:[#allocation2 + $0xa0] sm:$0xff] %vm224_vm2, %v653_v63  ;;  %v640_v14 = vadd.f32 %v1348_v4, %v264_v0  ;;  %v656_v15 = vadd.f32 %v1364_v5, %v280_v1 }
  0xe7   : > { %v790_v7 = vsub.f32 0.0, %v1723_v61  ;;  %v1733_v9 = vadd.f32 %v1715_v49, %v717_v3  ;;  %v704_v12 = vld [vmem:[#allocation2 + $0x18] sm:$0xff]  ;;  %v525_v16 = vpop.f32.mrf.mxu0  ;;  %v589_v17 = vpop.f32.mrf.mxu1  ;;  %v265_v62 = vld [vmem:[#allocation2 + $0x40] sm:$0xff] }
  0xe8   : > { %v720_v13 = vld [vmem:[#allocation2 + $0x98] sm:$0xff]  ;;  %v808_v18 = vmul.f32 1.442695, %v774_v6  ;;  %v772_v20 = vsub.f32 0.0, %v1730_v8  ;;  %v1740_v22 = vadd.f32 %v1715_v49, %v704_v12  ;;  %673 = vst.msk [vmem:[#allocation2 + $0x38] sm:$0xff] %vm224_vm2, %v640_v14  ;;  %689 = vst.msk [vmem:[#allocation2 + $0xb8] sm:$0xff] %vm224_vm2, %v656_v15  ;;  %v638_v26 = vadd.f32 %v525_v16, %v262_v10 }
  0xe9   : > { %v840_v19 = vmul.f32 1.442695, %v790_v7  ;;  %v788_v21 = vsub.f32 0.0, %v1733_v9  ;;  %v1743_v23 = vadd.f32 %v1715_v49, %v720_v13  ;;  %v702_v24 = vld [vmem:[#allocation2 + $0x8] sm:$0xff]  ;;  %v654_v27 = vadd.f32 %v589_v17, %v278_v11  ;;  %v1351_v28 = vpop.f32.mrf.mxu0  ;;  %v1367_v29 = vpop.f32.mrf.mxu1  ;;  %v281_v11 = vld [vmem:[#allocation2 + $0xc0] sm:$0xff] }
  0xea   : > { %v718_v25 = vld [vmem:[#allocation2 + $0x88] sm:$0xff]  ;;  %1421 = vpow2.f32 %v808_v18  ;;  %v804_v30 = vmul.f32 1.442695, %v772_v20  ;;  %v1748_v32 = vadd.f32 %v1715_v49, %v702_v24  ;;  %v775_v33 = vsub.f32 0.0, %v1740_v22  ;;  %671 = vst.msk [vmem:[#allocation2 + $0x28] sm:$0xff] %vm224_vm2, %v638_v26 }
  0xeb   : > { %v836_v31 = vmul.f32 1.442695, %v788_v21  ;;  %1423 = vpow2.f32 %v840_v19  ;;  %v791_v34 = vsub.f32 0.0, %v1743_v23  ;;  %v1753_v35 = vadd.f32 %v1715_v49, %v718_v25  ;;  %v707_v36 = vld [vmem:[#allocation2 + $0x30] sm:$0xff]  ;;  %687 = vst.msk [vmem:[#allocation2 + $0xa8] sm:$0xff] %vm224_vm2, %v654_v27  ;;  %v538_v38 = vpop.f32.mrf.mxu0  ;;  %v602_v39 = vpop.f32.mrf.mxu1  ;;  %v268_v19 = vld [vmem:[#allocation2 + $0x58] sm:$0xff] }
  0xec   : > { %v723_v37 = vld [vmem:[#allocation2 + $0xb0] sm:$0xff]  ;;  %1425 = vpow2.f32 %v804_v30  ;;  %v773_v40 = vsub.f32 0.0, %v1748_v32  ;;  %v1759_v41 = vadd.f32 %v1715_v49, %v707_v36  ;;  %v810_v44 = vmul.f32 1.442695, %v775_v33  ;;  %v284_v25 = vld [vmem:[#allocation2 + $0xd8] sm:$0xff]  ;;  %v282_v30 = vld [vmem:[#allocation2 + $0xc8] sm:$0xff] }
  0xed   : > { %v1762_v42 = vadd.f32 %v1715_v49, %v723_v37  ;;  %1427 = vpow2.f32 %v836_v31  ;;  %v842_v45 = vmul.f32 1.442695, %v791_v34  ;;  %v789_v46 = vsub.f32 0.0, %v1753_v35  ;;  %v705_v47 = vld [vmem:[#allocation2 + $0x20] sm:$0xff]  ;;  %v1352_v48 = vpop.f32.mrf.mxu0  ;;  %v1368_v50 = vpop.f32.mrf.mxu1  ;;  %v271_v36 = vld [vmem:[#allocation2 + $0x70] sm:$0xff] }
  0xee   : > { %v806_v51 = vmul.f32 1.442695, %v773_v40  ;;  %v778_v52 = vsub.f32 0.0, %v1759_v41  ;;  %v1768_v54 = vadd.f32 %v1715_v49, %v705_v47  ;;  %v721_v55 = vld [vmem:[#allocation2 + $0xa0] sm:$0xff]  ;;  %1429 = vpow2.f32 %v810_v44 }
  0xef   : > { %v794_v53 = vsub.f32 0.0, %v1762_v42  ;;  %v838_v57 = vmul.f32 1.442695, %v789_v46  ;;  %v1771_v58 = vadd.f32 %v1715_v49, %v721_v55  ;;  %v643_v59 = vadd.f32 %v1351_v28, %v267_v43  ;;  %v541_v63 = vpop.f32.mrf.mxu0  ;;  %v605_v0 = vpop.f32.mrf.mxu1  ;;  %v708_v4 = vld [vmem:[#allocation2 + $0x38] sm:$0xff] }
  0xf0   : > { %1431 = vpow2.f32 %v842_v45  ;;  %v816_v1 = vmul.f32 1.442695, %v778_v52  ;;  %v776_v3 = vsub.f32 0.0, %v1768_v54  ;;  %v1776_v6 = vadd.f32 %v1715_v49, %v708_v4  ;;  %v724_v7 = vld [vmem:[#allocation2 + $0xb8] sm:$0xff]  ;;  %v287_v45 = vld [vmem:[#allocation2 + $0xf0] sm:$0xff]  ;;  %v269_v52 = vld [vmem:[#allocation2 + $0x60] sm:$0xff] }
  0xf1   : > { %v848_v2 = vmul.f32 1.442695, %v794_v53  ;;  %1433 = vpow2.f32 %v806_v51  ;;  %v792_v5 = vsub.f32 0.0, %v1771_v58  ;;  %676 = vst.msk [vmem:[#allocation2 + $0x50] sm:$0xff] %vm224_vm2, %v643_v59  ;;  %v659_v10 = vadd.f32 %v1367_v29, %v283_v56  ;;  %v1355_v12 = vpop.f32.mrf.mxu0  ;;  %v1371_v13 = vpop.f32.mrf.mxu1  ;;  %v706_v16 = vld [vmem:[#allocation2 + $0x28] sm:$0xff] }
  0xf2   : > { %1435 = vpow2.f32 %v838_v57  ;;  %v812_v14 = vmul.f32 1.442695, %v776_v3  ;;  %v1780_v15 = vadd.f32 %v1715_v49, %v724_v7  ;;  %v722_v17 = vld [vmem:[#allocation2 + $0xa8] sm:$0xff]  ;;  %v641_v18 = vadd.f32 %v538_v38, %v265_v62  ;;  %v288_v3 = vld [vmem:[#allocation2 + $0xf8] sm:$0xff] }
  0xf3   : > { %1437 = vpow2.f32 %v816_v1  ;;  %v844_v20 = vmul.f32 1.442695, %v792_v5  ;;  %v779_v21 = vsub.f32 0.0, %v1776_v6  ;;  %v1784_v24 = vadd.f32 %v1715_v49, %v706_v16  ;;  %692 = vst.msk [vmem:[#allocation2 + $0xd0] sm:$0xff] %vm224_vm2, %v659_v10  ;;  %v266_v29 = vld [vmem:[#allocation2 + $0x48] sm:$0xff]  ;;  %v554_v37 = vpop.f32.mrf.mxu0  ;;  %v618_v38 = vpop.f32.mrf.mxu1 }
  0xf4   : > { %1439 = vpow2.f32 %v848_v2  ;;  %v795_v26 = vsub.f32 0.0, %v1780_v15  ;;  %v1789_v27 = vadd.f32 %v1715_v49, %v722_v17  ;;  %674 = vst.msk [vmem:[#allocation2 + $0x40] sm:$0xff] %vm224_vm2, %v641_v18  ;;  %v657_v28 = vadd.f32 %v602_v39, %v281_v11 }
  0xf5   : > { %1441 = vpow2.f32 %v812_v14  ;;  %v818_v31 = vmul.f32 1.442695, %v779_v21  ;;  %v777_v33 = vsub.f32 0.0, %v1784_v24  ;;  %v644_v34 = vadd.f32 %v1352_v48, %v268_v19  ;;  %v285_v48 = vld [vmem:[#allocation2 + $0xe0] sm:$0xff]  ;;  %v1356_v2 = vpop.f32.mrf.mxu0  ;;  %v1372_v4 = vpop.f32.mrf.mxu1 }
  0xf6   : > { %1443 = vpow2.f32 %v844_v20  ;;  %v850_v40 = vmul.f32 1.442695, %v795_v26  ;;  %v793_v43 = vsub.f32 0.0, %v1789_v27  ;;  %690 = vst.msk [vmem:[#allocation2 + $0xc0] sm:$0xff] %vm224_vm2, %v657_v28  ;;  %v660_v44 = vadd.f32 %v1368_v50, %v284_v25 }
  0xf7   : > { %v1422_v46 = vpop.eup %1421  ;;  %1445 = vpow2.f32 %v818_v31  ;;  %v814_v39 = vmul.f32 1.442695, %v777_v33  ;;  %677 = vst.msk [vmem:[#allocation2 + $0x58] sm:$0xff] %vm224_vm2, %v644_v34  ;;  %v642_v47 = vadd.f32 %v541_v63, %v266_v29  ;;  %v658_v51 = vadd.f32 %v605_v0, %v282_v30  ;;  %v272_v0 = vld [vmem:[#allocation2 + $0x78] sm:$0xff] }
  0xf8   : > { %v1424_v53 = vpop.eup %1423  ;;  %v870_v55 = vadd.f32 1.0, %v1422_v46  ;;  %1447 = vpow2.f32 %v850_v40  ;;  %v846_v56 = vmul.f32 1.442695, %v793_v43  ;;  %v711_v57 = vld [vmem:[#allocation2 + $0x50] sm:$0xff]  ;;  %693 = vst.msk [vmem:[#allocation2 + $0xd8] sm:$0xff] %vm224_vm2, %v660_v44  ;;  %v647_v59 = vadd.f32 %v1355_v12, %v271_v36 }
  0xf9   : > { %v1426_v62 = vpop.eup %1425  ;;  %v886_v50 = vadd.f32 1.0, %v1424_v53  ;;  %1449 = vpow2.f32 %v814_v39  ;;  %v1798_v1 = vadd.f32 %v1715_v49, %v711_v57  ;;  %675 = vst.msk [vmem:[#allocation2 + $0x48] sm:$0xff] %vm224_vm2, %v642_v47  ;;  %691 = vst.msk [vmem:[#allocation2 + $0xc8] sm:$0xff] %vm224_vm2, %v658_v51  ;;  %v663_v63 = vadd.f32 %v1371_v13, %v287_v45 }
  0xfa   : > { %v1428_v5 = vpop.eup %1427  ;;  %1451 = vrcp.f32 %v870_v55  ;;  %v868_v7 = vadd.f32 1.0, %v1426_v62  ;;  %v727_v10 = vld [vmem:[#allocation2 + $0xd0] sm:$0xff]  ;;  %680 = vst.msk [vmem:[#allocation2 + $0x70] sm:$0xff] %vm224_vm2, %v647_v59  ;;  %v645_v11 = vadd.f32 %v554_v37, %v269_v52  ;;  %v661_v12 = vadd.f32 %v618_v38, %v285_v48 }
  0xfb   : > { %1453 = vrcp.f32 %v886_v50  ;;  %v884_v14 = vadd.f32 1.0, %v1428_v5  ;;  %v782_v16 = vsub.f32 0.0, %v1798_v1  ;;  %v1805_v17 = vadd.f32 %v1715_v49, %v727_v10  ;;  %v709_v13 = vld [vmem:[#allocation2 + $0x40] sm:$0xff]  ;;  %696 = vst.msk [vmem:[#allocation2 + $0xf0] sm:$0xff] %vm224_vm2, %v663_v63  ;;  %v1430_v18 = vpop.eup %1429 }
  0xfc   : > { %1455 = vrcp.f32 %v868_v7  ;;  %v1809_v19 = vadd.f32 %v1715_v49, %v709_v13  ;;  %678 = vst.msk [vmem:[#allocation2 + $0x60] sm:$0xff] %vm224_vm2, %v645_v11  ;;  %694 = vst.msk [vmem:[#allocation2 + $0xe0] sm:$0xff] %vm224_vm2, %v661_v12  ;;  %v648_v20 = vadd.f32 %v1356_v2, %v272_v0  ;;  %v664_v21 = vadd.f32 %v1372_v4, %v288_v3 }
  0xfd   : > { %v1432_v25 = vpop.eup %1431  ;;  %1457 = vrcp.f32 %v884_v14  ;;  %v871_v26 = vadd.f32 1.0, %v1430_v18  ;;  %v1813_v28 = vmul.f32 1.442695, %v782_v16  ;;  %v798_v29 = vsub.f32 0.0, %v1805_v17  ;;  %v725_v30 = vld [vmem:[#allocation2 + $0xc0] sm:$0xff] }
  0xfe   : > { %v1434_v31 = vpop.eup %1433  ;;  %v887_v33 = vadd.f32 1.0, %v1432_v25  ;;  %1459 = vpow2.f32 %v846_v56  ;;  %v780_v34 = vsub.f32 0.0, %v1809_v19  ;;  %v1818_v36 = vadd.f32 %v1715_v49, %v725_v30  ;;  %v712_v37 = vld [vmem:[#allocation2 + $0x58] sm:$0xff]  ;;  %681 = vst.msk [vmem:[#allocation2 + $0x78] sm:$0xff] %vm224_vm2, %v648_v20  ;;  %697 = vst.msk [vmem:[#allocation2 + $0xf8] sm:$0xff] %vm224_vm2, %v664_v21 }
  0xff   : > { %v1436_v38 = vpop.eup %1435  ;;  %1461 = vrcp.f32 %v871_v26  ;;  %v869_v40 = vadd.f32 1.0, %v1434_v31  ;;  %v1822_v43 = vmul.f32 1.442695, %v798_v29  ;;  %v1825_v44 = vadd.f32 %v1715_v49, %v712_v37  ;;  %v728_v45 = vld [vmem:[#allocation2 + $0xd8] sm:$0xff] }
 0x100   : > { %v1438_v46 = vpop.eup %1437  ;;  %1463 = vrcp.f32 %v887_v33  ;;  %v885_v39 = vadd.f32 1.0, %v1436_v38  ;;  %v1827_v47 = vmul.f32 1.442695, %v780_v34  ;;  %v796_v51 = vsub.f32 0.0, %v1818_v36  ;;  %v710_v52 = vld [vmem:[#allocation2 + $0x48] sm:$0xff] }
 0x101   : > { %v1440_v48 = vpop.eup %1439  ;;  %1465 = vrcp.f32 %v869_v40  ;;  %v874_v53 = vadd.f32 1.0, %v1438_v46  ;;  %v783_v55 = vsub.f32 0.0, %v1825_v44  ;;  %v1832_v56 = vadd.f32 %v1715_v49, %v728_v45  ;;  %v726_v57 = vld [vmem:[#allocation2 + $0xc8] sm:$0xff]  ;;  %v715_v0 = vld [vmem:[#allocation2 + $0x70] sm:$0xff] }
 0x102   : > { %v1442_v59 = vpop.eup %1441  ;;  %1467 = vrcp.f32 %v885_v39  ;;  %v890_v62 = vadd.f32 1.0, %v1440_v48  ;;  %v1834_v50 = vmul.f32 1.442695, %v796_v51  ;;  %v1837_v63 = vadd.f32 %v1715_v49, %v710_v52  ;;  %v731_v14 = vld [vmem:[#allocation2 + $0xf0] sm:$0xff] }
 0x103   : > { %v1444_v2 = vpop.eup %1443  ;;  %1469 = vrcp.f32 %v874_v53  ;;  %v872_v3 = vadd.f32 1.0, %v1442_v59  ;;  %v1839_v4 = vmul.f32 1.442695, %v783_v55  ;;  %v799_v5 = vsub.f32 0.0, %v1832_v56  ;;  %v713_v21 = vld [vmem:[#allocation2 + $0x60] sm:$0xff] }
 0x104   : > { %v1446_v7 = vpop.eup %1445  ;;  %1471 = vrcp.f32 %v890_v62  ;;  %v888_v10 = vadd.f32 1.0, %v1444_v2  ;;  %v781_v11 = vsub.f32 0.0, %v1837_v63  ;;  %v1844_v12 = vadd.f32 %v1715_v49, %v726_v57  ;;  %v729_v59 = vld [vmem:[#allocation2 + $0xe0] sm:$0xff] }
 0x105   : > { %v1448_v16 = vpop.eup %1447  ;;  %1473 = vrcp.f32 %v872_v3  ;;  %v875_v13 = vadd.f32 1.0, %v1446_v7  ;;  %v1846_v18 = vmul.f32 1.442695, %v799_v5  ;;  %v1849_v20 = vadd.f32 %v1715_v49, %v715_v0  ;;  %v716_v3 = vld [vmem:[#allocation2 + $0x78] sm:$0xff] }
 0x106   : > { %v1450_v25 = vpop.eup %1449  ;;  %1475 = vrcp.f32 %v888_v10  ;;  %v891_v26 = vadd.f32 1.0, %v1448_v16  ;;  %v1851_v29 = vmul.f32 1.442695, %v781_v11  ;;  %v797_v30 = vsub.f32 0.0, %v1844_v12  ;;  %v732_v5 = vld [vmem:[#allocation2 + $0xf8] sm:$0xff] }
 0x107   : > { %v1452_v31 = vpop.eup %1451  ;;  %1477 = vrcp.f32 %v875_v13  ;;  %v873_v33 = vadd.f32 1.0, %v1450_v25  ;;  %v786_v34 = vsub.f32 0.0, %v1849_v20  ;;  %v1856_v37 = vadd.f32 %v1715_v49, %v731_v14 }
 0x108   : > { %v1454_v38 = vpop.eup %1453  ;;  %v934_v40 = vmul.f32 %v1452_v31, %v1720_v60  ;;  %1479 = vrcp.f32 %v891_v26  ;;  %v854_v45 = vmul.f32 1.442695, %v797_v30  ;;  %v1860_v46 = vadd.f32 %v1715_v49, %v713_v21 }
 0x109   : > { %v1456_v39 = vpop.eup %1455  ;;  %v950_v51 = vmul.f32 %v1454_v38, %v1723_v61  ;;  %1481 = vrcp.f32 %v873_v33  ;;  %v832_v52 = vmul.f32 1.442695, %v786_v34  ;;  %v802_v48 = vsub.f32 0.0, %v1856_v37 }
 0x10a   : > { %v1458_v60 = vpop.eup %1457  ;;  %v1289_v53 = vpack.c.bf16 %v934_v40, %v934_v40  ;;  %v932_v55 = vmul.f32 %v1456_v39, %v1730_v8  ;;  %1483 = vpow2.f32 %v1813_v28  ;;  %v784_v57 = vsub.f32 0.0, %v1860_v46  ;;  %v270_v40 = vld [vmem:[#allocation2 + $0x68] sm:$0xff]  ;;  %v557_v39 = vpop.f32.mrf.mxu0 }
 0x10b   : > { %v1460_v62 = vpop.eup %1459  ;;  %v1305_v0 = vpack.c.bf16 %v950_v51, %v950_v51  ;;  %v948_v2 = vmul.f32 %v1458_v60, %v1733_v9  ;;  %1485 = vpow2.f32 %v1822_v43  ;;  %v864_v61 = vmul.f32 1.442695, %v802_v48 }
 0x10c   : > { %v1462_v7 = vpop.eup %1461  ;;  %1095 = vst.msk [vmem:[%s1867_s30 + $0x8] sm:$0xf] %vm1092_vm4, %v1289_v53  ;;  %v1287_v8 = vpack.c.bf16 %v932_v55, %v932_v55  ;;  %v889_v10 = vadd.f32 1.0, %v1460_v62  ;;  %1487 = vpow2.f32 %v1827_v47  ;;  %v828_v28 = vmul.f32 1.442695, %v784_v57  ;;  %v286_v55 = vld [vmem:[#allocation2 + $0xe8] sm:$0xff]  ;;  %v621_v57 = vpop.f32.mrf.mxu1 }
 0x10d   : > { %v1464_v11 = vpop.eup %1463  ;;  %1111 = vst.msk [vmem:[%s1867_s30 + $0x48] sm:$0xf] %vm1092_vm4, %v1305_v0  ;;  %v1303_v14 = vpack.c.bf16 %v948_v2, %v948_v2  ;;  %v935_v9 = vmul.f32 %v1462_v7, %v1740_v22  ;;  %1489 = vpow2.f32 %v1834_v50  ;;  %v1884_v43 = vadd.f32 %v1715_v49, %v729_v59 }
 0x10e   : > { %v1466_v16 = vpop.eup %1465  ;;  %1093 = vst.msk [vmem:[%s1867_s30] sm:$0xf] %vm1092_vm4, %v1287_v8  ;;  %v951_v13 = vmul.f32 %v1464_v11, %v1743_v23  ;;  %1491 = vrcp.f32 %v889_v10  ;;  %v1890_v47 = vadd.f32 %v1715_v49, %v716_v3  ;;  %v1893_v21 = vadd.f32 %v1715_v49, %v732_v5 }
 0x10f   : > { %v1468_v25 = vpop.eup %1467  ;;  %1109 = vst.msk [vmem:[%s1867_s30 + $0x40] sm:$0xf] %vm1092_vm4, %v1303_v14  ;;  %v1290_v22 = vpack.c.bf16 %v935_v9, %v935_v9  ;;  %v933_v50 = vmul.f32 %v1466_v16, %v1748_v32  ;;  %1493 = vpow2.f32 %v1839_v4  ;;  %v800_v26 = vsub.f32 0.0, %v1884_v43 }
 0x110   : > { %v1470_v23 = vpop.eup %1469  ;;  %v1306_v30 = vpack.c.bf16 %v951_v13, %v951_v13  ;;  %v949_v31 = vmul.f32 %v1468_v25, %v1753_v35  ;;  %1495 = vpow2.f32 %v1846_v18  ;;  %v787_v33 = vsub.f32 0.0, %v1890_v47 }
 0x111   : > { %v1472_v34 = vpop.eup %1471  ;;  %1096 = vst.msk [vmem:[%s1867_s30 + $0xc] sm:$0xf] %vm1092_vm4, %v1290_v22  ;;  %v1288_v38 = vpack.c.bf16 %v933_v50, %v933_v50  ;;  %v938_v32 = vmul.f32 %v1470_v23, %v1759_v41  ;;  %1497 = vpow2.f32 %v1851_v29  ;;  %v860_v4 = vmul.f32 1.442695, %v800_v26 }
 0x112   : > { %v1474_v51 = vpop.eup %1473  ;;  %1112 = vst.msk [vmem:[%s1867_s30 + $0x4c] sm:$0xf] %vm1092_vm4, %v1306_v30  ;;  %v1304_v35 = vpack.c.bf16 %v949_v31, %v949_v31  ;;  %v954_v18 = vmul.f32 %v1472_v34, %v1762_v42  ;;  %1499 = vpow2.f32 %v854_v45  ;;  %v834_v48 = vmul.f32 1.442695, %v787_v33 }
 0x113   : > { %v1476_v60 = vpop.eup %1475  ;;  %1094 = vst.msk [vmem:[%s1867_s30 + $0x4] sm:$0xf] %vm1092_vm4, %v1288_v38  ;;  %v1293_v53 = vpack.c.bf16 %v938_v32, %v938_v32  ;;  %v936_v41 = vmul.f32 %v1474_v51, %v1768_v54  ;;  %1501 = vpow2.f32 %v832_v52  ;;  %v803_v29 = vsub.f32 0.0, %v1893_v21 }
 0x114   : > { %v1478_v59 = vpop.eup %1477  ;;  %1110 = vst.msk [vmem:[%s1867_s30 + $0x44] sm:$0xf] %vm1092_vm4, %v1304_v35  ;;  %v1309_v62 = vpack.c.bf16 %v954_v18, %v954_v18  ;;  %v952_v42 = vmul.f32 %v1476_v60, %v1771_v58  ;;  %1503 = vpow2.f32 %v864_v61  ;;  %v646_v45 = vadd.f32 %v557_v39, %v270_v40 }
 0x115   : > { %v1480_v0 = vpop.eup %1479  ;;  %1099 = vst.msk [vmem:[%s1867_s30 + $0x18] sm:$0xf] %vm1092_vm4, %v1293_v53  ;;  %v1291_v2 = vpack.c.bf16 %v936_v41, %v936_v41  ;;  %v939_v54 = vmul.f32 %v1478_v59, %v1776_v6  ;;  %1505 = vpow2.f32 %v828_v28  ;;  %v866_v52 = vmul.f32 1.442695, %v803_v29 }
 0x116   : > { %v1482_v3 = vpop.eup %1481  ;;  %1115 = vst.msk [vmem:[%s1867_s30 + $0x58] sm:$0xf] %vm1092_vm4, %v1309_v62  ;;  %v1307_v5 = vpack.c.bf16 %v952_v42, %v952_v42  ;;  %v955_v7 = vmul.f32 %v1480_v0, %v1780_v15  ;;  %1507 = vpow2.f32 %v860_v4  ;;  %v662_v58 = vadd.f32 %v621_v57, %v286_v55 }
 0x117   : > { %679 = vst.msk [vmem:[#allocation2 + $0x68] sm:$0xff] %vm224_vm2, %v646_v45  ;;  %v1484_v61 = vpop.eup %1483  ;;  %v1294_v8 = vpack.c.bf16 %v939_v54, %v939_v54  ;;  %v937_v6 = vmul.f32 %v1482_v3, %v1784_v24  ;;  %1509 = vpow2.f32 %v834_v48 }
 0x118   : > { %1097 = vst.msk [vmem:[%s1867_s30 + $0x10] sm:$0xf] %vm1092_vm4, %v1291_v2  ;;  %v1486_v10 = vpop.eup %1485  ;;  %1113 = vst.msk [vmem:[%s1867_s30 + $0x50] sm:$0xf] %vm1092_vm4, %v1307_v5  ;;  %v1310_v28 = vpack.c.bf16 %v955_v7, %v955_v7  ;;  %v878_v11 = vadd.f32 1.0, %v1484_v61  ;;  %1511 = vpow2.f32 %v866_v52 }
 0x119   : > { %695 = vst.msk [vmem:[#allocation2 + $0xe8] sm:$0xff] %vm224_vm2, %v662_v58  ;;  %v1488_v15 = vpop.eup %1487  ;;  %v1292_v14 = vpack.c.bf16 %v937_v6, %v937_v6  ;;  %v894_v9 = vadd.f32 1.0, %v1486_v10 }
 0x11a   : > { %1100 = vst.msk [vmem:[%s1867_s30 + $0x1c] sm:$0xf] %vm1092_vm4, %v1294_v8  ;;  %v1490_v16 = vpop.eup %1489  ;;  %1116 = vst.msk [vmem:[%s1867_s30 + $0x5c] sm:$0xf] %vm1092_vm4, %v1310_v28  ;;  %1513 = vrcp.f32 %v878_v11  ;;  %v876_v24 = vadd.f32 1.0, %v1488_v15 }
 0x11b   : > { %v1492_v13 = vpop.eup %1491  ;;  %1098 = vst.msk [vmem:[%s1867_s30 + $0x14] sm:$0xf] %vm1092_vm4, %v1292_v14  ;;  %1515 = vrcp.f32 %v894_v9  ;;  %v892_v25 = vadd.f32 1.0, %v1490_v16 }
 0x11c   : > { %v1494_v22 = vpop.eup %1493  ;;  %v953_v50 = vmul.f32 %v1492_v13, %v1789_v27  ;;  %1517 = vrcp.f32 %v876_v24 }
 0x11d   : > { %v1496_v26 = vpop.eup %1495  ;;  %1519 = vrcp.f32 %v892_v25  ;;  %v879_v23 = vadd.f32 1.0, %v1494_v22 }
 0x11e   : > { %v714_v30 = vld [vmem:[#allocation2 + $0x68] sm:$0xff]  ;;  %v1498_v31 = vpop.eup %1497  ;;  %v1308_v33 = vpack.c.bf16 %v953_v50, %v953_v50  ;;  %v895_v34 = vadd.f32 1.0, %v1496_v26 }
 0x11f   : > { %v1938_v38 = vadd.f32 %v1715_v49, %v714_v30  ;;  %v1500_v32 = vpop.eup %1499  ;;  %1521 = vrcp.f32 %v879_v23  ;;  %v877_v4 = vadd.f32 1.0, %v1498_v31 }
 0x120   : > { %v730_v40 = vld [vmem:[#allocation2 + $0xe8] sm:$0xff]  ;;  %v1502_v39 = vpop.eup %1501  ;;  %1114 = vst.msk [vmem:[%s1867_s30 + $0x54] sm:$0xf] %vm1092_vm4, %v1308_v33  ;;  %1523 = vrcp.f32 %v895_v34  ;;  %v893_v27 = vadd.f32 1.0, %v1500_v32 }
 0x121   : > { %v1943_v51 = vadd.f32 %v1715_v49, %v730_v40  ;;  %v1504_v35 = vpop.eup %1503  ;;  %1525 = vrcp.f32 %v877_v4  ;;  %v882_v18 = vadd.f32 1.0, %v1502_v39  ;;  %v785_v48 = vsub.f32 0.0, %v1938_v38 }
 0x122   : > { %v1506_v60 = vpop.eup %1505  ;;  %1527 = vrcp.f32 %v893_v27  ;;  %v898_v53 = vadd.f32 1.0, %v1504_v35 }
 0x123   : > { %v801_v41 = vsub.f32 0.0, %v1943_v51  ;;  %v1508_v29 = vpop.eup %1507  ;;  %1529 = vrcp.f32 %v882_v18  ;;  %v880_v55 = vadd.f32 1.0, %v1506_v60  ;;  %v830_v42 = vmul.f32 1.442695, %v785_v48 }
 0x124   : > { %v1510_v57 = vpop.eup %1509  ;;  %1531 = vrcp.f32 %v898_v53  ;;  %v896_v59 = vadd.f32 1.0, %v1508_v29 }
 0x125   : > { %v1512_v62 = vpop.eup %1511  ;;  %1533 = vrcp.f32 %v880_v55  ;;  %v883_v49 = vadd.f32 1.0, %v1510_v57  ;;  %v862_v0 = vmul.f32 1.442695, %v801_v41 }
 0x126   : > { %1535 = vrcp.f32 %v896_v59  ;;  %v899_v45 = vadd.f32 1.0, %v1512_v62 }
 0x127   : > { %v1514_v2 = vpop.eup %1513  ;;  %1537 = vrcp.f32 %v883_v49 }
 0x128   : > { %v1516_v54 = vpop.eup %1515  ;;  %v942_v52 = vmul.f32 %v1514_v2, %v1798_v1  ;;  %1539 = vrcp.f32 %v899_v45 }
 0x129   : > { %v1518_v3 = vpop.eup %1517  ;;  %v958_v5 = vmul.f32 %v1516_v54, %v1805_v17  ;;  %1541 = vpow2.f32 %v830_v42 }
 0x12a   : > { %v1520_v7 = vpop.eup %1519  ;;  %v1297_v58 = vpack.c.bf16 %v942_v52, %v942_v52  ;;  %v940_v61 = vmul.f32 %v1518_v3, %v1809_v19  ;;  %1543 = vpow2.f32 %v862_v0 }
 0x12b   : > { %v1313_v8 = vpack.c.bf16 %v958_v5, %v958_v5  ;;  %v956_v6 = vmul.f32 %v1520_v7, %v1818_v36 }
 0x12c   : > { %v1522_v10 = vpop.eup %1521  ;;  %1103 = vst.msk [vmem:[%s1867_s30 + $0x28] sm:$0xf] %vm1092_vm4, %v1297_v58  ;;  %v1295_v28 = vpack.c.bf16 %v940_v61, %v940_v61 }
 0x12d   : > { %v1524_v1 = vpop.eup %1523  ;;  %1119 = vst.msk [vmem:[%s1867_s30 + $0x68] sm:$0xf] %vm1092_vm4, %v1313_v8  ;;  %v1311_v17 = vpack.c.bf16 %v956_v6, %v956_v6  ;;  %v943_v11 = vmul.f32 %v1522_v10, %v1825_v44 }
 0x12e   : > { %v1526_v15 = vpop.eup %1525  ;;  %1101 = vst.msk [vmem:[%s1867_s30 + $0x20] sm:$0xf] %vm1092_vm4, %v1295_v28  ;;  %v959_v19 = vmul.f32 %v1524_v1, %v1832_v56 }
 0x12f   : > { %v1528_v14 = vpop.eup %1527  ;;  %1117 = vst.msk [vmem:[%s1867_s30 + $0x60] sm:$0xf] %vm1092_vm4, %v1311_v17  ;;  %v1298_v36 = vpack.c.bf16 %v943_v11, %v943_v11  ;;  %v941_v9 = vmul.f32 %v1526_v15, %v1837_v63 }
 0x130   : > { %v1530_v16 = vpop.eup %1529  ;;  %v1314_v24 = vpack.c.bf16 %v959_v19, %v959_v19  ;;  %v957_v13 = vmul.f32 %v1528_v14, %v1844_v12 }
 0x131   : > { %v1532_v25 = vpop.eup %1531  ;;  %1104 = vst.msk [vmem:[%s1867_s30 + $0x2c] sm:$0xf] %vm1092_vm4, %v1298_v36  ;;  %v1296_v44 = vpack.c.bf16 %v941_v9, %v941_v9  ;;  %v946_v22 = vmul.f32 %v1530_v16, %v1849_v20 }
 0x132   : > { %v1534_v56 = vpop.eup %1533  ;;  %1120 = vst.msk [vmem:[%s1867_s30 + $0x6c] sm:$0xf] %vm1092_vm4, %v1314_v24  ;;  %v1312_v50 = vpack.c.bf16 %v957_v13, %v957_v13  ;;  %v962_v26 = vmul.f32 %v1532_v25, %v1856_v37 }
 0x133   : > { %v1536_v63 = vpop.eup %1535  ;;  %1102 = vst.msk [vmem:[%s1867_s30 + $0x24] sm:$0xf] %vm1092_vm4, %v1296_v44  ;;  %v1301_v23 = vpack.c.bf16 %v946_v22, %v946_v22  ;;  %v944_v12 = vmul.f32 %v1534_v56, %v1860_v46 }
 0x134   : > { %v1538_v30 = vpop.eup %1537  ;;  %1118 = vst.msk [vmem:[%s1867_s30 + $0x64] sm:$0xf] %vm1092_vm4, %v1312_v50  ;;  %v1317_v31 = vpack.c.bf16 %v962_v26, %v962_v26  ;;  %v960_v20 = vmul.f32 %v1536_v63, %v1884_v43 }
 0x135   : > { %v1540_v33 = vpop.eup %1539  ;;  %1107 = vst.msk [vmem:[%s1867_s30 + $0x38] sm:$0xf] %vm1092_vm4, %v1301_v23  ;;  %v1299_v37 = vpack.c.bf16 %v944_v12, %v944_v12  ;;  %v947_v34 = vmul.f32 %v1538_v30, %v1890_v47 }
 0x136   : > { %v1542_v32 = vpop.eup %1541  ;;  %1123 = vst.msk [vmem:[%s1867_s30 + $0x78] sm:$0xf] %vm1092_vm4, %v1317_v31  ;;  %v1315_v4 = vpack.c.bf16 %v960_v20, %v960_v20  ;;  %v963_v46 = vmul.f32 %v1540_v33, %v1893_v21 }
 0x137   : > { %v1544_v40 = vpop.eup %1543  ;;  %1105 = vst.msk [vmem:[%s1867_s30 + $0x30] sm:$0xf] %vm1092_vm4, %v1299_v37  ;;  %v1302_v39 = vpack.c.bf16 %v947_v34, %v947_v34  ;;  %v881_v43 = vadd.f32 1.0, %v1542_v32 }
 0x138   : > { %1121 = vst.msk [vmem:[%s1867_s30 + $0x70] sm:$0xf] %vm1092_vm4, %v1315_v4  ;;  %v1318_v27 = vpack.c.bf16 %v963_v46, %v963_v46  ;;  %v897_v35 = vadd.f32 1.0, %v1544_v40 }
 0x139   : > { %1108 = vst.msk [vmem:[%s1867_s30 + $0x3c] sm:$0xf] %vm1092_vm4, %v1302_v39  ;;  %1545 = vrcp.f32 %v881_v43 }
 0x13a   : > { %1124 = vst.msk [vmem:[%s1867_s30 + $0x7c] sm:$0xf] %vm1092_vm4, %v1318_v27  ;;  %1547 = vrcp.f32 %v897_v35 }
 0x146   : > { %v1546_v47 = vpop.eup %1545 }
 0x147   : > { %v1548_v18 = vpop.eup %1547  ;;  %v945_v21 = vmul.f32 %v1546_v47, %v1938_v38 }
 0x148   : > { %v961_v48 = vmul.f32 %v1548_v18, %v1943_v51 }
 0x149   : > { %v1300_v60 = vpack.c.bf16 %v945_v21, %v945_v21 }
 0x14a   : > { %v1316_v53 = vpack.c.bf16 %v961_v48, %v961_v48 }
 0x14b   : > { %1106 = vst.msk [vmem:[%s1867_s30 + $0x34] sm:$0xf] %vm1092_vm4, %v1300_v60 }
 0x14c   : > { %1122 = vst.msk [vmem:[%s1867_s30 + $0x74] sm:$0xf] %vm1092_vm4, %v1316_v53 }
 0x14d PF: > { %s13_s14 = sadd.s32 1, %s1571_s14   ;;  %s2009_s12 = smov %s1567_s13 }
 0x14e   : > { %p10_p5 = scmp.ge.s32.totalorder %s13_s14, 4   ;;  %s2010_s13 = smov %s2012_s15 }
 0x150   :  { %12 = sbr.rel (!%p10_p5) target bundleno = 2 (0x2), region = 73 }

// kernel: elandarknet_fwd.27
= control target key start
LH: loop header
LB: loop body
LE: loop exit
PB: predicated region body
PF: predicated region fallthrough
CT: control target
= control target key end

     0   :  { %vm19_vm0 = vcmask 261120   ;;  %v773_v0 = vmov 0   ;;  %v774_v2 = vmov 0.0   ;;  %vm212_vm1 = vcmask 130048   ;;  %s1077_s1 = inlined_call_operand.vmem [shape: bf16[144,32], index: 1, kind: input, shape index: {}]   ;;  %s1078_s0 = inlined_call_operand.vmem [shape: bf16[128,144], index: 0, kind: input, shape index: {}]   ;;  %s1079_s2 = inlined_call_operand.vmem [shape: f32[1,32], index: 2, kind: input, shape index: {}]   ;;  %s1080_s3 = inlined_call_operand.vmem [shape: bf16[128,32], index: 3, kind: output, shape index: {}]  }
   0x1   :  { %237 = vmatprep.subr.bf16.mxu0 %v773_v0  ;;  %656 = vmatprep.subr.bf16.mxu1 %v773_v0  ;;  %v676_v1 = vld [vmem:[%s1077_s1 + $0x38] sm:$0xff]   ;;  %20 = vst.msk [vmem:[#allocation2] sm:$0xff] %vm19_vm0, %v774_v2  ;;  %21 = vst.msk [vmem:[#allocation2 + $0x8] sm:$0xff] %vm19_vm0, %v774_v2  ;;  %v677_v3 = vld [vmem:[%s1077_s1 + $0x30] sm:$0xff]   ;;  %vm569_vm2 = vcmask 257024  }
   0x2   :  { %22 = vst.msk [vmem:[#allocation2 + $0x10] sm:$0xff] %vm19_vm0, %v774_v2  ;;  %23 = vst.msk [vmem:[#allocation2 + $0x18] sm:$0xff] %vm19_vm0, %v774_v2  ;;  %238 = vmatpush1.bf16.msra.mxu0 %v676_v1  ;;  %665 = vmatpush1.bf16.msra.mxu1 %v676_v1  ;;  %v678_v4 = vld [vmem:[%s1077_s1 + $0x28] sm:$0xff]   ;;  %v679_v5 = vld [vmem:[%s1077_s1 + $0x20] sm:$0xff]  }
   0x3   :  { %24 = vst.msk [vmem:[#allocation2 + $0x20] sm:$0xff] %vm19_vm0, %v774_v2  ;;  %25 = vst.msk [vmem:[#allocation2 + $0x28] sm:$0xff] %vm19_vm0, %v774_v2  ;;  %239 = vmatprep.subr.bf16.mxu0 %v773_v0  ;;  %657 = vmatprep.subr.bf16.mxu1 %v773_v0  ;;  %v687_v6 = vld [vmem:[%s1078_s0 + $0x4] ss:$8 sps:$4 sm:$0xff]   ;;  %v680_v8 = vld [vmem:[%s1077_s1 + $0x18] sm:$0xff]  }
   0x4   :  { %26 = vst.msk [vmem:[#allocation2 + $0x30] sm:$0xff] %vm19_vm0, %v774_v2  ;;  %27 = vst.msk [vmem:[#allocation2 + $0x38] sm:$0xff] %vm19_vm0, %v774_v2  ;;  %v690_v7 = vld [vmem:[%s1078_s0 + $0x44] ss:$8 sps:$4 sm:$0xff]   ;;  %615 = vmatprep.mubr.msk.bf16.mxu0 %vm212_vm1, %v687_v6  ;;  %v681_v9 = vld [vmem:[%s1077_s1 + $0x10] sm:$0xff]  }
   0x5   :  { %28 = vst.msk [vmem:[#allocation2 + $0x40] sm:$0xff] %vm19_vm0, %v774_v2  ;;  %29 = vst.msk [vmem:[#allocation2 + $0x48] sm:$0xff] %vm19_vm0, %v774_v2  ;;  %619 = vmatprep.mubr.msk.bf16.mxu1 %vm212_vm1, %v690_v7  ;;  %v682_v10 = vld [vmem:[%s1077_s1 + $0x8] sm:$0xff]   ;;  %v683_v11 = vld [vmem:[%s1077_s1] sm:$0xff]  }
   0x6   :  { %30 = vst.msk [vmem:[#allocation2 + $0x50] sm:$0xff] %vm19_vm0, %v774_v2  ;;  %31 = vst.msk [vmem:[#allocation2 + $0x58] sm:$0xff] %vm19_vm0, %v774_v2  ;;  %240 = vmatpush1.bf16.msra.mxu0 %v677_v3  ;;  %666 = vmatpush1.bf16.msra.mxu1 %v677_v3  ;;  %v684_v12 = vld [vmem:[%s1077_s1 + $0x40] sm:$0xff]   ;;  %v691_v15 = vld [vmem:[%s1078_s0 + $0x14] ss:$8 sps:$4 sm:$0xff]  }
   0x7   :  { %32 = vst.msk [vmem:[#allocation2 + $0x60] sm:$0xff] %vm19_vm0, %v774_v2  ;;  %33 = vst.msk [vmem:[#allocation2 + $0x68] sm:$0xff] %vm19_vm0, %v774_v2  ;;  %241 = vmatprep.subr.bf16.mxu0 %v773_v0  ;;  %658 = vmatprep.subr.bf16.mxu1 %v773_v0  ;;  %v685_v13 = vld [vmem:[%s1078_s0] ss:$8 sps:$4 sm:$0xff]   ;;  %v693_v16 = vld [vmem:[%s1078_s0 + $0x54] ss:$8 sps:$4 sm:$0xff]  }
   0x8   :  { %34 = vst.msk [vmem:[#allocation2 + $0x70] sm:$0xff] %vm19_vm0, %v774_v2  ;;  %35 = vst.msk [vmem:[#allocation2 + $0x78] sm:$0xff] %vm19_vm0, %v774_v2  ;;  %v688_v14 = vld [vmem:[%s1078_s0 + $0x40] ss:$8 sps:$4 sm:$0xff]   ;;  %v695_v17 = vld [vmem:[%s1078_s0 + $0x10] ss:$8 sps:$4 sm:$0xff]  }
   0x9   :  { %v696_v18 = vld [vmem:[%s1078_s0 + $0x50] ss:$8 sps:$4 sm:$0xff]   ;;  %v697_v19 = vld [vmem:[%s1078_s0 + $0x24] ss:$8 sps:$4 sm:$0xff]   ;;  %v701_v21 = vld [vmem:[%s1078_s0 + $0x20] ss:$8 sps:$4 sm:$0xff]  }
   0xa   :  { %242 = vmatpush1.bf16.msra.mxu0 %v678_v4  ;;  %667 = vmatpush1.bf16.msra.mxu1 %v678_v4  ;;  %v699_v20 = vld [vmem:[%s1078_s0 + $0x64] ss:$8 sps:$4 sm:$0xff]   ;;  %v702_v22 = vld [vmem:[%s1078_s0 + $0x60] ss:$8 sps:$4 sm:$0xff]   ;;  %v703_v23 = vld [vmem:[%s1078_s0 + $0x34] ss:$8 sps:$4 sm:$0xff]  }
   0xb   :  { %243 = vmatprep.subr.bf16.mxu0 %v773_v0  ;;  %659 = vmatprep.subr.bf16.mxu1 %v773_v0  ;;  %v705_v24 = vld [vmem:[%s1078_s0 + $0x74] ss:$8 sps:$4 sm:$0xff]   ;;  %v707_v25 = vld [vmem:[%s1078_s0 + $0x30] ss:$8 sps:$4 sm:$0xff]   ;;  %v36_v27 = vld [vmem:[#allocation2] sm:$0xff] }
   0xc   :  { %v708_v26 = vld [vmem:[%s1078_s0 + $0x70] ss:$8 sps:$4 sm:$0xff]   ;;  %v44_v28 = vld [vmem:[#allocation2 + $0x40] sm:$0xff]  ;;  %v37_v35 = vld [vmem:[#allocation2 + $0x8] sm:$0xff] }
   0xd   :  { %v45_v36 = vld [vmem:[#allocation2 + $0x48] sm:$0xff]  ;;  %v38_v43 = vld [vmem:[#allocation2 + $0x10] sm:$0xff]  ;;  %v919_v45 = vld [vmem:[%s1079_s2] ss:$0 sm:$0xff] }
   0xe   :  { %244 = vmatpush1.bf16.msra.mxu0 %v679_v5  ;;  %668 = vmatpush1.bf16.msra.mxu1 %v679_v5  ;;  %v46_v44 = vld [vmem:[#allocation2 + $0x50] sm:$0xff]  ;;  %v39_v50 = vld [vmem:[#allocation2 + $0x18] sm:$0xff]  ;;  %v40_v4 = vld [vmem:[#allocation2 + $0x20] sm:$0xff] }
   0xf   :  { %245 = vmatprep.subr.bf16.mxu0 %v773_v0  ;;  %660 = vmatprep.subr.bf16.mxu1 %v773_v0  ;;  %v47_v55 = vld [vmem:[#allocation2 + $0x58] sm:$0xff] }
  0x12   :  { %246 = vmatpush1.bf16.msra.mxu0 %v680_v8  ;;  %669 = vmatpush1.bf16.msra.mxu1 %v680_v8 }
  0x13   :  { %247 = vmatprep.subr.bf16.mxu0 %v773_v0  ;;  %661 = vmatprep.subr.bf16.mxu1 %v773_v0 }
  0x16   :  { %248 = vmatpush1.bf16.msra.mxu0 %v681_v9  ;;  %670 = vmatpush1.bf16.msra.mxu1 %v681_v9  ;;  %v48_v9 = vld [vmem:[#allocation2 + $0x60] sm:$0xff] }
  0x17   :  { %249 = vmatprep.subr.bf16.mxu0 %v773_v0  ;;  %662 = vmatprep.subr.bf16.mxu1 %v773_v0 }
  0x1a   :  { %250 = vmatpush1.bf16.msra.mxu0 %v682_v10  ;;  %671 = vmatpush1.bf16.msra.mxu1 %v682_v10 }
  0x1b   :  { %251 = vmatprep.subr.bf16.mxu0 %v773_v0  ;;  %663 = vmatprep.subr.bf16.mxu1 %v773_v0 }
  0x1e   :  { %252 = vmatpush1.bf16.msra.mxu0 %v683_v11  ;;  %672 = vmatpush1.bf16.msra.mxu1 %v683_v11 }
  0x1f   :  { %267 = vmatprep.subr.bf16.mxu0 %v773_v0  ;;  %664 = vmatprep.subr.bf16.mxu1 %v773_v0 }
  0x22   :  { %268 = vmatpush2.bf16.msra.mxu0 %v684_v12  ;;  %673 = vmatpush2.bf16.msra.mxu1 %v684_v12 }
  0x25   :  { %270 = vmatmul.mubr.bf16.vlgmr.msra.gmra.mxu0 %v685_v13  ;;  %302 = vmatmul.mubr.bf16.vlgmr.msra.gmra.mxu1 %v688_v14 }
  0x26   :  { %616 = vmatprep.mubr.msk.bf16.mxu0 %vm212_vm1, %v691_v15  ;;  %620 = vmatprep.mubr.msk.bf16.mxu1 %vm212_vm1, %v693_v16 }
  0x2d   :  { %278 = vmatmul.mubr.bf16.gmra.mxu0 %v695_v17  ;;  %310 = vmatmul.mubr.bf16.gmra.mxu1 %v696_v18 }
  0x2e   :  { %617 = vmatprep.mubr.msk.bf16.mxu0 %vm212_vm1, %v697_v19  ;;  %621 = vmatprep.mubr.msk.bf16.mxu1 %vm212_vm1, %v699_v20  ;;  %v41_v20 = vld [vmem:[#allocation2 + $0x28] sm:$0xff] }
  0x35   :  { %286 = vmatmul.mubr.bf16.gmra.mxu0 %v701_v21  ;;  %318 = vmatmul.mubr.bf16.gmra.mxu1 %v702_v22 }
  0x36   :  { %618 = vmatprep.mubr.msk.bf16.mxu0 %vm212_vm1, %v703_v23  ;;  %622 = vmatprep.mubr.msk.bf16.mxu1 %vm212_vm1, %v705_v24 }
  0x3d   :  { %294 = vmatmul.mubr.bf16.gmra.mxu0 %v707_v25  ;;  %326 = vmatmul.mubr.bf16.gmra.mxu1 %v708_v26  ;;  %v49_v25 = vld [vmem:[#allocation2 + $0x68] sm:$0xff] }
  0xe5   :  { %v271_v29 = vpop.f32.mrf.mxu0  ;;  %v303_v30 = vpop.f32.mrf.mxu1 }
  0xe6   :  { %v334_v31 = vadd.f32 %v271_v29, %v36_v27  ;;  %v342_v32 = vadd.f32 %v303_v30, %v44_v28 }
  0xe7   :  { %v273_v33 = vpop.f32.mrf.mxu0  ;;  %v305_v34 = vpop.f32.mrf.mxu1 }
  0xe8   :  { %351 = vst.msk [vmem:[#allocation2] sm:$0xff] %vm19_vm0, %v334_v31  ;;  %359 = vst.msk [vmem:[#allocation2 + $0x40] sm:$0xff] %vm19_vm0, %v342_v32 }
  0xe9   :  { %v274_v37 = vpop.f32.mrf.mxu0  ;;  %v306_v38 = vpop.f32.mrf.mxu1 }
  0xea   :  { %v335_v39 = vadd.f32 %v274_v37, %v37_v35  ;;  %v343_v40 = vadd.f32 %v306_v38, %v45_v36  ;;  %v42_v36 = vld [vmem:[#allocation2 + $0x30] sm:$0xff] }
  0xeb   :  { %v276_v41 = vpop.f32.mrf.mxu0  ;;  %v308_v42 = vpop.f32.mrf.mxu1 }
  0xec   :  { %352 = vst.msk [vmem:[#allocation2 + $0x8] sm:$0xff] %vm19_vm0, %v335_v39  ;;  %360 = vst.msk [vmem:[#allocation2 + $0x48] sm:$0xff] %vm19_vm0, %v343_v40  ;;  %v50_v41 = vld [vmem:[#allocation2 + $0x70] sm:$0xff] }
  0xed   :  { %v279_v46 = vpop.f32.mrf.mxu0  ;;  %v311_v47 = vpop.f32.mrf.mxu1 }
  0xee   :  { %v336_v48 = vadd.f32 %v279_v46, %v38_v43  ;;  %v344_v49 = vadd.f32 %v311_v47, %v46_v44 }
  0xef   :  { %v370_v51 = vld [vmem:[#allocation2] sm:$0xff]  ;;  %v281_v53 = vpop.f32.mrf.mxu0  ;;  %v313_v54 = vpop.f32.mrf.mxu1 }
  0xf0   :  { %v378_v52 = vld [vmem:[#allocation2 + $0x40] sm:$0xff]  ;;  %v922_v56 = vadd.f32 %v919_v45, %v370_v51  ;;  %353 = vst.msk [vmem:[#allocation2 + $0x10] sm:$0xff] %vm19_vm0, %v336_v48  ;;  %361 = vst.msk [vmem:[#allocation2 + $0x50] sm:$0xff] %vm19_vm0, %v344_v49  ;;  %v51_v53 = vld [vmem:[#allocation2 + $0x78] sm:$0xff] }
  0xf1   :  { %v925_v57 = vadd.f32 %v919_v45, %v378_v52  ;;  %v282_v58 = vpop.f32.mrf.mxu0  ;;  %v314_v59 = vpop.f32.mrf.mxu1  ;;  %v43_v52 = vld [vmem:[#allocation2 + $0x38] sm:$0xff] }
  0xf2   :  { %v409_v60 = vsub.f32 0.0, %v922_v56  ;;  %v337_v62 = vadd.f32 %v282_v58, %v39_v50  ;;  %v345_v63 = vadd.f32 %v314_v59, %v47_v55 }
  0xf3   :  { %v417_v61 = vsub.f32 0.0, %v925_v57  ;;  %v371_v0 = vld [vmem:[#allocation2 + $0x8] sm:$0xff]  ;;  %v284_v2 = vpop.f32.mrf.mxu0  ;;  %v316_v3 = vpop.f32.mrf.mxu1 }
  0xf4   :  { %v379_v1 = vld [vmem:[#allocation2 + $0x48] sm:$0xff]  ;;  %v425_v5 = vmul.f32 1.442695, %v409_v60  ;;  %v932_v7 = vadd.f32 %v919_v45, %v371_v0  ;;  %354 = vst.msk [vmem:[#allocation2 + $0x18] sm:$0xff] %vm19_vm0, %v337_v62  ;;  %362 = vst.msk [vmem:[#allocation2 + $0x58] sm:$0xff] %vm19_vm0, %v345_v63 }
  0xf5   :  { %v441_v6 = vmul.f32 1.442695, %v417_v61  ;;  %v935_v8 = vadd.f32 %v919_v45, %v379_v1  ;;  %v287_v10 = vpop.f32.mrf.mxu0  ;;  %v319_v11 = vpop.f32.mrf.mxu1 }
  0xf6   :  { %709 = vpow2.f32 %v425_v5  ;;  %v410_v12 = vsub.f32 0.0, %v932_v7  ;;  %v338_v14 = vadd.f32 %v287_v10, %v40_v4  ;;  %v346_v17 = vadd.f32 %v319_v11, %v48_v9 }
  0xf7   :  { %v418_v13 = vsub.f32 0.0, %v935_v8  ;;  %711 = vpow2.f32 %v441_v6  ;;  %v372_v15 = vld [vmem:[#allocation2 + $0x10] sm:$0xff]  ;;  %v289_v18 = vpop.f32.mrf.mxu0  ;;  %v321_v19 = vpop.f32.mrf.mxu1 }
  0xf8   :  { %v380_v16 = vld [vmem:[#allocation2 + $0x50] sm:$0xff]  ;;  %v427_v21 = vmul.f32 1.442695, %v410_v12  ;;  %v942_v23 = vadd.f32 %v919_v45, %v372_v15  ;;  %355 = vst.msk [vmem:[#allocation2 + $0x20] sm:$0xff] %vm19_vm0, %v338_v14  ;;  %363 = vst.msk [vmem:[#allocation2 + $0x60] sm:$0xff] %vm19_vm0, %v346_v17 }
  0xf9   :  { %v443_v22 = vmul.f32 1.442695, %v418_v13  ;;  %v945_v24 = vadd.f32 %v919_v45, %v380_v16  ;;  %v290_v26 = vpop.f32.mrf.mxu0  ;;  %v322_v27 = vpop.f32.mrf.mxu1 }
  0xfa   :  { %713 = vpow2.f32 %v427_v21  ;;  %v411_v28 = vsub.f32 0.0, %v942_v23  ;;  %v339_v30 = vadd.f32 %v290_v26, %v41_v20  ;;  %v347_v33 = vadd.f32 %v322_v27, %v49_v25 }
  0xfb   :  { %v419_v29 = vsub.f32 0.0, %v945_v24  ;;  %715 = vpow2.f32 %v443_v22  ;;  %v373_v31 = vld [vmem:[#allocation2 + $0x18] sm:$0xff]  ;;  %v292_v34 = vpop.f32.mrf.mxu0  ;;  %v324_v35 = vpop.f32.mrf.mxu1 }
  0xfc   :  { %v381_v32 = vld [vmem:[#allocation2 + $0x58] sm:$0xff]  ;;  %v429_v37 = vmul.f32 1.442695, %v411_v28  ;;  %v952_v39 = vadd.f32 %v919_v45, %v373_v31  ;;  %356 = vst.msk [vmem:[#allocation2 + $0x28] sm:$0xff] %vm19_vm0, %v339_v30  ;;  %364 = vst.msk [vmem:[#allocation2 + $0x68] sm:$0xff] %vm19_vm0, %v347_v33 }
  0xfd   :  { %v445_v38 = vmul.f32 1.442695, %v419_v29  ;;  %v955_v40 = vadd.f32 %v919_v45, %v381_v32  ;;  %v295_v42 = vpop.f32.mrf.mxu0  ;;  %v327_v43 = vpop.f32.mrf.mxu1 }
  0xfe   :  { %717 = vpow2.f32 %v429_v37  ;;  %v412_v44 = vsub.f32 0.0, %v952_v39  ;;  %v340_v47 = vadd.f32 %v295_v42, %v42_v36  ;;  %v348_v49 = vadd.f32 %v327_v43, %v50_v41 }
  0xff   :  { %v420_v46 = vsub.f32 0.0, %v955_v40  ;;  %719 = vpow2.f32 %v445_v38  ;;  %v374_v48 = vld [vmem:[#allocation2 + $0x20] sm:$0xff]  ;;  %v297_v50 = vpop.f32.mrf.mxu0  ;;  %v329_v51 = vpop.f32.mrf.mxu1 }
 0x100   :  { %v431_v54 = vmul.f32 1.442695, %v412_v44  ;;  %v962_v58 = vadd.f32 %v919_v45, %v374_v48  ;;  %v382_v59 = vld [vmem:[#allocation2 + $0x60] sm:$0xff]  ;;  %357 = vst.msk [vmem:[#allocation2 + $0x30] sm:$0xff] %vm19_vm0, %v340_v47  ;;  %365 = vst.msk [vmem:[#allocation2 + $0x70] sm:$0xff] %vm19_vm0, %v348_v49 }
 0x101   :  { %v447_v55 = vmul.f32 1.442695, %v420_v46  ;;  %v966_v60 = vadd.f32 %v919_v45, %v382_v59  ;;  %v298_v61 = vpop.f32.mrf.mxu0  ;;  %v330_v62 = vpop.f32.mrf.mxu1 }
 0x102   :  { %721 = vpow2.f32 %v431_v54  ;;  %v413_v63 = vsub.f32 0.0, %v962_v58  ;;  %v341_v0 = vadd.f32 %v298_v61, %v43_v52  ;;  %v349_v1 = vadd.f32 %v330_v62, %v51_v53 }
 0x103   :  { %v710_v2 = vpop.eup %709  ;;  %723 = vpow2.f32 %v447_v55  ;;  %v421_v3 = vsub.f32 0.0, %v966_v60  ;;  %v375_v4 = vld [vmem:[#allocation2 + $0x28] sm:$0xff]  ;;  %v300_v5 = vpop.f32.mrf.mxu0 }
 0x104   :  { %v332_v6 = vpop.f32.mrf.mxu1  ;;  %v712_v9 = vpop.eup %711  ;;  %v457_v10 = vadd.f32 1.0, %v710_v2  ;;  %v433_v11 = vmul.f32 1.442695, %v413_v63  ;;  %v972_v12 = vadd.f32 %v919_v45, %v375_v4  ;;  %v383_v13 = vld [vmem:[#allocation2 + $0x68] sm:$0xff]  ;;  %358 = vst.msk [vmem:[#allocation2 + $0x38] sm:$0xff] %vm19_vm0, %v341_v0  ;;  %366 = vst.msk [vmem:[#allocation2 + $0x78] sm:$0xff] %vm19_vm0, %v349_v1 }
 0x105   :  { %v465_v14 = vadd.f32 1.0, %v712_v9  ;;  %v449_v15 = vmul.f32 1.442695, %v421_v3  ;;  %v977_v16 = vadd.f32 %v919_v45, %v383_v13 }
 0x106   :  { %725 = vrcp.f32 %v457_v10  ;;  %v414_v17 = vsub.f32 0.0, %v972_v12 }
 0x107   :  { %v714_v18 = vpop.eup %713  ;;  %727 = vrcp.f32 %v465_v14  ;;  %v422_v19 = vsub.f32 0.0, %v977_v16  ;;  %v376_v20 = vld [vmem:[#allocation2 + $0x30] sm:$0xff] }
 0x108   :  { %v716_v21 = vpop.eup %715  ;;  %v458_v22 = vadd.f32 1.0, %v714_v18  ;;  %729 = vpow2.f32 %v433_v11  ;;  %v435_v25 = vmul.f32 1.442695, %v414_v17  ;;  %v982_v26 = vadd.f32 %v919_v45, %v376_v20  ;;  %v384_v27 = vld [vmem:[#allocation2 + $0x70] sm:$0xff] }
 0x109   :  { %v466_v28 = vadd.f32 1.0, %v716_v21  ;;  %731 = vpow2.f32 %v449_v15  ;;  %v451_v29 = vmul.f32 1.442695, %v422_v19  ;;  %v985_v30 = vadd.f32 %v919_v45, %v384_v27 }
 0x10a   :  { %733 = vrcp.f32 %v458_v22  ;;  %v415_v31 = vsub.f32 0.0, %v982_v26 }
 0x10b   :  { %v718_v32 = vpop.eup %717  ;;  %735 = vrcp.f32 %v466_v28  ;;  %v423_v33 = vsub.f32 0.0, %v985_v30  ;;  %v377_v34 = vld [vmem:[#allocation2 + $0x38] sm:$0xff] }
 0x10c   :  { %v385_v35 = vld [vmem:[#allocation2 + $0x78] sm:$0xff]  ;;  %v720_v36 = vpop.eup %719  ;;  %v459_v37 = vadd.f32 1.0, %v718_v32  ;;  %737 = vpow2.f32 %v435_v25  ;;  %v437_v38 = vmul.f32 1.442695, %v415_v31  ;;  %v990_v41 = vadd.f32 %v919_v45, %v377_v34 }
 0x10d   :  { %v467_v42 = vadd.f32 1.0, %v720_v36  ;;  %739 = vpow2.f32 %v451_v29  ;;  %v453_v43 = vmul.f32 1.442695, %v423_v33  ;;  %v993_v44 = vadd.f32 %v919_v45, %v385_v35 }
 0x10e   :  { %741 = vrcp.f32 %v459_v37  ;;  %v416_v46 = vsub.f32 0.0, %v990_v41 }
 0x10f   :  { %v722_v47 = vpop.eup %721  ;;  %743 = vrcp.f32 %v467_v42  ;;  %v424_v48 = vsub.f32 0.0, %v993_v44 }
 0x110   :  { %v724_v49 = vpop.eup %723  ;;  %v460_v50 = vadd.f32 1.0, %v722_v47  ;;  %745 = vpow2.f32 %v437_v38  ;;  %v439_v51 = vmul.f32 1.442695, %v416_v46 }
 0x111   :  { %v468_v52 = vadd.f32 1.0, %v724_v49  ;;  %747 = vpow2.f32 %v453_v43  ;;  %v455_v53 = vmul.f32 1.442695, %v424_v48 }
 0x112   :  { %749 = vrcp.f32 %v460_v50 }
 0x113   :  { %v726_v54 = vpop.eup %725  ;;  %751 = vrcp.f32 %v468_v52 }
 0x114   :  { %v728_v55 = vpop.eup %727  ;;  %v489_v45 = vmul.f32 %v726_v54, %v922_v56  ;;  %753 = vpow2.f32 %v439_v51 }
 0x115   :  { %v730_v59 = vpop.eup %729  ;;  %v497_v61 = vmul.f32 %v728_v55, %v925_v57  ;;  %755 = vpow2.f32 %v455_v53 }
 0x116   :  { %v732_v62 = vpop.eup %731  ;;  %v640_v63 = vpack.c.bf16 %v489_v45, %v489_v45  ;;  %v461_v0 = vadd.f32 1.0, %v730_v59 }
 0x117   :  { %v734_v1 = vpop.eup %733  ;;  %v648_v2 = vpack.c.bf16 %v497_v61, %v497_v61  ;;  %v469_v3 = vadd.f32 1.0, %v732_v62 }
 0x118   :  { %v736_v4 = vpop.eup %735  ;;  %570 = vst.msk [vmem:[%s1080_s3] sm:$0xf] %vm569_vm2, %v640_v63  ;;  %v490_v56 = vmul.f32 %v734_v1, %v932_v7  ;;  %757 = vrcp.f32 %v461_v0 }
 0x119   :  { %v738_v5 = vpop.eup %737  ;;  %578 = vst.msk [vmem:[%s1080_s3 + $0x20] sm:$0xf] %vm569_vm2, %v648_v2  ;;  %v498_v57 = vmul.f32 %v736_v4, %v935_v8  ;;  %759 = vrcp.f32 %v469_v3 }
 0x11a   :  { %v740_v6 = vpop.eup %739  ;;  %v641_v9 = vpack.c.bf16 %v490_v56, %v490_v56  ;;  %v462_v10 = vadd.f32 1.0, %v738_v5 }
 0x11b   :  { %v742_v11 = vpop.eup %741  ;;  %v649_v13 = vpack.c.bf16 %v498_v57, %v498_v57  ;;  %v470_v14 = vadd.f32 1.0, %v740_v6 }
 0x11c   :  { %v744_v15 = vpop.eup %743  ;;  %571 = vst.msk [vmem:[%s1080_s3 + $0x4] sm:$0xf] %vm569_vm2, %v641_v9  ;;  %v491_v7 = vmul.f32 %v742_v11, %v942_v23  ;;  %761 = vrcp.f32 %v462_v10 }
 0x11d   :  { %v746_v17 = vpop.eup %745  ;;  %579 = vst.msk [vmem:[%s1080_s3 + $0x24] sm:$0xf] %vm569_vm2, %v649_v13  ;;  %v499_v8 = vmul.f32 %v744_v15, %v945_v24  ;;  %763 = vrcp.f32 %v470_v14 }
 0x11e   :  { %v748_v18 = vpop.eup %747  ;;  %v642_v19 = vpack.c.bf16 %v491_v7, %v491_v7  ;;  %v463_v20 = vadd.f32 1.0, %v746_v17 }
 0x11f   :  { %v750_v21 = vpop.eup %749  ;;  %v650_v22 = vpack.c.bf16 %v499_v8, %v499_v8  ;;  %v471_v25 = vadd.f32 1.0, %v748_v18 }
 0x120   :  { %v752_v27 = vpop.eup %751  ;;  %572 = vst.msk [vmem:[%s1080_s3 + $0x8] sm:$0xf] %vm569_vm2, %v642_v19  ;;  %v492_v23 = vmul.f32 %v750_v21, %v952_v39  ;;  %765 = vrcp.f32 %v463_v20 }
 0x121   :  { %v754_v28 = vpop.eup %753  ;;  %580 = vst.msk [vmem:[%s1080_s3 + $0x28] sm:$0xf] %vm569_vm2, %v650_v22  ;;  %v500_v24 = vmul.f32 %v752_v27, %v955_v40  ;;  %767 = vrcp.f32 %v471_v25 }
 0x122   :  { %v756_v29 = vpop.eup %755  ;;  %v643_v31 = vpack.c.bf16 %v492_v23, %v492_v23  ;;  %v464_v32 = vadd.f32 1.0, %v754_v28 }
 0x123   :  { %v651_v33 = vpack.c.bf16 %v500_v24, %v500_v24  ;;  %v472_v34 = vadd.f32 1.0, %v756_v29 }
 0x124   :  { %573 = vst.msk [vmem:[%s1080_s3 + $0xc] sm:$0xf] %vm569_vm2, %v643_v31  ;;  %769 = vrcp.f32 %v464_v32 }
 0x125   :  { %v758_v39 = vpop.eup %757  ;;  %581 = vst.msk [vmem:[%s1080_s3 + $0x2c] sm:$0xf] %vm569_vm2, %v651_v33  ;;  %771 = vrcp.f32 %v472_v34 }
 0x126   :  { %v760_v40 = vpop.eup %759  ;;  %v493_v35 = vmul.f32 %v758_v39, %v962_v58 }
 0x127   :  { %v501_v36 = vmul.f32 %v760_v40, %v966_v60 }
 0x128   :  { %v644_v37 = vpack.c.bf16 %v493_v35, %v493_v35 }
 0x129   :  { %v762_v38 = vpop.eup %761  ;;  %v652_v42 = vpack.c.bf16 %v501_v36, %v501_v36 }
 0x12a   :  { %v764_v43 = vpop.eup %763  ;;  %574 = vst.msk [vmem:[%s1080_s3 + $0x10] sm:$0xf] %vm569_vm2, %v644_v37  ;;  %v494_v46 = vmul.f32 %v762_v38, %v972_v12 }
 0x12b   :  { %582 = vst.msk [vmem:[%s1080_s3 + $0x30] sm:$0xf] %vm569_vm2, %v652_v42  ;;  %v502_v58 = vmul.f32 %v764_v43, %v977_v16 }
 0x12c   :  { %v645_v47 = vpack.c.bf16 %v494_v46, %v494_v46 }
 0x12d   :  { %v766_v60 = vpop.eup %765  ;;  %v653_v48 = vpack.c.bf16 %v502_v58, %v502_v58 }
 0x12e   :  { %v768_v49 = vpop.eup %767  ;;  %575 = vst.msk [vmem:[%s1080_s3 + $0x14] sm:$0xf] %vm569_vm2, %v645_v47  ;;  %v495_v50 = vmul.f32 %v766_v60, %v982_v26 }
 0x12f   :  { %583 = vst.msk [vmem:[%s1080_s3 + $0x34] sm:$0xf] %vm569_vm2, %v653_v48  ;;  %v503_v12 = vmul.f32 %v768_v49, %v985_v30 }
 0x130   :  { %v646_v51 = vpack.c.bf16 %v495_v50, %v495_v50 }
 0x131   :  { %v770_v16 = vpop.eup %769  ;;  %v654_v52 = vpack.c.bf16 %v503_v12, %v503_v12 }
 0x132   :  { %v772_v53 = vpop.eup %771  ;;  %576 = vst.msk [vmem:[%s1080_s3 + $0x18] sm:$0xf] %vm569_vm2, %v646_v51  ;;  %v496_v54 = vmul.f32 %v770_v16, %v990_v41 }
 0x133   :  { %584 = vst.msk [vmem:[%s1080_s3 + $0x38] sm:$0xf] %vm569_vm2, %v654_v52  ;;  %v504_v26 = vmul.f32 %v772_v53, %v993_v44 }
 0x134   :  { %v647_v55 = vpack.c.bf16 %v496_v54, %v496_v54 }
 0x135   :  { %v655_v30 = vpack.c.bf16 %v504_v26, %v504_v26 }
 0x136   :  { %577 = vst.msk [vmem:[%s1080_s3 + $0x1c] sm:$0xf] %vm569_vm2, %v647_v55 }
 0x137   :  { %585 = vst.msk [vmem:[%s1080_s3 + $0x3c] sm:$0xf] %vm569_vm2, %v655_v30 }

// kernel: elandarknet_fwd.28
= control target key start
LH: loop header
LB: loop body
LE: loop exit
PB: predicated region body
PF: predicated region fallthrough
CT: control target
= control target key end

     0   :  { %vm19_vm0 = vcmask 261120   ;;  %v661_v1 = vmov 0.0   ;;  %vm480_vm1 = vcmask 257024   ;;  %s901_s1 = inlined_call_operand.vmem [shape: bf16[32,32], index: 1, kind: input, shape index: {}]   ;;  %s902_s0 = inlined_call_operand.vmem [shape: bf16[128,32], index: 0, kind: input, shape index: {}]   ;;  %s903_s2 = inlined_call_operand.vmem [shape: f32[1,32], index: 2, kind: input, shape index: {}]   ;;  %s904_s3 = inlined_call_operand.vmem [shape: bf16[128,32], index: 3, kind: output, shape index: {}]  }
   0x1   :  { %v587_v0 = vld [vmem:[%s901_s1 + $0x8] sm:$0xff]   ;;  %22 = vst.msk [vmem:[#allocation2 + $0x10] sm:$0xff] %vm19_vm0, %v661_v1  ;;  %20 = vst.msk [vmem:[#allocation2] sm:$0xff] %vm19_vm0, %v661_v1  ;;  %v588_v2 = vld [vmem:[%s901_s1] sm:$0xff]  }
   0x2   :  { %21 = vst.msk [vmem:[#allocation2 + $0x8] sm:$0xff] %vm19_vm0, %v661_v1  ;;  %23 = vst.msk [vmem:[#allocation2 + $0x18] sm:$0xff] %vm19_vm0, %v661_v1  ;;  %562 = vmatprep.subr.bf16.mxu0 %v587_v0  ;;  %582 = vmatprep.subr.bf16.mxu1 %v587_v0  ;;  %v589_v3 = vld [vmem:[%s902_s0] sm:$0xff]   ;;  %v591_v5 = vld [vmem:[%s902_s0 + $0x8] sm:$0xff]  }
   0x3   :  { %24 = vst.msk [vmem:[#allocation2 + $0x20] sm:$0xff] %vm19_vm0, %v661_v1  ;;  %25 = vst.msk [vmem:[#allocation2 + $0x28] sm:$0xff] %vm19_vm0, %v661_v1  ;;  %563 = vmatpush3.bf16.msra.mxu0 %v587_v0  ;;  %584 = vmatpush3.bf16.msra.mxu1 %v587_v0  ;;  %v590_v4 = vld [vmem:[%s902_s0 + $0x20] sm:$0xff]   ;;  %v592_v6 = vld [vmem:[%s902_s0 + $0x28] sm:$0xff]  }
   0x4   :  { %26 = vst.msk [vmem:[#allocation2 + $0x30] sm:$0xff] %vm19_vm0, %v661_v1  ;;  %27 = vst.msk [vmem:[#allocation2 + $0x38] sm:$0xff] %vm19_vm0, %v661_v1  ;;  %564 = vmatprep.subr.bf16.mxu0 %v588_v2  ;;  %583 = vmatprep.subr.bf16.mxu1 %v588_v2  ;;  %v593_v7 = vld [vmem:[%s902_s0 + $0x10] sm:$0xff]   ;;  %v595_v9 = vld [vmem:[%s902_s0 + $0x18] sm:$0xff]  }
   0x5   :  { %28 = vst.msk [vmem:[#allocation2 + $0x40] sm:$0xff] %vm19_vm0, %v661_v1  ;;  %29 = vst.msk [vmem:[#allocation2 + $0x48] sm:$0xff] %vm19_vm0, %v661_v1  ;;  %566 = vmatprep.mubr.msk.bf16.mxu0 %vm19_vm0, %v589_v3  ;;  %574 = vmatprep.mubr.msk.bf16.mxu1 %vm19_vm0, %v590_v4  ;;  %v594_v8 = vld [vmem:[%s902_s0 + $0x30] sm:$0xff]   ;;  %v596_v10 = vld [vmem:[%s902_s0 + $0x38] sm:$0xff]  }
   0x6   :  { %30 = vst.msk [vmem:[#allocation2 + $0x50] sm:$0xff] %vm19_vm0, %v661_v1  ;;  %31 = vst.msk [vmem:[#allocation2 + $0x58] sm:$0xff] %vm19_vm0, %v661_v1  ;;  %v745_v37 = vld [vmem:[%s903_s2] ss:$0 sm:$0xff] }
   0x7   :  { %32 = vst.msk [vmem:[#allocation2 + $0x60] sm:$0xff] %vm19_vm0, %v661_v1  ;;  %33 = vst.msk [vmem:[#allocation2 + $0x68] sm:$0xff] %vm19_vm0, %v661_v1  ;;  %565 = vmatpush3.bf16.msra.mxu0 %v588_v2  ;;  %585 = vmatpush3.bf16.msra.mxu1 %v588_v2 }
   0x8   :  { %34 = vst.msk [vmem:[#allocation2 + $0x70] sm:$0xff] %vm19_vm0, %v661_v1  ;;  %35 = vst.msk [vmem:[#allocation2 + $0x78] sm:$0xff] %vm19_vm0, %v661_v1  ;;  %v38_v11 = vld [vmem:[#allocation2 + $0x10] sm:$0xff]  ;;  %v36_v15 = vld [vmem:[#allocation2] sm:$0xff] }
   0x9   :  { %v39_v21 = vld [vmem:[#allocation2 + $0x18] sm:$0xff]  ;;  %v37_v27 = vld [vmem:[#allocation2 + $0x8] sm:$0xff] }
   0xa   :  { %567 = vmatmul.mubr.msk.bf16.vlgmr.msra.gmra.mxu0 %vm19_vm0, %v591_v5  ;;  %575 = vmatmul.mubr.msk.bf16.vlgmr.msra.gmra.mxu1 %vm19_vm0, %v592_v6  ;;  %v40_v40 = vld [vmem:[#allocation2 + $0x20] sm:$0xff]  ;;  %v41_v62 = vld [vmem:[#allocation2 + $0x28] sm:$0xff] }
   0xb   :  { %570 = vmatprep.mubr.msk.bf16.mxu0 %vm19_vm0, %v593_v7  ;;  %578 = vmatprep.mubr.msk.bf16.mxu1 %vm19_vm0, %v594_v8  ;;  %v42_v33 = vld [vmem:[#allocation2 + $0x30] sm:$0xff]  ;;  %v43_v52 = vld [vmem:[#allocation2 + $0x38] sm:$0xff] }
   0xc   :  { %v44_v16 = vld [vmem:[#allocation2 + $0x40] sm:$0xff]  ;;  %v45_v28 = vld [vmem:[#allocation2 + $0x48] sm:$0xff] }
   0xd   :  { %v46_v12 = vld [vmem:[#allocation2 + $0x50] sm:$0xff]  ;;  %v47_v22 = vld [vmem:[#allocation2 + $0x58] sm:$0xff] }
   0xe   :  { %v48_v41 = vld [vmem:[#allocation2 + $0x60] sm:$0xff]  ;;  %v49_v63 = vld [vmem:[#allocation2 + $0x68] sm:$0xff] }
   0xf   :  { %v50_v34 = vld [vmem:[#allocation2 + $0x70] sm:$0xff]  ;;  %v51_v53 = vld [vmem:[#allocation2 + $0x78] sm:$0xff] }
  0x12   :  { %571 = vmatmul.mubr.msk.bf16.gmra.mxu0 %vm19_vm0, %v595_v9  ;;  %579 = vmatmul.mubr.msk.bf16.gmra.mxu1 %vm19_vm0, %v596_v10 }
  0xca   :  { %v568_v13 = vpop.f32.mrf.mxu0  ;;  %v576_v14 = vpop.f32.mrf.mxu1 }
  0xcb   :  { %v248_v17 = vadd.f32 %v568_v13, %v38_v11  ;;  %v256_v18 = vadd.f32 %v576_v14, %v46_v12 }
  0xcc   :  { %v183_v19 = vpop.f32.mrf.mxu0  ;;  %v215_v20 = vpop.f32.mrf.mxu1 }
  0xcd   :  { %264 = vst.msk [vmem:[#allocation2 + $0x10] sm:$0xff] %vm19_vm0, %v248_v17  ;;  %272 = vst.msk [vmem:[#allocation2 + $0x50] sm:$0xff] %vm19_vm0, %v256_v18  ;;  %v246_v23 = vadd.f32 %v183_v19, %v36_v15  ;;  %v254_v24 = vadd.f32 %v215_v20, %v44_v16 }
  0xce   :  { %v569_v25 = vpop.f32.mrf.mxu0  ;;  %v577_v26 = vpop.f32.mrf.mxu1 }
  0xcf   :  { %262 = vst.msk [vmem:[#allocation2] sm:$0xff] %vm19_vm0, %v246_v23  ;;  %270 = vst.msk [vmem:[#allocation2 + $0x40] sm:$0xff] %vm19_vm0, %v254_v24  ;;  %v249_v29 = vadd.f32 %v569_v25, %v39_v21  ;;  %v257_v30 = vadd.f32 %v577_v26, %v47_v22 }
  0xd0   :  { %v186_v31 = vpop.f32.mrf.mxu0  ;;  %v218_v32 = vpop.f32.mrf.mxu1 }
  0xd1   :  { %265 = vst.msk [vmem:[#allocation2 + $0x18] sm:$0xff] %vm19_vm0, %v249_v29  ;;  %273 = vst.msk [vmem:[#allocation2 + $0x58] sm:$0xff] %vm19_vm0, %v257_v30  ;;  %v247_v35 = vadd.f32 %v186_v31, %v37_v27  ;;  %v255_v36 = vadd.f32 %v218_v32, %v45_v28 }
  0xd2   :  { %v572_v38 = vpop.f32.mrf.mxu0  ;;  %v580_v39 = vpop.f32.mrf.mxu1 }
  0xd3   :  { %263 = vst.msk [vmem:[#allocation2 + $0x8] sm:$0xff] %vm19_vm0, %v247_v35  ;;  %271 = vst.msk [vmem:[#allocation2 + $0x48] sm:$0xff] %vm19_vm0, %v255_v36  ;;  %v252_v42 = vadd.f32 %v572_v38, %v42_v33  ;;  %v260_v43 = vadd.f32 %v580_v39, %v50_v34 }
  0xd4   :  { %v283_v44 = vld [vmem:[#allocation2 + $0x10] sm:$0xff]  ;;  %v199_v46 = vpop.f32.mrf.mxu0  ;;  %v231_v47 = vpop.f32.mrf.mxu1 }
  0xd5   :  { %v291_v45 = vld [vmem:[#allocation2 + $0x50] sm:$0xff]  ;;  %v750_v48 = vadd.f32 %v745_v37, %v283_v44  ;;  %268 = vst.msk [vmem:[#allocation2 + $0x30] sm:$0xff] %vm19_vm0, %v252_v42  ;;  %276 = vst.msk [vmem:[#allocation2 + $0x70] sm:$0xff] %vm19_vm0, %v260_v43  ;;  %v250_v50 = vadd.f32 %v199_v46, %v40_v40  ;;  %v258_v51 = vadd.f32 %v231_v47, %v48_v41 }
  0xd6   :  { %v753_v49 = vadd.f32 %v745_v37, %v291_v45  ;;  %v281_v54 = vld [vmem:[#allocation2] sm:$0xff]  ;;  %v573_v56 = vpop.f32.mrf.mxu0  ;;  %v581_v57 = vpop.f32.mrf.mxu1 }
  0xd7   :  { %v289_v55 = vld [vmem:[#allocation2 + $0x40] sm:$0xff]  ;;  %v322_v58 = vsub.f32 0.0, %v750_v48  ;;  %v760_v60 = vadd.f32 %v745_v37, %v281_v54  ;;  %266 = vst.msk [vmem:[#allocation2 + $0x20] sm:$0xff] %vm19_vm0, %v250_v50  ;;  %274 = vst.msk [vmem:[#allocation2 + $0x60] sm:$0xff] %vm19_vm0, %v258_v51  ;;  %v253_v2 = vadd.f32 %v573_v56, %v43_v52  ;;  %v261_v3 = vadd.f32 %v581_v57, %v51_v53 }
  0xd8   :  { %v330_v59 = vsub.f32 0.0, %v753_v49  ;;  %v763_v61 = vadd.f32 %v745_v37, %v289_v55  ;;  %v284_v0 = vld [vmem:[#allocation2 + $0x18] sm:$0xff]  ;;  %v202_v4 = vpop.f32.mrf.mxu0  ;;  %v234_v5 = vpop.f32.mrf.mxu1 }
  0xd9   :  { %v292_v1 = vld [vmem:[#allocation2 + $0x58] sm:$0xff]  ;;  %v340_v6 = vmul.f32 1.442695, %v322_v58  ;;  %v320_v8 = vsub.f32 0.0, %v760_v60  ;;  %v770_v10 = vadd.f32 %v745_v37, %v284_v0  ;;  %269 = vst.msk [vmem:[#allocation2 + $0x38] sm:$0xff] %vm19_vm0, %v253_v2  ;;  %277 = vst.msk [vmem:[#allocation2 + $0x78] sm:$0xff] %vm19_vm0, %v261_v3  ;;  %v251_v14 = vadd.f32 %v202_v4, %v41_v62 }
  0xda   :  { %v356_v7 = vmul.f32 1.442695, %v330_v59  ;;  %v328_v9 = vsub.f32 0.0, %v763_v61  ;;  %v773_v11 = vadd.f32 %v745_v37, %v292_v1  ;;  %v282_v12 = vld [vmem:[#allocation2 + $0x8] sm:$0xff]  ;;  %v259_v15 = vadd.f32 %v234_v5, %v49_v63 }
  0xdb   :  { %v290_v13 = vld [vmem:[#allocation2 + $0x48] sm:$0xff]  ;;  %597 = vpow2.f32 %v340_v6  ;;  %v336_v16 = vmul.f32 1.442695, %v320_v8  ;;  %v778_v18 = vadd.f32 %v745_v37, %v282_v12  ;;  %v323_v19 = vsub.f32 0.0, %v770_v10  ;;  %267 = vst.msk [vmem:[#allocation2 + $0x28] sm:$0xff] %vm19_vm0, %v251_v14 }
  0xdc   :  { %v352_v17 = vmul.f32 1.442695, %v328_v9  ;;  %599 = vpow2.f32 %v356_v7  ;;  %v331_v20 = vsub.f32 0.0, %v773_v11  ;;  %v783_v21 = vadd.f32 %v745_v37, %v290_v13  ;;  %v287_v22 = vld [vmem:[#allocation2 + $0x30] sm:$0xff]  ;;  %275 = vst.msk [vmem:[#allocation2 + $0x68] sm:$0xff] %vm19_vm0, %v259_v15 }
  0xdd   :  { %v295_v23 = vld [vmem:[#allocation2 + $0x70] sm:$0xff]  ;;  %601 = vpow2.f32 %v336_v16  ;;  %v321_v24 = vsub.f32 0.0, %v778_v18  ;;  %v789_v25 = vadd.f32 %v745_v37, %v287_v22  ;;  %v342_v27 = vmul.f32 1.442695, %v323_v19 }
  0xde   :  { %v792_v26 = vadd.f32 %v745_v37, %v295_v23  ;;  %603 = vpow2.f32 %v352_v17  ;;  %v358_v28 = vmul.f32 1.442695, %v331_v20  ;;  %v329_v29 = vsub.f32 0.0, %v783_v21  ;;  %v285_v30 = vld [vmem:[#allocation2 + $0x20] sm:$0xff] }
  0xdf   :  { %v338_v31 = vmul.f32 1.442695, %v321_v24  ;;  %v326_v32 = vsub.f32 0.0, %v789_v25  ;;  %v798_v34 = vadd.f32 %v745_v37, %v285_v30  ;;  %v293_v35 = vld [vmem:[#allocation2 + $0x60] sm:$0xff]  ;;  %605 = vpow2.f32 %v342_v27 }
  0xe0   :  { %v334_v33 = vsub.f32 0.0, %v792_v26  ;;  %v354_v36 = vmul.f32 1.442695, %v329_v29  ;;  %v801_v38 = vadd.f32 %v745_v37, %v293_v35  ;;  %607 = vpow2.f32 %v358_v28  ;;  %v288_v42 = vld [vmem:[#allocation2 + $0x38] sm:$0xff] }
  0xe1   :  { %v348_v39 = vmul.f32 1.442695, %v326_v32  ;;  %v324_v41 = vsub.f32 0.0, %v798_v34  ;;  %609 = vpow2.f32 %v338_v31  ;;  %v806_v44 = vadd.f32 %v745_v37, %v288_v42  ;;  %v296_v45 = vld [vmem:[#allocation2 + $0x78] sm:$0xff] }
  0xe2   :  { %v364_v40 = vmul.f32 1.442695, %v334_v33  ;;  %v332_v43 = vsub.f32 0.0, %v801_v38  ;;  %611 = vpow2.f32 %v354_v36  ;;  %v809_v47 = vadd.f32 %v745_v37, %v296_v45  ;;  %v286_v50 = vld [vmem:[#allocation2 + $0x28] sm:$0xff] }
  0xe3   :  { %v344_v46 = vmul.f32 1.442695, %v324_v41  ;;  %v294_v51 = vld [vmem:[#allocation2 + $0x68] sm:$0xff]  ;;  %613 = vpow2.f32 %v348_v39  ;;  %v327_v53 = vsub.f32 0.0, %v806_v44  ;;  %v813_v54 = vadd.f32 %v745_v37, %v286_v50 }
  0xe4   :  { %v360_v52 = vmul.f32 1.442695, %v332_v43  ;;  %615 = vpow2.f32 %v364_v40  ;;  %v335_v55 = vsub.f32 0.0, %v809_v47  ;;  %v817_v56 = vadd.f32 %v745_v37, %v294_v51 }
  0xe5   :  { %617 = vpow2.f32 %v344_v46  ;;  %v350_v57 = vmul.f32 1.442695, %v327_v53  ;;  %v325_v58 = vsub.f32 0.0, %v813_v54 }
  0xe6   :  { %619 = vpow2.f32 %v360_v52  ;;  %v366_v59 = vmul.f32 1.442695, %v335_v55  ;;  %v333_v62 = vsub.f32 0.0, %v817_v56 }
  0xe7   :  { %621 = vpow2.f32 %v350_v57  ;;  %v346_v0 = vmul.f32 1.442695, %v325_v58 }
  0xe8   :  { %v598_v63 = vpop.eup %597  ;;  %623 = vpow2.f32 %v366_v59  ;;  %v362_v6 = vmul.f32 1.442695, %v333_v62 }
  0xe9   :  { %v600_v1 = vpop.eup %599  ;;  %v370_v2 = vadd.f32 1.0, %v598_v63  ;;  %625 = vpow2.f32 %v346_v0 }
  0xea   :  { %v602_v3 = vpop.eup %601  ;;  %v378_v4 = vadd.f32 1.0, %v600_v1 }
  0xeb   :  { %v604_v5 = vpop.eup %603  ;;  %627 = vrcp.f32 %v370_v2  ;;  %v368_v37 = vadd.f32 1.0, %v602_v3 }
  0xec   :  { %629 = vrcp.f32 %v378_v4  ;;  %v376_v7 = vadd.f32 1.0, %v604_v5  ;;  %v606_v8 = vpop.eup %605 }
  0xed   :  { %631 = vrcp.f32 %v368_v37  ;;  %v608_v9 = vpop.eup %607  ;;  %v371_v12 = vadd.f32 1.0, %v606_v8 }
  0xee   :  { %633 = vrcp.f32 %v376_v7  ;;  %v610_v13 = vpop.eup %609  ;;  %v379_v14 = vadd.f32 1.0, %v608_v9 }
  0xef   :  { %635 = vpow2.f32 %v362_v6  ;;  %v612_v15 = vpop.eup %611  ;;  %v369_v16 = vadd.f32 1.0, %v610_v13 }
  0xf0   :  { %637 = vrcp.f32 %v371_v12  ;;  %v614_v17 = vpop.eup %613  ;;  %v377_v19 = vadd.f32 1.0, %v612_v15 }
  0xf1   :  { %639 = vrcp.f32 %v379_v14  ;;  %v616_v20 = vpop.eup %615  ;;  %v374_v22 = vadd.f32 1.0, %v614_v17 }
  0xf2   :  { %641 = vrcp.f32 %v369_v16  ;;  %v618_v23 = vpop.eup %617  ;;  %v382_v24 = vadd.f32 1.0, %v616_v20 }
  0xf3   :  { %643 = vrcp.f32 %v377_v19  ;;  %v620_v27 = vpop.eup %619  ;;  %v372_v28 = vadd.f32 1.0, %v618_v23 }
  0xf4   :  { %645 = vrcp.f32 %v374_v22  ;;  %v622_v29 = vpop.eup %621  ;;  %v380_v30 = vadd.f32 1.0, %v620_v27 }
  0xf5   :  { %647 = vrcp.f32 %v382_v24  ;;  %v624_v31 = vpop.eup %623  ;;  %v375_v32 = vadd.f32 1.0, %v622_v29 }
  0xf6   :  { %649 = vrcp.f32 %v372_v28  ;;  %v626_v33 = vpop.eup %625  ;;  %v383_v35 = vadd.f32 1.0, %v624_v31 }
  0xf7   :  { %651 = vrcp.f32 %v380_v30  ;;  %v373_v39 = vadd.f32 1.0, %v626_v33 }
  0xf8   :  { %v628_v36 = vpop.eup %627  ;;  %653 = vrcp.f32 %v375_v32 }
  0xf9   :  { %v630_v40 = vpop.eup %629  ;;  %v402_v41 = vmul.f32 %v628_v36, %v750_v48  ;;  %655 = vrcp.f32 %v383_v35 }
  0xfa   :  { %v632_v42 = vpop.eup %631  ;;  %v410_v43 = vmul.f32 %v630_v40, %v753_v49  ;;  %657 = vrcp.f32 %v373_v39 }
  0xfb   :  { %v634_v45 = vpop.eup %633  ;;  %v538_v46 = vpack.c.bf16 %v402_v41, %v402_v41  ;;  %v400_v50 = vmul.f32 %v632_v42, %v760_v60 }
  0xfc   :  { %v636_v51 = vpop.eup %635  ;;  %v546_v52 = vpack.c.bf16 %v410_v43, %v410_v43  ;;  %v408_v53 = vmul.f32 %v634_v45, %v763_v61 }
  0xfd   :  { %v638_v55 = vpop.eup %637  ;;  %483 = vst.msk [vmem:[%s904_s3 + $0x8] sm:$0xf] %vm480_vm1, %v538_v46  ;;  %v536_v48 = vpack.c.bf16 %v400_v50, %v400_v50  ;;  %v381_v57 = vadd.f32 1.0, %v636_v51 }
  0xfe   :  { %v640_v58 = vpop.eup %639  ;;  %491 = vst.msk [vmem:[%s904_s3 + $0x28] sm:$0xf] %vm480_vm1, %v546_v52  ;;  %v544_v49 = vpack.c.bf16 %v408_v53, %v408_v53  ;;  %v403_v60 = vmul.f32 %v638_v55, %v770_v10 }
  0xff   :  { %v642_v59 = vpop.eup %641  ;;  %481 = vst.msk [vmem:[%s904_s3] sm:$0xf] %vm480_vm1, %v536_v48  ;;  %v411_v61 = vmul.f32 %v640_v58, %v773_v11  ;;  %659 = vrcp.f32 %v381_v57 }
 0x100   :  { %v644_v62 = vpop.eup %643  ;;  %489 = vst.msk [vmem:[%s904_s3 + $0x20] sm:$0xf] %vm480_vm1, %v544_v49  ;;  %v539_v63 = vpack.c.bf16 %v403_v60, %v403_v60  ;;  %v401_v0 = vmul.f32 %v642_v59, %v778_v18 }
 0x101   :  { %v646_v1 = vpop.eup %645  ;;  %v547_v10 = vpack.c.bf16 %v411_v61, %v411_v61  ;;  %v409_v2 = vmul.f32 %v644_v62, %v783_v21 }
 0x102   :  { %v648_v3 = vpop.eup %647  ;;  %484 = vst.msk [vmem:[%s904_s3 + $0xc] sm:$0xf] %vm480_vm1, %v539_v63  ;;  %v537_v11 = vpack.c.bf16 %v401_v0, %v401_v0  ;;  %v406_v4 = vmul.f32 %v646_v1, %v789_v25 }
 0x103   :  { %v650_v5 = vpop.eup %649  ;;  %492 = vst.msk [vmem:[%s904_s3 + $0x2c] sm:$0xf] %vm480_vm1, %v547_v10  ;;  %v545_v18 = vpack.c.bf16 %v409_v2, %v409_v2  ;;  %v414_v37 = vmul.f32 %v648_v3, %v792_v26 }
 0x104   :  { %v652_v6 = vpop.eup %651  ;;  %482 = vst.msk [vmem:[%s904_s3 + $0x4] sm:$0xf] %vm480_vm1, %v537_v11  ;;  %v542_v21 = vpack.c.bf16 %v406_v4, %v406_v4  ;;  %v404_v7 = vmul.f32 %v650_v5, %v798_v34 }
 0x105   :  { %v654_v8 = vpop.eup %653  ;;  %490 = vst.msk [vmem:[%s904_s3 + $0x24] sm:$0xf] %vm480_vm1, %v545_v18  ;;  %v550_v25 = vpack.c.bf16 %v414_v37, %v414_v37  ;;  %v412_v9 = vmul.f32 %v652_v6, %v801_v38 }
 0x106   :  { %v656_v12 = vpop.eup %655  ;;  %487 = vst.msk [vmem:[%s904_s3 + $0x18] sm:$0xf] %vm480_vm1, %v542_v21  ;;  %v540_v26 = vpack.c.bf16 %v404_v7, %v404_v7  ;;  %v407_v13 = vmul.f32 %v654_v8, %v806_v44 }
 0x107   :  { %v658_v14 = vpop.eup %657  ;;  %495 = vst.msk [vmem:[%s904_s3 + $0x38] sm:$0xf] %vm480_vm1, %v550_v25  ;;  %v548_v34 = vpack.c.bf16 %v412_v9, %v412_v9  ;;  %v415_v15 = vmul.f32 %v656_v12, %v809_v47 }
 0x108   :  { %485 = vst.msk [vmem:[%s904_s3 + $0x10] sm:$0xf] %vm480_vm1, %v540_v26  ;;  %v543_v38 = vpack.c.bf16 %v407_v13, %v407_v13  ;;  %v405_v16 = vmul.f32 %v658_v14, %v813_v54 }
 0x109   :  { %493 = vst.msk [vmem:[%s904_s3 + $0x30] sm:$0xf] %vm480_vm1, %v548_v34  ;;  %v551_v44 = vpack.c.bf16 %v415_v15, %v415_v15 }
 0x10a   :  { %488 = vst.msk [vmem:[%s904_s3 + $0x1c] sm:$0xf] %vm480_vm1, %v543_v38  ;;  %v541_v47 = vpack.c.bf16 %v405_v16, %v405_v16 }
 0x10b   :  { %496 = vst.msk [vmem:[%s904_s3 + $0x3c] sm:$0xf] %vm480_vm1, %v551_v44 }
 0x10c   :  { %v660_v17 = vpop.eup %659  ;;  %486 = vst.msk [vmem:[%s904_s3 + $0x14] sm:$0xf] %vm480_vm1, %v541_v47 }
 0x10d   :  { %v413_v54 = vmul.f32 %v660_v17, %v817_v56 }
 0x10f   :  { %v549_v19 = vpack.c.bf16 %v413_v54, %v413_v54 }
 0x111   :  { %494 = vst.msk [vmem:[%s904_s3 + $0x34] sm:$0xf] %vm480_vm1, %v549_v19 }

// kernel: elandarknet_fwd.29
= control target key start
LH: loop header
LB: loop body
LE: loop exit
PB: predicated region body
PF: predicated region fallthrough
CT: control target
= control target key end

     0   :  { %vm19_vm0 = vcmask 130048   ;;  %v772_v0 = vmov 0   ;;  %v773_v2 = vmov 0.0   ;;  %vm568_vm1 = vcmask 125952   ;;  %s1076_s1 = inlined_call_operand.vmem [shape: bf16[144,16], index: 1, kind: input, shape index: {}]   ;;  %s1077_s0 = inlined_call_operand.vmem [shape: bf16[128,144], index: 0, kind: input, shape index: {}]   ;;  %s1078_s2 = inlined_call_operand.vmem [shape: f32[1,16], index: 2, kind: input, shape index: {}]   ;;  %s1079_s3 = inlined_call_operand.vmem [shape: bf16[128,16], index: 3, kind: output, shape index: {}]  }
   0x1   :  { %237 = vmatprep.subr.bf16.mxu0 %v772_v0  ;;  %655 = vmatprep.subr.bf16.mxu1 %v772_v0  ;;  %v675_v1 = vld [vmem:[%s1076_s1 + $0x38] sm:$0xff]   ;;  %20 = vst.msk [vmem:[#allocation2] sm:$0xff] %vm19_vm0, %v773_v2  ;;  %21 = vst.msk [vmem:[#allocation2 + $0x8] sm:$0xff] %vm19_vm0, %v773_v2  ;;  %v676_v3 = vld [vmem:[%s1076_s1 + $0x30] sm:$0xff]  }
   0x2   :  { %22 = vst.msk [vmem:[#allocation2 + $0x10] sm:$0xff] %vm19_vm0, %v773_v2  ;;  %23 = vst.msk [vmem:[#allocation2 + $0x18] sm:$0xff] %vm19_vm0, %v773_v2  ;;  %238 = vmatpush1.bf16.msra.mxu0 %v675_v1  ;;  %664 = vmatpush1.bf16.msra.mxu1 %v675_v1  ;;  %v677_v4 = vld [vmem:[%s1076_s1 + $0x28] sm:$0xff]   ;;  %v678_v5 = vld [vmem:[%s1076_s1 + $0x20] sm:$0xff]  }
   0x3   :  { %24 = vst.msk [vmem:[#allocation2 + $0x20] sm:$0xff] %vm19_vm0, %v773_v2  ;;  %25 = vst.msk [vmem:[#allocation2 + $0x28] sm:$0xff] %vm19_vm0, %v773_v2  ;;  %239 = vmatprep.subr.bf16.mxu0 %v772_v0  ;;  %656 = vmatprep.subr.bf16.mxu1 %v772_v0  ;;  %v686_v6 = vld [vmem:[%s1077_s0 + $0x4] ss:$8 sps:$4 sm:$0xff]   ;;  %v679_v8 = vld [vmem:[%s1076_s1 + $0x18] sm:$0xff]  }
   0x4   :  { %26 = vst.msk [vmem:[#allocation2 + $0x30] sm:$0xff] %vm19_vm0, %v773_v2  ;;  %27 = vst.msk [vmem:[#allocation2 + $0x38] sm:$0xff] %vm19_vm0, %v773_v2  ;;  %v689_v7 = vld [vmem:[%s1077_s0 + $0x44] ss:$8 sps:$4 sm:$0xff]   ;;  %614 = vmatprep.mubr.msk.bf16.mxu0 %vm19_vm0, %v686_v6  ;;  %v680_v9 = vld [vmem:[%s1076_s1 + $0x10] sm:$0xff]  }
   0x5   :  { %28 = vst.msk [vmem:[#allocation2 + $0x40] sm:$0xff] %vm19_vm0, %v773_v2  ;;  %29 = vst.msk [vmem:[#allocation2 + $0x48] sm:$0xff] %vm19_vm0, %v773_v2  ;;  %618 = vmatprep.mubr.msk.bf16.mxu1 %vm19_vm0, %v689_v7  ;;  %v681_v10 = vld [vmem:[%s1076_s1 + $0x8] sm:$0xff]   ;;  %v682_v11 = vld [vmem:[%s1076_s1] sm:$0xff]  }
   0x6   :  { %30 = vst.msk [vmem:[#allocation2 + $0x50] sm:$0xff] %vm19_vm0, %v773_v2  ;;  %31 = vst.msk [vmem:[#allocation2 + $0x58] sm:$0xff] %vm19_vm0, %v773_v2  ;;  %240 = vmatpush1.bf16.msra.mxu0 %v676_v3  ;;  %665 = vmatpush1.bf16.msra.mxu1 %v676_v3  ;;  %v683_v12 = vld [vmem:[%s1076_s1 + $0x40] sm:$0xff]   ;;  %v690_v15 = vld [vmem:[%s1077_s0 + $0x14] ss:$8 sps:$4 sm:$0xff]  }
   0x7   :  { %32 = vst.msk [vmem:[#allocation2 + $0x60] sm:$0xff] %vm19_vm0, %v773_v2  ;;  %33 = vst.msk [vmem:[#allocation2 + $0x68] sm:$0xff] %vm19_vm0, %v773_v2  ;;  %241 = vmatprep.subr.bf16.mxu0 %v772_v0  ;;  %657 = vmatprep.subr.bf16.mxu1 %v772_v0  ;;  %v684_v13 = vld [vmem:[%s1077_s0] ss:$8 sps:$4 sm:$0xff]   ;;  %v692_v16 = vld [vmem:[%s1077_s0 + $0x54] ss:$8 sps:$4 sm:$0xff]  }
   0x8   :  { %34 = vst.msk [vmem:[#allocation2 + $0x70] sm:$0xff] %vm19_vm0, %v773_v2  ;;  %35 = vst.msk [vmem:[#allocation2 + $0x78] sm:$0xff] %vm19_vm0, %v773_v2  ;;  %v687_v14 = vld [vmem:[%s1077_s0 + $0x40] ss:$8 sps:$4 sm:$0xff]   ;;  %v694_v17 = vld [vmem:[%s1077_s0 + $0x10] ss:$8 sps:$4 sm:$0xff]  }
   0x9   :  { %v695_v18 = vld [vmem:[%s1077_s0 + $0x50] ss:$8 sps:$4 sm:$0xff]   ;;  %v696_v19 = vld [vmem:[%s1077_s0 + $0x24] ss:$8 sps:$4 sm:$0xff]   ;;  %v700_v21 = vld [vmem:[%s1077_s0 + $0x20] ss:$8 sps:$4 sm:$0xff]  }
   0xa   :  { %242 = vmatpush1.bf16.msra.mxu0 %v677_v4  ;;  %666 = vmatpush1.bf16.msra.mxu1 %v677_v4  ;;  %v698_v20 = vld [vmem:[%s1077_s0 + $0x64] ss:$8 sps:$4 sm:$0xff]   ;;  %v701_v22 = vld [vmem:[%s1077_s0 + $0x60] ss:$8 sps:$4 sm:$0xff]   ;;  %v702_v23 = vld [vmem:[%s1077_s0 + $0x34] ss:$8 sps:$4 sm:$0xff]  }
   0xb   :  { %243 = vmatprep.subr.bf16.mxu0 %v772_v0  ;;  %658 = vmatprep.subr.bf16.mxu1 %v772_v0  ;;  %v704_v24 = vld [vmem:[%s1077_s0 + $0x74] ss:$8 sps:$4 sm:$0xff]   ;;  %v706_v25 = vld [vmem:[%s1077_s0 + $0x30] ss:$8 sps:$4 sm:$0xff]   ;;  %v36_v27 = vld [vmem:[#allocation2] sm:$0xff] }
   0xc   :  { %v707_v26 = vld [vmem:[%s1077_s0 + $0x70] ss:$8 sps:$4 sm:$0xff]   ;;  %v44_v28 = vld [vmem:[#allocation2 + $0x40] sm:$0xff]  ;;  %v37_v35 = vld [vmem:[#allocation2 + $0x8] sm:$0xff] }
   0xd   :  { %v45_v36 = vld [vmem:[#allocation2 + $0x48] sm:$0xff]  ;;  %v38_v43 = vld [vmem:[#allocation2 + $0x10] sm:$0xff]  ;;  %v918_v45 = vld [vmem:[%s1078_s2] ss:$0 sm:$0xff] }
   0xe   :  { %244 = vmatpush1.bf16.msra.mxu0 %v678_v5  ;;  %667 = vmatpush1.bf16.msra.mxu1 %v678_v5  ;;  %v46_v44 = vld [vmem:[#allocation2 + $0x50] sm:$0xff]  ;;  %v39_v50 = vld [vmem:[#allocation2 + $0x18] sm:$0xff]  ;;  %v40_v4 = vld [vmem:[#allocation2 + $0x20] sm:$0xff] }
   0xf   :  { %245 = vmatprep.subr.bf16.mxu0 %v772_v0  ;;  %659 = vmatprep.subr.bf16.mxu1 %v772_v0  ;;  %v47_v55 = vld [vmem:[#allocation2 + $0x58] sm:$0xff] }
  0x12   :  { %246 = vmatpush1.bf16.msra.mxu0 %v679_v8  ;;  %668 = vmatpush1.bf16.msra.mxu1 %v679_v8 }
  0x13   :  { %247 = vmatprep.subr.bf16.mxu0 %v772_v0  ;;  %660 = vmatprep.subr.bf16.mxu1 %v772_v0 }
  0x16   :  { %248 = vmatpush1.bf16.msra.mxu0 %v680_v9  ;;  %669 = vmatpush1.bf16.msra.mxu1 %v680_v9  ;;  %v48_v9 = vld [vmem:[#allocation2 + $0x60] sm:$0xff] }
  0x17   :  { %249 = vmatprep.subr.bf16.mxu0 %v772_v0  ;;  %661 = vmatprep.subr.bf16.mxu1 %v772_v0 }
  0x1a   :  { %250 = vmatpush1.bf16.msra.mxu0 %v681_v10  ;;  %670 = vmatpush1.bf16.msra.mxu1 %v681_v10 }
  0x1b   :  { %251 = vmatprep.subr.bf16.mxu0 %v772_v0  ;;  %662 = vmatprep.subr.bf16.mxu1 %v772_v0 }
  0x1e   :  { %252 = vmatpush1.bf16.msra.mxu0 %v682_v11  ;;  %671 = vmatpush1.bf16.msra.mxu1 %v682_v11 }
  0x1f   :  { %267 = vmatprep.subr.bf16.mxu0 %v772_v0  ;;  %663 = vmatprep.subr.bf16.mxu1 %v772_v0 }
  0x22   :  { %268 = vmatpush2.bf16.msra.mxu0 %v683_v12  ;;  %672 = vmatpush2.bf16.msra.mxu1 %v683_v12 }
  0x25   :  { %270 = vmatmul.mubr.bf16.vlgmr.msra.gmra.mxu0 %v684_v13  ;;  %302 = vmatmul.mubr.bf16.vlgmr.msra.gmra.mxu1 %v687_v14 }
  0x26   :  { %615 = vmatprep.mubr.msk.bf16.mxu0 %vm19_vm0, %v690_v15  ;;  %619 = vmatprep.mubr.msk.bf16.mxu1 %vm19_vm0, %v692_v16 }
  0x2d   :  { %278 = vmatmul.mubr.bf16.gmra.mxu0 %v694_v17  ;;  %310 = vmatmul.mubr.bf16.gmra.mxu1 %v695_v18 }
  0x2e   :  { %616 = vmatprep.mubr.msk.bf16.mxu0 %vm19_vm0, %v696_v19  ;;  %620 = vmatprep.mubr.msk.bf16.mxu1 %vm19_vm0, %v698_v20  ;;  %v41_v20 = vld [vmem:[#allocation2 + $0x28] sm:$0xff] }
  0x35   :  { %286 = vmatmul.mubr.bf16.gmra.mxu0 %v700_v21  ;;  %318 = vmatmul.mubr.bf16.gmra.mxu1 %v701_v22 }
  0x36   :  { %617 = vmatprep.mubr.msk.bf16.mxu0 %vm19_vm0, %v702_v23  ;;  %621 = vmatprep.mubr.msk.bf16.mxu1 %vm19_vm0, %v704_v24 }
  0x3d   :  { %294 = vmatmul.mubr.bf16.gmra.mxu0 %v706_v25  ;;  %326 = vmatmul.mubr.bf16.gmra.mxu1 %v707_v26  ;;  %v49_v25 = vld [vmem:[#allocation2 + $0x68] sm:$0xff] }
  0xe5   :  { %v271_v29 = vpop.f32.mrf.mxu0  ;;  %v303_v30 = vpop.f32.mrf.mxu1 }
  0xe6   :  { %v334_v31 = vadd.f32 %v271_v29, %v36_v27  ;;  %v342_v32 = vadd.f32 %v303_v30, %v44_v28 }
  0xe7   :  { %v273_v33 = vpop.f32.mrf.mxu0  ;;  %v305_v34 = vpop.f32.mrf.mxu1 }
  0xe8   :  { %350 = vst.msk [vmem:[#allocation2] sm:$0xff] %vm19_vm0, %v334_v31  ;;  %358 = vst.msk [vmem:[#allocation2 + $0x40] sm:$0xff] %vm19_vm0, %v342_v32 }
  0xe9   :  { %v274_v37 = vpop.f32.mrf.mxu0  ;;  %v306_v38 = vpop.f32.mrf.mxu1 }
  0xea   :  { %v335_v39 = vadd.f32 %v274_v37, %v37_v35  ;;  %v343_v40 = vadd.f32 %v306_v38, %v45_v36  ;;  %v42_v36 = vld [vmem:[#allocation2 + $0x30] sm:$0xff] }
  0xeb   :  { %v276_v41 = vpop.f32.mrf.mxu0  ;;  %v308_v42 = vpop.f32.mrf.mxu1 }
  0xec   :  { %351 = vst.msk [vmem:[#allocation2 + $0x8] sm:$0xff] %vm19_vm0, %v335_v39  ;;  %359 = vst.msk [vmem:[#allocation2 + $0x48] sm:$0xff] %vm19_vm0, %v343_v40  ;;  %v50_v41 = vld [vmem:[#allocation2 + $0x70] sm:$0xff] }
  0xed   :  { %v279_v46 = vpop.f32.mrf.mxu0  ;;  %v311_v47 = vpop.f32.mrf.mxu1 }
  0xee   :  { %v336_v48 = vadd.f32 %v279_v46, %v38_v43  ;;  %v344_v49 = vadd.f32 %v311_v47, %v46_v44 }
  0xef   :  { %v369_v51 = vld [vmem:[#allocation2] sm:$0xff]  ;;  %v281_v53 = vpop.f32.mrf.mxu0  ;;  %v313_v54 = vpop.f32.mrf.mxu1 }
  0xf0   :  { %v377_v52 = vld [vmem:[#allocation2 + $0x40] sm:$0xff]  ;;  %v921_v56 = vadd.f32 %v918_v45, %v369_v51  ;;  %352 = vst.msk [vmem:[#allocation2 + $0x10] sm:$0xff] %vm19_vm0, %v336_v48  ;;  %360 = vst.msk [vmem:[#allocation2 + $0x50] sm:$0xff] %vm19_vm0, %v344_v49  ;;  %v51_v53 = vld [vmem:[#allocation2 + $0x78] sm:$0xff] }
  0xf1   :  { %v924_v57 = vadd.f32 %v918_v45, %v377_v52  ;;  %v282_v58 = vpop.f32.mrf.mxu0  ;;  %v314_v59 = vpop.f32.mrf.mxu1  ;;  %v43_v52 = vld [vmem:[#allocation2 + $0x38] sm:$0xff] }
  0xf2   :  { %v408_v60 = vsub.f32 0.0, %v921_v56  ;;  %v337_v62 = vadd.f32 %v282_v58, %v39_v50  ;;  %v345_v63 = vadd.f32 %v314_v59, %v47_v55 }
  0xf3   :  { %v416_v61 = vsub.f32 0.0, %v924_v57  ;;  %v370_v0 = vld [vmem:[#allocation2 + $0x8] sm:$0xff]  ;;  %v284_v2 = vpop.f32.mrf.mxu0  ;;  %v316_v3 = vpop.f32.mrf.mxu1 }
  0xf4   :  { %v378_v1 = vld [vmem:[#allocation2 + $0x48] sm:$0xff]  ;;  %v424_v5 = vmul.f32 1.442695, %v408_v60  ;;  %v931_v7 = vadd.f32 %v918_v45, %v370_v0  ;;  %353 = vst.msk [vmem:[#allocation2 + $0x18] sm:$0xff] %vm19_vm0, %v337_v62  ;;  %361 = vst.msk [vmem:[#allocation2 + $0x58] sm:$0xff] %vm19_vm0, %v345_v63 }
  0xf5   :  { %v440_v6 = vmul.f32 1.442695, %v416_v61  ;;  %v934_v8 = vadd.f32 %v918_v45, %v378_v1  ;;  %v287_v10 = vpop.f32.mrf.mxu0  ;;  %v319_v11 = vpop.f32.mrf.mxu1 }
  0xf6   :  { %708 = vpow2.f32 %v424_v5  ;;  %v409_v12 = vsub.f32 0.0, %v931_v7  ;;  %v338_v14 = vadd.f32 %v287_v10, %v40_v4  ;;  %v346_v17 = vadd.f32 %v319_v11, %v48_v9 }
  0xf7   :  { %v417_v13 = vsub.f32 0.0, %v934_v8  ;;  %710 = vpow2.f32 %v440_v6  ;;  %v371_v15 = vld [vmem:[#allocation2 + $0x10] sm:$0xff]  ;;  %v289_v18 = vpop.f32.mrf.mxu0  ;;  %v321_v19 = vpop.f32.mrf.mxu1 }
  0xf8   :  { %v379_v16 = vld [vmem:[#allocation2 + $0x50] sm:$0xff]  ;;  %v426_v21 = vmul.f32 1.442695, %v409_v12  ;;  %v941_v23 = vadd.f32 %v918_v45, %v371_v15  ;;  %354 = vst.msk [vmem:[#allocation2 + $0x20] sm:$0xff] %vm19_vm0, %v338_v14  ;;  %362 = vst.msk [vmem:[#allocation2 + $0x60] sm:$0xff] %vm19_vm0, %v346_v17 }
  0xf9   :  { %v442_v22 = vmul.f32 1.442695, %v417_v13  ;;  %v944_v24 = vadd.f32 %v918_v45, %v379_v16  ;;  %v290_v26 = vpop.f32.mrf.mxu0  ;;  %v322_v27 = vpop.f32.mrf.mxu1 }
  0xfa   :  { %712 = vpow2.f32 %v426_v21  ;;  %v410_v28 = vsub.f32 0.0, %v941_v23  ;;  %v339_v30 = vadd.f32 %v290_v26, %v41_v20  ;;  %v347_v33 = vadd.f32 %v322_v27, %v49_v25 }
  0xfb   :  { %v418_v29 = vsub.f32 0.0, %v944_v24  ;;  %714 = vpow2.f32 %v442_v22  ;;  %v372_v31 = vld [vmem:[#allocation2 + $0x18] sm:$0xff]  ;;  %v292_v34 = vpop.f32.mrf.mxu0  ;;  %v324_v35 = vpop.f32.mrf.mxu1 }
  0xfc   :  { %v380_v32 = vld [vmem:[#allocation2 + $0x58] sm:$0xff]  ;;  %v428_v37 = vmul.f32 1.442695, %v410_v28  ;;  %v951_v39 = vadd.f32 %v918_v45, %v372_v31  ;;  %355 = vst.msk [vmem:[#allocation2 + $0x28] sm:$0xff] %vm19_vm0, %v339_v30  ;;  %363 = vst.msk [vmem:[#allocation2 + $0x68] sm:$0xff] %vm19_vm0, %v347_v33 }
  0xfd   :  { %v444_v38 = vmul.f32 1.442695, %v418_v29  ;;  %v954_v40 = vadd.f32 %v918_v45, %v380_v32  ;;  %v295_v42 = vpop.f32.mrf.mxu0  ;;  %v327_v43 = vpop.f32.mrf.mxu1 }
  0xfe   :  { %716 = vpow2.f32 %v428_v37  ;;  %v411_v44 = vsub.f32 0.0, %v951_v39  ;;  %v340_v47 = vadd.f32 %v295_v42, %v42_v36  ;;  %v348_v49 = vadd.f32 %v327_v43, %v50_v41 }
  0xff   :  { %v419_v46 = vsub.f32 0.0, %v954_v40  ;;  %718 = vpow2.f32 %v444_v38  ;;  %v373_v48 = vld [vmem:[#allocation2 + $0x20] sm:$0xff]  ;;  %v297_v50 = vpop.f32.mrf.mxu0  ;;  %v329_v51 = vpop.f32.mrf.mxu1 }
 0x100   :  { %v430_v54 = vmul.f32 1.442695, %v411_v44  ;;  %v961_v58 = vadd.f32 %v918_v45, %v373_v48  ;;  %v381_v59 = vld [vmem:[#allocation2 + $0x60] sm:$0xff]  ;;  %356 = vst.msk [vmem:[#allocation2 + $0x30] sm:$0xff] %vm19_vm0, %v340_v47  ;;  %364 = vst.msk [vmem:[#allocation2 + $0x70] sm:$0xff] %vm19_vm0, %v348_v49 }
 0x101   :  { %v446_v55 = vmul.f32 1.442695, %v419_v46  ;;  %v965_v60 = vadd.f32 %v918_v45, %v381_v59  ;;  %v298_v61 = vpop.f32.mrf.mxu0  ;;  %v330_v62 = vpop.f32.mrf.mxu1 }
 0x102   :  { %720 = vpow2.f32 %v430_v54  ;;  %v412_v63 = vsub.f32 0.0, %v961_v58  ;;  %v341_v0 = vadd.f32 %v298_v61, %v43_v52  ;;  %v349_v1 = vadd.f32 %v330_v62, %v51_v53 }
 0x103   :  { %v709_v2 = vpop.eup %708  ;;  %722 = vpow2.f32 %v446_v55  ;;  %v420_v3 = vsub.f32 0.0, %v965_v60  ;;  %v374_v4 = vld [vmem:[#allocation2 + $0x28] sm:$0xff]  ;;  %v300_v5 = vpop.f32.mrf.mxu0 }
 0x104   :  { %v332_v6 = vpop.f32.mrf.mxu1  ;;  %v711_v9 = vpop.eup %710  ;;  %v456_v10 = vadd.f32 1.0, %v709_v2  ;;  %v432_v11 = vmul.f32 1.442695, %v412_v63  ;;  %v971_v12 = vadd.f32 %v918_v45, %v374_v4  ;;  %v382_v13 = vld [vmem:[#allocation2 + $0x68] sm:$0xff]  ;;  %357 = vst.msk [vmem:[#allocation2 + $0x38] sm:$0xff] %vm19_vm0, %v341_v0  ;;  %365 = vst.msk [vmem:[#allocation2 + $0x78] sm:$0xff] %vm19_vm0, %v349_v1 }
 0x105   :  { %v464_v14 = vadd.f32 1.0, %v711_v9  ;;  %v448_v15 = vmul.f32 1.442695, %v420_v3  ;;  %v976_v16 = vadd.f32 %v918_v45, %v382_v13 }
 0x106   :  { %724 = vrcp.f32 %v456_v10  ;;  %v413_v17 = vsub.f32 0.0, %v971_v12 }
 0x107   :  { %v713_v18 = vpop.eup %712  ;;  %726 = vrcp.f32 %v464_v14  ;;  %v421_v19 = vsub.f32 0.0, %v976_v16  ;;  %v375_v20 = vld [vmem:[#allocation2 + $0x30] sm:$0xff] }
 0x108   :  { %v715_v21 = vpop.eup %714  ;;  %v457_v22 = vadd.f32 1.0, %v713_v18  ;;  %728 = vpow2.f32 %v432_v11  ;;  %v434_v25 = vmul.f32 1.442695, %v413_v17  ;;  %v981_v26 = vadd.f32 %v918_v45, %v375_v20  ;;  %v383_v27 = vld [vmem:[#allocation2 + $0x70] sm:$0xff] }
 0x109   :  { %v465_v28 = vadd.f32 1.0, %v715_v21  ;;  %730 = vpow2.f32 %v448_v15  ;;  %v450_v29 = vmul.f32 1.442695, %v421_v19  ;;  %v984_v30 = vadd.f32 %v918_v45, %v383_v27 }
 0x10a   :  { %732 = vrcp.f32 %v457_v22  ;;  %v414_v31 = vsub.f32 0.0, %v981_v26 }
 0x10b   :  { %v717_v32 = vpop.eup %716  ;;  %734 = vrcp.f32 %v465_v28  ;;  %v422_v33 = vsub.f32 0.0, %v984_v30  ;;  %v376_v34 = vld [vmem:[#allocation2 + $0x38] sm:$0xff] }
 0x10c   :  { %v384_v35 = vld [vmem:[#allocation2 + $0x78] sm:$0xff]  ;;  %v719_v36 = vpop.eup %718  ;;  %v458_v37 = vadd.f32 1.0, %v717_v32  ;;  %736 = vpow2.f32 %v434_v25  ;;  %v436_v38 = vmul.f32 1.442695, %v414_v31  ;;  %v989_v41 = vadd.f32 %v918_v45, %v376_v34 }
 0x10d   :  { %v466_v42 = vadd.f32 1.0, %v719_v36  ;;  %738 = vpow2.f32 %v450_v29  ;;  %v452_v43 = vmul.f32 1.442695, %v422_v33  ;;  %v992_v44 = vadd.f32 %v918_v45, %v384_v35 }
 0x10e   :  { %740 = vrcp.f32 %v458_v37  ;;  %v415_v46 = vsub.f32 0.0, %v989_v41 }
 0x10f   :  { %v721_v47 = vpop.eup %720  ;;  %742 = vrcp.f32 %v466_v42  ;;  %v423_v48 = vsub.f32 0.0, %v992_v44 }
 0x110   :  { %v723_v49 = vpop.eup %722  ;;  %v459_v50 = vadd.f32 1.0, %v721_v47  ;;  %744 = vpow2.f32 %v436_v38  ;;  %v438_v51 = vmul.f32 1.442695, %v415_v46 }
 0x111   :  { %v467_v52 = vadd.f32 1.0, %v723_v49  ;;  %746 = vpow2.f32 %v452_v43  ;;  %v454_v53 = vmul.f32 1.442695, %v423_v48 }
 0x112   :  { %748 = vrcp.f32 %v459_v50 }
 0x113   :  { %v725_v54 = vpop.eup %724  ;;  %750 = vrcp.f32 %v467_v52 }
 0x114   :  { %v727_v55 = vpop.eup %726  ;;  %v488_v45 = vmul.f32 %v725_v54, %v921_v56  ;;  %752 = vpow2.f32 %v438_v51 }
 0x115   :  { %v729_v59 = vpop.eup %728  ;;  %v496_v61 = vmul.f32 %v727_v55, %v924_v57  ;;  %754 = vpow2.f32 %v454_v53 }
 0x116   :  { %v731_v62 = vpop.eup %730  ;;  %v639_v63 = vpack.c.bf16 %v488_v45, %v488_v45  ;;  %v460_v0 = vadd.f32 1.0, %v729_v59 }
 0x117   :  { %v733_v1 = vpop.eup %732  ;;  %v647_v2 = vpack.c.bf16 %v496_v61, %v496_v61  ;;  %v468_v3 = vadd.f32 1.0, %v731_v62 }
 0x118   :  { %v735_v4 = vpop.eup %734  ;;  %569 = vst.msk [vmem:[%s1079_s3] sm:$0xf] %vm568_vm1, %v639_v63  ;;  %v489_v56 = vmul.f32 %v733_v1, %v931_v7  ;;  %756 = vrcp.f32 %v460_v0 }
 0x119   :  { %v737_v5 = vpop.eup %736  ;;  %577 = vst.msk [vmem:[%s1079_s3 + $0x20] sm:$0xf] %vm568_vm1, %v647_v2  ;;  %v497_v57 = vmul.f32 %v735_v4, %v934_v8  ;;  %758 = vrcp.f32 %v468_v3 }
 0x11a   :  { %v739_v6 = vpop.eup %738  ;;  %v640_v9 = vpack.c.bf16 %v489_v56, %v489_v56  ;;  %v461_v10 = vadd.f32 1.0, %v737_v5 }
 0x11b   :  { %v741_v11 = vpop.eup %740  ;;  %v648_v13 = vpack.c.bf16 %v497_v57, %v497_v57  ;;  %v469_v14 = vadd.f32 1.0, %v739_v6 }
 0x11c   :  { %v743_v15 = vpop.eup %742  ;;  %570 = vst.msk [vmem:[%s1079_s3 + $0x4] sm:$0xf] %vm568_vm1, %v640_v9  ;;  %v490_v7 = vmul.f32 %v741_v11, %v941_v23  ;;  %760 = vrcp.f32 %v461_v10 }
 0x11d   :  { %v745_v17 = vpop.eup %744  ;;  %578 = vst.msk [vmem:[%s1079_s3 + $0x24] sm:$0xf] %vm568_vm1, %v648_v13  ;;  %v498_v8 = vmul.f32 %v743_v15, %v944_v24  ;;  %762 = vrcp.f32 %v469_v14 }
 0x11e   :  { %v747_v18 = vpop.eup %746  ;;  %v641_v19 = vpack.c.bf16 %v490_v7, %v490_v7  ;;  %v462_v20 = vadd.f32 1.0, %v745_v17 }
 0x11f   :  { %v749_v21 = vpop.eup %748  ;;  %v649_v22 = vpack.c.bf16 %v498_v8, %v498_v8  ;;  %v470_v25 = vadd.f32 1.0, %v747_v18 }
 0x120   :  { %v751_v27 = vpop.eup %750  ;;  %571 = vst.msk [vmem:[%s1079_s3 + $0x8] sm:$0xf] %vm568_vm1, %v641_v19  ;;  %v491_v23 = vmul.f32 %v749_v21, %v951_v39  ;;  %764 = vrcp.f32 %v462_v20 }
 0x121   :  { %v753_v28 = vpop.eup %752  ;;  %579 = vst.msk [vmem:[%s1079_s3 + $0x28] sm:$0xf] %vm568_vm1, %v649_v22  ;;  %v499_v24 = vmul.f32 %v751_v27, %v954_v40  ;;  %766 = vrcp.f32 %v470_v25 }
 0x122   :  { %v755_v29 = vpop.eup %754  ;;  %v642_v31 = vpack.c.bf16 %v491_v23, %v491_v23  ;;  %v463_v32 = vadd.f32 1.0, %v753_v28 }
 0x123   :  { %v650_v33 = vpack.c.bf16 %v499_v24, %v499_v24  ;;  %v471_v34 = vadd.f32 1.0, %v755_v29 }
 0x124   :  { %572 = vst.msk [vmem:[%s1079_s3 + $0xc] sm:$0xf] %vm568_vm1, %v642_v31  ;;  %768 = vrcp.f32 %v463_v32 }
 0x125   :  { %v757_v39 = vpop.eup %756  ;;  %580 = vst.msk [vmem:[%s1079_s3 + $0x2c] sm:$0xf] %vm568_vm1, %v650_v33  ;;  %770 = vrcp.f32 %v471_v34 }
 0x126   :  { %v759_v40 = vpop.eup %758  ;;  %v492_v35 = vmul.f32 %v757_v39, %v961_v58 }
 0x127   :  { %v500_v36 = vmul.f32 %v759_v40, %v965_v60 }
 0x128   :  { %v643_v37 = vpack.c.bf16 %v492_v35, %v492_v35 }
 0x129   :  { %v761_v38 = vpop.eup %760  ;;  %v651_v42 = vpack.c.bf16 %v500_v36, %v500_v36 }
 0x12a   :  { %v763_v43 = vpop.eup %762  ;;  %573 = vst.msk [vmem:[%s1079_s3 + $0x10] sm:$0xf] %vm568_vm1, %v643_v37  ;;  %v493_v46 = vmul.f32 %v761_v38, %v971_v12 }
 0x12b   :  { %581 = vst.msk [vmem:[%s1079_s3 + $0x30] sm:$0xf] %vm568_vm1, %v651_v42  ;;  %v501_v58 = vmul.f32 %v763_v43, %v976_v16 }
 0x12c   :  { %v644_v47 = vpack.c.bf16 %v493_v46, %v493_v46 }
 0x12d   :  { %v765_v60 = vpop.eup %764  ;;  %v652_v48 = vpack.c.bf16 %v501_v58, %v501_v58 }
 0x12e   :  { %v767_v49 = vpop.eup %766  ;;  %574 = vst.msk [vmem:[%s1079_s3 + $0x14] sm:$0xf] %vm568_vm1, %v644_v47  ;;  %v494_v50 = vmul.f32 %v765_v60, %v981_v26 }
 0x12f   :  { %582 = vst.msk [vmem:[%s1079_s3 + $0x34] sm:$0xf] %vm568_vm1, %v652_v48  ;;  %v502_v12 = vmul.f32 %v767_v49, %v984_v30 }
 0x130   :  { %v645_v51 = vpack.c.bf16 %v494_v50, %v494_v50 }
 0x131   :  { %v769_v16 = vpop.eup %768  ;;  %v653_v52 = vpack.c.bf16 %v502_v12, %v502_v12 }
 0x132   :  { %v771_v53 = vpop.eup %770  ;;  %575 = vst.msk [vmem:[%s1079_s3 + $0x18] sm:$0xf] %vm568_vm1, %v645_v51  ;;  %v495_v54 = vmul.f32 %v769_v16, %v989_v41 }
 0x133   :  { %583 = vst.msk [vmem:[%s1079_s3 + $0x38] sm:$0xf] %vm568_vm1, %v653_v52  ;;  %v503_v26 = vmul.f32 %v771_v53, %v992_v44 }
 0x134   :  { %v646_v55 = vpack.c.bf16 %v495_v54, %v495_v54 }
 0x135   :  { %v654_v30 = vpack.c.bf16 %v503_v26, %v503_v26 }
 0x136   :  { %576 = vst.msk [vmem:[%s1079_s3 + $0x1c] sm:$0xf] %vm568_vm1, %v646_v55 }
 0x137   :  { %584 = vst.msk [vmem:[%s1079_s3 + $0x3c] sm:$0xf] %vm568_vm1, %v654_v30 }

// kernel: elandarknet_fwd.30
= control target key start
LH: loop header
LB: loop body
LE: loop exit
PB: predicated region body
PF: predicated region fallthrough
CT: control target
= control target key end

     0   :  { %vm22_vm0 = vcmask 130048   ;;  %v862_v0 = vmov 0   ;;  %v863_v2 = vmov 0.0   ;;  %vm619_vm1 = vcmask 125952   ;;  %s1195_s1 = inlined_call_operand.vmem [shape: bf16[144,16], index: 1, kind: input, shape index: {}]   ;;  %s1196_s0 = inlined_call_operand.vmem [shape: bf16[128,144], index: 0, kind: input, shape index: {}]   ;;  %s1197_s2 = inlined_call_operand.vmem [shape: f32[1,16], index: 2, kind: input, shape index: {}]   ;;  %s1198_s3 = inlined_call_operand.vmem [shape: bf16[128,16], index: 3, kind: input, shape index: {}]   ;;  %s1199_s4 = inlined_call_operand.vmem [shape: bf16[128,16], index: 4, kind: output, shape index: {}]  }
   0x1   :  { %240 = vmatprep.subr.bf16.mxu0 %v862_v0  ;;  %745 = vmatprep.subr.bf16.mxu1 %v862_v0  ;;  %v765_v1 = vld [vmem:[%s1195_s1 + $0x38] sm:$0xff]   ;;  %23 = vst.msk [vmem:[#allocation2] sm:$0xff] %vm22_vm0, %v863_v2  ;;  %24 = vst.msk [vmem:[#allocation2 + $0x8] sm:$0xff] %vm22_vm0, %v863_v2  ;;  %v766_v3 = vld [vmem:[%s1195_s1 + $0x30] sm:$0xff]  }
   0x2   :  { %25 = vst.msk [vmem:[#allocation2 + $0x10] sm:$0xff] %vm22_vm0, %v863_v2  ;;  %26 = vst.msk [vmem:[#allocation2 + $0x18] sm:$0xff] %vm22_vm0, %v863_v2  ;;  %241 = vmatpush1.bf16.msra.mxu0 %v765_v1  ;;  %754 = vmatpush1.bf16.msra.mxu1 %v765_v1  ;;  %v767_v4 = vld [vmem:[%s1195_s1 + $0x28] sm:$0xff]   ;;  %v768_v5 = vld [vmem:[%s1195_s1 + $0x20] sm:$0xff]  }
   0x3   :  { %27 = vst.msk [vmem:[#allocation2 + $0x20] sm:$0xff] %vm22_vm0, %v863_v2  ;;  %28 = vst.msk [vmem:[#allocation2 + $0x28] sm:$0xff] %vm22_vm0, %v863_v2  ;;  %242 = vmatprep.subr.bf16.mxu0 %v862_v0  ;;  %746 = vmatprep.subr.bf16.mxu1 %v862_v0  ;;  %v776_v6 = vld [vmem:[%s1196_s0 + $0x4] ss:$8 sps:$4 sm:$0xff]   ;;  %v769_v8 = vld [vmem:[%s1195_s1 + $0x18] sm:$0xff]  }
   0x4   :  { %29 = vst.msk [vmem:[#allocation2 + $0x30] sm:$0xff] %vm22_vm0, %v863_v2  ;;  %30 = vst.msk [vmem:[#allocation2 + $0x38] sm:$0xff] %vm22_vm0, %v863_v2  ;;  %v779_v7 = vld [vmem:[%s1196_s0 + $0x44] ss:$8 sps:$4 sm:$0xff]   ;;  %665 = vmatprep.mubr.msk.bf16.mxu0 %vm22_vm0, %v776_v6  ;;  %v770_v9 = vld [vmem:[%s1195_s1 + $0x10] sm:$0xff]  }
   0x5   :  { %31 = vst.msk [vmem:[#allocation2 + $0x40] sm:$0xff] %vm22_vm0, %v863_v2  ;;  %32 = vst.msk [vmem:[#allocation2 + $0x48] sm:$0xff] %vm22_vm0, %v863_v2  ;;  %669 = vmatprep.mubr.msk.bf16.mxu1 %vm22_vm0, %v779_v7  ;;  %v771_v10 = vld [vmem:[%s1195_s1 + $0x8] sm:$0xff]   ;;  %v772_v11 = vld [vmem:[%s1195_s1] sm:$0xff]  }
   0x6   :  { %33 = vst.msk [vmem:[#allocation2 + $0x50] sm:$0xff] %vm22_vm0, %v863_v2  ;;  %34 = vst.msk [vmem:[#allocation2 + $0x58] sm:$0xff] %vm22_vm0, %v863_v2  ;;  %243 = vmatpush1.bf16.msra.mxu0 %v766_v3  ;;  %755 = vmatpush1.bf16.msra.mxu1 %v766_v3  ;;  %v773_v12 = vld [vmem:[%s1195_s1 + $0x40] sm:$0xff]   ;;  %v780_v15 = vld [vmem:[%s1196_s0 + $0x14] ss:$8 sps:$4 sm:$0xff]  }
   0x7   :  { %35 = vst.msk [vmem:[#allocation2 + $0x60] sm:$0xff] %vm22_vm0, %v863_v2  ;;  %36 = vst.msk [vmem:[#allocation2 + $0x68] sm:$0xff] %vm22_vm0, %v863_v2  ;;  %244 = vmatprep.subr.bf16.mxu0 %v862_v0  ;;  %747 = vmatprep.subr.bf16.mxu1 %v862_v0  ;;  %v774_v13 = vld [vmem:[%s1196_s0] ss:$8 sps:$4 sm:$0xff]   ;;  %v782_v16 = vld [vmem:[%s1196_s0 + $0x54] ss:$8 sps:$4 sm:$0xff]  }
   0x8   :  { %37 = vst.msk [vmem:[#allocation2 + $0x70] sm:$0xff] %vm22_vm0, %v863_v2  ;;  %38 = vst.msk [vmem:[#allocation2 + $0x78] sm:$0xff] %vm22_vm0, %v863_v2  ;;  %v777_v14 = vld [vmem:[%s1196_s0 + $0x40] ss:$8 sps:$4 sm:$0xff]   ;;  %v784_v17 = vld [vmem:[%s1196_s0 + $0x10] ss:$8 sps:$4 sm:$0xff]  }
   0x9   :  { %v785_v18 = vld [vmem:[%s1196_s0 + $0x50] ss:$8 sps:$4 sm:$0xff]   ;;  %v786_v19 = vld [vmem:[%s1196_s0 + $0x24] ss:$8 sps:$4 sm:$0xff]   ;;  %v790_v21 = vld [vmem:[%s1196_s0 + $0x20] ss:$8 sps:$4 sm:$0xff]  }
   0xa   :  { %245 = vmatpush1.bf16.msra.mxu0 %v767_v4  ;;  %756 = vmatpush1.bf16.msra.mxu1 %v767_v4  ;;  %v788_v20 = vld [vmem:[%s1196_s0 + $0x64] ss:$8 sps:$4 sm:$0xff]   ;;  %v791_v22 = vld [vmem:[%s1196_s0 + $0x60] ss:$8 sps:$4 sm:$0xff]   ;;  %v792_v23 = vld [vmem:[%s1196_s0 + $0x34] ss:$8 sps:$4 sm:$0xff]  }
   0xb   :  { %246 = vmatprep.subr.bf16.mxu0 %v862_v0  ;;  %748 = vmatprep.subr.bf16.mxu1 %v862_v0  ;;  %v794_v24 = vld [vmem:[%s1196_s0 + $0x74] ss:$8 sps:$4 sm:$0xff]   ;;  %v796_v25 = vld [vmem:[%s1196_s0 + $0x30] ss:$8 sps:$4 sm:$0xff]   ;;  %v39_v27 = vld [vmem:[#allocation2] sm:$0xff] }
   0xc   :  { %v797_v26 = vld [vmem:[%s1196_s0 + $0x70] ss:$8 sps:$4 sm:$0xff]   ;;  %v47_v28 = vld [vmem:[#allocation2 + $0x40] sm:$0xff]  ;;  %v40_v35 = vld [vmem:[#allocation2 + $0x8] sm:$0xff] }
   0xd   :  { %v48_v36 = vld [vmem:[#allocation2 + $0x48] sm:$0xff]  ;;  %v41_v43 = vld [vmem:[#allocation2 + $0x10] sm:$0xff]  ;;  %v1013_v45 = vld [vmem:[%s1197_s2] ss:$0 sm:$0xff] }
   0xe   :  { %247 = vmatpush1.bf16.msra.mxu0 %v768_v5  ;;  %757 = vmatpush1.bf16.msra.mxu1 %v768_v5  ;;  %v49_v44 = vld [vmem:[#allocation2 + $0x50] sm:$0xff]  ;;  %v42_v50 = vld [vmem:[#allocation2 + $0x18] sm:$0xff]  ;;  %v43_v4 = vld [vmem:[#allocation2 + $0x20] sm:$0xff] }
   0xf   :  { %248 = vmatprep.subr.bf16.mxu0 %v862_v0  ;;  %749 = vmatprep.subr.bf16.mxu1 %v862_v0  ;;  %v50_v55 = vld [vmem:[#allocation2 + $0x58] sm:$0xff] }
  0x12   :  { %249 = vmatpush1.bf16.msra.mxu0 %v769_v8  ;;  %758 = vmatpush1.bf16.msra.mxu1 %v769_v8 }
  0x13   :  { %250 = vmatprep.subr.bf16.mxu0 %v862_v0  ;;  %750 = vmatprep.subr.bf16.mxu1 %v862_v0 }
  0x16   :  { %251 = vmatpush1.bf16.msra.mxu0 %v770_v9  ;;  %759 = vmatpush1.bf16.msra.mxu1 %v770_v9  ;;  %v51_v9 = vld [vmem:[#allocation2 + $0x60] sm:$0xff] }
  0x17   :  { %252 = vmatprep.subr.bf16.mxu0 %v862_v0  ;;  %751 = vmatprep.subr.bf16.mxu1 %v862_v0 }
  0x1a   :  { %253 = vmatpush1.bf16.msra.mxu0 %v771_v10  ;;  %760 = vmatpush1.bf16.msra.mxu1 %v771_v10 }
  0x1b   :  { %254 = vmatprep.subr.bf16.mxu0 %v862_v0  ;;  %752 = vmatprep.subr.bf16.mxu1 %v862_v0 }
  0x1e   :  { %255 = vmatpush1.bf16.msra.mxu0 %v772_v11  ;;  %761 = vmatpush1.bf16.msra.mxu1 %v772_v11 }
  0x1f   :  { %270 = vmatprep.subr.bf16.mxu0 %v862_v0  ;;  %753 = vmatprep.subr.bf16.mxu1 %v862_v0 }
  0x22   :  { %271 = vmatpush2.bf16.msra.mxu0 %v773_v12  ;;  %762 = vmatpush2.bf16.msra.mxu1 %v773_v12 }
  0x25   :  { %273 = vmatmul.mubr.bf16.vlgmr.msra.gmra.mxu0 %v774_v13  ;;  %305 = vmatmul.mubr.bf16.vlgmr.msra.gmra.mxu1 %v777_v14 }
  0x26   :  { %666 = vmatprep.mubr.msk.bf16.mxu0 %vm22_vm0, %v780_v15  ;;  %670 = vmatprep.mubr.msk.bf16.mxu1 %vm22_vm0, %v782_v16 }
  0x2d   :  { %281 = vmatmul.mubr.bf16.gmra.mxu0 %v784_v17  ;;  %313 = vmatmul.mubr.bf16.gmra.mxu1 %v785_v18 }
  0x2e   :  { %667 = vmatprep.mubr.msk.bf16.mxu0 %vm22_vm0, %v786_v19  ;;  %671 = vmatprep.mubr.msk.bf16.mxu1 %vm22_vm0, %v788_v20  ;;  %v44_v20 = vld [vmem:[#allocation2 + $0x28] sm:$0xff] }
  0x35   :  { %289 = vmatmul.mubr.bf16.gmra.mxu0 %v790_v21  ;;  %321 = vmatmul.mubr.bf16.gmra.mxu1 %v791_v22 }
  0x36   :  { %668 = vmatprep.mubr.msk.bf16.mxu0 %vm22_vm0, %v792_v23  ;;  %672 = vmatprep.mubr.msk.bf16.mxu1 %vm22_vm0, %v794_v24 }
  0x3d   :  { %297 = vmatmul.mubr.bf16.gmra.mxu0 %v796_v25  ;;  %329 = vmatmul.mubr.bf16.gmra.mxu1 %v797_v26  ;;  %v52_v25 = vld [vmem:[#allocation2 + $0x68] sm:$0xff] }
  0xe5   :  { %v274_v29 = vpop.f32.mrf.mxu0  ;;  %v306_v30 = vpop.f32.mrf.mxu1 }
  0xe6   :  { %v337_v31 = vadd.f32 %v274_v29, %v39_v27  ;;  %v345_v32 = vadd.f32 %v306_v30, %v47_v28 }
  0xe7   :  { %v276_v33 = vpop.f32.mrf.mxu0  ;;  %v308_v34 = vpop.f32.mrf.mxu1 }
  0xe8   :  { %353 = vst.msk [vmem:[#allocation2] sm:$0xff] %vm22_vm0, %v337_v31  ;;  %361 = vst.msk [vmem:[#allocation2 + $0x40] sm:$0xff] %vm22_vm0, %v345_v32 }
  0xe9   :  { %v277_v37 = vpop.f32.mrf.mxu0  ;;  %v309_v38 = vpop.f32.mrf.mxu1 }
  0xea   :  { %v338_v39 = vadd.f32 %v277_v37, %v40_v35  ;;  %v346_v40 = vadd.f32 %v309_v38, %v48_v36  ;;  %v45_v36 = vld [vmem:[#allocation2 + $0x30] sm:$0xff] }
  0xeb   :  { %v279_v41 = vpop.f32.mrf.mxu0  ;;  %v311_v42 = vpop.f32.mrf.mxu1 }
  0xec   :  { %354 = vst.msk [vmem:[#allocation2 + $0x8] sm:$0xff] %vm22_vm0, %v338_v39  ;;  %362 = vst.msk [vmem:[#allocation2 + $0x48] sm:$0xff] %vm22_vm0, %v346_v40  ;;  %v53_v41 = vld [vmem:[#allocation2 + $0x70] sm:$0xff] }
  0xed   :  { %v282_v46 = vpop.f32.mrf.mxu0  ;;  %v314_v47 = vpop.f32.mrf.mxu1 }
  0xee   :  { %v339_v48 = vadd.f32 %v282_v46, %v41_v43  ;;  %v347_v49 = vadd.f32 %v314_v47, %v49_v44 }
  0xef   :  { %v372_v51 = vld [vmem:[#allocation2] sm:$0xff]  ;;  %v284_v53 = vpop.f32.mrf.mxu0  ;;  %v316_v54 = vpop.f32.mrf.mxu1 }
  0xf0   :  { %v380_v52 = vld [vmem:[#allocation2 + $0x40] sm:$0xff]  ;;  %v1016_v56 = vadd.f32 %v1013_v45, %v372_v51  ;;  %355 = vst.msk [vmem:[#allocation2 + $0x10] sm:$0xff] %vm22_vm0, %v339_v48  ;;  %363 = vst.msk [vmem:[#allocation2 + $0x50] sm:$0xff] %vm22_vm0, %v347_v49  ;;  %v54_v53 = vld [vmem:[#allocation2 + $0x78] sm:$0xff] }
  0xf1   :  { %v1019_v57 = vadd.f32 %v1013_v45, %v380_v52  ;;  %v285_v58 = vpop.f32.mrf.mxu0  ;;  %v317_v59 = vpop.f32.mrf.mxu1  ;;  %v46_v52 = vld [vmem:[#allocation2 + $0x38] sm:$0xff] }
  0xf2   :  { %v411_v60 = vsub.f32 0.0, %v1016_v56  ;;  %v340_v62 = vadd.f32 %v285_v58, %v42_v50  ;;  %v348_v63 = vadd.f32 %v317_v59, %v50_v55 }
  0xf3   :  { %v419_v61 = vsub.f32 0.0, %v1019_v57  ;;  %v373_v0 = vld [vmem:[#allocation2 + $0x8] sm:$0xff]  ;;  %v287_v2 = vpop.f32.mrf.mxu0  ;;  %v319_v3 = vpop.f32.mrf.mxu1 }
  0xf4   :  { %v381_v1 = vld [vmem:[#allocation2 + $0x48] sm:$0xff]  ;;  %v427_v5 = vmul.f32 1.442695, %v411_v60  ;;  %v1026_v7 = vadd.f32 %v1013_v45, %v373_v0  ;;  %356 = vst.msk [vmem:[#allocation2 + $0x18] sm:$0xff] %vm22_vm0, %v340_v62  ;;  %364 = vst.msk [vmem:[#allocation2 + $0x58] sm:$0xff] %vm22_vm0, %v348_v63 }
  0xf5   :  { %v443_v6 = vmul.f32 1.442695, %v419_v61  ;;  %v1029_v8 = vadd.f32 %v1013_v45, %v381_v1  ;;  %v290_v10 = vpop.f32.mrf.mxu0  ;;  %v322_v11 = vpop.f32.mrf.mxu1 }
  0xf6   :  { %798 = vpow2.f32 %v427_v5  ;;  %v412_v12 = vsub.f32 0.0, %v1026_v7  ;;  %v341_v14 = vadd.f32 %v290_v10, %v43_v4  ;;  %v349_v17 = vadd.f32 %v322_v11, %v51_v9 }
  0xf7   :  { %v420_v13 = vsub.f32 0.0, %v1029_v8  ;;  %800 = vpow2.f32 %v443_v6  ;;  %v374_v15 = vld [vmem:[#allocation2 + $0x10] sm:$0xff]  ;;  %v292_v18 = vpop.f32.mrf.mxu0  ;;  %v324_v19 = vpop.f32.mrf.mxu1 }
  0xf8   :  { %v382_v16 = vld [vmem:[#allocation2 + $0x50] sm:$0xff]  ;;  %v429_v21 = vmul.f32 1.442695, %v412_v12  ;;  %v1036_v23 = vadd.f32 %v1013_v45, %v374_v15  ;;  %357 = vst.msk [vmem:[#allocation2 + $0x20] sm:$0xff] %vm22_vm0, %v341_v14  ;;  %365 = vst.msk [vmem:[#allocation2 + $0x60] sm:$0xff] %vm22_vm0, %v349_v17 }
  0xf9   :  { %v445_v22 = vmul.f32 1.442695, %v420_v13  ;;  %v1039_v24 = vadd.f32 %v1013_v45, %v382_v16  ;;  %v293_v26 = vpop.f32.mrf.mxu0  ;;  %v325_v27 = vpop.f32.mrf.mxu1 }
  0xfa   :  { %802 = vpow2.f32 %v429_v21  ;;  %v413_v28 = vsub.f32 0.0, %v1036_v23  ;;  %v342_v30 = vadd.f32 %v293_v26, %v44_v20  ;;  %v350_v33 = vadd.f32 %v325_v27, %v52_v25 }
  0xfb   :  { %v421_v29 = vsub.f32 0.0, %v1039_v24  ;;  %804 = vpow2.f32 %v445_v22  ;;  %v375_v31 = vld [vmem:[#allocation2 + $0x18] sm:$0xff]  ;;  %v295_v34 = vpop.f32.mrf.mxu0  ;;  %v327_v35 = vpop.f32.mrf.mxu1 }
  0xfc   :  { %v383_v32 = vld [vmem:[#allocation2 + $0x58] sm:$0xff]  ;;  %v431_v37 = vmul.f32 1.442695, %v413_v28  ;;  %v1046_v39 = vadd.f32 %v1013_v45, %v375_v31  ;;  %358 = vst.msk [vmem:[#allocation2 + $0x28] sm:$0xff] %vm22_vm0, %v342_v30  ;;  %366 = vst.msk [vmem:[#allocation2 + $0x68] sm:$0xff] %vm22_vm0, %v350_v33 }
  0xfd   :  { %v447_v38 = vmul.f32 1.442695, %v421_v29  ;;  %v1049_v40 = vadd.f32 %v1013_v45, %v383_v32  ;;  %v298_v42 = vpop.f32.mrf.mxu0  ;;  %v330_v43 = vpop.f32.mrf.mxu1 }
  0xfe   :  { %806 = vpow2.f32 %v431_v37  ;;  %v414_v44 = vsub.f32 0.0, %v1046_v39  ;;  %v343_v47 = vadd.f32 %v298_v42, %v45_v36  ;;  %v351_v49 = vadd.f32 %v330_v43, %v53_v41 }
  0xff   :  { %v422_v46 = vsub.f32 0.0, %v1049_v40  ;;  %808 = vpow2.f32 %v447_v38  ;;  %v376_v48 = vld [vmem:[#allocation2 + $0x20] sm:$0xff]  ;;  %v300_v50 = vpop.f32.mrf.mxu0  ;;  %v332_v51 = vpop.f32.mrf.mxu1 }
 0x100   :  { %v433_v54 = vmul.f32 1.442695, %v414_v44  ;;  %v1056_v58 = vadd.f32 %v1013_v45, %v376_v48  ;;  %v384_v59 = vld [vmem:[#allocation2 + $0x60] sm:$0xff]  ;;  %359 = vst.msk [vmem:[#allocation2 + $0x30] sm:$0xff] %vm22_vm0, %v343_v47  ;;  %367 = vst.msk [vmem:[#allocation2 + $0x70] sm:$0xff] %vm22_vm0, %v351_v49 }
 0x101   :  { %v449_v55 = vmul.f32 1.442695, %v422_v46  ;;  %v1060_v60 = vadd.f32 %v1013_v45, %v384_v59  ;;  %v301_v61 = vpop.f32.mrf.mxu0  ;;  %v333_v62 = vpop.f32.mrf.mxu1  ;;  %v707_v48 = vld [vmem:[%s1198_s3] sm:$0xff]  }
 0x102   :  { %810 = vpow2.f32 %v433_v54  ;;  %v415_v63 = vsub.f32 0.0, %v1056_v58  ;;  %v344_v0 = vadd.f32 %v301_v61, %v46_v52  ;;  %v352_v1 = vadd.f32 %v333_v62, %v54_v53  ;;  %v741_v51 = vld [vmem:[%s1198_s3 + $0x20] sm:$0xff]  }
 0x103   :  { %v799_v2 = vpop.eup %798  ;;  %812 = vpow2.f32 %v449_v55  ;;  %v423_v3 = vsub.f32 0.0, %v1060_v60  ;;  %v377_v4 = vld [vmem:[#allocation2 + $0x28] sm:$0xff]  ;;  %v303_v5 = vpop.f32.mrf.mxu0  ;;  %v708_v55 = vunpack.c.l.bf16 %v707_v48  ;;  %v724_v61 = vunpack.c.l.bf16 %v741_v51 }
 0x104   :  { %v335_v6 = vpop.f32.mrf.mxu1  ;;  %v801_v9 = vpop.eup %800  ;;  %v459_v10 = vadd.f32 1.0, %v799_v2  ;;  %v435_v11 = vmul.f32 1.442695, %v415_v63  ;;  %v1066_v12 = vadd.f32 %v1013_v45, %v377_v4  ;;  %v385_v13 = vld [vmem:[#allocation2 + $0x68] sm:$0xff]  ;;  %360 = vst.msk [vmem:[#allocation2 + $0x38] sm:$0xff] %vm22_vm0, %v344_v0  ;;  %368 = vst.msk [vmem:[#allocation2 + $0x78] sm:$0xff] %vm22_vm0, %v352_v1  ;;  %v709_v4 = vunpack.c.h.bf16 %v707_v48 }
 0x105   :  { %v467_v14 = vadd.f32 1.0, %v801_v9  ;;  %v451_v15 = vmul.f32 1.442695, %v423_v3  ;;  %v1071_v16 = vadd.f32 %v1013_v45, %v385_v13 }
 0x106   :  { %814 = vrcp.f32 %v459_v10  ;;  %v416_v17 = vsub.f32 0.0, %v1066_v12  ;;  %v725_v10 = vunpack.c.h.bf16 %v741_v51 }
 0x107   :  { %v803_v18 = vpop.eup %802  ;;  %816 = vrcp.f32 %v467_v14  ;;  %v424_v19 = vsub.f32 0.0, %v1071_v16  ;;  %v378_v20 = vld [vmem:[#allocation2 + $0x30] sm:$0xff] }
 0x108   :  { %v805_v21 = vpop.eup %804  ;;  %v460_v22 = vadd.f32 1.0, %v803_v18  ;;  %818 = vpow2.f32 %v435_v11  ;;  %v437_v25 = vmul.f32 1.442695, %v416_v17  ;;  %v1076_v26 = vadd.f32 %v1013_v45, %v378_v20  ;;  %v386_v27 = vld [vmem:[#allocation2 + $0x70] sm:$0xff]  ;;  %v738_v11 = vld [vmem:[%s1198_s3 + $0x8] sm:$0xff]  }
 0x109   :  { %v468_v28 = vadd.f32 1.0, %v805_v21  ;;  %820 = vpow2.f32 %v451_v15  ;;  %v453_v29 = vmul.f32 1.442695, %v424_v19  ;;  %v1079_v30 = vadd.f32 %v1013_v45, %v386_v27 }
 0x10a   :  { %822 = vrcp.f32 %v460_v22  ;;  %v417_v31 = vsub.f32 0.0, %v1076_v26  ;;  %v712_v22 = vunpack.c.l.bf16 %v738_v11 }
 0x10b   :  { %v807_v32 = vpop.eup %806  ;;  %824 = vrcp.f32 %v468_v28  ;;  %v425_v33 = vsub.f32 0.0, %v1079_v30  ;;  %v379_v34 = vld [vmem:[#allocation2 + $0x38] sm:$0xff] }
 0x10c   :  { %v387_v35 = vld [vmem:[#allocation2 + $0x78] sm:$0xff]  ;;  %v809_v36 = vpop.eup %808  ;;  %v461_v37 = vadd.f32 1.0, %v807_v32  ;;  %826 = vpow2.f32 %v437_v25  ;;  %v439_v38 = vmul.f32 1.442695, %v417_v31  ;;  %v1084_v41 = vadd.f32 %v1013_v45, %v379_v34 }
 0x10d   :  { %v469_v42 = vadd.f32 1.0, %v809_v36  ;;  %828 = vpow2.f32 %v453_v29  ;;  %v455_v43 = vmul.f32 1.442695, %v425_v33  ;;  %v1087_v44 = vadd.f32 %v1013_v45, %v387_v35 }
 0x10e   :  { %830 = vrcp.f32 %v461_v37  ;;  %v418_v46 = vsub.f32 0.0, %v1084_v41 }
 0x10f   :  { %v811_v47 = vpop.eup %810  ;;  %832 = vrcp.f32 %v469_v42  ;;  %v426_v49 = vsub.f32 0.0, %v1087_v44 }
 0x110   :  { %v813_v50 = vpop.eup %812  ;;  %v462_v52 = vadd.f32 1.0, %v811_v47  ;;  %834 = vpow2.f32 %v439_v38  ;;  %v441_v45 = vmul.f32 1.442695, %v418_v46  ;;  %v713_v38 = vunpack.c.h.bf16 %v738_v11 }
 0x111   :  { %v470_v53 = vadd.f32 1.0, %v813_v50  ;;  %836 = vpow2.f32 %v455_v43  ;;  %v457_v54 = vmul.f32 1.442695, %v426_v49 }
 0x112   :  { %838 = vrcp.f32 %v462_v52 }
 0x113   :  { %v815_v59 = vpop.eup %814  ;;  %840 = vrcp.f32 %v470_v53 }
 0x114   :  { %v817_v62 = vpop.eup %816  ;;  %v491_v63 = vmul.f32 %v815_v59, %v1016_v56  ;;  %842 = vpow2.f32 %v441_v45  ;;  %v739_v45 = vld [vmem:[%s1198_s3 + $0x10] sm:$0xff]  }
 0x115   :  { %v819_v0 = vpop.eup %818  ;;  %v499_v1 = vmul.f32 %v817_v62, %v1019_v57  ;;  %844 = vpow2.f32 %v457_v54  ;;  %v742_v57 = vld [vmem:[%s1198_s3 + $0x28] sm:$0xff]   ;;  %v716_v62 = vunpack.c.l.bf16 %v739_v45 }
 0x116   :  { %v821_v2 = vpop.eup %820  ;;  %v539_v3 = vadd.f32 %v708_v55, %v491_v63  ;;  %v463_v5 = vadd.f32 1.0, %v819_v0  ;;  %v728_v28 = vunpack.c.l.bf16 %v742_v57  ;;  %v729_v46 = vunpack.c.h.bf16 %v742_v57 }
 0x117   :  { %v823_v6 = vpop.eup %822  ;;  %v547_v9 = vadd.f32 %v724_v61, %v499_v1  ;;  %v471_v13 = vadd.f32 1.0, %v821_v2 }
 0x118   :  { %v825_v14 = vpop.eup %824  ;;  %v690_v56 = vpack.c.bf16 %v539_v3, %v539_v3  ;;  %v492_v15 = vmul.f32 %v823_v6, %v1026_v7  ;;  %846 = vrcp.f32 %v463_v5  ;;  %v717_v6 = vunpack.c.h.bf16 %v739_v45 }
 0x119   :  { %v827_v17 = vpop.eup %826  ;;  %v698_v18 = vpack.c.bf16 %v547_v9, %v547_v9  ;;  %v500_v19 = vmul.f32 %v825_v14, %v1029_v8  ;;  %848 = vrcp.f32 %v471_v13  ;;  %v740_v13 = vld [vmem:[%s1198_s3 + $0x18] sm:$0xff]  }
 0x11a   :  { %v829_v20 = vpop.eup %828  ;;  %620 = vst.msk [vmem:[%s1199_s4] sm:$0xf] %vm619_vm1, %v690_v56  ;;  %v540_v21 = vadd.f32 %v709_v4, %v492_v15  ;;  %v464_v25 = vadd.f32 1.0, %v827_v17  ;;  %v744_v15 = vld [vmem:[%s1198_s3 + $0x38] sm:$0xff]  }
 0x11b   :  { %v831_v7 = vpop.eup %830  ;;  %628 = vst.msk [vmem:[%s1199_s4 + $0x20] sm:$0xf] %vm619_vm1, %v698_v18  ;;  %v548_v27 = vadd.f32 %v725_v10, %v500_v19  ;;  %v472_v29 = vadd.f32 1.0, %v829_v20  ;;  %v720_v18 = vunpack.c.l.bf16 %v740_v13  ;;  %v736_v20 = vunpack.c.l.bf16 %v744_v15 }
 0x11c   :  { %v833_v8 = vpop.eup %832  ;;  %v691_v31 = vpack.c.bf16 %v540_v21, %v540_v21  ;;  %v493_v32 = vmul.f32 %v831_v7, %v1036_v23  ;;  %850 = vrcp.f32 %v464_v25 }
 0x11d   :  { %v835_v33 = vpop.eup %834  ;;  %v699_v34 = vpack.c.bf16 %v548_v27, %v548_v27  ;;  %v501_v35 = vmul.f32 %v833_v8, %v1039_v24  ;;  %852 = vrcp.f32 %v472_v29 }
 0x11e   :  { %v837_v36 = vpop.eup %836  ;;  %621 = vst.msk [vmem:[%s1199_s4 + $0x4] sm:$0xf] %vm619_vm1, %v691_v31  ;;  %v541_v37 = vadd.f32 %v712_v22, %v493_v32  ;;  %v465_v42 = vadd.f32 1.0, %v835_v33  ;;  %v737_v31 = vunpack.c.h.bf16 %v744_v15 }
 0x11f   :  { %v839_v43 = vpop.eup %838  ;;  %629 = vst.msk [vmem:[%s1199_s4 + $0x24] sm:$0xf] %vm619_vm1, %v699_v34  ;;  %v549_v23 = vadd.f32 %v728_v28, %v501_v35  ;;  %v473_v47 = vadd.f32 1.0, %v837_v36  ;;  %v721_v28 = vunpack.c.h.bf16 %v740_v13 }
 0x120   :  { %v841_v24 = vpop.eup %840  ;;  %v692_v48 = vpack.c.bf16 %v541_v37, %v541_v37  ;;  %v494_v49 = vmul.f32 %v839_v43, %v1046_v39  ;;  %854 = vrcp.f32 %v465_v42  ;;  %v743_v39 = vld [vmem:[%s1198_s3 + $0x30] sm:$0xff]  }
 0x121   :  { %v843_v50 = vpop.eup %842  ;;  %v700_v51 = vpack.c.bf16 %v549_v23, %v549_v23  ;;  %v502_v52 = vmul.f32 %v841_v24, %v1049_v40  ;;  %856 = vrcp.f32 %v473_v47  ;;  %v732_v1 = vunpack.c.l.bf16 %v743_v39 }
 0x122   :  { %v845_v53 = vpop.eup %844  ;;  %622 = vst.msk [vmem:[%s1199_s4 + $0x8] sm:$0xf] %vm619_vm1, %v692_v48  ;;  %v542_v54 = vadd.f32 %v713_v38, %v494_v49  ;;  %v466_v55 = vadd.f32 1.0, %v843_v50  ;;  %v733_v11 = vunpack.c.h.bf16 %v743_v39 }
 0x123   :  { %630 = vst.msk [vmem:[%s1199_s4 + $0x28] sm:$0xf] %vm619_vm1, %v700_v51  ;;  %v550_v40 = vadd.f32 %v729_v46, %v502_v52  ;;  %v474_v59 = vadd.f32 1.0, %v845_v53 }
 0x124   :  { %v693_v61 = vpack.c.bf16 %v542_v54, %v542_v54  ;;  %858 = vrcp.f32 %v466_v55 }
 0x125   :  { %v847_v63 = vpop.eup %846  ;;  %v701_v0 = vpack.c.bf16 %v550_v40, %v550_v40  ;;  %860 = vrcp.f32 %v474_v59 }
 0x126   :  { %v849_v2 = vpop.eup %848  ;;  %623 = vst.msk [vmem:[%s1199_s4 + $0xc] sm:$0xf] %vm619_vm1, %v693_v61  ;;  %v495_v3 = vmul.f32 %v847_v63, %v1056_v58 }
 0x127   :  { %631 = vst.msk [vmem:[%s1199_s4 + $0x2c] sm:$0xf] %vm619_vm1, %v701_v0  ;;  %v503_v4 = vmul.f32 %v849_v2, %v1060_v60 }
 0x128   :  { %v543_v5 = vadd.f32 %v716_v62, %v495_v3 }
 0x129   :  { %v851_v9 = vpop.eup %850  ;;  %v551_v10 = vadd.f32 %v732_v1, %v503_v4 }
 0x12a   :  { %v853_v14 = vpop.eup %852  ;;  %v694_v56 = vpack.c.bf16 %v543_v5, %v543_v5  ;;  %v496_v58 = vmul.f32 %v851_v9, %v1066_v12 }
 0x12b   :  { %v702_v57 = vpack.c.bf16 %v551_v10, %v551_v10  ;;  %v504_v60 = vmul.f32 %v853_v14, %v1071_v16 }
 0x12c   :  { %624 = vst.msk [vmem:[%s1199_s4 + $0x10] sm:$0xf] %vm619_vm1, %v694_v56  ;;  %v544_v17 = vadd.f32 %v717_v6, %v496_v58 }
 0x12d   :  { %v855_v19 = vpop.eup %854  ;;  %632 = vst.msk [vmem:[%s1199_s4 + $0x30] sm:$0xf] %vm619_vm1, %v702_v57  ;;  %v552_v12 = vadd.f32 %v733_v11, %v504_v60 }
 0x12e   :  { %v857_v21 = vpop.eup %856  ;;  %v695_v22 = vpack.c.bf16 %v544_v17, %v544_v17  ;;  %v497_v25 = vmul.f32 %v855_v19, %v1076_v26 }
 0x12f   :  { %v703_v16 = vpack.c.bf16 %v552_v12, %v552_v12  ;;  %v505_v7 = vmul.f32 %v857_v21, %v1079_v30 }
 0x130   :  { %625 = vst.msk [vmem:[%s1199_s4 + $0x14] sm:$0xf] %vm619_vm1, %v695_v22  ;;  %v545_v27 = vadd.f32 %v720_v18, %v497_v25 }
 0x131   :  { %v859_v29 = vpop.eup %858  ;;  %633 = vst.msk [vmem:[%s1199_s4 + $0x34] sm:$0xf] %vm619_vm1, %v703_v16  ;;  %v553_v8 = vadd.f32 %v736_v20, %v505_v7 }
 0x132   :  { %v861_v32 = vpop.eup %860  ;;  %v696_v26 = vpack.c.bf16 %v545_v27, %v545_v27  ;;  %v498_v33 = vmul.f32 %v859_v29, %v1084_v41 }
 0x133   :  { %v704_v30 = vpack.c.bf16 %v553_v8, %v553_v8  ;;  %v506_v34 = vmul.f32 %v861_v32, %v1087_v44 }
 0x134   :  { %626 = vst.msk [vmem:[%s1199_s4 + $0x18] sm:$0xf] %vm619_vm1, %v696_v26  ;;  %v546_v35 = vadd.f32 %v721_v28, %v498_v33 }
 0x135   :  { %634 = vst.msk [vmem:[%s1199_s4 + $0x38] sm:$0xf] %vm619_vm1, %v704_v30  ;;  %v554_v36 = vadd.f32 %v737_v31, %v506_v34 }
 0x136   :  { %v697_v37 = vpack.c.bf16 %v546_v35, %v546_v35 }
 0x137   :  { %v705_v38 = vpack.c.bf16 %v554_v36, %v554_v36 }
 0x138   :  { %627 = vst.msk [vmem:[%s1199_s4 + $0x1c] sm:$0xf] %vm619_vm1, %v697_v37 }
 0x139   :  { %635 = vst.msk [vmem:[%s1199_s4 + $0x3c] sm:$0xf] %vm619_vm1, %v705_v38 }

// kernel: elandarknet_fwd.31
= control target key start
LH: loop header
LB: loop body
LE: loop exit
PB: predicated region body
PF: predicated region fallthrough
CT: control target
= control target key end

     0   :  { %vm105_vm0 = vcmask 130048   ;;  %vm279_vm1 = vcmask 261120   ;;  %vm584_vm2 = vcmask 257024   ;;  %s1065_s3 = inlined_call_operand.vmem [shape: bf16[16,32], index: 3, kind: input, shape index: {}]   ;;  %s1066_s2 = inlined_call_operand.vmem [shape: bf16[32,32], index: 2, kind: input, shape index: {}]   ;;  %s1067_s1 = inlined_call_operand.vmem [shape: bf16[128,16], index: 1, kind: input, shape index: {}]   ;;  %s1068_s0 = inlined_call_operand.vmem [shape: bf16[128,32], index: 0, kind: input, shape index: {}]   ;;  %s1069_s4 = inlined_call_operand.vmem [shape: f32[1,32], index: 4, kind: input, shape index: {}]   ;;  %s1070_s5 = inlined_call_operand.vmem [shape: bf16[128,32], index: 5, kind: output, shape index: {}]  }
   0x1   :  { %v730_v0 = vld [vmem:[%s1065_s3] sm:$0xff]   ;;  %v731_v1 = vld [vmem:[%s1066_s2 + $0x8] sm:$0xff]   ;;  %v737_v7 = vld [vmem:[%s1067_s1 + $0x10] sm:$0xff]  }
   0x2   :  { %692 = vmatprep.subr.bf16.mxu0 %v730_v0  ;;  %v732_v2 = vld [vmem:[%s1067_s1] sm:$0xff]   ;;  %710 = vmatprep.subr.bf16.mxu1 %v731_v1  ;;  %v733_v3 = vld [vmem:[%s1067_s1 + $0x8] sm:$0xff]   ;;  %v739_v8 = vld [vmem:[%s1068_s0 + $0x10] sm:$0xff]  }
   0x3   :  { %693 = vmatpush3.bf16.msra.mxu0 %v730_v0  ;;  %711 = vmatpush3.bf16.msra.mxu1 %v731_v1  ;;  %v734_v4 = vld [vmem:[%s1066_s2] sm:$0xff]   ;;  %v736_v6 = vld [vmem:[%s1068_s0 + $0x8] sm:$0xff]   ;;  %v738_v9 = vld [vmem:[%s1067_s1 + $0x18] sm:$0xff]  }
   0x4   :  { %694 = vmatprep.mubr.msk.bf16.mxu0 %vm105_vm0, %v732_v2  ;;  %v735_v5 = vld [vmem:[%s1068_s0] sm:$0xff]   ;;  %712 = vmatprep.subr.bf16.mxu1 %v734_v4  ;;  %v740_v11 = vld [vmem:[%s1068_s0 + $0x18] sm:$0xff]   ;;  %v742_v13 = vld [vmem:[%s1067_s1 + $0x28] sm:$0xff]  }
   0x5   :  { %714 = vmatprep.mubr.msk.bf16.mxu1 %vm279_vm1, %v735_v5  ;;  %v741_v10 = vld [vmem:[%s1067_s1 + $0x20] sm:$0xff]   ;;  %v745_v14 = vld [vmem:[%s1067_s1 + $0x30] sm:$0xff]   ;;  %v744_v15 = vld [vmem:[%s1068_s0 + $0x28] sm:$0xff]  }
   0x6   :  { %695 = vmatmul.mubr.msk.bf16.vlgmr.msra.gmra.mxu0 %vm105_vm0, %v733_v3  ;;  %v743_v12 = vld [vmem:[%s1068_s0 + $0x20] sm:$0xff]   ;;  %v747_v16 = vld [vmem:[%s1068_s0 + $0x30] sm:$0xff]   ;;  %v746_v17 = vld [vmem:[%s1067_s1 + $0x38] sm:$0xff]  }
   0x7   :  { %713 = vmatpush3.bf16.msra.mxu1 %v734_v4  ;;  %698 = vmatprep.mubr.msk.bf16.mxu0 %vm105_vm0, %v737_v7  ;;  %v748_v18 = vld [vmem:[%s1068_s0 + $0x38] sm:$0xff]   ;;  %v919_v23 = vld [vmem:[%s1069_s4] ss:$0 sm:$0xff] }
   0xa   :  { %715 = vmatmul.mubr.msk.bf16.vlgmr.msra.gmra.mxu1 %vm279_vm1, %v736_v6 }
   0xb   :  { %718 = vmatprep.mubr.msk.bf16.mxu1 %vm279_vm1, %v739_v8 }
   0xe   :  { %699 = vmatmul.mubr.msk.bf16.gmra.mxu0 %vm105_vm0, %v738_v9 }
   0xf   :  { %702 = vmatprep.mubr.msk.bf16.mxu0 %vm105_vm0, %v741_v10 }
  0x12   :  { %719 = vmatmul.mubr.msk.bf16.gmra.mxu1 %vm279_vm1, %v740_v11 }
  0x13   :  { %722 = vmatprep.mubr.msk.bf16.mxu1 %vm279_vm1, %v743_v12 }
  0x16   :  { %703 = vmatmul.mubr.msk.bf16.gmra.mxu0 %vm105_vm0, %v742_v13 }
  0x17   :  { %706 = vmatprep.mubr.msk.bf16.mxu0 %vm105_vm0, %v745_v14 }
  0x1a   :  { %723 = vmatmul.mubr.msk.bf16.gmra.mxu1 %vm279_vm1, %v744_v15 }
  0x1b   :  { %726 = vmatprep.mubr.msk.bf16.mxu1 %vm279_vm1, %v747_v16 }
  0x1e   :  { %707 = vmatmul.mubr.msk.bf16.gmra.mxu0 %vm105_vm0, %v746_v17 }
  0x22   :  { %727 = vmatmul.mubr.msk.bf16.gmra.mxu1 %vm279_vm1, %v748_v18 }
  0xc6   :  { %v696_v19 = vpop.f32.mrf.mxu0 }
  0xc8   :  { %v164_v20 = vpop.f32.mrf.mxu0 }
  0xca   :  { %v697_v21 = vpop.f32.mrf.mxu0  ;;  %v716_v22 = vpop.f32.mrf.mxu1 }
  0xcb   :  { %v347_v24 = vadd.f32 %v716_v22, %v696_v19 }
  0xcc   :  { %v167_v25 = vpop.f32.mrf.mxu0  ;;  %v338_v26 = vpop.f32.mrf.mxu1 }
  0xcd   :  { %v922_v27 = vadd.f32 %v919_v23, %v347_v24  ;;  %v339_v28 = vadd.f32 %v338_v26, %v164_v20 }
  0xce   :  { %v700_v29 = vpop.f32.mrf.mxu0  ;;  %v717_v30 = vpop.f32.mrf.mxu1 }
  0xcf   :  { %v426_v31 = vsub.f32 0.0, %v922_v27  ;;  %v926_v32 = vadd.f32 %v919_v23, %v339_v28  ;;  %v350_v33 = vadd.f32 %v717_v30, %v697_v21 }
  0xd0   :  { %v180_v34 = vpop.f32.mrf.mxu0  ;;  %v341_v35 = vpop.f32.mrf.mxu1 }
  0xd1   :  { %v444_v36 = vmul.f32 1.442695, %v426_v31  ;;  %v424_v37 = vsub.f32 0.0, %v926_v32  ;;  %v930_v38 = vadd.f32 %v919_v23, %v350_v33  ;;  %v342_v39 = vadd.f32 %v341_v35, %v167_v25 }
  0xd2   :  { %v701_v40 = vpop.f32.mrf.mxu0  ;;  %v720_v41 = vpop.f32.mrf.mxu1 }
  0xd3   :  { %749 = vpow2.f32 %v444_v36  ;;  %v440_v42 = vmul.f32 1.442695, %v424_v37  ;;  %v427_v43 = vsub.f32 0.0, %v930_v38  ;;  %v934_v44 = vadd.f32 %v919_v23, %v342_v39 }
  0xd4   :  { %v183_v45 = vpop.f32.mrf.mxu0  ;;  %v363_v46 = vadd.f32 %v720_v41, %v700_v29  ;;  %v354_v47 = vpop.f32.mrf.mxu1 }
  0xd5   :  { %751 = vpow2.f32 %v440_v42  ;;  %v446_v48 = vmul.f32 1.442695, %v427_v43  ;;  %v425_v49 = vsub.f32 0.0, %v934_v44  ;;  %v355_v50 = vadd.f32 %v354_v47, %v180_v34 }
  0xd6   :  { %v704_v51 = vpop.f32.mrf.mxu0  ;;  %v938_v52 = vadd.f32 %v919_v23, %v363_v46  ;;  %v721_v53 = vpop.f32.mrf.mxu1 }
  0xd7   :  { %753 = vpow2.f32 %v446_v48  ;;  %v442_v54 = vmul.f32 1.442695, %v425_v49  ;;  %v941_v55 = vadd.f32 %v919_v23, %v355_v50  ;;  %v366_v56 = vadd.f32 %v721_v53, %v701_v40 }
  0xd8   :  { %v196_v57 = vpop.f32.mrf.mxu0  ;;  %v430_v58 = vsub.f32 0.0, %v938_v52  ;;  %v357_v59 = vpop.f32.mrf.mxu1 }
  0xd9   :  { %755 = vpow2.f32 %v442_v54  ;;  %v428_v60 = vsub.f32 0.0, %v941_v55  ;;  %v946_v61 = vadd.f32 %v919_v23, %v366_v56  ;;  %v358_v62 = vadd.f32 %v357_v59, %v183_v45 }
  0xda   :  { %v705_v63 = vpop.f32.mrf.mxu0  ;;  %v452_v0 = vmul.f32 1.442695, %v430_v58  ;;  %v724_v1 = vpop.f32.mrf.mxu1 }
  0xdb   :  { %v448_v2 = vmul.f32 1.442695, %v428_v60  ;;  %v431_v3 = vsub.f32 0.0, %v946_v61  ;;  %v950_v4 = vadd.f32 %v919_v23, %v358_v62  ;;  %v379_v5 = vadd.f32 %v724_v1, %v704_v51 }
  0xdc   :  { %v199_v6 = vpop.f32.mrf.mxu0  ;;  %757 = vpow2.f32 %v452_v0  ;;  %v370_v7 = vpop.f32.mrf.mxu1 }
  0xdd   :  { %759 = vpow2.f32 %v448_v2  ;;  %v454_v8 = vmul.f32 1.442695, %v431_v3  ;;  %v429_v9 = vsub.f32 0.0, %v950_v4  ;;  %v954_v10 = vadd.f32 %v919_v23, %v379_v5 }
  0xde   :  { %v708_v11 = vpop.f32.mrf.mxu0  ;;  %v371_v12 = vadd.f32 %v370_v7, %v196_v57  ;;  %v725_v13 = vpop.f32.mrf.mxu1 }
  0xdf   :  { %761 = vpow2.f32 %v454_v8  ;;  %v450_v14 = vmul.f32 1.442695, %v429_v9  ;;  %v434_v15 = vsub.f32 0.0, %v954_v10  ;;  %v382_v16 = vadd.f32 %v725_v13, %v705_v63 }
  0xe0   :  { %v750_v17 = vpop.eup %749  ;;  %v958_v18 = vadd.f32 %v919_v23, %v371_v12  ;;  %v212_v19 = vpop.f32.mrf.mxu0 }
  0xe1   :  { %v373_v20 = vpop.f32.mrf.mxu1  ;;  %v474_v21 = vadd.f32 1.0, %v750_v17  ;;  %763 = vpow2.f32 %v450_v14  ;;  %v460_v22 = vmul.f32 1.442695, %v434_v15  ;;  %v961_v24 = vadd.f32 %v919_v23, %v382_v16 }
  0xe2   :  { %v752_v25 = vpop.eup %751  ;;  %v432_v26 = vsub.f32 0.0, %v958_v18  ;;  %v374_v28 = vadd.f32 %v373_v20, %v199_v6  ;;  %v709_v37 = vpop.f32.mrf.mxu0 }
  0xe3   :  { %v728_v29 = vpop.f32.mrf.mxu1  ;;  %765 = vrcp.f32 %v474_v21  ;;  %v472_v30 = vadd.f32 1.0, %v752_v25  ;;  %v435_v31 = vsub.f32 0.0, %v961_v24 }
  0xe4   :  { %v395_v33 = vadd.f32 %v728_v29, %v708_v11  ;;  %v754_v34 = vpop.eup %753  ;;  %767 = vpow2.f32 %v460_v22  ;;  %v456_v35 = vmul.f32 1.442695, %v432_v26  ;;  %v966_v36 = vadd.f32 %v919_v23, %v374_v28  ;;  %v215_v53 = vpop.f32.mrf.mxu0 }
  0xe5   :  { %v386_v39 = vpop.f32.mrf.mxu1  ;;  %769 = vrcp.f32 %v472_v30  ;;  %v475_v40 = vadd.f32 1.0, %v754_v34  ;;  %v462_v41 = vmul.f32 1.442695, %v435_v31 }
  0xe6   :  { %v969_v42 = vadd.f32 %v919_v23, %v395_v33  ;;  %v756_v43 = vpop.eup %755  ;;  %771 = vpow2.f32 %v456_v35  ;;  %v433_v45 = vsub.f32 0.0, %v966_v36  ;;  %v387_v46 = vadd.f32 %v386_v39, %v212_v19 }
  0xe7   :  { %v729_v47 = vpop.f32.mrf.mxu1  ;;  %773 = vrcp.f32 %v475_v40  ;;  %v473_v48 = vadd.f32 1.0, %v756_v43 }
  0xe8   :  { %v438_v49 = vsub.f32 0.0, %v969_v42  ;;  %v398_v50 = vadd.f32 %v729_v47, %v709_v37  ;;  %775 = vpow2.f32 %v462_v41  ;;  %v458_v51 = vmul.f32 1.442695, %v433_v45 }
  0xe9   :  { %v974_v54 = vadd.f32 %v919_v23, %v387_v46  ;;  %v389_v56 = vpop.f32.mrf.mxu1  ;;  %v758_v57 = vpop.eup %757  ;;  %777 = vrcp.f32 %v473_v48 }
  0xea   :  { %v468_v58 = vmul.f32 1.442695, %v438_v49  ;;  %v977_v59 = vadd.f32 %v919_v23, %v398_v50  ;;  %v390_v60 = vadd.f32 %v389_v56, %v215_v53  ;;  %v760_v62 = vpop.eup %759  ;;  %v478_v63 = vadd.f32 1.0, %v758_v57 }
  0xeb   :  { %779 = vpow2.f32 %v458_v51  ;;  %v436_v0 = vsub.f32 0.0, %v974_v54  ;;  %v476_v1 = vadd.f32 1.0, %v760_v62 }
  0xec   :  { %781 = vpow2.f32 %v468_v58  ;;  %v439_v2 = vsub.f32 0.0, %v977_v59  ;;  %v982_v3 = vadd.f32 %v919_v23, %v390_v60  ;;  %v762_v5 = vpop.eup %761 }
  0xed   :  { %783 = vrcp.f32 %v478_v63  ;;  %v464_v6 = vmul.f32 1.442695, %v436_v0  ;;  %v479_v7 = vadd.f32 1.0, %v762_v5 }
  0xee   :  { %785 = vrcp.f32 %v476_v1  ;;  %v470_v8 = vmul.f32 1.442695, %v439_v2  ;;  %v437_v9 = vsub.f32 0.0, %v982_v3  ;;  %v764_v11 = vpop.eup %763 }
  0xef   :  { %787 = vpow2.f32 %v464_v6  ;;  %v477_v12 = vadd.f32 1.0, %v764_v11 }
  0xf0   :  { %789 = vrcp.f32 %v479_v7  ;;  %v466_v13 = vmul.f32 1.442695, %v437_v9  ;;  %v766_v14 = vpop.eup %765 }
  0xf1   :  { %791 = vpow2.f32 %v470_v8  ;;  %v768_v15 = vpop.eup %767  ;;  %v506_v16 = vmul.f32 %v766_v14, %v922_v27 }
  0xf2   :  { %793 = vrcp.f32 %v477_v12  ;;  %v770_v23 = vpop.eup %769  ;;  %v482_v17 = vadd.f32 1.0, %v768_v15 }
  0xf3   :  { %795 = vpow2.f32 %v466_v13  ;;  %v772_v19 = vpop.eup %771  ;;  %v659_v20 = vpack.c.bf16 %v506_v16, %v506_v16  ;;  %v504_v21 = vmul.f32 %v770_v23, %v926_v32 }
  0xf4   :  { %v774_v22 = vpop.eup %773  ;;  %797 = vrcp.f32 %v482_v17  ;;  %v480_v25 = vadd.f32 1.0, %v772_v19 }
  0xf5   :  { %v776_v26 = vpop.eup %775  ;;  %587 = vst.msk [vmem:[%s1070_s5 + $0x8] sm:$0xf] %vm584_vm2, %v659_v20  ;;  %v657_v28 = vpack.c.bf16 %v504_v21, %v504_v21  ;;  %v507_v27 = vmul.f32 %v774_v22, %v930_v38 }
  0xf6   :  { %v778_v29 = vpop.eup %777  ;;  %799 = vrcp.f32 %v480_v25  ;;  %v483_v30 = vadd.f32 1.0, %v776_v26 }
  0xf7   :  { %585 = vst.msk [vmem:[%s1070_s5] sm:$0xf] %vm584_vm2, %v657_v28  ;;  %v660_v32 = vpack.c.bf16 %v507_v27, %v507_v27  ;;  %v505_v33 = vmul.f32 %v778_v29, %v934_v44 }
  0xf8   :  { %v780_v31 = vpop.eup %779  ;;  %801 = vrcp.f32 %v483_v30 }
  0xf9   :  { %v782_v34 = vpop.eup %781  ;;  %v481_v35 = vadd.f32 1.0, %v780_v31  ;;  %588 = vst.msk [vmem:[%s1070_s5 + $0xc] sm:$0xf] %vm584_vm2, %v660_v32  ;;  %v658_v38 = vpack.c.bf16 %v505_v33, %v505_v33 }
  0xfa   :  { %v784_v37 = vpop.eup %783  ;;  %v486_v39 = vadd.f32 1.0, %v782_v34 }
  0xfb   :  { %v786_v40 = vpop.eup %785  ;;  %v510_v41 = vmul.f32 %v784_v37, %v938_v52  ;;  %803 = vrcp.f32 %v481_v35  ;;  %586 = vst.msk [vmem:[%s1070_s5 + $0x4] sm:$0xf] %vm584_vm2, %v658_v38 }
  0xfc   :  { %v788_v43 = vpop.eup %787  ;;  %v508_v44 = vmul.f32 %v786_v40, %v941_v55  ;;  %805 = vrcp.f32 %v486_v39 }
  0xfd   :  { %v790_v45 = vpop.eup %789  ;;  %v663_v46 = vpack.c.bf16 %v510_v41, %v510_v41  ;;  %v484_v47 = vadd.f32 1.0, %v788_v43 }
  0xfe   :  { %v792_v48 = vpop.eup %791  ;;  %v661_v49 = vpack.c.bf16 %v508_v44, %v508_v44  ;;  %v511_v50 = vmul.f32 %v790_v45, %v946_v61 }
  0xff   :  { %v794_v51 = vpop.eup %793  ;;  %591 = vst.msk [vmem:[%s1070_s5 + $0x18] sm:$0xf] %vm584_vm2, %v663_v46  ;;  %807 = vrcp.f32 %v484_v47  ;;  %v487_v52 = vadd.f32 1.0, %v792_v48 }
 0x100   :  { %v796_v53 = vpop.eup %795  ;;  %589 = vst.msk [vmem:[%s1070_s5 + $0x10] sm:$0xf] %vm584_vm2, %v661_v49  ;;  %v664_v55 = vpack.c.bf16 %v511_v50, %v511_v50  ;;  %v509_v56 = vmul.f32 %v794_v51, %v950_v4 }
 0x101   :  { %809 = vrcp.f32 %v487_v52  ;;  %v485_v57 = vadd.f32 1.0, %v796_v53  ;;  %v798_v61 = vpop.eup %797 }
 0x102   :  { %592 = vst.msk [vmem:[%s1070_s5 + $0x1c] sm:$0xf] %vm584_vm2, %v664_v55  ;;  %v662_v58 = vpack.c.bf16 %v509_v56, %v509_v56  ;;  %v514_v60 = vmul.f32 %v798_v61, %v954_v10 }
 0x103   :  { %811 = vrcp.f32 %v485_v57  ;;  %v800_v62 = vpop.eup %799 }
 0x104   :  { %590 = vst.msk [vmem:[%s1070_s5 + $0x14] sm:$0xf] %vm584_vm2, %v662_v58  ;;  %v667_v63 = vpack.c.bf16 %v514_v60, %v514_v60  ;;  %v512_v4 = vmul.f32 %v800_v62, %v958_v18 }
 0x105   :  { %v802_v0 = vpop.eup %801 }
 0x106   :  { %595 = vst.msk [vmem:[%s1070_s5 + $0x28] sm:$0xf] %vm584_vm2, %v667_v63  ;;  %v665_v1 = vpack.c.bf16 %v512_v4, %v512_v4  ;;  %v515_v2 = vmul.f32 %v802_v0, %v961_v24 }
 0x108   :  { %v804_v10 = vpop.eup %803  ;;  %593 = vst.msk [vmem:[%s1070_s5 + $0x20] sm:$0xf] %vm584_vm2, %v665_v1  ;;  %v668_v6 = vpack.c.bf16 %v515_v2, %v515_v2 }
 0x109   :  { %v806_v5 = vpop.eup %805  ;;  %v513_v7 = vmul.f32 %v804_v10, %v966_v36 }
 0x10a   :  { %v518_v18 = vmul.f32 %v806_v5, %v969_v42  ;;  %596 = vst.msk [vmem:[%s1070_s5 + $0x2c] sm:$0xf] %vm584_vm2, %v668_v6 }
 0x10b   :  { %v666_v8 = vpack.c.bf16 %v513_v7, %v513_v7 }
 0x10c   :  { %v808_v9 = vpop.eup %807  ;;  %v671_v24 = vpack.c.bf16 %v518_v18, %v518_v18 }
 0x10d   :  { %594 = vst.msk [vmem:[%s1070_s5 + $0x24] sm:$0xf] %vm584_vm2, %v666_v8  ;;  %v516_v11 = vmul.f32 %v808_v9, %v974_v54 }
 0x10e   :  { %v810_v12 = vpop.eup %809  ;;  %599 = vst.msk [vmem:[%s1070_s5 + $0x38] sm:$0xf] %vm584_vm2, %v671_v24 }
 0x10f   :  { %v669_v36 = vpack.c.bf16 %v516_v11, %v516_v11  ;;  %v519_v42 = vmul.f32 %v810_v12, %v977_v59 }
 0x110   :  { %v812_v13 = vpop.eup %811 }
 0x111   :  { %597 = vst.msk [vmem:[%s1070_s5 + $0x30] sm:$0xf] %vm584_vm2, %v669_v36  ;;  %v672_v14 = vpack.c.bf16 %v519_v42, %v519_v42  ;;  %v517_v15 = vmul.f32 %v812_v13, %v982_v3 }
 0x113   :  { %600 = vst.msk [vmem:[%s1070_s5 + $0x3c] sm:$0xf] %vm584_vm2, %v672_v14  ;;  %v670_v54 = vpack.c.bf16 %v517_v15, %v517_v15 }
 0x115   :  { %598 = vst.msk [vmem:[%s1070_s5 + $0x34] sm:$0xf] %vm584_vm2, %v670_v54 }

// kernel: elandarknet_fwd.33
= control target key start
LH: loop header
LB: loop body
LE: loop exit
PB: predicated region body
PF: predicated region fallthrough
CT: control target
= control target key end

     0   :  { %vm19_vm0 = vcmask 523264   ;;  %v263_v1 = vmov 0.0   ;;  %vm196_vm1 = vcmask 519168   ;;  %s327_s1 = inlined_call_operand.vmem [shape: bf16[64,64], index: 1, kind: input, shape index: {}]   ;;  %s328_s0 = inlined_call_operand.vmem [shape: bf16[32,64], index: 0, kind: input, shape index: {}]   ;;  %s329_s2 = inlined_call_operand.vmem [shape: f32[1,64], index: 2, kind: input, shape index: {}]   ;;  %s330_s3 = inlined_call_operand.vmem [shape: bf16[32,64], index: 3, kind: output, shape index: {}]  }
   0x1   :  { %v241_v0 = vld [vmem:[%s327_s1 + $0x18] sm:$0xff]   ;;  %22 = vst.msk [vmem:[#allocation2 + $0x10] sm:$0xff] %vm19_vm0, %v263_v1  ;;  %20 = vst.msk [vmem:[#allocation2] sm:$0xff] %vm19_vm0, %v263_v1  ;;  %v242_v2 = vld [vmem:[%s327_s1 + $0x10] sm:$0xff]  }
   0x2   :  { %21 = vst.msk [vmem:[#allocation2 + $0x8] sm:$0xff] %vm19_vm0, %v263_v1  ;;  %23 = vst.msk [vmem:[#allocation2 + $0x18] sm:$0xff] %vm19_vm0, %v263_v1  ;;  %228 = vmatprep.subr.bf16.mxu0 %v241_v0  ;;  %v243_v3 = vld [vmem:[%s327_s1 + $0x8] sm:$0xff]   ;;  %v245_v4 = vld [vmem:[%s328_s0] sm:$0xff]  }
   0x3   :  { %229 = vmatpush3.bf16.msra.mxu0 %v241_v0  ;;  %236 = vmatprep.mubr.msk.bf16.mxu0 %vm19_vm0, %v245_v4  ;;  %v244_v5 = vld [vmem:[%s327_s1] sm:$0xff]   ;;  %v246_v6 = vld [vmem:[%s328_s0 + $0x8] sm:$0xff]  }
   0x4   :  { %230 = vmatprep.subr.bf16.mxu0 %v242_v2  ;;  %v213_v19 = vld [vmem:[%s329_s2] ss:$0 sm:$0xff] }
   0x7   :  { %231 = vmatpush3.bf16.msra.mxu0 %v242_v2 }
   0x8   :  { %232 = vmatprep.subr.bf16.mxu0 %v243_v3  ;;  %v26_v7 = vld [vmem:[#allocation2 + $0x10] sm:$0xff]  ;;  %v24_v9 = vld [vmem:[#allocation2] sm:$0xff] }
   0x9   :  { %v27_v12 = vld [vmem:[#allocation2 + $0x18] sm:$0xff]  ;;  %v25_v15 = vld [vmem:[#allocation2 + $0x8] sm:$0xff] }
   0xb   :  { %233 = vmatpush3.bf16.msra.mxu0 %v243_v3 }
   0xc   :  { %234 = vmatprep.subr.bf16.mxu0 %v244_v5 }
   0xf   :  { %235 = vmatpush3.bf16.msra.mxu0 %v244_v5 }
  0x12   :  { %237 = vmatmul.mubr.msk.bf16.vlgmr.msra.gmra.mxu0 %vm19_vm0, %v246_v6 }
  0xd2   :  { %v238_v8 = vpop.f32.mrf.mxu0 }
  0xd3   :  { %v132_v10 = vadd.f32 %v238_v8, %v26_v7 }
  0xd4   :  { %v115_v11 = vpop.f32.mrf.mxu0 }
  0xd5   :  { %136 = vst.msk [vmem:[#allocation2 + $0x10] sm:$0xff] %vm19_vm0, %v132_v10  ;;  %v130_v13 = vadd.f32 %v115_v11, %v24_v9 }
  0xd6   :  { %v239_v14 = vpop.f32.mrf.mxu0 }
  0xd7   :  { %134 = vst.msk [vmem:[#allocation2] sm:$0xff] %vm19_vm0, %v130_v13  ;;  %v133_v16 = vadd.f32 %v239_v14, %v27_v12 }
  0xd8   :  { %v118_v17 = vpop.f32.mrf.mxu0 }
  0xd9   :  { %137 = vst.msk [vmem:[#allocation2 + $0x18] sm:$0xff] %vm19_vm0, %v133_v16  ;;  %v131_v18 = vadd.f32 %v118_v17, %v25_v15 }
  0xdb   :  { %135 = vst.msk [vmem:[#allocation2 + $0x8] sm:$0xff] %vm19_vm0, %v131_v18 }
  0xdc   :  { %v143_v20 = vld [vmem:[#allocation2 + $0x10] sm:$0xff] }
  0xdd   :  { %v154_v21 = vadd.f32 %v213_v19, %v143_v20 }
  0xde   :  { %v141_v22 = vld [vmem:[#allocation2] sm:$0xff] }
  0xdf   :  { %v158_v23 = vsub.f32 0.0, %v154_v21  ;;  %v152_v24 = vadd.f32 %v213_v19, %v141_v22 }
  0xe0   :  { %v144_v25 = vld [vmem:[#allocation2 + $0x18] sm:$0xff] }
  0xe1   :  { %v164_v26 = vmul.f32 1.442695, %v158_v23  ;;  %v156_v27 = vsub.f32 0.0, %v152_v24  ;;  %v155_v28 = vadd.f32 %v213_v19, %v144_v25 }
  0xe2   :  { %v142_v29 = vld [vmem:[#allocation2 + $0x8] sm:$0xff] }
  0xe3   :  { %247 = vpow2.f32 %v164_v26  ;;  %v160_v30 = vmul.f32 1.442695, %v156_v27  ;;  %v159_v31 = vsub.f32 0.0, %v155_v28  ;;  %v153_v32 = vadd.f32 %v213_v19, %v142_v29 }
  0xe5   :  { %249 = vpow2.f32 %v160_v30  ;;  %v166_v33 = vmul.f32 1.442695, %v159_v31  ;;  %v157_v34 = vsub.f32 0.0, %v153_v32 }
  0xe7   :  { %251 = vpow2.f32 %v166_v33  ;;  %v162_v35 = vmul.f32 1.442695, %v157_v34 }
  0xe9   :  { %253 = vpow2.f32 %v162_v35 }
  0xf0   :  { %v248_v36 = vpop.eup %247 }
  0xf1   :  { %v170_v37 = vadd.f32 1.0, %v248_v36 }
  0xf2   :  { %v250_v38 = vpop.eup %249 }
  0xf3   :  { %255 = vrcp.f32 %v170_v37  ;;  %v168_v39 = vadd.f32 1.0, %v250_v38 }
  0xf4   :  { %v252_v40 = vpop.eup %251 }
  0xf5   :  { %257 = vrcp.f32 %v168_v39  ;;  %v171_v41 = vadd.f32 1.0, %v252_v40 }
  0xf6   :  { %v254_v42 = vpop.eup %253 }
  0xf7   :  { %259 = vrcp.f32 %v171_v41  ;;  %v169_v43 = vadd.f32 1.0, %v254_v42 }
  0xf9   :  { %261 = vrcp.f32 %v169_v43 }
 0x100   :  { %v256_v44 = vpop.eup %255 }
 0x101   :  { %v178_v45 = vmul.f32 %v256_v44, %v154_v21 }
 0x102   :  { %v258_v46 = vpop.eup %257 }
 0x103   :  { %v220_v47 = vpack.c.bf16 %v178_v45, %v178_v45  ;;  %v176_v48 = vmul.f32 %v258_v46, %v152_v24 }
 0x104   :  { %v260_v49 = vpop.eup %259 }
 0x105   :  { %199 = vst.msk [vmem:[%s330_s3 + $0x8] sm:$0xf] %vm196_vm1, %v220_v47  ;;  %v218_v50 = vpack.c.bf16 %v176_v48, %v176_v48  ;;  %v179_v51 = vmul.f32 %v260_v49, %v155_v28 }
 0x106   :  { %v262_v52 = vpop.eup %261 }
 0x107   :  { %197 = vst.msk [vmem:[%s330_s3] sm:$0xf] %vm196_vm1, %v218_v50  ;;  %v221_v53 = vpack.c.bf16 %v179_v51, %v179_v51  ;;  %v177_v54 = vmul.f32 %v262_v52, %v153_v32 }
 0x109   :  { %200 = vst.msk [vmem:[%s330_s3 + $0xc] sm:$0xf] %vm196_vm1, %v221_v53  ;;  %v219_v55 = vpack.c.bf16 %v177_v54, %v177_v54 }
 0x10b   :  { %198 = vst.msk [vmem:[%s330_s3 + $0x4] sm:$0xf] %vm196_vm1, %v219_v55 }

// kernel: elandarknet_fwd.32
= control target key start
LH: loop header
LB: loop body
LE: loop exit
PB: predicated region body
PF: predicated region fallthrough
CT: control target
= control target key end

     0   :  { %vm210_vm0 = vcmask 261120   ;;  %vm19_vm1 = vcmask 523264   ;;  %v509_v24 = vmov 0.0   ;;  %vm382_vm2 = vcmask 519168   ;;  %s625_s1 = inlined_call_operand.vmem [shape: bf16[288,64], index: 1, kind: input, shape index: {}]   ;;  %s626_s0 = inlined_call_operand.vmem [shape: bf16[32,288], index: 0, kind: input, shape index: {}]   ;;  %s627_s2 = inlined_call_operand.vmem [shape: f32[1,64], index: 2, kind: input, shape index: {}]   ;;  %s628_s3 = inlined_call_operand.vmem [shape: bf16[32,64], index: 3, kind: output, shape index: {}]  }
   0x1   :  { %v467_v0 = vld [vmem:[%s625_s1 + $0x78] sm:$0xff]   ;;  %v469_v2 = vld [vmem:[%s625_s1 + $0x70] sm:$0xff]   ;;  %v471_v4 = vld [vmem:[%s625_s1 + $0x68] sm:$0xff]   ;;  %20 = vst.msk [vmem:[#allocation2] sm:$0xff] %vm19_vm1, %v509_v24 }
   0x2   :  { %v468_v1 = vld [vmem:[%s625_s1 + $0x38] sm:$0xff]   ;;  %426 = vmatprep.subr.bf16.mxu0 %v467_v0  ;;  %v470_v3 = vld [vmem:[%s625_s1 + $0x30] sm:$0xff]   ;;  %v472_v5 = vld [vmem:[%s625_s1 + $0x28] sm:$0xff]   ;;  %21 = vst.msk [vmem:[#allocation2 + $0x8] sm:$0xff] %vm19_vm1, %v509_v24 }
   0x3   :  { %427 = vmatpush3.bf16.msra.mxu0 %v468_v1  ;;  %v473_v6 = vld [vmem:[%s625_s1 + $0x60] sm:$0xff]   ;;  %v475_v8 = vld [vmem:[%s625_s1 + $0x58] sm:$0xff]   ;;  %v481_v9 = vld [vmem:[%s625_s1 + $0x88] sm:$0xff]   ;;  %22 = vst.msk [vmem:[#allocation2 + $0x10] sm:$0xff] %vm19_vm1, %v509_v24 }
   0x4   :  { %428 = vmatprep.subr.bf16.mxu0 %v469_v2  ;;  %v474_v7 = vld [vmem:[%s625_s1 + $0x20] sm:$0xff]   ;;  %v476_v10 = vld [vmem:[%s625_s1 + $0x18] sm:$0xff]   ;;  %v477_v11 = vld [vmem:[%s625_s1 + $0x50] sm:$0xff]   ;;  %458 = vmatprep.subr.bf16.mxu1 %v481_v9  ;;  %23 = vst.msk [vmem:[#allocation2 + $0x18] sm:$0xff] %vm19_vm1, %v509_v24 }
   0x5   :  { %v478_v12 = vld [vmem:[%s625_s1 + $0x10] sm:$0xff]   ;;  %459 = vmatpush3.bf16.msra.mxu1 %v481_v9  ;;  %v484_v13 = vld [vmem:[%s625_s1 + $0x80] sm:$0xff]   ;;  %v479_v14 = vld [vmem:[%s625_s1 + $0x48] sm:$0xff]  }
   0x6   :  { %460 = vmatprep.subr.bf16.mxu1 %v484_v13  ;;  %v487_v15 = vld [vmem:[%s626_s0 + $0x4] ss:$12 sps:$4 sm:$0xff]   ;;  %v488_v16 = vld [vmem:[%s626_s0 + $0x8] ss:$12 sps:$4 sm:$0xff]   ;;  %v489_v17 = vld [vmem:[%s626_s0 + $0x20] ss:$12 sps:$4 sm:$0xff]  }
   0x7   :  { %429 = vmatpush3.bf16.msra.mxu0 %v470_v3  ;;  %249 = vmatprep.mubr.bf16.mxu0 %v487_v15  ;;  %v480_v18 = vld [vmem:[%s625_s1 + $0x8] sm:$0xff]   ;;  %v482_v19 = vld [vmem:[%s625_s1 + $0x40] sm:$0xff]  }
   0x8   :  { %430 = vmatprep.subr.bf16.mxu0 %v471_v4  ;;  %462 = vmatprep.mubr.msk.bf16.mxu1 %vm210_vm0, %v488_v16  ;;  %v483_v20 = vld [vmem:[%s625_s1] sm:$0xff]   ;;  %v490_v22 = vld [vmem:[%s626_s0 + $0x1c] ss:$12 sps:$4 sm:$0xff]  }
   0x9   :  { %461 = vmatpush3.bf16.msra.mxu1 %v484_v13  ;;  %v485_v21 = vld [vmem:[%s626_s0] ss:$12 sps:$4 sm:$0xff]   ;;  %v492_v23 = vld [vmem:[%s626_s0 + $0x18] ss:$12 sps:$4 sm:$0xff]  }
   0xa   :  { %v24_v32 = vld [vmem:[#allocation2] sm:$0xff]  ;;  %v25_v39 = vld [vmem:[#allocation2 + $0x8] sm:$0xff]  ;;  %v26_v44 = vld [vmem:[#allocation2 + $0x10] sm:$0xff] }
   0xb   :  { %431 = vmatpush3.bf16.msra.mxu0 %v472_v5  ;;  %v417_v47 = vld [vmem:[%s627_s2] ss:$0 sm:$0xff]  ;;  %v27_v52 = vld [vmem:[#allocation2 + $0x18] sm:$0xff] }
   0xc   :  { %432 = vmatprep.subr.bf16.mxu0 %v473_v6  ;;  %463 = vmatmul.mubr.msk.bf16.vlgmr.msra.gmra.mxu1 %vm210_vm0, %v489_v17 }
   0xf   :  { %433 = vmatpush3.bf16.msra.mxu0 %v474_v7 }
  0x10   :  { %434 = vmatprep.subr.bf16.mxu0 %v475_v8 }
  0x13   :  { %435 = vmatpush3.bf16.msra.mxu0 %v476_v10 }
  0x14   :  { %436 = vmatprep.subr.bf16.mxu0 %v477_v11 }
  0x17   :  { %437 = vmatpush3.bf16.msra.mxu0 %v478_v12 }
  0x18   :  { %438 = vmatprep.subr.bf16.mxu0 %v479_v14 }
  0x1b   :  { %439 = vmatpush3.bf16.msra.mxu0 %v480_v18 }
  0x1c   :  { %440 = vmatprep.subr.bf16.mxu0 %v482_v19 }
  0x1f   :  { %441 = vmatpush3.bf16.msra.mxu0 %v483_v20 }
  0x22   :  { %250 = vmatmul.mubr.bf16.vlgmr.msra.gmra.mxu0 %v485_v21 }
  0x23   :  { %257 = vmatprep.mubr.bf16.mxu0 %v490_v22 }
  0x2a   :  { %258 = vmatmul.mubr.bf16.gmra.mxu0 %v492_v23 }
  0xcc   :  { %v464_v25 = vpop.f32.mrf.mxu1 }
  0xce   :  { %v300_v26 = vpop.f32.mrf.mxu1 }
  0xd0   :  { %v465_v29 = vpop.f32.mrf.mxu1 }
  0xd2   :  { %v303_v35 = vpop.f32.mrf.mxu1 }
  0xe2   :  { %v442_v27 = vpop.f32.mrf.mxu0 }
  0xe4   :  { %v443_v28 = vpop.f32.mrf.mxu0 }
  0xe5   :  { %v444_v30 = vadd.f32 %v443_v28, %v442_v27 }
  0xe6   :  { %v445_v31 = vpop.f32.mrf.mxu0 }
  0xe7   :  { %v301_v33 = vadd.f32 %v444_v30, %v300_v26 }
  0xe8   :  { %v446_v34 = vpop.f32.mrf.mxu0 }
  0xe9   :  { %v315_v36 = vadd.f32 %v301_v33, %v24_v32  ;;  %v447_v37 = vadd.f32 %v446_v34, %v445_v31 }
  0xea   :  { %v448_v38 = vpop.f32.mrf.mxu0 }
  0xeb   :  { %320 = vst.msk [vmem:[#allocation2] sm:$0xff] %vm19_vm1, %v315_v36  ;;  %v304_v40 = vadd.f32 %v447_v37, %v303_v35 }
  0xec   :  { %v449_v41 = vpop.f32.mrf.mxu0 }
  0xed   :  { %v316_v42 = vadd.f32 %v304_v40, %v25_v39  ;;  %v450_v43 = vadd.f32 %v449_v41, %v448_v38 }
  0xee   :  { %v451_v45 = vpop.f32.mrf.mxu0 }
  0xef   :  { %321 = vst.msk [vmem:[#allocation2 + $0x8] sm:$0xff] %vm19_vm1, %v316_v42  ;;  %v309_v46 = vadd.f32 %v464_v25, %v450_v43 }
  0xf0   :  { %v452_v48 = vpop.f32.mrf.mxu0 }
  0xf1   :  { %v317_v49 = vadd.f32 %v309_v46, %v26_v44  ;;  %v453_v50 = vadd.f32 %v452_v48, %v451_v45 }
  0xf2   :  { %v327_v51 = vld [vmem:[#allocation2] sm:$0xff] }
  0xf3   :  { %v338_v53 = vadd.f32 %v417_v47, %v327_v51  ;;  %322 = vst.msk [vmem:[#allocation2 + $0x10] sm:$0xff] %vm19_vm1, %v317_v49  ;;  %v312_v54 = vadd.f32 %v465_v29, %v453_v50 }
  0xf5   :  { %v342_v55 = vsub.f32 0.0, %v338_v53  ;;  %v318_v56 = vadd.f32 %v312_v54, %v27_v52 }
  0xf6   :  { %v328_v57 = vld [vmem:[#allocation2 + $0x8] sm:$0xff] }
  0xf7   :  { %v346_v58 = vmul.f32 1.442695, %v342_v55  ;;  %v339_v59 = vadd.f32 %v417_v47, %v328_v57  ;;  %323 = vst.msk [vmem:[#allocation2 + $0x18] sm:$0xff] %vm19_vm1, %v318_v56 }
  0xf9   :  { %493 = vpow2.f32 %v346_v58  ;;  %v343_v60 = vsub.f32 0.0, %v339_v59 }
  0xfa   :  { %v329_v61 = vld [vmem:[#allocation2 + $0x10] sm:$0xff] }
  0xfb   :  { %v348_v62 = vmul.f32 1.442695, %v343_v60  ;;  %v340_v63 = vadd.f32 %v417_v47, %v329_v61 }
  0xfd   :  { %495 = vpow2.f32 %v348_v62  ;;  %v344_v0 = vsub.f32 0.0, %v340_v63 }
  0xfe   :  { %v330_v1 = vld [vmem:[#allocation2 + $0x18] sm:$0xff] }
  0xff   :  { %v350_v2 = vmul.f32 1.442695, %v344_v0  ;;  %v341_v3 = vadd.f32 %v417_v47, %v330_v1 }
 0x101   :  { %497 = vpow2.f32 %v350_v2  ;;  %v345_v4 = vsub.f32 0.0, %v341_v3 }
 0x103   :  { %v352_v5 = vmul.f32 1.442695, %v345_v4 }
 0x105   :  { %499 = vpow2.f32 %v352_v5 }
 0x106   :  { %v494_v6 = vpop.eup %493 }
 0x107   :  { %v354_v7 = vadd.f32 1.0, %v494_v6 }
 0x109   :  { %501 = vrcp.f32 %v354_v7 }
 0x10a   :  { %v496_v8 = vpop.eup %495 }
 0x10b   :  { %v355_v9 = vadd.f32 1.0, %v496_v8 }
 0x10d   :  { %503 = vrcp.f32 %v355_v9 }
 0x10e   :  { %v498_v10 = vpop.eup %497 }
 0x10f   :  { %v356_v11 = vadd.f32 1.0, %v498_v10 }
 0x111   :  { %505 = vrcp.f32 %v356_v11 }
 0x112   :  { %v500_v12 = vpop.eup %499 }
 0x113   :  { %v357_v13 = vadd.f32 1.0, %v500_v12 }
 0x115   :  { %507 = vrcp.f32 %v357_v13 }
 0x116   :  { %v502_v14 = vpop.eup %501 }
 0x117   :  { %v362_v15 = vmul.f32 %v502_v14, %v338_v53 }
 0x119   :  { %v422_v16 = vpack.c.bf16 %v362_v15, %v362_v15 }
 0x11a   :  { %v504_v17 = vpop.eup %503 }
 0x11b   :  { %383 = vst.msk [vmem:[%s628_s3] sm:$0xf] %vm382_vm2, %v422_v16  ;;  %v363_v18 = vmul.f32 %v504_v17, %v339_v59 }
 0x11d   :  { %v423_v19 = vpack.c.bf16 %v363_v18, %v363_v18 }
 0x11e   :  { %v506_v20 = vpop.eup %505 }
 0x11f   :  { %384 = vst.msk [vmem:[%s628_s3 + $0x4] sm:$0xf] %vm382_vm2, %v423_v19  ;;  %v364_v21 = vmul.f32 %v506_v20, %v340_v63 }
 0x121   :  { %v424_v22 = vpack.c.bf16 %v364_v21, %v364_v21 }
 0x122   :  { %v508_v23 = vpop.eup %507 }
 0x123   :  { %385 = vst.msk [vmem:[%s628_s3 + $0x8] sm:$0xf] %vm382_vm2, %v424_v22  ;;  %v365_v24 = vmul.f32 %v508_v23, %v341_v3 }
 0x125   :  { %v425_v25 = vpack.c.bf16 %v365_v24, %v365_v24 }
 0x127   :  { %386 = vst.msk [vmem:[%s628_s3 + $0xc] sm:$0xf] %vm382_vm2, %v425_v25 }

// kernel: elandarknet_fwd.34
= control target key start
LH: loop header
LB: loop body
LE: loop exit
PB: predicated region body
PF: predicated region fallthrough
CT: control target
= control target key end

     0   :  { %vm19_vm0 = vcmask 261120   ;;  %v508_v24 = vmov 0.0   ;;  %vm381_vm1 = vcmask 257024   ;;  %s626_s1 = inlined_call_operand.vmem [shape: bf16[288,32], index: 1, kind: input, shape index: {}]   ;;  %s627_s0 = inlined_call_operand.vmem [shape: bf16[32,288], index: 0, kind: input, shape index: {}]   ;;  %s628_s2 = inlined_call_operand.vmem [shape: f32[1,32], index: 2, kind: input, shape index: {}]   ;;  %s629_s3 = inlined_call_operand.vmem [shape: bf16[32,32], index: 3, kind: output, shape index: {}]  }
   0x1   :  { %v466_v0 = vld [vmem:[%s626_s1 + $0x78] sm:$0xff]   ;;  %v468_v2 = vld [vmem:[%s626_s1 + $0x70] sm:$0xff]   ;;  %v470_v4 = vld [vmem:[%s626_s1 + $0x68] sm:$0xff]   ;;  %20 = vst.msk [vmem:[#allocation2] sm:$0xff] %vm19_vm0, %v508_v24 }
   0x2   :  { %v467_v1 = vld [vmem:[%s626_s1 + $0x38] sm:$0xff]   ;;  %425 = vmatprep.subr.bf16.mxu0 %v466_v0  ;;  %v469_v3 = vld [vmem:[%s626_s1 + $0x30] sm:$0xff]   ;;  %v471_v5 = vld [vmem:[%s626_s1 + $0x28] sm:$0xff]   ;;  %21 = vst.msk [vmem:[#allocation2 + $0x8] sm:$0xff] %vm19_vm0, %v508_v24 }
   0x3   :  { %426 = vmatpush3.bf16.msra.mxu0 %v467_v1  ;;  %v472_v6 = vld [vmem:[%s626_s1 + $0x60] sm:$0xff]   ;;  %v474_v8 = vld [vmem:[%s626_s1 + $0x58] sm:$0xff]   ;;  %v480_v9 = vld [vmem:[%s626_s1 + $0x88] sm:$0xff]   ;;  %22 = vst.msk [vmem:[#allocation2 + $0x10] sm:$0xff] %vm19_vm0, %v508_v24 }
   0x4   :  { %427 = vmatprep.subr.bf16.mxu0 %v468_v2  ;;  %v473_v7 = vld [vmem:[%s626_s1 + $0x20] sm:$0xff]   ;;  %v475_v10 = vld [vmem:[%s626_s1 + $0x18] sm:$0xff]   ;;  %v476_v11 = vld [vmem:[%s626_s1 + $0x50] sm:$0xff]   ;;  %457 = vmatprep.subr.bf16.mxu1 %v480_v9  ;;  %23 = vst.msk [vmem:[#allocation2 + $0x18] sm:$0xff] %vm19_vm0, %v508_v24 }
   0x5   :  { %v477_v12 = vld [vmem:[%s626_s1 + $0x10] sm:$0xff]   ;;  %458 = vmatpush3.bf16.msra.mxu1 %v480_v9  ;;  %v483_v13 = vld [vmem:[%s626_s1 + $0x80] sm:$0xff]   ;;  %v478_v14 = vld [vmem:[%s626_s1 + $0x48] sm:$0xff]  }
   0x6   :  { %459 = vmatprep.subr.bf16.mxu1 %v483_v13  ;;  %v486_v15 = vld [vmem:[%s627_s0 + $0x4] ss:$12 sps:$4 sm:$0xff]   ;;  %v487_v16 = vld [vmem:[%s627_s0 + $0x8] ss:$12 sps:$4 sm:$0xff]   ;;  %v488_v17 = vld [vmem:[%s627_s0 + $0x20] ss:$12 sps:$4 sm:$0xff]  }
   0x7   :  { %428 = vmatpush3.bf16.msra.mxu0 %v469_v3  ;;  %249 = vmatprep.mubr.bf16.mxu0 %v486_v15  ;;  %v479_v18 = vld [vmem:[%s626_s1 + $0x8] sm:$0xff]   ;;  %v481_v19 = vld [vmem:[%s626_s1 + $0x40] sm:$0xff]  }
   0x8   :  { %429 = vmatprep.subr.bf16.mxu0 %v470_v4  ;;  %461 = vmatprep.mubr.msk.bf16.mxu1 %vm19_vm0, %v487_v16  ;;  %v482_v20 = vld [vmem:[%s626_s1] sm:$0xff]   ;;  %v489_v22 = vld [vmem:[%s627_s0 + $0x1c] ss:$12 sps:$4 sm:$0xff]  }
   0x9   :  { %460 = vmatpush3.bf16.msra.mxu1 %v483_v13  ;;  %v484_v21 = vld [vmem:[%s627_s0] ss:$12 sps:$4 sm:$0xff]   ;;  %v491_v23 = vld [vmem:[%s627_s0 + $0x18] ss:$12 sps:$4 sm:$0xff]  }
   0xa   :  { %v24_v32 = vld [vmem:[#allocation2] sm:$0xff]  ;;  %v25_v39 = vld [vmem:[#allocation2 + $0x8] sm:$0xff]  ;;  %v26_v44 = vld [vmem:[#allocation2 + $0x10] sm:$0xff] }
   0xb   :  { %430 = vmatpush3.bf16.msra.mxu0 %v471_v5  ;;  %v416_v47 = vld [vmem:[%s628_s2] ss:$0 sm:$0xff]  ;;  %v27_v52 = vld [vmem:[#allocation2 + $0x18] sm:$0xff] }
   0xc   :  { %431 = vmatprep.subr.bf16.mxu0 %v472_v6  ;;  %462 = vmatmul.mubr.msk.bf16.vlgmr.msra.gmra.mxu1 %vm19_vm0, %v488_v17 }
   0xf   :  { %432 = vmatpush3.bf16.msra.mxu0 %v473_v7 }
  0x10   :  { %433 = vmatprep.subr.bf16.mxu0 %v474_v8 }
  0x13   :  { %434 = vmatpush3.bf16.msra.mxu0 %v475_v10 }
  0x14   :  { %435 = vmatprep.subr.bf16.mxu0 %v476_v11 }
  0x17   :  { %436 = vmatpush3.bf16.msra.mxu0 %v477_v12 }
  0x18   :  { %437 = vmatprep.subr.bf16.mxu0 %v478_v14 }
  0x1b   :  { %438 = vmatpush3.bf16.msra.mxu0 %v479_v18 }
  0x1c   :  { %439 = vmatprep.subr.bf16.mxu0 %v481_v19 }
  0x1f   :  { %440 = vmatpush3.bf16.msra.mxu0 %v482_v20 }
  0x22   :  { %250 = vmatmul.mubr.bf16.vlgmr.msra.gmra.mxu0 %v484_v21 }
  0x23   :  { %257 = vmatprep.mubr.bf16.mxu0 %v489_v22 }
  0x2a   :  { %258 = vmatmul.mubr.bf16.gmra.mxu0 %v491_v23 }
  0xcc   :  { %v463_v25 = vpop.f32.mrf.mxu1 }
  0xce   :  { %v300_v26 = vpop.f32.mrf.mxu1 }
  0xd0   :  { %v464_v29 = vpop.f32.mrf.mxu1 }
  0xd2   :  { %v303_v35 = vpop.f32.mrf.mxu1 }
  0xe2   :  { %v441_v27 = vpop.f32.mrf.mxu0 }
  0xe4   :  { %v442_v28 = vpop.f32.mrf.mxu0 }
  0xe5   :  { %v443_v30 = vadd.f32 %v442_v28, %v441_v27 }
  0xe6   :  { %v444_v31 = vpop.f32.mrf.mxu0 }
  0xe7   :  { %v301_v33 = vadd.f32 %v443_v30, %v300_v26 }
  0xe8   :  { %v445_v34 = vpop.f32.mrf.mxu0 }
  0xe9   :  { %v315_v36 = vadd.f32 %v301_v33, %v24_v32  ;;  %v446_v37 = vadd.f32 %v445_v34, %v444_v31 }
  0xea   :  { %v447_v38 = vpop.f32.mrf.mxu0 }
  0xeb   :  { %319 = vst.msk [vmem:[#allocation2] sm:$0xff] %vm19_vm0, %v315_v36  ;;  %v304_v40 = vadd.f32 %v446_v37, %v303_v35 }
  0xec   :  { %v448_v41 = vpop.f32.mrf.mxu0 }
  0xed   :  { %v316_v42 = vadd.f32 %v304_v40, %v25_v39  ;;  %v449_v43 = vadd.f32 %v448_v41, %v447_v38 }
  0xee   :  { %v450_v45 = vpop.f32.mrf.mxu0 }
  0xef   :  { %320 = vst.msk [vmem:[#allocation2 + $0x8] sm:$0xff] %vm19_vm0, %v316_v42  ;;  %v309_v46 = vadd.f32 %v463_v25, %v449_v43 }
  0xf0   :  { %v451_v48 = vpop.f32.mrf.mxu0 }
  0xf1   :  { %v317_v49 = vadd.f32 %v309_v46, %v26_v44  ;;  %v452_v50 = vadd.f32 %v451_v48, %v450_v45 }
  0xf2   :  { %v326_v51 = vld [vmem:[#allocation2] sm:$0xff] }
  0xf3   :  { %v337_v53 = vadd.f32 %v416_v47, %v326_v51  ;;  %321 = vst.msk [vmem:[#allocation2 + $0x10] sm:$0xff] %vm19_vm0, %v317_v49  ;;  %v312_v54 = vadd.f32 %v464_v29, %v452_v50 }
  0xf5   :  { %v341_v55 = vsub.f32 0.0, %v337_v53  ;;  %v318_v56 = vadd.f32 %v312_v54, %v27_v52 }
  0xf6   :  { %v327_v57 = vld [vmem:[#allocation2 + $0x8] sm:$0xff] }
  0xf7   :  { %v345_v58 = vmul.f32 1.442695, %v341_v55  ;;  %v338_v59 = vadd.f32 %v416_v47, %v327_v57  ;;  %322 = vst.msk [vmem:[#allocation2 + $0x18] sm:$0xff] %vm19_vm0, %v318_v56 }
  0xf9   :  { %492 = vpow2.f32 %v345_v58  ;;  %v342_v60 = vsub.f32 0.0, %v338_v59 }
  0xfa   :  { %v328_v61 = vld [vmem:[#allocation2 + $0x10] sm:$0xff] }
  0xfb   :  { %v347_v62 = vmul.f32 1.442695, %v342_v60  ;;  %v339_v63 = vadd.f32 %v416_v47, %v328_v61 }
  0xfd   :  { %494 = vpow2.f32 %v347_v62  ;;  %v343_v0 = vsub.f32 0.0, %v339_v63 }
  0xfe   :  { %v329_v1 = vld [vmem:[#allocation2 + $0x18] sm:$0xff] }
  0xff   :  { %v349_v2 = vmul.f32 1.442695, %v343_v0  ;;  %v340_v3 = vadd.f32 %v416_v47, %v329_v1 }
 0x101   :  { %496 = vpow2.f32 %v349_v2  ;;  %v344_v4 = vsub.f32 0.0, %v340_v3 }
 0x103   :  { %v351_v5 = vmul.f32 1.442695, %v344_v4 }
 0x105   :  { %498 = vpow2.f32 %v351_v5 }
 0x106   :  { %v493_v6 = vpop.eup %492 }
 0x107   :  { %v353_v7 = vadd.f32 1.0, %v493_v6 }
 0x109   :  { %500 = vrcp.f32 %v353_v7 }
 0x10a   :  { %v495_v8 = vpop.eup %494 }
 0x10b   :  { %v354_v9 = vadd.f32 1.0, %v495_v8 }
 0x10d   :  { %502 = vrcp.f32 %v354_v9 }
 0x10e   :  { %v497_v10 = vpop.eup %496 }
 0x10f   :  { %v355_v11 = vadd.f32 1.0, %v497_v10 }
 0x111   :  { %504 = vrcp.f32 %v355_v11 }
 0x112   :  { %v499_v12 = vpop.eup %498 }
 0x113   :  { %v356_v13 = vadd.f32 1.0, %v499_v12 }
 0x115   :  { %506 = vrcp.f32 %v356_v13 }
 0x116   :  { %v501_v14 = vpop.eup %500 }
 0x117   :  { %v361_v15 = vmul.f32 %v501_v14, %v337_v53 }
 0x119   :  { %v421_v16 = vpack.c.bf16 %v361_v15, %v361_v15 }
 0x11a   :  { %v503_v17 = vpop.eup %502 }
 0x11b   :  { %382 = vst.msk [vmem:[%s629_s3] sm:$0xf] %vm381_vm1, %v421_v16  ;;  %v362_v18 = vmul.f32 %v503_v17, %v338_v59 }
 0x11d   :  { %v422_v19 = vpack.c.bf16 %v362_v18, %v362_v18 }
 0x11e   :  { %v505_v20 = vpop.eup %504 }
 0x11f   :  { %383 = vst.msk [vmem:[%s629_s3 + $0x4] sm:$0xf] %vm381_vm1, %v422_v19  ;;  %v363_v21 = vmul.f32 %v505_v20, %v339_v63 }
 0x121   :  { %v423_v22 = vpack.c.bf16 %v363_v21, %v363_v21 }
 0x122   :  { %v507_v23 = vpop.eup %506 }
 0x123   :  { %384 = vst.msk [vmem:[%s629_s3 + $0x8] sm:$0xf] %vm381_vm1, %v423_v22  ;;  %v364_v24 = vmul.f32 %v507_v23, %v340_v3 }
 0x125   :  { %v424_v25 = vpack.c.bf16 %v364_v24, %v364_v24 }
 0x127   :  { %385 = vst.msk [vmem:[%s629_s3 + $0xc] sm:$0xf] %vm381_vm1, %v424_v25 }

// kernel: elandarknet_fwd.35
= control target key start
LH: loop header
LB: loop body
LE: loop exit
PB: predicated region body
PF: predicated region fallthrough
CT: control target
= control target key end

     0   :  { %vm22_vm0 = vcmask 261120   ;;  %v532_v24 = vmov 0.0   ;;  %vm396_vm1 = vcmask 257024   ;;  %s665_s1 = inlined_call_operand.vmem [shape: bf16[288,32], index: 1, kind: input, shape index: {}]   ;;  %s666_s0 = inlined_call_operand.vmem [shape: bf16[32,288], index: 0, kind: input, shape index: {}]   ;;  %s667_s2 = inlined_call_operand.vmem [shape: f32[1,32], index: 2, kind: input, shape index: {}]   ;;  %s668_s3 = inlined_call_operand.vmem [shape: bf16[32,32], index: 3, kind: input, shape index: {}]   ;;  %s669_s4 = inlined_call_operand.vmem [shape: bf16[32,32], index: 4, kind: output, shape index: {}]  }
   0x1   :  { %v490_v0 = vld [vmem:[%s665_s1 + $0x78] sm:$0xff]   ;;  %v492_v2 = vld [vmem:[%s665_s1 + $0x70] sm:$0xff]   ;;  %v494_v4 = vld [vmem:[%s665_s1 + $0x68] sm:$0xff]   ;;  %23 = vst.msk [vmem:[#allocation2] sm:$0xff] %vm22_vm0, %v532_v24 }
   0x2   :  { %v491_v1 = vld [vmem:[%s665_s1 + $0x38] sm:$0xff]   ;;  %449 = vmatprep.subr.bf16.mxu0 %v490_v0  ;;  %v493_v3 = vld [vmem:[%s665_s1 + $0x30] sm:$0xff]   ;;  %v495_v5 = vld [vmem:[%s665_s1 + $0x28] sm:$0xff]   ;;  %24 = vst.msk [vmem:[#allocation2 + $0x8] sm:$0xff] %vm22_vm0, %v532_v24 }
   0x3   :  { %450 = vmatpush3.bf16.msra.mxu0 %v491_v1  ;;  %v496_v6 = vld [vmem:[%s665_s1 + $0x60] sm:$0xff]   ;;  %v498_v8 = vld [vmem:[%s665_s1 + $0x58] sm:$0xff]   ;;  %v504_v9 = vld [vmem:[%s665_s1 + $0x88] sm:$0xff]   ;;  %25 = vst.msk [vmem:[#allocation2 + $0x10] sm:$0xff] %vm22_vm0, %v532_v24 }
   0x4   :  { %451 = vmatprep.subr.bf16.mxu0 %v492_v2  ;;  %v497_v7 = vld [vmem:[%s665_s1 + $0x20] sm:$0xff]   ;;  %v499_v10 = vld [vmem:[%s665_s1 + $0x18] sm:$0xff]   ;;  %v500_v11 = vld [vmem:[%s665_s1 + $0x50] sm:$0xff]   ;;  %481 = vmatprep.subr.bf16.mxu1 %v504_v9  ;;  %26 = vst.msk [vmem:[#allocation2 + $0x18] sm:$0xff] %vm22_vm0, %v532_v24 }
   0x5   :  { %v501_v12 = vld [vmem:[%s665_s1 + $0x10] sm:$0xff]   ;;  %482 = vmatpush3.bf16.msra.mxu1 %v504_v9  ;;  %v507_v13 = vld [vmem:[%s665_s1 + $0x80] sm:$0xff]   ;;  %v502_v14 = vld [vmem:[%s665_s1 + $0x48] sm:$0xff]  }
   0x6   :  { %483 = vmatprep.subr.bf16.mxu1 %v507_v13  ;;  %v510_v15 = vld [vmem:[%s666_s0 + $0x4] ss:$12 sps:$4 sm:$0xff]   ;;  %v511_v16 = vld [vmem:[%s666_s0 + $0x8] ss:$12 sps:$4 sm:$0xff]   ;;  %v512_v17 = vld [vmem:[%s666_s0 + $0x20] ss:$12 sps:$4 sm:$0xff]  }
   0x7   :  { %452 = vmatpush3.bf16.msra.mxu0 %v493_v3  ;;  %252 = vmatprep.mubr.bf16.mxu0 %v510_v15  ;;  %v503_v18 = vld [vmem:[%s665_s1 + $0x8] sm:$0xff]   ;;  %v505_v19 = vld [vmem:[%s665_s1 + $0x40] sm:$0xff]  }
   0x8   :  { %453 = vmatprep.subr.bf16.mxu0 %v494_v4  ;;  %485 = vmatprep.mubr.msk.bf16.mxu1 %vm22_vm0, %v511_v16  ;;  %v506_v20 = vld [vmem:[%s665_s1] sm:$0xff]   ;;  %v513_v22 = vld [vmem:[%s666_s0 + $0x1c] ss:$12 sps:$4 sm:$0xff]  }
   0x9   :  { %484 = vmatpush3.bf16.msra.mxu1 %v507_v13  ;;  %v508_v21 = vld [vmem:[%s666_s0] ss:$12 sps:$4 sm:$0xff]   ;;  %v515_v23 = vld [vmem:[%s666_s0 + $0x18] ss:$12 sps:$4 sm:$0xff]  }
   0xa   :  { %v27_v32 = vld [vmem:[#allocation2] sm:$0xff]  ;;  %v28_v39 = vld [vmem:[#allocation2 + $0x8] sm:$0xff]  ;;  %v29_v44 = vld [vmem:[#allocation2 + $0x10] sm:$0xff] }
   0xb   :  { %454 = vmatpush3.bf16.msra.mxu0 %v495_v5  ;;  %v431_v47 = vld [vmem:[%s667_s2] ss:$0 sm:$0xff]  ;;  %v30_v52 = vld [vmem:[#allocation2 + $0x18] sm:$0xff] }
   0xc   :  { %455 = vmatprep.subr.bf16.mxu0 %v496_v6  ;;  %486 = vmatmul.mubr.msk.bf16.vlgmr.msra.gmra.mxu1 %vm22_vm0, %v512_v17  ;;  %v441_v13 = vld [vmem:[%s668_s3] sm:$0xff]  }
   0xd   :  { %v442_v15 = vunpack.c.l.bf16 %v441_v13 }
   0xf   :  { %456 = vmatpush3.bf16.msra.mxu0 %v497_v7 }
  0x10   :  { %457 = vmatprep.subr.bf16.mxu0 %v498_v8 }
  0x13   :  { %458 = vmatpush3.bf16.msra.mxu0 %v499_v10 }
  0x14   :  { %459 = vmatprep.subr.bf16.mxu0 %v500_v11 }
  0x17   :  { %460 = vmatpush3.bf16.msra.mxu0 %v501_v12 }
  0x18   :  { %461 = vmatprep.subr.bf16.mxu0 %v502_v14 }
  0x1b   :  { %462 = vmatpush3.bf16.msra.mxu0 %v503_v18 }
  0x1c   :  { %463 = vmatprep.subr.bf16.mxu0 %v505_v19  ;;  %v443_v19 = vunpack.c.h.bf16 %v441_v13 }
  0x1f   :  { %464 = vmatpush3.bf16.msra.mxu0 %v506_v20 }
  0x22   :  { %253 = vmatmul.mubr.bf16.vlgmr.msra.gmra.mxu0 %v508_v21  ;;  %v448_v21 = vld [vmem:[%s668_s3 + $0x8] sm:$0xff]  }
  0x23   :  { %260 = vmatprep.mubr.bf16.mxu0 %v513_v22 }
  0x2a   :  { %261 = vmatmul.mubr.bf16.gmra.mxu0 %v515_v23 }
  0xcc   :  { %v487_v25 = vpop.f32.mrf.mxu1 }
  0xce   :  { %v303_v26 = vpop.f32.mrf.mxu1 }
  0xd0   :  { %v488_v29 = vpop.f32.mrf.mxu1 }
  0xd2   :  { %v306_v35 = vpop.f32.mrf.mxu1 }
  0xe2   :  { %v465_v27 = vpop.f32.mrf.mxu0 }
  0xe4   :  { %v466_v28 = vpop.f32.mrf.mxu0 }
  0xe5   :  { %v467_v30 = vadd.f32 %v466_v28, %v465_v27 }
  0xe6   :  { %v468_v31 = vpop.f32.mrf.mxu0 }
  0xe7   :  { %v304_v33 = vadd.f32 %v467_v30, %v303_v26  ;;  %v447_v30 = vunpack.c.h.bf16 %v448_v21 }
  0xe8   :  { %v469_v34 = vpop.f32.mrf.mxu0 }
  0xe9   :  { %v318_v36 = vadd.f32 %v304_v33, %v27_v32  ;;  %v470_v37 = vadd.f32 %v469_v34, %v468_v31 }
  0xea   :  { %v471_v38 = vpop.f32.mrf.mxu0 }
  0xeb   :  { %322 = vst.msk [vmem:[#allocation2] sm:$0xff] %vm22_vm0, %v318_v36  ;;  %v307_v40 = vadd.f32 %v470_v37, %v306_v35 }
  0xec   :  { %v472_v41 = vpop.f32.mrf.mxu0 }
  0xed   :  { %v319_v42 = vadd.f32 %v307_v40, %v28_v39  ;;  %v473_v43 = vadd.f32 %v472_v41, %v471_v38 }
  0xee   :  { %v474_v45 = vpop.f32.mrf.mxu0 }
  0xef   :  { %323 = vst.msk [vmem:[#allocation2 + $0x8] sm:$0xff] %vm22_vm0, %v319_v42  ;;  %v312_v46 = vadd.f32 %v487_v25, %v473_v43  ;;  %v446_v25 = vunpack.c.l.bf16 %v448_v21 }
  0xf0   :  { %v475_v48 = vpop.f32.mrf.mxu0 }
  0xf1   :  { %v320_v49 = vadd.f32 %v312_v46, %v29_v44  ;;  %v476_v50 = vadd.f32 %v475_v48, %v474_v45 }
  0xf2   :  { %v329_v51 = vld [vmem:[#allocation2] sm:$0xff] }
  0xf3   :  { %v340_v53 = vadd.f32 %v431_v47, %v329_v51  ;;  %324 = vst.msk [vmem:[#allocation2 + $0x10] sm:$0xff] %vm22_vm0, %v320_v49  ;;  %v315_v54 = vadd.f32 %v488_v29, %v476_v50 }
  0xf5   :  { %v344_v55 = vsub.f32 0.0, %v340_v53  ;;  %v321_v56 = vadd.f32 %v315_v54, %v30_v52 }
  0xf6   :  { %v330_v57 = vld [vmem:[#allocation2 + $0x8] sm:$0xff] }
  0xf7   :  { %v348_v58 = vmul.f32 1.442695, %v344_v55  ;;  %v341_v59 = vadd.f32 %v431_v47, %v330_v57  ;;  %325 = vst.msk [vmem:[#allocation2 + $0x18] sm:$0xff] %vm22_vm0, %v321_v56 }
  0xf9   :  { %516 = vpow2.f32 %v348_v58  ;;  %v345_v60 = vsub.f32 0.0, %v341_v59 }
  0xfa   :  { %v331_v61 = vld [vmem:[#allocation2 + $0x10] sm:$0xff] }
  0xfb   :  { %v350_v62 = vmul.f32 1.442695, %v345_v60  ;;  %v342_v63 = vadd.f32 %v431_v47, %v331_v61 }
  0xfd   :  { %518 = vpow2.f32 %v350_v62  ;;  %v346_v0 = vsub.f32 0.0, %v342_v63 }
  0xfe   :  { %v332_v1 = vld [vmem:[#allocation2 + $0x18] sm:$0xff] }
  0xff   :  { %v352_v2 = vmul.f32 1.442695, %v346_v0  ;;  %v343_v3 = vadd.f32 %v431_v47, %v332_v1 }
 0x101   :  { %520 = vpow2.f32 %v352_v2  ;;  %v347_v4 = vsub.f32 0.0, %v343_v3 }
 0x103   :  { %v354_v5 = vmul.f32 1.442695, %v347_v4 }
 0x105   :  { %522 = vpow2.f32 %v354_v5 }
 0x106   :  { %v517_v6 = vpop.eup %516 }
 0x107   :  { %v356_v7 = vadd.f32 1.0, %v517_v6 }
 0x109   :  { %524 = vrcp.f32 %v356_v7 }
 0x10a   :  { %v519_v8 = vpop.eup %518 }
 0x10b   :  { %v357_v9 = vadd.f32 1.0, %v519_v8 }
 0x10d   :  { %526 = vrcp.f32 %v357_v9 }
 0x10e   :  { %v521_v10 = vpop.eup %520 }
 0x10f   :  { %v358_v11 = vadd.f32 1.0, %v521_v10 }
 0x111   :  { %528 = vrcp.f32 %v358_v11 }
 0x112   :  { %v523_v12 = vpop.eup %522 }
 0x113   :  { %v359_v14 = vadd.f32 1.0, %v523_v12 }
 0x115   :  { %530 = vrcp.f32 %v359_v14 }
 0x116   :  { %v525_v16 = vpop.eup %524 }
 0x117   :  { %v364_v17 = vmul.f32 %v525_v16, %v340_v53 }
 0x119   :  { %v376_v18 = vadd.f32 %v442_v15, %v364_v17 }
 0x11a   :  { %v527_v20 = vpop.eup %526 }
 0x11b   :  { %v436_v22 = vpack.c.bf16 %v376_v18, %v376_v18  ;;  %v365_v23 = vmul.f32 %v527_v20, %v341_v59 }
 0x11d   :  { %397 = vst.msk [vmem:[%s669_s4] sm:$0xf] %vm396_vm1, %v436_v22  ;;  %v377_v24 = vadd.f32 %v443_v19, %v365_v23 }
 0x11e   :  { %v529_v26 = vpop.eup %528 }
 0x11f   :  { %v437_v27 = vpack.c.bf16 %v377_v24, %v377_v24  ;;  %v366_v28 = vmul.f32 %v529_v26, %v342_v63 }
 0x121   :  { %398 = vst.msk [vmem:[%s669_s4 + $0x4] sm:$0xf] %vm396_vm1, %v437_v27  ;;  %v378_v29 = vadd.f32 %v446_v25, %v366_v28 }
 0x122   :  { %v531_v31 = vpop.eup %530 }
 0x123   :  { %v438_v32 = vpack.c.bf16 %v378_v29, %v378_v29  ;;  %v367_v33 = vmul.f32 %v531_v31, %v343_v3 }
 0x125   :  { %399 = vst.msk [vmem:[%s669_s4 + $0x8] sm:$0xf] %vm396_vm1, %v438_v32  ;;  %v379_v34 = vadd.f32 %v447_v30, %v367_v33 }
 0x127   :  { %v439_v35 = vpack.c.bf16 %v379_v34, %v379_v34 }
 0x129   :  { %400 = vst.msk [vmem:[%s669_s4 + $0xc] sm:$0xf] %vm396_vm1, %v439_v35 }

// kernel: elandarknet_fwd.38
= control target key start
LH: loop header
LB: loop body
LE: loop exit
PB: predicated region body
PF: predicated region fallthrough
CT: control target
= control target key end

     0   :  { %vm69_vm0 = vcmask 261120   ;;  %vm159_vm1 = vcmask 523264   ;;  %vm355_vm2 = vcmask 519168   ;;  %s566_s4 = inlined_call_operand.vmem [shape: bf16[32,64], index: 4, kind: input, shape index: {}]   ;;  %s567_s3 = inlined_call_operand.vmem [shape: bf16[64,64], index: 3, kind: input, shape index: {}]   ;;  %s568_s1 = inlined_call_operand.vmem [shape: bf16[32,32], index: 1, kind: input, shape index: {}]   ;;  %s569_s5 = inlined_call_operand.vmem [shape: bf16[32,64], index: 5, kind: input, shape index: {}]   ;;  %s570_s0 = inlined_call_operand.vmem [shape: bf16[32,64], index: 0, kind: input, shape index: {}]   ;;  %s571_s2 = inlined_call_operand.vmem [shape: bf16[32,32], index: 2, kind: input, shape index: {}]   ;;  %s572_s6 = inlined_call_operand.vmem [shape: f32[1,64], index: 6, kind: input, shape index: {}]   ;;  %s573_s7 = inlined_call_operand.vmem [shape: bf16[32,64], index: 7, kind: output, shape index: {}]  }
   0x1   :  { %v435_v0 = vld [vmem:[%s566_s4 + $0x8] sm:$0xff]   ;;  %v436_v1 = vld [vmem:[%s567_s3 + $0x18] sm:$0xff]   ;;  %v437_v2 = vld [vmem:[%s566_s4] sm:$0xff]  }
   0x2   :  { %407 = vmatprep.subr.bf16.mxu0 %v435_v0  ;;  %415 = vmatprep.subr.bf16.mxu1 %v436_v1  ;;  %v438_v3 = vld [vmem:[%s567_s3 + $0x10] sm:$0xff]   ;;  %v439_v4 = vld [vmem:[%s568_s1] sm:$0xff]   ;;  %v440_v5 = vld [vmem:[%s568_s1 + $0x8] sm:$0xff]  }
   0x3   :  { %408 = vmatpush3.bf16.msra.mxu0 %v435_v0  ;;  %416 = vmatpush3.bf16.msra.mxu1 %v436_v1  ;;  %v441_v6 = vld [vmem:[%s567_s3 + $0x8] sm:$0xff]   ;;  %v443_v8 = vld [vmem:[%s567_s3] sm:$0xff]  }
   0x4   :  { %409 = vmatprep.subr.bf16.mxu0 %v437_v2  ;;  %417 = vmatprep.subr.bf16.mxu1 %v438_v3  ;;  %v442_v7 = vld [vmem:[%s569_s5 + $0x8] sm:$0xff]   ;;  %v444_v9 = vld [vmem:[%s569_s5] sm:$0xff]  }
   0x5   :  { %411 = vmatprep.mubr.msk.bf16.mxu0 %vm69_vm0, %v439_v4  ;;  %v445_v10 = vld [vmem:[%s570_s0] sm:$0xff]   ;;  %v448_v12 = vld [vmem:[%s571_s2 + $0x8] sm:$0xff]  }
   0x6   :  { %v446_v11 = vld [vmem:[%s571_s2] sm:$0xff]   ;;  %423 = vmatprep.mubr.msk.bf16.mxu1 %vm159_vm1, %v445_v10  ;;  %v447_v13 = vld [vmem:[%s570_s0 + $0x8] sm:$0xff]  }
   0x7   :  { %410 = vmatpush3.bf16.msra.mxu0 %v437_v2  ;;  %418 = vmatpush3.bf16.msra.mxu1 %v438_v3  ;;  %v384_v22 = vld [vmem:[%s572_s6] ss:$0 sm:$0xff] }
   0x8   :  { %419 = vmatprep.subr.bf16.mxu1 %v441_v6  ;;  %427 = vmatprep.subr.bf16.mxu0 %v442_v7 }
   0xa   :  { %412 = vmatmul.mubr.msk.bf16.vlgmr.msra.gmra.mxu0 %vm69_vm0, %v440_v5 }
   0xb   :  { %428 = vmatpush3.bf16.msra.mxu0 %v442_v7  ;;  %420 = vmatpush3.bf16.msra.mxu1 %v441_v6 }
   0xc   :  { %429 = vmatprep.subr.bf16.mxu0 %v444_v9  ;;  %421 = vmatprep.subr.bf16.mxu1 %v443_v8 }
   0xd   :  { %431 = vmatprep.mubr.msk.bf16.mxu0 %vm69_vm0, %v446_v11 }
   0xf   :  { %430 = vmatpush3.bf16.msra.mxu0 %v444_v9  ;;  %422 = vmatpush3.bf16.msra.mxu1 %v443_v8 }
  0x12   :  { %432 = vmatmul.mubr.msk.bf16.vlgmr.msra.gmra.mxu0 %vm69_vm0, %v448_v12  ;;  %424 = vmatmul.mubr.msk.bf16.vlgmr.msra.gmra.mxu1 %vm159_vm1, %v447_v13 }
  0xca   :  { %v413_v14 = vpop.f32.mrf.mxu0 }
  0xcc   :  { %v110_v15 = vpop.f32.mrf.mxu0 }
  0xce   :  { %v414_v16 = vpop.f32.mrf.mxu0 }
  0xd0   :  { %v113_v17 = vpop.f32.mrf.mxu0 }
  0xd2   :  { %v433_v18 = vpop.f32.mrf.mxu0  ;;  %v425_v19 = vpop.f32.mrf.mxu1 }
  0xd3   :  { %v209_v20 = vadd.f32 %v425_v19, %v413_v14 }
  0xd4   :  { %v285_v21 = vpop.f32.mrf.mxu0  ;;  %v200_v23 = vpop.f32.mrf.mxu1 }
  0xd5   :  { %v302_v24 = vadd.f32 %v433_v18, %v209_v20  ;;  %v201_v25 = vadd.f32 %v200_v23, %v110_v15 }
  0xd6   :  { %v426_v26 = vpop.f32.mrf.mxu1  ;;  %v434_v27 = vpop.f32.mrf.mxu0 }
  0xd7   :  { %v313_v28 = vadd.f32 %v384_v22, %v302_v24  ;;  %v300_v29 = vadd.f32 %v285_v21, %v201_v25  ;;  %v212_v30 = vadd.f32 %v426_v26, %v414_v16 }
  0xd8   :  { %v203_v31 = vpop.f32.mrf.mxu1  ;;  %v288_v36 = vpop.f32.mrf.mxu0 }
  0xd9   :  { %v317_v32 = vsub.f32 0.0, %v313_v28  ;;  %v311_v33 = vadd.f32 %v384_v22, %v300_v29  ;;  %v303_v34 = vadd.f32 %v434_v27, %v212_v30  ;;  %v204_v35 = vadd.f32 %v203_v31, %v113_v17 }
  0xdb   :  { %v323_v37 = vmul.f32 1.442695, %v317_v32  ;;  %v315_v38 = vsub.f32 0.0, %v311_v33  ;;  %v314_v39 = vadd.f32 %v384_v22, %v303_v34  ;;  %v301_v40 = vadd.f32 %v288_v36, %v204_v35 }
  0xdd   :  { %449 = vpow2.f32 %v323_v37  ;;  %v319_v41 = vmul.f32 1.442695, %v315_v38  ;;  %v318_v42 = vsub.f32 0.0, %v314_v39  ;;  %v312_v43 = vadd.f32 %v384_v22, %v301_v40 }
  0xdf   :  { %451 = vpow2.f32 %v319_v41  ;;  %v325_v44 = vmul.f32 1.442695, %v318_v42  ;;  %v316_v45 = vsub.f32 0.0, %v312_v43 }
  0xe1   :  { %453 = vpow2.f32 %v325_v44  ;;  %v321_v46 = vmul.f32 1.442695, %v316_v45 }
  0xe3   :  { %455 = vpow2.f32 %v321_v46 }
  0xea   :  { %v450_v47 = vpop.eup %449 }
  0xeb   :  { %v329_v48 = vadd.f32 1.0, %v450_v47 }
  0xec   :  { %v452_v49 = vpop.eup %451 }
  0xed   :  { %457 = vrcp.f32 %v329_v48  ;;  %v327_v50 = vadd.f32 1.0, %v452_v49 }
  0xee   :  { %v454_v51 = vpop.eup %453 }
  0xef   :  { %459 = vrcp.f32 %v327_v50  ;;  %v330_v52 = vadd.f32 1.0, %v454_v51 }
  0xf0   :  { %v456_v53 = vpop.eup %455 }
  0xf1   :  { %461 = vrcp.f32 %v330_v52  ;;  %v328_v54 = vadd.f32 1.0, %v456_v53 }
  0xf3   :  { %463 = vrcp.f32 %v328_v54 }
  0xfa   :  { %v458_v55 = vpop.eup %457 }
  0xfb   :  { %v337_v56 = vmul.f32 %v458_v55, %v313_v28 }
  0xfc   :  { %v460_v57 = vpop.eup %459 }
  0xfd   :  { %v391_v58 = vpack.c.bf16 %v337_v56, %v337_v56  ;;  %v335_v59 = vmul.f32 %v460_v57, %v311_v33 }
  0xfe   :  { %v462_v60 = vpop.eup %461 }
  0xff   :  { %358 = vst.msk [vmem:[%s573_s7 + $0x8] sm:$0xf] %vm355_vm2, %v391_v58  ;;  %v389_v61 = vpack.c.bf16 %v335_v59, %v335_v59  ;;  %v338_v62 = vmul.f32 %v462_v60, %v314_v39 }
 0x100   :  { %v464_v63 = vpop.eup %463 }
 0x101   :  { %356 = vst.msk [vmem:[%s573_s7] sm:$0xf] %vm355_vm2, %v389_v61  ;;  %v392_v0 = vpack.c.bf16 %v338_v62, %v338_v62  ;;  %v336_v1 = vmul.f32 %v464_v63, %v312_v43 }
 0x103   :  { %359 = vst.msk [vmem:[%s573_s7 + $0xc] sm:$0xf] %vm355_vm2, %v392_v0  ;;  %v390_v2 = vpack.c.bf16 %v336_v1, %v336_v1 }
 0x105   :  { %357 = vst.msk [vmem:[%s573_s7 + $0x4] sm:$0xf] %vm355_vm2, %v390_v2 }

// kernel: elandarknet_fwd.40
= control target key start
LH: loop header
LB: loop body
LE: loop exit
PB: predicated region body
PF: predicated region fallthrough
CT: control target
= control target key end

     0   :  { %v204_v0 = vmov 0.0   ;;  %vm205_vm0 = vmmov 0   ;;  %s259_s1 = inlined_call_operand.vmem [shape: bf16[128,128], index: 1, kind: input, shape index: {}]   ;;  %s260_s0 = inlined_call_operand.vmem [shape: bf16[8,128], index: 0, kind: input, shape index: {}]   ;;  %s261_s2 = inlined_call_operand.vmem [shape: f32[1,128], index: 2, kind: input, shape index: {}]   ;;  %s262_s3 = inlined_call_operand.vmem [shape: bf16[8,128], index: 3, kind: output, shape index: {}]  }
   0x1   :  { %170 = vmatprep.subr.bf16.mxu0 %v204_v0  ;;  %v192_v1 = vld [vmem:[%s259_s1 + $0x38] sm:$0xff]   ;;  %186 = vmatprep.mubr.msk.bf16.mxu0 %vm205_vm0, %v204_v0  ;;  %v193_v2 = vld [vmem:[%s259_s1 + $0x30] sm:$0xff]   ;;  %v194_v3 = vld [vmem:[%s259_s1 + $0x28] sm:$0xff]  }
   0x2   :  { %171 = vmatpush3.bf16.msra.mxu0 %v192_v1  ;;  %v195_v4 = vld [vmem:[%s259_s1 + $0x20] sm:$0xff]   ;;  %v196_v5 = vld [vmem:[%s259_s1 + $0x18] sm:$0xff]   ;;  %v197_v6 = vld [vmem:[%s259_s1 + $0x10] sm:$0xff]  }
   0x3   :  { %172 = vmatprep.subr.bf16.mxu0 %v204_v0  ;;  %v198_v7 = vld [vmem:[%s259_s1 + $0x8] sm:$0xff]   ;;  %v199_v8 = vld [vmem:[%s259_s1] sm:$0xff]  }
   0x4   :  { %v21_v9 = vld [vmem:[%s260_s0] sm:$0xf] }
   0x5   :  { %v160_v10 = vld [vmem:[%s261_s2] ss:$0 sm:$0xff] }
   0x6   :  { %173 = vmatpush3.bf16.msra.mxu0 %v193_v2 }
   0x7   :  { %174 = vmatprep.subr.bf16.mxu0 %v204_v0 }
   0xa   :  { %175 = vmatpush3.bf16.msra.mxu0 %v194_v3 }
   0xb   :  { %176 = vmatprep.subr.bf16.mxu0 %v204_v0 }
   0xe   :  { %177 = vmatpush3.bf16.msra.mxu0 %v195_v4 }
   0xf   :  { %178 = vmatprep.subr.bf16.mxu0 %v204_v0 }
  0x12   :  { %179 = vmatpush3.bf16.msra.mxu0 %v196_v5 }
  0x13   :  { %180 = vmatprep.subr.bf16.mxu0 %v204_v0 }
  0x16   :  { %181 = vmatpush3.bf16.msra.mxu0 %v197_v6 }
  0x17   :  { %182 = vmatprep.subr.bf16.mxu0 %v204_v0 }
  0x1a   :  { %183 = vmatpush3.bf16.msra.mxu0 %v198_v7 }
  0x1b   :  { %184 = vmatprep.subr.bf16.mxu0 %v204_v0 }
  0x1e   :  { %185 = vmatpush3.bf16.msra.mxu0 %v199_v8 }
  0x21   :  { %187 = vmatmul.mubr.bf16.vlgmr.msra.gmra.mxu0 %v21_v9 }
  0xe1   :  { %v120_v11 = vpop.f32.mrf.mxu0 }
  0xe2   :  { %v139_v12 = vadd.f32 %v160_v10, %v120_v11 }
  0xe3   :  { %v188_v13 = vpop.f32.mrf.mxu0 }
  0xe4   :  { %v140_v14 = vsub.f32 0.0, %v139_v12 }
  0xe5   :  { %v123_v15 = vpop.f32.mrf.mxu0 }
  0xe6   :  { %v141_v16 = vmul.f32 1.442695, %v140_v14 }
  0xe7   :  { %v189_v17 = vpop.f32.mrf.mxu0 }
  0xe8   :  { %200 = vpow2.f32 %v141_v16 }
  0xf5   :  { %v201_v18 = vpop.eup %200 }
  0xf6   :  { %v143_v19 = vadd.f32 1.0, %v201_v18 }
  0xf8   :  { %202 = vrcp.f32 %v143_v19 }
 0x105   :  { %v203_v20 = vpop.eup %202 }
 0x106   :  { %v145_v21 = vmul.f32 %v203_v20, %v139_v12 }
 0x108   :  { %v146_v22 = vpack.c.bf16 %v145_v21, %v145_v21 }
 0x10a   :  { %147 = vst [vmem:[%s262_s3] sm:$0xf] %v146_v22 }

// kernel: elandarknet_fwd.39
= control target key start
LH: loop header
LB: loop body
LE: loop exit
PB: predicated region body
PF: predicated region fallthrough
CT: control target
= control target key end

     0   :  { %v630_v36 = vmov 0.0   ;;  %vm631_vm0 = vmmov 0   ;;  %vm329_vm1 = vcmask 523264   ;;  %s775_s1 = inlined_call_operand.vmem [shape: bf16[576,128], index: 1, kind: input, shape index: {}]   ;;  %s776_s0 = inlined_call_operand.vmem [shape: bf16[8,576], index: 0, kind: input, shape index: {}]   ;;  %s777_s2 = inlined_call_operand.vmem [shape: f32[1,128], index: 2, kind: input, shape index: {}]   ;;  %s778_s3 = inlined_call_operand.vmem [shape: bf16[8,128], index: 3, kind: output, shape index: {}]  }
   0x1   :  { %v585_v0 = vld [vmem:[%s775_s1 + $0x78] sm:$0xff]   ;;  %v589_v4 = vld [vmem:[%s775_s1 + $0x70] sm:$0xff]   ;;  %v593_v8 = vld [vmem:[%s775_s1 + $0x68] sm:$0xff]  }
   0x2   :  { %v586_v1 = vld [vmem:[%s775_s1 + $0xf8] sm:$0xff]   ;;  %522 = vmatprep.subr.bf16.mxu0 %v585_v0  ;;  %v590_v5 = vld [vmem:[%s775_s1 + $0xf0] sm:$0xff]   ;;  %v594_v9 = vld [vmem:[%s775_s1 + $0xe8] sm:$0xff]  }
   0x3   :  { %v587_v2 = vld [vmem:[%s775_s1 + $0x38] sm:$0xff]   ;;  %544 = vmatprep.subr.bf16.mxu1 %v586_v1  ;;  %v591_v6 = vld [vmem:[%s775_s1 + $0x30] sm:$0xff]   ;;  %v595_v10 = vld [vmem:[%s775_s1 + $0x28] sm:$0xff]  }
   0x4   :  { %v588_v3 = vld [vmem:[%s775_s1 + $0xb8] sm:$0xff]   ;;  %523 = vmatpush3.bf16.msra.mxu0 %v587_v2  ;;  %v592_v7 = vld [vmem:[%s775_s1 + $0xb0] sm:$0xff]   ;;  %v596_v11 = vld [vmem:[%s775_s1 + $0xa8] sm:$0xff]  }
   0x5   :  { %545 = vmatpush3.bf16.msra.mxu1 %v588_v3  ;;  %524 = vmatprep.subr.bf16.mxu0 %v589_v4  ;;  %v597_v12 = vld [vmem:[%s775_s1 + $0x60] sm:$0xff]   ;;  %v601_v16 = vld [vmem:[%s775_s1 + $0x58] sm:$0xff]   ;;  %v605_v20 = vld [vmem:[%s775_s1 + $0x50] sm:$0xff]  }
   0x6   :  { %546 = vmatprep.subr.bf16.mxu1 %v590_v5  ;;  %v598_v13 = vld [vmem:[%s775_s1 + $0xe0] sm:$0xff]   ;;  %v602_v17 = vld [vmem:[%s775_s1 + $0xd8] sm:$0xff]   ;;  %v606_v21 = vld [vmem:[%s775_s1 + $0xd0] sm:$0xff]  }
   0x7   :  { %v599_v14 = vld [vmem:[%s775_s1 + $0x20] sm:$0xff]   ;;  %v603_v18 = vld [vmem:[%s775_s1 + $0x18] sm:$0xff]   ;;  %v607_v22 = vld [vmem:[%s775_s1 + $0x10] sm:$0xff]  }
   0x8   :  { %525 = vmatpush3.bf16.msra.mxu0 %v591_v6  ;;  %v600_v15 = vld [vmem:[%s775_s1 + $0xa0] sm:$0xff]   ;;  %v604_v19 = vld [vmem:[%s775_s1 + $0x98] sm:$0xff]   ;;  %v608_v23 = vld [vmem:[%s775_s1 + $0x90] sm:$0xff]  }
   0x9   :  { %547 = vmatpush3.bf16.msra.mxu1 %v592_v7  ;;  %526 = vmatprep.subr.bf16.mxu0 %v593_v8  ;;  %v609_v24 = vld [vmem:[%s775_s1 + $0x48] sm:$0xff]   ;;  %v613_v28 = vld [vmem:[%s775_s1 + $0x40] sm:$0xff]   ;;  %v622_v39 = vld [vmem:[%s775_s1 + $0x118] sm:$0xff]  }
   0xa   :  { %548 = vmatprep.subr.bf16.mxu1 %v594_v9  ;;  %v610_v25 = vld [vmem:[%s775_s1 + $0xc8] sm:$0xff]   ;;  %v614_v29 = vld [vmem:[%s775_s1 + $0xc0] sm:$0xff]   ;;  %v623_v40 = vld [vmem:[%s775_s1 + $0x110] sm:$0xff]  }
   0xb   :  { %v611_v26 = vld [vmem:[%s775_s1 + $0x8] sm:$0xff]   ;;  %v615_v30 = vld [vmem:[%s775_s1] sm:$0xff]   ;;  %v619_v43 = vld [vmem:[%s776_s0 + $0x10] ss:$0 sps:$4 sm:$0xff]  }
   0xc   :  { %527 = vmatpush3.bf16.msra.mxu0 %v595_v10  ;;  %v612_v27 = vld [vmem:[%s775_s1 + $0x88] sm:$0xff]   ;;  %v616_v31 = vld [vmem:[%s775_s1 + $0x80] sm:$0xff]  }
   0xd   :  { %549 = vmatpush3.bf16.msra.mxu1 %v596_v11  ;;  %528 = vmatprep.subr.bf16.mxu0 %v597_v12  ;;  %v21_v32 = vld [vmem:[%s776_s0] sm:$0xff]  ;;  %v22_v35 = vld [vmem:[%s776_s0 + $0x8] sm:$0xff] }
   0xe   :  { %550 = vmatprep.subr.bf16.mxu1 %v598_v13  ;;  %v479_v33 = vcombine.low %v21_v32, %v21_v32  ;;  %v480_v34 = vcombine.high %v21_v32, %v21_v32  ;;  %v481_v37 = vcombine.low %v22_v35, %v22_v35  ;;  %v482_v38 = vcombine.high %v22_v35, %v22_v35  ;;  %v624_v41 = vld [vmem:[%s775_s1 + $0x108] sm:$0xff]   ;;  %v625_v42 = vld [vmem:[%s775_s1 + $0x100] sm:$0xff]  }
   0xf   :  { %v521_v56 = vld [vmem:[%s777_s2] ss:$0 sm:$0xff] }
  0x10   :  { %529 = vmatpush3.bf16.msra.mxu0 %v599_v14  ;;  %365 = vmatprep.mubr.bf16.mxu0 %v480_v34 }
  0x11   :  { %551 = vmatpush3.bf16.msra.mxu1 %v600_v15  ;;  %530 = vmatprep.subr.bf16.mxu0 %v601_v16 }
  0x12   :  { %552 = vmatprep.subr.bf16.mxu1 %v602_v17  ;;  %405 = vmatprep.mubr.bf16.mxu1 %v482_v38 }
  0x14   :  { %531 = vmatpush3.bf16.msra.mxu0 %v603_v18 }
  0x15   :  { %553 = vmatpush3.bf16.msra.mxu1 %v604_v19  ;;  %532 = vmatprep.subr.bf16.mxu0 %v605_v20 }
  0x16   :  { %554 = vmatprep.subr.bf16.mxu1 %v606_v21 }
  0x18   :  { %533 = vmatpush3.bf16.msra.mxu0 %v607_v22 }
  0x19   :  { %555 = vmatpush3.bf16.msra.mxu1 %v608_v23  ;;  %534 = vmatprep.subr.bf16.mxu0 %v609_v24 }
  0x1a   :  { %556 = vmatprep.subr.bf16.mxu1 %v610_v25 }
  0x1c   :  { %535 = vmatpush3.bf16.msra.mxu0 %v611_v26 }
  0x1d   :  { %557 = vmatpush3.bf16.msra.mxu1 %v612_v27  ;;  %536 = vmatprep.subr.bf16.mxu0 %v613_v28 }
  0x1e   :  { %558 = vmatprep.subr.bf16.mxu1 %v614_v29 }
  0x20   :  { %537 = vmatpush3.bf16.msra.mxu0 %v615_v30 }
  0x21   :  { %559 = vmatpush3.bf16.msra.mxu1 %v616_v31  ;;  %571 = vmatprep.subr.bf16.mxu0 %v630_v36 }
  0x23   :  { %366 = vmatmul.mubr.bf16.vlgmr.msra.gmra.mxu0 %v479_v33 }
  0x24   :  { %406 = vmatmul.mubr.bf16.vlgmr.msra.gmra.mxu1 %v481_v37  ;;  %572 = vmatpush3.bf16.msra.mxu0 %v622_v39 }
  0x25   :  { %573 = vmatprep.subr.bf16.mxu0 %v630_v36  ;;  %579 = vmatprep.mubr.msk.bf16.mxu0 %vm631_vm0, %v630_v36 }
  0x28   :  { %574 = vmatpush3.bf16.msra.mxu0 %v623_v40 }
  0x29   :  { %575 = vmatprep.subr.bf16.mxu0 %v630_v36 }
  0x2c   :  { %576 = vmatpush3.bf16.msra.mxu0 %v624_v41 }
  0x2d   :  { %577 = vmatprep.subr.bf16.mxu0 %v630_v36 }
  0x30   :  { %578 = vmatpush3.bf16.msra.mxu0 %v625_v42 }
  0x33   :  { %580 = vmatmul.mubr.msk.bf16.vlgmr.msra.gmra.mxu0 %vm329_vm1, %v619_v43 }
  0xe3   :  { %v538_v44 = vpop.f32.mrf.mxu0 }
  0xe4   :  { %v560_v45 = vpop.f32.mrf.mxu1 }
  0xe5   :  { %v539_v46 = vpop.f32.mrf.mxu0 }
  0xe6   :  { %v561_v47 = vpop.f32.mrf.mxu1  ;;  %v540_v52 = vadd.f32 %v539_v46, %v538_v44 }
  0xe7   :  { %v541_v48 = vpop.f32.mrf.mxu0  ;;  %v562_v53 = vadd.f32 %v561_v47, %v560_v45 }
  0xe8   :  { %v563_v49 = vpop.f32.mrf.mxu1 }
  0xe9   :  { %v542_v50 = vpop.f32.mrf.mxu0  ;;  %v408_v54 = vadd.f32 %v562_v53, %v540_v52 }
  0xea   :  { %v564_v51 = vpop.f32.mrf.mxu1 }
  0xf3   :  { %v447_v55 = vpop.f32.mrf.mxu0 }
  0xf4   :  { %v448_v57 = vadd.f32 %v447_v55, %v408_v54 }
  0xf5   :  { %v581_v58 = vpop.f32.mrf.mxu0 }
  0xf6   :  { %v466_v59 = vadd.f32 %v521_v56, %v448_v57 }
  0xf7   :  { %v450_v60 = vpop.f32.mrf.mxu0 }
  0xf8   :  { %v467_v61 = vsub.f32 0.0, %v466_v59 }
  0xf9   :  { %v582_v62 = vpop.f32.mrf.mxu0 }
  0xfa   :  { %v468_v63 = vmul.f32 1.442695, %v467_v61 }
  0xfc   :  { %626 = vpow2.f32 %v468_v63 }
 0x109   :  { %v627_v0 = vpop.eup %626 }
 0x10a   :  { %v470_v1 = vadd.f32 1.0, %v627_v0 }
 0x10c   :  { %628 = vrcp.f32 %v470_v1 }
 0x119   :  { %v629_v2 = vpop.eup %628 }
 0x11a   :  { %v472_v3 = vmul.f32 %v629_v2, %v466_v59 }
 0x11c   :  { %v473_v4 = vpack.c.bf16 %v472_v3, %v472_v3 }
 0x11e   :  { %474 = vst [vmem:[%s778_s3] sm:$0xf] %v473_v4 }

// kernel: elandarknet_fwd.41
= control target key start
LH: loop header
LB: loop body
LE: loop exit
PB: predicated region body
PF: predicated region fallthrough
CT: control target
= control target key end

     0   :  { %vm19_vm0 = vcmask 523264   ;;  %v632_v1 = vmov 0.0   ;;  %vm633_vm1 = vmmov 0   ;;  %vm475_vm2 = vcmask 519168   ;;  %s786_s1 = inlined_call_operand.vmem [shape: bf16[576,64], index: 1, kind: input, shape index: {}]   ;;  %s787_s0 = inlined_call_operand.vmem [shape: bf16[8,576], index: 0, kind: input, shape index: {}]   ;;  %s788_s2 = inlined_call_operand.vmem [shape: f32[1,64], index: 2, kind: input, shape index: {}]   ;;  %s789_s3 = inlined_call_operand.vmem [shape: bf16[8,64], index: 3, kind: output, shape index: {}]  }
   0x1   :  { %v587_v0 = vld [vmem:[%s786_s1 + $0x78] sm:$0xff]   ;;  %20 = vst.msk [vmem:[#allocation2] sm:$0xff] %vm19_vm0, %v632_v1  ;;  %v591_v5 = vld [vmem:[%s786_s1 + $0x70] sm:$0xff]   ;;  %v595_v9 = vld [vmem:[%s786_s1 + $0x68] sm:$0xff]  }
   0x2   :  { %v588_v2 = vld [vmem:[%s786_s1 + $0xf8] sm:$0xff]   ;;  %524 = vmatprep.subr.bf16.mxu0 %v587_v0  ;;  %v592_v6 = vld [vmem:[%s786_s1 + $0xf0] sm:$0xff]   ;;  %v596_v10 = vld [vmem:[%s786_s1 + $0xe8] sm:$0xff]  }
   0x3   :  { %v589_v3 = vld [vmem:[%s786_s1 + $0x38] sm:$0xff]   ;;  %546 = vmatprep.subr.bf16.mxu1 %v588_v2  ;;  %v593_v7 = vld [vmem:[%s786_s1 + $0x30] sm:$0xff]   ;;  %v597_v11 = vld [vmem:[%s786_s1 + $0x28] sm:$0xff]  }
   0x4   :  { %v590_v4 = vld [vmem:[%s786_s1 + $0xb8] sm:$0xff]   ;;  %525 = vmatpush3.bf16.msra.mxu0 %v589_v3  ;;  %v594_v8 = vld [vmem:[%s786_s1 + $0xb0] sm:$0xff]   ;;  %v598_v12 = vld [vmem:[%s786_s1 + $0xa8] sm:$0xff]  }
   0x5   :  { %547 = vmatpush3.bf16.msra.mxu1 %v590_v4  ;;  %526 = vmatprep.subr.bf16.mxu0 %v591_v5  ;;  %v599_v13 = vld [vmem:[%s786_s1 + $0x60] sm:$0xff]   ;;  %v603_v17 = vld [vmem:[%s786_s1 + $0x58] sm:$0xff]   ;;  %v607_v21 = vld [vmem:[%s786_s1 + $0x50] sm:$0xff]  }
   0x6   :  { %548 = vmatprep.subr.bf16.mxu1 %v592_v6  ;;  %v600_v14 = vld [vmem:[%s786_s1 + $0xe0] sm:$0xff]   ;;  %v604_v18 = vld [vmem:[%s786_s1 + $0xd8] sm:$0xff]   ;;  %v608_v22 = vld [vmem:[%s786_s1 + $0xd0] sm:$0xff]  }
   0x7   :  { %v601_v15 = vld [vmem:[%s786_s1 + $0x20] sm:$0xff]   ;;  %v605_v19 = vld [vmem:[%s786_s1 + $0x18] sm:$0xff]   ;;  %v609_v23 = vld [vmem:[%s786_s1 + $0x10] sm:$0xff]  }
   0x8   :  { %527 = vmatpush3.bf16.msra.mxu0 %v593_v7  ;;  %v602_v16 = vld [vmem:[%s786_s1 + $0xa0] sm:$0xff]   ;;  %v606_v20 = vld [vmem:[%s786_s1 + $0x98] sm:$0xff]   ;;  %v610_v24 = vld [vmem:[%s786_s1 + $0x90] sm:$0xff]  }
   0x9   :  { %549 = vmatpush3.bf16.msra.mxu1 %v594_v8  ;;  %528 = vmatprep.subr.bf16.mxu0 %v595_v9  ;;  %v611_v25 = vld [vmem:[%s786_s1 + $0x48] sm:$0xff]   ;;  %v615_v29 = vld [vmem:[%s786_s1 + $0x40] sm:$0xff]   ;;  %v624_v39 = vld [vmem:[%s786_s1 + $0x118] sm:$0xff]  }
   0xa   :  { %550 = vmatprep.subr.bf16.mxu1 %v596_v10  ;;  %v612_v26 = vld [vmem:[%s786_s1 + $0xc8] sm:$0xff]   ;;  %v616_v30 = vld [vmem:[%s786_s1 + $0xc0] sm:$0xff]   ;;  %v625_v40 = vld [vmem:[%s786_s1 + $0x110] sm:$0xff]  }
   0xb   :  { %v613_v27 = vld [vmem:[%s786_s1 + $0x8] sm:$0xff]   ;;  %v617_v31 = vld [vmem:[%s786_s1] sm:$0xff]   ;;  %v621_v43 = vld [vmem:[%s787_s0 + $0x10] ss:$0 sps:$4 sm:$0xff]  }
   0xc   :  { %529 = vmatpush3.bf16.msra.mxu0 %v597_v11  ;;  %v614_v28 = vld [vmem:[%s786_s1 + $0x88] sm:$0xff]   ;;  %v618_v32 = vld [vmem:[%s786_s1 + $0x80] sm:$0xff]  }
   0xd   :  { %551 = vmatpush3.bf16.msra.mxu1 %v598_v12  ;;  %530 = vmatprep.subr.bf16.mxu0 %v599_v13  ;;  %v22_v33 = vld [vmem:[%s787_s0] sm:$0xff]  ;;  %v23_v36 = vld [vmem:[%s787_s0 + $0x8] sm:$0xff] }
   0xe   :  { %552 = vmatprep.subr.bf16.mxu1 %v600_v14  ;;  %v481_v34 = vcombine.low %v22_v33, %v22_v33  ;;  %v482_v35 = vcombine.high %v22_v33, %v22_v33  ;;  %v483_v37 = vcombine.low %v23_v36, %v23_v36  ;;  %v484_v38 = vcombine.high %v23_v36, %v23_v36  ;;  %v626_v41 = vld [vmem:[%s786_s1 + $0x108] sm:$0xff]   ;;  %v627_v42 = vld [vmem:[%s786_s1 + $0x100] sm:$0xff]  }
   0xf   :  { %v21_v55 = vld [vmem:[#allocation2] sm:$0xff] }
  0x10   :  { %531 = vmatpush3.bf16.msra.mxu0 %v601_v15  ;;  %366 = vmatprep.mubr.bf16.mxu0 %v482_v35  ;;  %v523_v62 = vld [vmem:[%s788_s2] ss:$0 sm:$0xff] }
  0x11   :  { %553 = vmatpush3.bf16.msra.mxu1 %v602_v16  ;;  %532 = vmatprep.subr.bf16.mxu0 %v603_v17 }
  0x12   :  { %554 = vmatprep.subr.bf16.mxu1 %v604_v18  ;;  %406 = vmatprep.mubr.bf16.mxu1 %v484_v38 }
  0x14   :  { %533 = vmatpush3.bf16.msra.mxu0 %v605_v19 }
  0x15   :  { %555 = vmatpush3.bf16.msra.mxu1 %v606_v20  ;;  %534 = vmatprep.subr.bf16.mxu0 %v607_v21 }
  0x16   :  { %556 = vmatprep.subr.bf16.mxu1 %v608_v22 }
  0x18   :  { %535 = vmatpush3.bf16.msra.mxu0 %v609_v23 }
  0x19   :  { %557 = vmatpush3.bf16.msra.mxu1 %v610_v24  ;;  %536 = vmatprep.subr.bf16.mxu0 %v611_v25 }
  0x1a   :  { %558 = vmatprep.subr.bf16.mxu1 %v612_v26 }
  0x1c   :  { %537 = vmatpush3.bf16.msra.mxu0 %v613_v27 }
  0x1d   :  { %559 = vmatpush3.bf16.msra.mxu1 %v614_v28  ;;  %538 = vmatprep.subr.bf16.mxu0 %v615_v29 }
  0x1e   :  { %560 = vmatprep.subr.bf16.mxu1 %v616_v30 }
  0x20   :  { %539 = vmatpush3.bf16.msra.mxu0 %v617_v31 }
  0x21   :  { %561 = vmatpush3.bf16.msra.mxu1 %v618_v32  ;;  %573 = vmatprep.subr.bf16.mxu0 %v632_v1 }
  0x23   :  { %367 = vmatmul.mubr.bf16.vlgmr.msra.gmra.mxu0 %v481_v34 }
  0x24   :  { %407 = vmatmul.mubr.bf16.vlgmr.msra.gmra.mxu1 %v483_v37  ;;  %574 = vmatpush3.bf16.msra.mxu0 %v624_v39 }
  0x25   :  { %575 = vmatprep.subr.bf16.mxu0 %v632_v1  ;;  %581 = vmatprep.mubr.msk.bf16.mxu0 %vm633_vm1, %v632_v1 }
  0x28   :  { %576 = vmatpush3.bf16.msra.mxu0 %v625_v40 }
  0x29   :  { %577 = vmatprep.subr.bf16.mxu0 %v632_v1 }
  0x2c   :  { %578 = vmatpush3.bf16.msra.mxu0 %v626_v41 }
  0x2d   :  { %579 = vmatprep.subr.bf16.mxu0 %v632_v1 }
  0x30   :  { %580 = vmatpush3.bf16.msra.mxu0 %v627_v42 }
  0x33   :  { %582 = vmatmul.mubr.msk.bf16.vlgmr.msra.gmra.mxu0 %vm19_vm0, %v621_v43 }
  0xe3   :  { %v540_v44 = vpop.f32.mrf.mxu0 }
  0xe4   :  { %v562_v45 = vpop.f32.mrf.mxu1 }
  0xe5   :  { %v541_v46 = vpop.f32.mrf.mxu0 }
  0xe6   :  { %v563_v47 = vpop.f32.mrf.mxu1  ;;  %v542_v52 = vadd.f32 %v541_v46, %v540_v44 }
  0xe7   :  { %v543_v48 = vpop.f32.mrf.mxu0  ;;  %v564_v53 = vadd.f32 %v563_v47, %v562_v45 }
  0xe8   :  { %v565_v49 = vpop.f32.mrf.mxu1 }
  0xe9   :  { %v544_v50 = vpop.f32.mrf.mxu0  ;;  %v409_v54 = vadd.f32 %v564_v53, %v542_v52 }
  0xea   :  { %v566_v51 = vpop.f32.mrf.mxu1 }
  0xf3   :  { %v448_v56 = vpop.f32.mrf.mxu0 }
  0xf4   :  { %v449_v57 = vadd.f32 %v448_v56, %v409_v54 }
  0xf5   :  { %v583_v58 = vpop.f32.mrf.mxu0 }
  0xf6   :  { %v454_v59 = vadd.f32 %v449_v57, %v21_v55 }
  0xf7   :  { %v451_v60 = vpop.f32.mrf.mxu0 }
  0xf8   :  { %455 = vst.msk [vmem:[#allocation2] sm:$0xff] %vm19_vm0, %v454_v59 }
  0xf9   :  { %v584_v61 = vpop.f32.mrf.mxu0 }
  0xff   :  { %v459_v63 = vld [vmem:[#allocation2] sm:$0xff] }
 0x100   :  { %v467_v0 = vadd.f32 %v523_v62, %v459_v63 }
 0x102   :  { %v468_v1 = vsub.f32 0.0, %v467_v0 }
 0x104   :  { %v469_v2 = vmul.f32 1.442695, %v468_v1 }
 0x106   :  { %628 = vpow2.f32 %v469_v2 }
 0x113   :  { %v629_v3 = vpop.eup %628 }
 0x114   :  { %v471_v4 = vadd.f32 1.0, %v629_v3 }
 0x116   :  { %630 = vrcp.f32 %v471_v4 }
 0x123   :  { %v631_v5 = vpop.eup %630 }
 0x124   :  { %v473_v6 = vmul.f32 %v631_v5, %v467_v0 }
 0x126   :  { %v474_v7 = vpack.c.bf16 %v473_v6, %v473_v6 }
 0x128   :  { %476 = vst.msk [vmem:[%s789_s3] sm:$0xf] %vm475_vm2, %v474_v7 }

// kernel: elandarknet_fwd.42
= control target key start
LH: loop header
LB: loop body
LE: loop exit
PB: predicated region body
PF: predicated region fallthrough
CT: control target
= control target key end

     0   :  { %vm22_vm0 = vcmask 523264   ;;  %v638_v1 = vmov 0.0   ;;  %vm639_vm1 = vmmov 0   ;;  %vm481_vm2 = vcmask 519168   ;;  %s800_s1 = inlined_call_operand.vmem [shape: bf16[576,64], index: 1, kind: input, shape index: {}]   ;;  %s801_s0 = inlined_call_operand.vmem [shape: bf16[8,576], index: 0, kind: input, shape index: {}]   ;;  %s802_s2 = inlined_call_operand.vmem [shape: f32[1,64], index: 2, kind: input, shape index: {}]   ;;  %s803_s3 = inlined_call_operand.vmem [shape: bf16[8,64], index: 3, kind: input, shape index: {}]   ;;  %s804_s4 = inlined_call_operand.vmem [shape: bf16[8,64], index: 4, kind: output, shape index: {}]  }
   0x1   :  { %v593_v0 = vld [vmem:[%s800_s1 + $0x78] sm:$0xff]   ;;  %23 = vst.msk [vmem:[#allocation2] sm:$0xff] %vm22_vm0, %v638_v1  ;;  %v597_v5 = vld [vmem:[%s800_s1 + $0x70] sm:$0xff]   ;;  %v601_v9 = vld [vmem:[%s800_s1 + $0x68] sm:$0xff]  }
   0x2   :  { %v594_v2 = vld [vmem:[%s800_s1 + $0xf8] sm:$0xff]   ;;  %530 = vmatprep.subr.bf16.mxu0 %v593_v0  ;;  %v598_v6 = vld [vmem:[%s800_s1 + $0xf0] sm:$0xff]   ;;  %v602_v10 = vld [vmem:[%s800_s1 + $0xe8] sm:$0xff]  }
   0x3   :  { %v595_v3 = vld [vmem:[%s800_s1 + $0x38] sm:$0xff]   ;;  %552 = vmatprep.subr.bf16.mxu1 %v594_v2  ;;  %v599_v7 = vld [vmem:[%s800_s1 + $0x30] sm:$0xff]   ;;  %v603_v11 = vld [vmem:[%s800_s1 + $0x28] sm:$0xff]  }
   0x4   :  { %v596_v4 = vld [vmem:[%s800_s1 + $0xb8] sm:$0xff]   ;;  %531 = vmatpush3.bf16.msra.mxu0 %v595_v3  ;;  %v600_v8 = vld [vmem:[%s800_s1 + $0xb0] sm:$0xff]   ;;  %v604_v12 = vld [vmem:[%s800_s1 + $0xa8] sm:$0xff]  }
   0x5   :  { %553 = vmatpush3.bf16.msra.mxu1 %v596_v4  ;;  %532 = vmatprep.subr.bf16.mxu0 %v597_v5  ;;  %v605_v13 = vld [vmem:[%s800_s1 + $0x60] sm:$0xff]   ;;  %v609_v17 = vld [vmem:[%s800_s1 + $0x58] sm:$0xff]   ;;  %v613_v21 = vld [vmem:[%s800_s1 + $0x50] sm:$0xff]  }
   0x6   :  { %554 = vmatprep.subr.bf16.mxu1 %v598_v6  ;;  %v606_v14 = vld [vmem:[%s800_s1 + $0xe0] sm:$0xff]   ;;  %v610_v18 = vld [vmem:[%s800_s1 + $0xd8] sm:$0xff]   ;;  %v614_v22 = vld [vmem:[%s800_s1 + $0xd0] sm:$0xff]  }
   0x7   :  { %v607_v15 = vld [vmem:[%s800_s1 + $0x20] sm:$0xff]   ;;  %v611_v19 = vld [vmem:[%s800_s1 + $0x18] sm:$0xff]   ;;  %v615_v23 = vld [vmem:[%s800_s1 + $0x10] sm:$0xff]  }
   0x8   :  { %533 = vmatpush3.bf16.msra.mxu0 %v599_v7  ;;  %v608_v16 = vld [vmem:[%s800_s1 + $0xa0] sm:$0xff]   ;;  %v612_v20 = vld [vmem:[%s800_s1 + $0x98] sm:$0xff]   ;;  %v616_v24 = vld [vmem:[%s800_s1 + $0x90] sm:$0xff]  }
   0x9   :  { %555 = vmatpush3.bf16.msra.mxu1 %v600_v8  ;;  %534 = vmatprep.subr.bf16.mxu0 %v601_v9  ;;  %v617_v25 = vld [vmem:[%s800_s1 + $0x48] sm:$0xff]   ;;  %v621_v29 = vld [vmem:[%s800_s1 + $0x40] sm:$0xff]   ;;  %v630_v39 = vld [vmem:[%s800_s1 + $0x118] sm:$0xff]  }
   0xa   :  { %556 = vmatprep.subr.bf16.mxu1 %v602_v10  ;;  %v618_v26 = vld [vmem:[%s800_s1 + $0xc8] sm:$0xff]   ;;  %v622_v30 = vld [vmem:[%s800_s1 + $0xc0] sm:$0xff]   ;;  %v631_v40 = vld [vmem:[%s800_s1 + $0x110] sm:$0xff]  }
   0xb   :  { %v619_v27 = vld [vmem:[%s800_s1 + $0x8] sm:$0xff]   ;;  %v623_v31 = vld [vmem:[%s800_s1] sm:$0xff]   ;;  %v627_v43 = vld [vmem:[%s801_s0 + $0x10] ss:$0 sps:$4 sm:$0xff]  }
   0xc   :  { %535 = vmatpush3.bf16.msra.mxu0 %v603_v11  ;;  %v620_v28 = vld [vmem:[%s800_s1 + $0x88] sm:$0xff]   ;;  %v624_v32 = vld [vmem:[%s800_s1 + $0x80] sm:$0xff]  }
   0xd   :  { %557 = vmatpush3.bf16.msra.mxu1 %v604_v12  ;;  %536 = vmatprep.subr.bf16.mxu0 %v605_v13  ;;  %v25_v33 = vld [vmem:[%s801_s0] sm:$0xff]  ;;  %v26_v36 = vld [vmem:[%s801_s0 + $0x8] sm:$0xff] }
   0xe   :  { %558 = vmatprep.subr.bf16.mxu1 %v606_v14  ;;  %v487_v34 = vcombine.low %v25_v33, %v25_v33  ;;  %v488_v35 = vcombine.high %v25_v33, %v25_v33  ;;  %v489_v37 = vcombine.low %v26_v36, %v26_v36  ;;  %v490_v38 = vcombine.high %v26_v36, %v26_v36  ;;  %v632_v41 = vld [vmem:[%s800_s1 + $0x108] sm:$0xff]   ;;  %v633_v42 = vld [vmem:[%s800_s1 + $0x100] sm:$0xff]  }
   0xf   :  { %v24_v55 = vld [vmem:[#allocation2] sm:$0xff] }
  0x10   :  { %537 = vmatpush3.bf16.msra.mxu0 %v607_v15  ;;  %369 = vmatprep.mubr.bf16.mxu0 %v488_v35  ;;  %v529_v62 = vld [vmem:[%s802_s2] ss:$0 sm:$0xff] }
  0x11   :  { %559 = vmatpush3.bf16.msra.mxu1 %v608_v16  ;;  %538 = vmatprep.subr.bf16.mxu0 %v609_v17  ;;  %v477_v5 = vld [vmem:[%s803_s3] sm:$0xf] }
  0x12   :  { %560 = vmatprep.subr.bf16.mxu1 %v610_v18  ;;  %409 = vmatprep.mubr.bf16.mxu1 %v490_v38  ;;  %v478_v6 = vunpack.c.l.bf16 %v477_v5 }
  0x14   :  { %539 = vmatpush3.bf16.msra.mxu0 %v611_v19 }
  0x15   :  { %561 = vmatpush3.bf16.msra.mxu1 %v612_v20  ;;  %540 = vmatprep.subr.bf16.mxu0 %v613_v21 }
  0x16   :  { %562 = vmatprep.subr.bf16.mxu1 %v614_v22 }
  0x18   :  { %541 = vmatpush3.bf16.msra.mxu0 %v615_v23 }
  0x19   :  { %563 = vmatpush3.bf16.msra.mxu1 %v616_v24  ;;  %542 = vmatprep.subr.bf16.mxu0 %v617_v25 }
  0x1a   :  { %564 = vmatprep.subr.bf16.mxu1 %v618_v26 }
  0x1c   :  { %543 = vmatpush3.bf16.msra.mxu0 %v619_v27 }
  0x1d   :  { %565 = vmatpush3.bf16.msra.mxu1 %v620_v28  ;;  %544 = vmatprep.subr.bf16.mxu0 %v621_v29 }
  0x1e   :  { %566 = vmatprep.subr.bf16.mxu1 %v622_v30 }
  0x20   :  { %545 = vmatpush3.bf16.msra.mxu0 %v623_v31 }
  0x21   :  { %567 = vmatpush3.bf16.msra.mxu1 %v624_v32  ;;  %579 = vmatprep.subr.bf16.mxu0 %v638_v1 }
  0x23   :  { %370 = vmatmul.mubr.bf16.vlgmr.msra.gmra.mxu0 %v487_v34 }
  0x24   :  { %410 = vmatmul.mubr.bf16.vlgmr.msra.gmra.mxu1 %v489_v37  ;;  %580 = vmatpush3.bf16.msra.mxu0 %v630_v39 }
  0x25   :  { %581 = vmatprep.subr.bf16.mxu0 %v638_v1  ;;  %587 = vmatprep.mubr.msk.bf16.mxu0 %vm639_vm1, %v638_v1 }
  0x28   :  { %582 = vmatpush3.bf16.msra.mxu0 %v631_v40 }
  0x29   :  { %583 = vmatprep.subr.bf16.mxu0 %v638_v1 }
  0x2c   :  { %584 = vmatpush3.bf16.msra.mxu0 %v632_v41 }
  0x2d   :  { %585 = vmatprep.subr.bf16.mxu0 %v638_v1 }
  0x30   :  { %586 = vmatpush3.bf16.msra.mxu0 %v633_v42 }
  0x33   :  { %588 = vmatmul.mubr.msk.bf16.vlgmr.msra.gmra.mxu0 %vm22_vm0, %v627_v43 }
  0xe3   :  { %v546_v44 = vpop.f32.mrf.mxu0 }
  0xe4   :  { %v568_v45 = vpop.f32.mrf.mxu1 }
  0xe5   :  { %v547_v46 = vpop.f32.mrf.mxu0 }
  0xe6   :  { %v569_v47 = vpop.f32.mrf.mxu1  ;;  %v548_v52 = vadd.f32 %v547_v46, %v546_v44 }
  0xe7   :  { %v549_v48 = vpop.f32.mrf.mxu0  ;;  %v570_v53 = vadd.f32 %v569_v47, %v568_v45 }
  0xe8   :  { %v571_v49 = vpop.f32.mrf.mxu1 }
  0xe9   :  { %v550_v50 = vpop.f32.mrf.mxu0  ;;  %v412_v54 = vadd.f32 %v570_v53, %v548_v52 }
  0xea   :  { %v572_v51 = vpop.f32.mrf.mxu1 }
  0xf3   :  { %v451_v56 = vpop.f32.mrf.mxu0 }
  0xf4   :  { %v452_v57 = vadd.f32 %v451_v56, %v412_v54 }
  0xf5   :  { %v589_v58 = vpop.f32.mrf.mxu0 }
  0xf6   :  { %v457_v59 = vadd.f32 %v452_v57, %v24_v55 }
  0xf7   :  { %v454_v60 = vpop.f32.mrf.mxu0 }
  0xf8   :  { %458 = vst.msk [vmem:[#allocation2] sm:$0xff] %vm22_vm0, %v457_v59 }
  0xf9   :  { %v590_v61 = vpop.f32.mrf.mxu0 }
  0xff   :  { %v462_v63 = vld [vmem:[#allocation2] sm:$0xff] }
 0x100   :  { %v470_v0 = vadd.f32 %v529_v62, %v462_v63 }
 0x102   :  { %v471_v1 = vsub.f32 0.0, %v470_v0 }
 0x104   :  { %v472_v2 = vmul.f32 1.442695, %v471_v1 }
 0x106   :  { %634 = vpow2.f32 %v472_v2 }
 0x113   :  { %v635_v3 = vpop.eup %634 }
 0x114   :  { %v474_v4 = vadd.f32 1.0, %v635_v3 }
 0x116   :  { %636 = vrcp.f32 %v474_v4 }
 0x123   :  { %v637_v7 = vpop.eup %636 }
 0x124   :  { %v476_v8 = vmul.f32 %v637_v7, %v470_v0 }
 0x126   :  { %v479_v9 = vadd.f32 %v478_v6, %v476_v8 }
 0x128   :  { %v480_v10 = vpack.c.bf16 %v479_v9, %v479_v9 }
 0x12a   :  { %482 = vst.msk [vmem:[%s804_s4] sm:$0xf] %vm481_vm2, %v480_v10 }

// kernel: elandarknet_fwd.45
= control target key start
LH: loop header
LB: loop body
LE: loop exit
PB: predicated region body
PF: predicated region fallthrough
CT: control target
= control target key end

     0   :  { %v410_v0 = vmov 0.0   ;;  %vm411_vm0 = vmmov 0   ;;  %vm77_vm1 = vcmask 523264   ;;  %s520_s4 = inlined_call_operand.vmem [shape: bf16[64,128], index: 4, kind: input, shape index: {}]   ;;  %s521_s3 = inlined_call_operand.vmem [shape: bf16[128,128], index: 3, kind: input, shape index: {}]   ;;  %s522_s5 = inlined_call_operand.vmem [shape: bf16[64,128], index: 5, kind: input, shape index: {}]   ;;  %s523_s1 = inlined_call_operand.vmem [shape: bf16[8,64], index: 1, kind: input, shape index: {}]   ;;  %s524_s2 = inlined_call_operand.vmem [shape: bf16[8,64], index: 2, kind: input, shape index: {}]   ;;  %s525_s0 = inlined_call_operand.vmem [shape: bf16[8,128], index: 0, kind: input, shape index: {}]   ;;  %s526_s6 = inlined_call_operand.vmem [shape: f32[1,128], index: 6, kind: input, shape index: {}]   ;;  %s527_s7 = inlined_call_operand.vmem [shape: bf16[8,128], index: 7, kind: output, shape index: {}]  }
   0x1   :  { %344 = vmatprep.subr.bf16.mxu0 %v410_v0  ;;  %356 = vmatprep.subr.bf16.mxu1 %v410_v0  ;;  %v390_v1 = vld [vmem:[%s520_s4 + $0x18] sm:$0xff]   ;;  %v392_v3 = vld [vmem:[%s520_s4 + $0x10] sm:$0xff]   ;;  %v394_v5 = vld [vmem:[%s520_s4 + $0x8] sm:$0xff]  }
   0x2   :  { %v391_v2 = vld [vmem:[%s521_s3 + $0x38] sm:$0xff]   ;;  %352 = vmatprep.mubr.msk.bf16.mxu0 %vm411_vm0, %v410_v0  ;;  %372 = vmatprep.mubr.msk.bf16.mxu1 %vm411_vm0, %v410_v0  ;;  %v393_v4 = vld [vmem:[%s521_s3 + $0x30] sm:$0xff]   ;;  %v395_v6 = vld [vmem:[%s521_s3 + $0x28] sm:$0xff]  }
   0x3   :  { %345 = vmatpush3.bf16.msra.mxu0 %v390_v1  ;;  %357 = vmatpush3.bf16.msra.mxu1 %v391_v2  ;;  %v396_v7 = vld [vmem:[%s520_s4] sm:$0xff]   ;;  %v399_v10 = vld [vmem:[%s522_s5 + $0x18] sm:$0xff]   ;;  %v401_v12 = vld [vmem:[%s522_s5 + $0x10] sm:$0xff]  }
   0x4   :  { %346 = vmatprep.subr.bf16.mxu0 %v410_v0  ;;  %358 = vmatprep.subr.bf16.mxu1 %v410_v0  ;;  %v397_v8 = vld [vmem:[%s521_s3 + $0x20] sm:$0xff]   ;;  %v398_v11 = vld [vmem:[%s521_s3 + $0x18] sm:$0xff]   ;;  %v400_v13 = vld [vmem:[%s521_s3 + $0x10] sm:$0xff]  }
   0x5   :  { %v44_v9 = vld [vmem:[%s523_s1] sm:$0xf]  ;;  %v403_v14 = vld [vmem:[%s522_s5 + $0x8] sm:$0xff]  }
   0x6   :  { %v402_v15 = vld [vmem:[%s521_s3 + $0x8] sm:$0xff]   ;;  %v405_v16 = vld [vmem:[%s522_s5] sm:$0xff]  }
   0x7   :  { %347 = vmatpush3.bf16.msra.mxu0 %v392_v3  ;;  %359 = vmatpush3.bf16.msra.mxu1 %v393_v4  ;;  %v404_v17 = vld [vmem:[%s521_s3] sm:$0xff]  }
   0x8   :  { %348 = vmatprep.subr.bf16.mxu0 %v410_v0  ;;  %360 = vmatprep.subr.bf16.mxu1 %v410_v0  ;;  %v209_v18 = vld [vmem:[%s524_s2] sm:$0xf] }
   0x9   :  { %v27_v19 = vld [vmem:[%s525_s0] sm:$0xf] }
   0xa   :  { %v324_v28 = vld [vmem:[%s526_s6] ss:$0 sm:$0xff] }
   0xb   :  { %349 = vmatpush3.bf16.msra.mxu0 %v394_v5  ;;  %361 = vmatpush3.bf16.msra.mxu1 %v395_v6 }
   0xc   :  { %350 = vmatprep.subr.bf16.mxu0 %v410_v0  ;;  %362 = vmatprep.subr.bf16.mxu1 %v410_v0 }
   0xf   :  { %351 = vmatpush3.bf16.msra.mxu0 %v396_v7  ;;  %363 = vmatpush3.bf16.msra.mxu1 %v397_v8 }
  0x10   :  { %376 = vmatprep.subr.bf16.mxu0 %v410_v0  ;;  %364 = vmatprep.subr.bf16.mxu1 %v410_v0 }
  0x12   :  { %353 = vmatmul.mubr.msk.bf16.vlgmr.msra.gmra.mxu0 %vm77_vm1, %v44_v9 }
  0x13   :  { %377 = vmatpush3.bf16.msra.mxu0 %v399_v10  ;;  %384 = vmatprep.mubr.msk.bf16.mxu0 %vm411_vm0, %v410_v0 }
  0x14   :  { %365 = vmatpush3.bf16.msra.mxu1 %v398_v11  ;;  %378 = vmatprep.subr.bf16.mxu0 %v410_v0 }
  0x15   :  { %366 = vmatprep.subr.bf16.mxu1 %v410_v0 }
  0x17   :  { %379 = vmatpush3.bf16.msra.mxu0 %v401_v12 }
  0x18   :  { %367 = vmatpush3.bf16.msra.mxu1 %v400_v13  ;;  %380 = vmatprep.subr.bf16.mxu0 %v410_v0 }
  0x19   :  { %368 = vmatprep.subr.bf16.mxu1 %v410_v0 }
  0x1b   :  { %381 = vmatpush3.bf16.msra.mxu0 %v403_v14 }
  0x1c   :  { %369 = vmatpush3.bf16.msra.mxu1 %v402_v15  ;;  %382 = vmatprep.subr.bf16.mxu0 %v410_v0 }
  0x1d   :  { %370 = vmatprep.subr.bf16.mxu1 %v410_v0 }
  0x1f   :  { %383 = vmatpush3.bf16.msra.mxu0 %v405_v16 }
  0x20   :  { %371 = vmatpush3.bf16.msra.mxu1 %v404_v17 }
  0x22   :  { %385 = vmatmul.mubr.msk.bf16.vlgmr.msra.gmra.mxu0 %vm77_vm1, %v209_v18 }
  0x23   :  { %373 = vmatmul.mubr.bf16.vlgmr.msra.gmra.mxu1 %v27_v19 }
  0xd2   :  { %v115_v20 = vpop.f32.mrf.mxu0 }
  0xd4   :  { %v354_v21 = vpop.f32.mrf.mxu0 }
  0xd6   :  { %v118_v22 = vpop.f32.mrf.mxu0 }
  0xd8   :  { %v355_v23 = vpop.f32.mrf.mxu0 }
  0xe2   :  { %v279_v24 = vpop.f32.mrf.mxu0 }
  0xe3   :  { %v203_v25 = vpop.f32.mrf.mxu1 }
  0xe4   :  { %v204_v26 = vadd.f32 %v203_v25, %v115_v20  ;;  %v386_v27 = vpop.f32.mrf.mxu0 }
  0xe5   :  { %v374_v29 = vpop.f32.mrf.mxu1 }
  0xe6   :  { %v285_v30 = vadd.f32 %v279_v24, %v204_v26  ;;  %v282_v31 = vpop.f32.mrf.mxu0 }
  0xe7   :  { %v206_v32 = vpop.f32.mrf.mxu1 }
  0xe8   :  { %v293_v33 = vadd.f32 %v324_v28, %v285_v30  ;;  %v387_v34 = vpop.f32.mrf.mxu0 }
  0xe9   :  { %v375_v35 = vpop.f32.mrf.mxu1 }
  0xea   :  { %v294_v36 = vsub.f32 0.0, %v293_v33 }
  0xec   :  { %v295_v37 = vmul.f32 1.442695, %v294_v36 }
  0xee   :  { %406 = vpow2.f32 %v295_v37 }
  0xfb   :  { %v407_v38 = vpop.eup %406 }
  0xfc   :  { %v297_v39 = vadd.f32 1.0, %v407_v38 }
  0xfe   :  { %408 = vrcp.f32 %v297_v39 }
 0x10b   :  { %v409_v40 = vpop.eup %408 }
 0x10c   :  { %v299_v41 = vmul.f32 %v409_v40, %v293_v33 }
 0x10e   :  { %v300_v42 = vpack.c.bf16 %v299_v41, %v299_v41 }
 0x110   :  { %301 = vst [vmem:[%s527_s7] sm:$0xf] %v300_v42 }

// kernel: elandarknet_fwd.50
= control target key start
LH: loop header
LB: loop body
LE: loop exit
PB: predicated region body
PF: predicated region fallthrough
CT: control target
= control target key end

     0   :  { %v301_v0 = vmov 0.0   ;;  %vm302_vm0 = vmmov 0   ;;  %vm71_vm1 = vcmask 523264   ;;  %s381_s2 = inlined_call_operand.vmem [shape: bf16[128,128], index: 2, kind: input, shape index: {}]   ;;  %s382_s3 = inlined_call_operand.vmem [shape: bf16[64,128], index: 3, kind: input, shape index: {}]   ;;  %s383_s1 = inlined_call_operand.vmem [shape: bf16[8,64], index: 1, kind: input, shape index: {}]   ;;  %s384_s0 = inlined_call_operand.vmem [shape: bf16[8,128], index: 0, kind: input, shape index: {}]   ;;  %s385_s4 = inlined_call_operand.vmem [shape: f32[1,128], index: 4, kind: input, shape index: {}]   ;;  %s386_s5 = inlined_call_operand.vmem [shape: bf16[8,128], index: 5, kind: output, shape index: {}]  }
   0x1   :  { %263 = vmatprep.subr.bf16.mxu1 %v301_v0  ;;  %v285_v1 = vld [vmem:[%s381_s2 + $0x38] sm:$0xff]   ;;  %251 = vmatprep.subr.bf16.mxu0 %v301_v0  ;;  %v286_v2 = vld [vmem:[%s381_s2 + $0x30] sm:$0xff]   ;;  %v287_v5 = vld [vmem:[%s381_s2 + $0x28] sm:$0xff]  }
   0x2   :  { %259 = vmatprep.mubr.msk.bf16.mxu0 %vm302_vm0, %v301_v0  ;;  %279 = vmatprep.mubr.msk.bf16.mxu1 %vm302_vm0, %v301_v0  ;;  %v288_v3 = vld [vmem:[%s382_s3 + $0x18] sm:$0xff]   ;;  %v290_v4 = vld [vmem:[%s382_s3 + $0x10] sm:$0xff]   ;;  %v292_v6 = vld [vmem:[%s382_s3 + $0x8] sm:$0xff]  }
   0x3   :  { %264 = vmatpush3.bf16.msra.mxu1 %v285_v1  ;;  %252 = vmatpush3.bf16.msra.mxu0 %v288_v3  ;;  %v289_v7 = vld [vmem:[%s381_s2 + $0x20] sm:$0xff]   ;;  %v291_v9 = vld [vmem:[%s381_s2 + $0x18] sm:$0xff]   ;;  %v293_v11 = vld [vmem:[%s381_s2 + $0x10] sm:$0xff]  }
   0x4   :  { %265 = vmatprep.subr.bf16.mxu1 %v301_v0  ;;  %253 = vmatprep.subr.bf16.mxu0 %v301_v0  ;;  %v294_v8 = vld [vmem:[%s382_s3] sm:$0xff]   ;;  %v295_v12 = vld [vmem:[%s381_s2 + $0x8] sm:$0xff]  }
   0x5   :  { %v38_v10 = vld [vmem:[%s383_s1] sm:$0xf] }
   0x6   :  { %v296_v13 = vld [vmem:[%s381_s2] sm:$0xff]  }
   0x7   :  { %266 = vmatpush3.bf16.msra.mxu1 %v286_v2  ;;  %254 = vmatpush3.bf16.msra.mxu0 %v290_v4  ;;  %v21_v14 = vld [vmem:[%s384_s0] sm:$0xf] }
   0x8   :  { %267 = vmatprep.subr.bf16.mxu1 %v301_v0  ;;  %255 = vmatprep.subr.bf16.mxu0 %v301_v0  ;;  %v236_v20 = vld [vmem:[%s385_s4] ss:$0 sm:$0xff] }
   0xb   :  { %268 = vmatpush3.bf16.msra.mxu1 %v287_v5  ;;  %256 = vmatpush3.bf16.msra.mxu0 %v292_v6 }
   0xc   :  { %269 = vmatprep.subr.bf16.mxu1 %v301_v0  ;;  %257 = vmatprep.subr.bf16.mxu0 %v301_v0 }
   0xf   :  { %270 = vmatpush3.bf16.msra.mxu1 %v289_v7  ;;  %258 = vmatpush3.bf16.msra.mxu0 %v294_v8 }
  0x10   :  { %271 = vmatprep.subr.bf16.mxu1 %v301_v0 }
  0x12   :  { %260 = vmatmul.mubr.msk.bf16.vlgmr.msra.gmra.mxu0 %vm71_vm1, %v38_v10 }
  0x13   :  { %272 = vmatpush3.bf16.msra.mxu1 %v291_v9 }
  0x14   :  { %273 = vmatprep.subr.bf16.mxu1 %v301_v0 }
  0x17   :  { %274 = vmatpush3.bf16.msra.mxu1 %v293_v11 }
  0x18   :  { %275 = vmatprep.subr.bf16.mxu1 %v301_v0 }
  0x1b   :  { %276 = vmatpush3.bf16.msra.mxu1 %v295_v12 }
  0x1c   :  { %277 = vmatprep.subr.bf16.mxu1 %v301_v0 }
  0x1f   :  { %278 = vmatpush3.bf16.msra.mxu1 %v296_v13 }
  0x22   :  { %280 = vmatmul.mubr.bf16.vlgmr.msra.gmra.mxu1 %v21_v14 }
  0xd2   :  { %v109_v15 = vpop.f32.mrf.mxu0 }
  0xd4   :  { %v261_v16 = vpop.f32.mrf.mxu0 }
  0xd6   :  { %v112_v17 = vpop.f32.mrf.mxu0 }
  0xd8   :  { %v262_v18 = vpop.f32.mrf.mxu0 }
  0xe2   :  { %v197_v19 = vpop.f32.mrf.mxu1 }
  0xe3   :  { %v198_v21 = vadd.f32 %v197_v19, %v109_v15 }
  0xe4   :  { %v281_v22 = vpop.f32.mrf.mxu1 }
  0xe5   :  { %v210_v23 = vadd.f32 %v236_v20, %v198_v21 }
  0xe6   :  { %v200_v24 = vpop.f32.mrf.mxu1 }
  0xe7   :  { %v211_v25 = vsub.f32 0.0, %v210_v23 }
  0xe8   :  { %v282_v26 = vpop.f32.mrf.mxu1 }
  0xe9   :  { %v212_v27 = vmul.f32 1.442695, %v211_v25 }
  0xeb   :  { %297 = vpow2.f32 %v212_v27 }
  0xf8   :  { %v298_v28 = vpop.eup %297 }
  0xf9   :  { %v214_v29 = vadd.f32 1.0, %v298_v28 }
  0xfb   :  { %299 = vrcp.f32 %v214_v29 }
 0x108   :  { %v300_v30 = vpop.eup %299 }
 0x109   :  { %v216_v31 = vmul.f32 %v300_v30, %v210_v23 }
 0x10b   :  { %v217_v32 = vpack.c.bf16 %v216_v31, %v216_v31 }
 0x10d   :  { %218 = vst [vmem:[%s386_s5] sm:$0xf] %v217_v32 }

// kernel: elandarknet_fwd.51
= control target key start
LH: loop header
LB: loop body
LE: loop exit
PB: predicated region body
PF: predicated region fallthrough
CT: control target
= control target key end

     0   :  { %v221_v1 = vmov 0.0   ;;  %vm222_vm0 = vmmov 0   ;;  %s304_s0 = inlined_call_operand.vmem [shape: bf16[2,1,128], index: 0, kind: input, shape index: {}]   ;;  %s305_s1 = inlined_call_operand.vmem [shape: f32[128,10], index: 1, kind: input, shape index: {}]   ;;  %s306_s2 = inlined_call_operand.vmem [shape: f32[1,10], index: 2, kind: input, shape index: {}]   ;;  %s307_s3 = inlined_call_operand.hbm [shape: f32[2,10], index: 3, kind: output, shape index: {}]  }
   0x1   :  { %v36_v0 = vld [vmem:[%s305_s1 + $0x78] sm:$0xff]  ;;  %161 = vmatprep.subr.mxu0 %v221_v1  ;;  %v35_v2 = vld [vmem:[%s305_s1 + $0x70] sm:$0xff]  ;;  %193 = vmatprep.mubr.msk.f32.mxu0 %vm222_vm0, %v221_v1  ;;  %v34_v3 = vld [vmem:[%s305_s1 + $0x68] sm:$0xff] }
   0x2   :  { %162 = vmatpush3.msra.mxu0 %v36_v0  ;;  %v33_v4 = vld [vmem:[%s305_s1 + $0x60] sm:$0xff] }
   0x3   :  { %163 = vmatprep.subr.mxu0 %v221_v1 }
   0x4   :  { %164 = vmatpush3.msra.mxu0 %v35_v2 }
   0x5   :  { %165 = vmatprep.subr.mxu0 %v221_v1 }
   0x6   :  { %166 = vmatpush3.msra.mxu0 %v34_v3 }
   0x7   :  { %8 = vsyncpa [#allocation3], 0  ;;  %167 = vmatprep.subr.mxu0 %v221_v1  ;;  %v32_v5 = vld [vmem:[%s305_s1 + $0x58] sm:$0xff]  ;;  %v31_v6 = vld [vmem:[%s305_s1 + $0x50] sm:$0xff]  ;;  %v46_v9 = vlaneseq  ;;  %vm54_vm1 = vcmask 1041409   ;;  %s223_s22 = smov [#allocation2]  }
   0x8   :  { %168 = vmatpush3.msra.mxu0 %v33_v4  ;;  %v30_v7 = vld [vmem:[%s305_s1 + $0x48] sm:$0xff]  ;;  %v29_v8 = vld [vmem:[%s305_s1 + $0x40] sm:$0xff]  ;;  %v28_v10 = vld [vmem:[%s305_s1 + $0x38] sm:$0xff]  ;;  %s135_s23 = sshll.u32 %s223_s22, 4  ;;  %vm127_vm2 = vcmask 74752   ;;  %s136_s23 = int_to_ptr.vmem [resolvable:$true] %s135_s23 }
   0x9   :  { %169 = vmatprep.subr.mxu0 %v221_v1  ;;  %v27_v11 = vld [vmem:[%s305_s1 + $0x30] sm:$0xff]  ;;  %v47_v12 = vshrl.u32 %v46_v9, 7  ;;  %v26_v13 = vld [vmem:[%s305_s1 + $0x28] sm:$0xff]  ;;  %v15_v14 = vld [vmem:[%s304_s0] sm:$0x1]  ;;  %s199_s24 = scalar_lea.vmem %s136_s23, 32  ;;  %p204_p1 = scmp.lt.s32.totalorder %s136_s23, %s136_s23 }
   0xa   :  { %170 = vmatpush3.msra.mxu0 %v32_v5  ;;  %v16_v15 = vld [vmem:[%s304_s0 + $0x1] sm:$0x1]  ;;  %v17_v17 = vunpack.c.l.bf16 %v15_v14  ;;  %v24_v20 = vld [vmem:[%s305_s1 + $0x18] sm:$0xff]  ;;  %v23_v21 = vld [vmem:[%s305_s1 + $0x10] sm:$0xff]  ;;  %p200_p0 = scmp.ne.s32.totalorder %s136_s23, %s199_s24  ;;  %p205_p2 = scmp.lt.s32.totalorder %s199_s24, %s199_s24 }
   0xb   :  { %171 = vmatprep.subr.mxu0 %v221_v1  ;;  %v25_v16 = vld [vmem:[%s305_s1 + $0x20] sm:$0xff]  ;;  %v18_v18 = vunpack.c.l.bf16 %v16_v15  ;;  %v48_v19 = vsub.s32 0, %v47_v12  ;;  %v22_v24 = vld [vmem:[%s305_s1 + $0x8] sm:$0xff] }
   0xc   :  { %172 = vmatpush3.msra.mxu0 %v31_v6  ;;  %v21_v25 = vld [vmem:[%s305_s1] sm:$0xff]  ;;  %p206_p3 = por %p205_p2, %p204_p1 }
   0xd   :  { %173 = vmatprep.subr.mxu0 %v221_v1  ;;  %v49_v22 = vrot.slane %v17_v17, %v48_v19  ;;  %v53_v23 = vrot.slane %v18_v18, %v48_v19  ;;  %v143_v27 = vld [vmem:[%s306_s2] ss:$0 sm:$0xff] }
   0xe   :  { %174 = vmatpush3.msra.mxu0 %v30_v7  ;;  %p207_p4 = pnand %p206_p3, %p200_p0 }
   0xf   :  { %175 = vmatprep.subr.mxu0 %v221_v1  ;;  %v55_v26 = vsel %vm54_vm1, %v53_v23, %v49_v22 }
  0x10   :  { %176 = vmatpush3.msra.mxu0 %v29_v8 }
  0x11   :  { %177 = vmatprep.subr.mxu0 %v221_v1 }
  0x12   :  { %178 = vmatpush3.msra.mxu0 %v28_v10 }
  0x13   :  { %179 = vmatprep.subr.mxu0 %v221_v1 }
  0x14   :  { %180 = vmatpush3.msra.mxu0 %v27_v11 }
  0x15   :  { %181 = vmatprep.subr.mxu0 %v221_v1 }
  0x16   :  { %182 = vmatpush3.msra.mxu0 %v26_v13 }
  0x17   :  { %183 = vmatprep.subr.mxu0 %v221_v1 }
  0x18   :  { %184 = vmatpush3.msra.mxu0 %v25_v16 }
  0x19   :  { %185 = vmatprep.subr.mxu0 %v221_v1 }
  0x1a   :  { %186 = vmatpush3.msra.mxu0 %v24_v20 }
  0x1b   :  { %187 = vmatprep.subr.mxu0 %v221_v1 }
  0x1c   :  { %188 = vmatpush3.msra.mxu0 %v23_v21 }
  0x1d   :  { %189 = vmatprep.subr.mxu0 %v221_v1 }
  0x1e   :  { %190 = vmatpush3.msra.mxu0 %v22_v24 }
  0x1f   :  { %191 = vmatprep.subr.mxu0 %v221_v1 }
  0x20   :  { %192 = vmatpush3.msra.mxu0 %v21_v25 }
  0x21   :  { %194 = vmatmul.mubr.f32.vlgmr.msra.gmra.mxu0 %v55_v26 }
  0xe1   :  { %v123_v28 = vpop.f32.mrf.mxu0 }
  0xe2   :  { %v124_v29 = vadd.f32 %v143_v27, %v123_v28 }
  0xe3   :  { %v195_v30 = vpop.f32.mrf.mxu0 }
  0xe4   :  { %128 = vst.msk [vmem:[#allocation2] sm:$0x3] %vm127_vm2, %v124_v29 }
  0xe5   :  { %210 = shalt.err (!%p207_p4)
}
  0xe6   :  { %138 = dma.vmem_to_hbm [thread:$0]  %s136_s23, 32, %s307_s3, [#allocation3]  }
  0xe7   :  { %219 = dma.done.wait [#allocation3], 32  }
  0xe8   :  { %220 = vsyncadd [#allocation3], 4294967264 }
  0xe9   :  { %142 = vsyncpa [#allocation3], 1 }

// kernel: elandarknet_fwd.46
= control target key start
LH: loop header
LB: loop body
LE: loop exit
PB: predicated region body
PF: predicated region fallthrough
CT: control target
= control target key end

     0   :  { %vm1147_vm0 = vmmov 0   ;;  %s1405_s1 = inlined_call_operand.vmem [shape: bf16[1152,128], index: 1, kind: input, shape index: {}]   ;;  %s1406_s0 = inlined_call_operand.vmem [shape: bf16[8,1152], index: 0, kind: input, shape index: {}]   ;;  %s1407_s2 = inlined_call_operand.vmem [shape: f32[1,128], index: 2, kind: input, shape index: {}]   ;;  %s1408_s3 = inlined_call_operand.vmem [shape: bf16[8,128], index: 3, kind: output, shape index: {}]  }
   0x1   :  { %v1061_v0 = vld [vmem:[%s1405_s1 + $0x78] sm:$0xff]   ;;  %v1065_v4 = vld [vmem:[%s1405_s1 + $0x70] sm:$0xff]   ;;  %v1069_v8 = vld [vmem:[%s1405_s1 + $0x68] sm:$0xff]  }
   0x2   :  { %v1062_v1 = vld [vmem:[%s1405_s1 + $0xf8] sm:$0xff]   ;;  %942 = vmatprep.subr.bf16.mxu0 %v1061_v0  ;;  %v1066_v5 = vld [vmem:[%s1405_s1 + $0xf0] sm:$0xff]   ;;  %v1070_v9 = vld [vmem:[%s1405_s1 + $0xe8] sm:$0xff]  }
   0x3   :  { %v1063_v2 = vld [vmem:[%s1405_s1 + $0x38] sm:$0xff]   ;;  %964 = vmatprep.subr.bf16.mxu1 %v1062_v1  ;;  %v1067_v6 = vld [vmem:[%s1405_s1 + $0x30] sm:$0xff]   ;;  %v1071_v10 = vld [vmem:[%s1405_s1 + $0x28] sm:$0xff]  }
   0x4   :  { %v1064_v3 = vld [vmem:[%s1405_s1 + $0xb8] sm:$0xff]   ;;  %943 = vmatpush3.bf16.msra.mxu0 %v1063_v2  ;;  %v1068_v7 = vld [vmem:[%s1405_s1 + $0xb0] sm:$0xff]   ;;  %v1072_v11 = vld [vmem:[%s1405_s1 + $0xa8] sm:$0xff]  }
   0x5   :  { %965 = vmatpush3.bf16.msra.mxu1 %v1064_v3  ;;  %944 = vmatprep.subr.bf16.mxu0 %v1065_v4  ;;  %v1073_v12 = vld [vmem:[%s1405_s1 + $0x60] sm:$0xff]   ;;  %v1077_v16 = vld [vmem:[%s1405_s1 + $0x58] sm:$0xff]   ;;  %v1081_v20 = vld [vmem:[%s1405_s1 + $0x50] sm:$0xff]  }
   0x6   :  { %966 = vmatprep.subr.bf16.mxu1 %v1066_v5  ;;  %v1074_v13 = vld [vmem:[%s1405_s1 + $0xe0] sm:$0xff]   ;;  %v1078_v17 = vld [vmem:[%s1405_s1 + $0xd8] sm:$0xff]   ;;  %v1082_v21 = vld [vmem:[%s1405_s1 + $0xd0] sm:$0xff]  }
   0x7   :  { %v1075_v14 = vld [vmem:[%s1405_s1 + $0x20] sm:$0xff]   ;;  %v1079_v18 = vld [vmem:[%s1405_s1 + $0x18] sm:$0xff]   ;;  %v1083_v22 = vld [vmem:[%s1405_s1 + $0x10] sm:$0xff]  }
   0x8   :  { %945 = vmatpush3.bf16.msra.mxu0 %v1067_v6  ;;  %v1076_v15 = vld [vmem:[%s1405_s1 + $0xa0] sm:$0xff]   ;;  %v1080_v19 = vld [vmem:[%s1405_s1 + $0x98] sm:$0xff]   ;;  %v1084_v23 = vld [vmem:[%s1405_s1 + $0x90] sm:$0xff]  }
   0x9   :  { %967 = vmatpush3.bf16.msra.mxu1 %v1068_v7  ;;  %946 = vmatprep.subr.bf16.mxu0 %v1069_v8  ;;  %v1085_v24 = vld [vmem:[%s1405_s1 + $0x48] sm:$0xff]   ;;  %v1089_v28 = vld [vmem:[%s1405_s1 + $0x40] sm:$0xff]   ;;  %v1097_v38 = vld [vmem:[%s1405_s1 + $0x178] sm:$0xff]  }
   0xa   :  { %968 = vmatprep.subr.bf16.mxu1 %v1070_v9  ;;  %v1086_v25 = vld [vmem:[%s1405_s1 + $0xc8] sm:$0xff]   ;;  %v1090_v29 = vld [vmem:[%s1405_s1 + $0xc0] sm:$0xff]   ;;  %v1098_v39 = vld [vmem:[%s1405_s1 + $0x138] sm:$0xff]  }
   0xb   :  { %v1087_v26 = vld [vmem:[%s1405_s1 + $0x8] sm:$0xff]   ;;  %v1091_v30 = vld [vmem:[%s1405_s1] sm:$0xff]   ;;  %v1099_v40 = vld [vmem:[%s1405_s1 + $0x1f8] sm:$0xff]  }
   0xc   :  { %947 = vmatpush3.bf16.msra.mxu0 %v1071_v10  ;;  %v1088_v27 = vld [vmem:[%s1405_s1 + $0x88] sm:$0xff]   ;;  %v1092_v31 = vld [vmem:[%s1405_s1 + $0x80] sm:$0xff]   ;;  %v1100_v41 = vld [vmem:[%s1405_s1 + $0x1b8] sm:$0xff]  }
   0xd   :  { %969 = vmatpush3.bf16.msra.mxu1 %v1072_v11  ;;  %948 = vmatprep.subr.bf16.mxu0 %v1073_v12  ;;  %v21_v32 = vld [vmem:[%s1406_s0] sm:$0xff]  ;;  %v22_v33 = vld [vmem:[%s1406_s0 + $0x8] sm:$0xff]  ;;  %v1101_v42 = vld [vmem:[%s1405_s1 + $0x170] sm:$0xff]  }
   0xe   :  { %970 = vmatprep.subr.bf16.mxu1 %v1074_v13  ;;  %v860_v34 = vcombine.low %v21_v32, %v21_v32  ;;  %v861_v35 = vcombine.high %v21_v32, %v21_v32  ;;  %v862_v36 = vcombine.low %v22_v33, %v22_v33  ;;  %v863_v37 = vcombine.high %v22_v33, %v22_v33  ;;  %v1102_v43 = vld [vmem:[%s1405_s1 + $0x130] sm:$0xff]   ;;  %v1105_v46 = vld [vmem:[%s1405_s1 + $0x168] sm:$0xff]   ;;  %v1109_v50 = vld [vmem:[%s1405_s1 + $0x160] sm:$0xff]  }
   0xf   :  { %v1103_v44 = vld [vmem:[%s1405_s1 + $0x1f0] sm:$0xff]   ;;  %v1106_v47 = vld [vmem:[%s1405_s1 + $0x128] sm:$0xff]   ;;  %v1110_v51 = vld [vmem:[%s1405_s1 + $0x120] sm:$0xff]   ;;  %v1146_v13 = vmov 0.0  }
  0x10   :  { %949 = vmatpush3.bf16.msra.mxu0 %v1075_v14  ;;  %666 = vmatprep.mubr.bf16.mxu0 %v861_v35  ;;  %v1104_v45 = vld [vmem:[%s1405_s1 + $0x1b0] sm:$0xff]   ;;  %v1107_v48 = vld [vmem:[%s1405_s1 + $0x1e8] sm:$0xff]   ;;  %v1111_v52 = vld [vmem:[%s1405_s1 + $0x1e0] sm:$0xff]  }
  0x11   :  { %971 = vmatpush3.bf16.msra.mxu1 %v1076_v15  ;;  %950 = vmatprep.subr.bf16.mxu0 %v1077_v16  ;;  %v1108_v49 = vld [vmem:[%s1405_s1 + $0x1a8] sm:$0xff]   ;;  %v1112_v53 = vld [vmem:[%s1405_s1 + $0x1a0] sm:$0xff]   ;;  %v1113_v54 = vld [vmem:[%s1405_s1 + $0x158] sm:$0xff]  }
  0x12   :  { %972 = vmatprep.subr.bf16.mxu1 %v1078_v17  ;;  %706 = vmatprep.mubr.bf16.mxu1 %v863_v37  ;;  %v1114_v55 = vld [vmem:[%s1405_s1 + $0x118] sm:$0xff]   ;;  %v1117_v58 = vld [vmem:[%s1405_s1 + $0x150] sm:$0xff]   ;;  %v1121_v62 = vld [vmem:[%s1405_s1 + $0x148] sm:$0xff]  }
  0x13   :  { %v1115_v56 = vld [vmem:[%s1405_s1 + $0x1d8] sm:$0xff]   ;;  %v1118_v59 = vld [vmem:[%s1405_s1 + $0x110] sm:$0xff]   ;;  %v1122_v63 = vld [vmem:[%s1405_s1 + $0x108] sm:$0xff]  }
  0x14   :  { %951 = vmatpush3.bf16.msra.mxu0 %v1079_v18  ;;  %v1116_v57 = vld [vmem:[%s1405_s1 + $0x198] sm:$0xff]   ;;  %v1119_v60 = vld [vmem:[%s1405_s1 + $0x1d0] sm:$0xff]   ;;  %v1123_v0 = vld [vmem:[%s1405_s1 + $0x1c8] sm:$0xff]  }
  0x15   :  { %973 = vmatpush3.bf16.msra.mxu1 %v1080_v19  ;;  %952 = vmatprep.subr.bf16.mxu0 %v1081_v20  ;;  %v1120_v61 = vld [vmem:[%s1405_s1 + $0x190] sm:$0xff]   ;;  %v1124_v1 = vld [vmem:[%s1405_s1 + $0x188] sm:$0xff]   ;;  %v1125_v2 = vld [vmem:[%s1405_s1 + $0x140] sm:$0xff]  }
  0x16   :  { %974 = vmatprep.subr.bf16.mxu1 %v1082_v21  ;;  %v1126_v3 = vld [vmem:[%s1405_s1 + $0x100] sm:$0xff]   ;;  %v23_v5 = vld [vmem:[%s1406_s0 + $0x10] sm:$0xff]  ;;  %v24_v9 = vld [vmem:[%s1406_s0 + $0x18] sm:$0xff] }
  0x17   :  { %v1127_v4 = vld [vmem:[%s1405_s1 + $0x1c0] sm:$0xff]   ;;  %v865_v6 = vcombine.high %v23_v5, %v23_v5  ;;  %v864_v8 = vcombine.low %v23_v5, %v23_v5  ;;  %v866_v10 = vcombine.low %v24_v9, %v24_v9  ;;  %v867_v11 = vcombine.high %v24_v9, %v24_v9  ;;  %v1133_v12 = vld [vmem:[%s1405_s1 + $0x238] sm:$0xff]   ;;  %v1134_v14 = vld [vmem:[%s1405_s1 + $0x230] sm:$0xff]  }
  0x18   :  { %953 = vmatpush3.bf16.msra.mxu0 %v1083_v22  ;;  %v1130_v7 = vld [vmem:[%s1405_s1 + $0x180] sm:$0xff]   ;;  %v1135_v15 = vld [vmem:[%s1405_s1 + $0x228] sm:$0xff]   ;;  %v1137_v17 = vld [vmem:[%s1405_s1 + $0x218] sm:$0xff]  }
  0x19   :  { %975 = vmatpush3.bf16.msra.mxu1 %v1084_v23  ;;  %954 = vmatprep.subr.bf16.mxu0 %v1085_v24  ;;  %v1136_v16 = vld [vmem:[%s1405_s1 + $0x220] sm:$0xff]   ;;  %v1138_v18 = vld [vmem:[%s1405_s1 + $0x210] sm:$0xff]   ;;  %v1139_v19 = vld [vmem:[%s1405_s1 + $0x208] sm:$0xff]  }
  0x1a   :  { %976 = vmatprep.subr.bf16.mxu1 %v1086_v25  ;;  %v1140_v20 = vld [vmem:[%s1405_s1 + $0x200] sm:$0xff]  }
  0x1b   :  { %v1141_v21 = vld [vmem:[%s1406_s0 + $0x20] ss:$0 sps:$4 sm:$0xff]  }
  0x1c   :  { %955 = vmatpush3.bf16.msra.mxu0 %v1087_v26 }
  0x1d   :  { %977 = vmatpush3.bf16.msra.mxu1 %v1088_v27  ;;  %956 = vmatprep.subr.bf16.mxu0 %v1089_v28 }
  0x1e   :  { %978 = vmatprep.subr.bf16.mxu1 %v1090_v29 }
  0x20   :  { %957 = vmatpush3.bf16.msra.mxu0 %v1091_v30 }
  0x21   :  { %979 = vmatpush3.bf16.msra.mxu1 %v1092_v31  ;;  %986 = vmatprep.subr.bf16.mxu0 %v1097_v38 }
  0x22   :  { %1008 = vmatprep.subr.bf16.mxu1 %v1099_v40 }
  0x23   :  { %667 = vmatmul.mubr.bf16.vlgmr.msra.gmra.mxu0 %v860_v34 }
  0x24   :  { %707 = vmatmul.mubr.bf16.vlgmr.msra.gmra.mxu1 %v862_v36  ;;  %987 = vmatpush3.bf16.msra.mxu0 %v1098_v39 }
  0x25   :  { %1009 = vmatpush3.bf16.msra.mxu1 %v1100_v41  ;;  %988 = vmatprep.subr.bf16.mxu0 %v1101_v42 }
  0x26   :  { %1010 = vmatprep.subr.bf16.mxu1 %v1103_v44  ;;  %746 = vmatprep.mubr.bf16.mxu0 %v865_v6 }
  0x27   :  { %786 = vmatprep.mubr.bf16.mxu1 %v867_v11 }
  0x28   :  { %989 = vmatpush3.bf16.msra.mxu0 %v1102_v43 }
  0x29   :  { %1011 = vmatpush3.bf16.msra.mxu1 %v1104_v45  ;;  %990 = vmatprep.subr.bf16.mxu0 %v1105_v46  ;;  %v941_v46 = vld [vmem:[%s1407_s2] ss:$0 sm:$0xff] }
  0x2a   :  { %1012 = vmatprep.subr.bf16.mxu1 %v1107_v48 }
  0x2c   :  { %991 = vmatpush3.bf16.msra.mxu0 %v1106_v47 }
  0x2d   :  { %1013 = vmatpush3.bf16.msra.mxu1 %v1108_v49  ;;  %992 = vmatprep.subr.bf16.mxu0 %v1109_v50 }
  0x2e   :  { %1014 = vmatprep.subr.bf16.mxu1 %v1111_v52 }
  0x30   :  { %993 = vmatpush3.bf16.msra.mxu0 %v1110_v51 }
  0x31   :  { %1015 = vmatpush3.bf16.msra.mxu1 %v1112_v53  ;;  %994 = vmatprep.subr.bf16.mxu0 %v1113_v54 }
  0x32   :  { %1016 = vmatprep.subr.bf16.mxu1 %v1115_v56 }
  0x34   :  { %995 = vmatpush3.bf16.msra.mxu0 %v1114_v55 }
  0x35   :  { %1017 = vmatpush3.bf16.msra.mxu1 %v1116_v57  ;;  %996 = vmatprep.subr.bf16.mxu0 %v1117_v58 }
  0x36   :  { %1018 = vmatprep.subr.bf16.mxu1 %v1119_v60 }
  0x38   :  { %997 = vmatpush3.bf16.msra.mxu0 %v1118_v59 }
  0x39   :  { %1019 = vmatpush3.bf16.msra.mxu1 %v1120_v61  ;;  %998 = vmatprep.subr.bf16.mxu0 %v1121_v62 }
  0x3a   :  { %1020 = vmatprep.subr.bf16.mxu1 %v1123_v0 }
  0x3c   :  { %999 = vmatpush3.bf16.msra.mxu0 %v1122_v63 }
  0x3d   :  { %1021 = vmatpush3.bf16.msra.mxu1 %v1124_v1  ;;  %1000 = vmatprep.subr.bf16.mxu0 %v1125_v2 }
  0x3e   :  { %1022 = vmatprep.subr.bf16.mxu1 %v1127_v4 }
  0x40   :  { %1001 = vmatpush3.bf16.msra.mxu0 %v1126_v3 }
  0x41   :  { %1023 = vmatpush3.bf16.msra.mxu1 %v1130_v7  ;;  %1039 = vmatprep.subr.bf16.mxu0 %v1146_v13 }
  0x43   :  { %747 = vmatmul.mubr.bf16.vlgmr.msra.gmra.mxu0 %v864_v8 }
  0x44   :  { %1040 = vmatpush3.bf16.msra.mxu0 %v1133_v12  ;;  %787 = vmatmul.mubr.bf16.vlgmr.msra.gmra.mxu1 %v866_v10 }
  0x45   :  { %1041 = vmatprep.subr.bf16.mxu0 %v1146_v13  ;;  %1055 = vmatprep.mubr.msk.bf16.mxu0 %vm1147_vm0, %v1146_v13 }
  0x48   :  { %1042 = vmatpush3.bf16.msra.mxu0 %v1134_v14 }
  0x49   :  { %1043 = vmatprep.subr.bf16.mxu0 %v1146_v13 }
  0x4c   :  { %1044 = vmatpush3.bf16.msra.mxu0 %v1135_v15 }
  0x4d   :  { %1045 = vmatprep.subr.bf16.mxu0 %v1146_v13 }
  0x50   :  { %1046 = vmatpush3.bf16.msra.mxu0 %v1136_v16 }
  0x51   :  { %1047 = vmatprep.subr.bf16.mxu0 %v1146_v13 }
  0x54   :  { %1048 = vmatpush3.bf16.msra.mxu0 %v1137_v17 }
  0x55   :  { %1049 = vmatprep.subr.bf16.mxu0 %v1146_v13 }
  0x58   :  { %1050 = vmatpush3.bf16.msra.mxu0 %v1138_v18 }
  0x59   :  { %1051 = vmatprep.subr.bf16.mxu0 %v1146_v13 }
  0x5c   :  { %1052 = vmatpush3.bf16.msra.mxu0 %v1139_v19 }
  0x5d   :  { %1053 = vmatprep.subr.bf16.mxu0 %v1146_v13 }
  0x60   :  { %1054 = vmatpush3.bf16.msra.mxu0 %v1140_v20 }
  0x63   :  { %1056 = vmatmul.mubr.bf16.vlgmr.msra.gmra.mxu0 %v1141_v21 }
  0xe3   :  { %v958_v22 = vpop.f32.mrf.mxu0 }
  0xe4   :  { %v980_v23 = vpop.f32.mrf.mxu1 }
  0xe5   :  { %v959_v24 = vpop.f32.mrf.mxu0 }
  0xe6   :  { %v981_v25 = vpop.f32.mrf.mxu1  ;;  %v960_v38 = vadd.f32 %v959_v24, %v958_v22 }
  0xe7   :  { %v961_v26 = vpop.f32.mrf.mxu0  ;;  %v982_v39 = vadd.f32 %v981_v25, %v980_v23 }
  0xe8   :  { %v983_v27 = vpop.f32.mrf.mxu1 }
  0xe9   :  { %v962_v28 = vpop.f32.mrf.mxu0  ;;  %v709_v41 = vadd.f32 %v982_v39, %v960_v38 }
  0xea   :  { %v984_v29 = vpop.f32.mrf.mxu1 }
 0x103   :  { %v1002_v30 = vpop.f32.mrf.mxu0 }
 0x104   :  { %v1024_v31 = vpop.f32.mrf.mxu1 }
 0x105   :  { %v1003_v32 = vpop.f32.mrf.mxu0 }
 0x106   :  { %v1025_v33 = vpop.f32.mrf.mxu1  ;;  %v1004_v40 = vadd.f32 %v1003_v32, %v1002_v30 }
 0x107   :  { %v1005_v34 = vpop.f32.mrf.mxu0  ;;  %v1026_v43 = vadd.f32 %v1025_v33, %v1024_v31 }
 0x108   :  { %v1027_v35 = vpop.f32.mrf.mxu1  ;;  %v749_v42 = vadd.f32 %v1004_v40, %v709_v41 }
 0x109   :  { %v1006_v36 = vpop.f32.mrf.mxu0 }
 0x10a   :  { %v1028_v37 = vpop.f32.mrf.mxu1  ;;  %v789_v44 = vadd.f32 %v1026_v43, %v749_v42 }
 0x123   :  { %v828_v45 = vpop.f32.mrf.mxu0 }
 0x124   :  { %v829_v47 = vadd.f32 %v828_v45, %v789_v44 }
 0x125   :  { %v1057_v48 = vpop.f32.mrf.mxu0 }
 0x126   :  { %v847_v49 = vadd.f32 %v941_v46, %v829_v47 }
 0x127   :  { %v831_v50 = vpop.f32.mrf.mxu0 }
 0x128   :  { %v848_v51 = vsub.f32 0.0, %v847_v49 }
 0x129   :  { %v1058_v52 = vpop.f32.mrf.mxu0 }
 0x12a   :  { %v849_v53 = vmul.f32 1.442695, %v848_v51 }
 0x12c   :  { %1142 = vpow2.f32 %v849_v53 }
 0x139   :  { %v1143_v54 = vpop.eup %1142 }
 0x13a   :  { %v851_v55 = vadd.f32 1.0, %v1143_v54 }
 0x13c   :  { %1144 = vrcp.f32 %v851_v55 }
 0x149   :  { %v1145_v56 = vpop.eup %1144 }
 0x14a   :  { %v853_v57 = vmul.f32 %v1145_v56, %v847_v49 }
 0x14c   :  { %v854_v58 = vpack.c.bf16 %v853_v57, %v853_v57 }
 0x14e   :  { %855 = vst [vmem:[%s1408_s3] sm:$0xf] %v854_v58 }

</bundles_post_ra>
